<compile_context>
chip_gen: v7x
topology: tpu7x:2x2x1
jax: 0.10.0
libtpu: 0.0.40
codegen_flags: <defaults>
</compile_context>

<pallas_src>
import functools

import jax
import jax.numpy as jnp
import numpy as np
from jax.experimental import pallas as pl
from jax.experimental.pallas import tpu as pltpu


# TN contraction: contract the sublane (channel) axis of both operands, i.e.
# result = lhs^T @ rhs; consumed by the MXU without an explicit XLU transpose.
_TN_DIMS = (((0,), (0,)), ((), ()))


# ----------------------------------------------------------------------------
# Pallas kernel
# ----------------------------------------------------------------------------
def _layernorm_t(v, g, b, eps=1e-5):
    """LayerNorm over the channel axis (axis 0) of a (C, N) activation.

    Single-pass form: one sweep produces sum(x) and sum(x*x);
    var = E[x^2] - mu^2 (fine at f32 with unit-scale activations).
    """
    inv_c = 1.0 / v.shape[0]
    mu = jnp.sum(v, axis=0, keepdims=True) * inv_c
    ex2 = jnp.sum(v * v, axis=0, keepdims=True) * inv_c
    var = ex2 - mu * mu
    return (v - mu) * jax.lax.rsqrt(var + eps) * g + b


def fused_transformer_kernel(
    x_ref, pos_ref,
    ln1g_ref, ln1b_ref, wqkv_ref, bqkv_ref, w0_ref, b0_ref,
    ln2g_ref, ln2b_ref, w1_ref, b1_ref, w2_ref, b2_ref,
    decg_ref, decb_ref,
    o_ref,
    attn_scr,
    *, n_layers, n_head, nb, T,
):
    # x_ref block: (1, C, nb*T), lane-dense (nb*T is a multiple of 128).
    # pos_ref is already tiled per-batch to (C, nb*T) in the wrapper.
    x = x_ref[0] + pos_ref[...]                         # (C, N), N = nb*T
    C = x.shape[0]
    hd = C // n_head
    scale = float(hd) ** -0.5

    # NOTE: static unroll is fine at n_layers=2; switch to lax.fori_loop with
    # dynamic first-axis weight indexing if n_layers is ever scaled up.
    for l in range(n_layers):
        # ---- LN1 -> fused QKV projection (one (3C, C) matmul) ----
        x2 = _layernorm_t(x, ln1g_ref[l], ln1b_ref[l])
        qkv = jnp.dot(wqkv_ref[l], x2, preferred_element_type=jnp.float32) + bqkv_ref[l]
        q = qkv[0 * C:1 * C]                            # (C, N) sublane-aligned slices
        k = qkv[1 * C:2 * C]
        v = qkv[2 * C:3 * C]

        # ---- attention: per (batch, head) sublane/lane-aligned slices ----
        # Each head's result is stored straight into a VMEM scratch accumulator
        # (bounds vreg pressure; no Python-list + lane concatenate).  The small
        # MXU matmuls stay independent and back-to-back so drains overlap.
        for b in range(nb):
            cols = slice(b * T, (b + 1) * T)            # lane offset: multiple of 128
            for h in range(n_head):
                rows = slice(h * hd, (h + 1) * hd)      # sublane offset: multiple of 8
                qh = q[rows, cols]                      # (hd, T)
                kh = k[rows, cols]
                vh = v[rows, cols]
                # sT[k_pos, q_pos] = kh^T @ qh -- contraction over the sublane
                # axis directly (no kh.T relayout materialized).
                sT = jax.lax.dot_general(
                    kh, qh, _TN_DIMS,
                    preferred_element_type=jnp.float32) * scale        # (T, T)
                sT = sT - jnp.max(sT, axis=0, keepdims=True)
                e = jnp.exp(sT)
                pT = e * pl.reciprocal(jnp.sum(e, axis=0, keepdims=True), approx=True)
                attn_scr[rows, cols] = jnp.dot(vh, pT,
                                               preferred_element_type=jnp.float32)

        attn = jnp.dot(w0_ref[l], attn_scr[...],
                       preferred_element_type=jnp.float32) + b0_ref[l]
        x3 = attn + x                                   # residual 1

        # ---- LN2 -> MLP ----
        x4 = _layernorm_t(x3, ln2g_ref[l], ln2b_ref[l])
        h1 = jnp.dot(w1_ref[l], x4, preferred_element_type=jnp.float32) + b1_ref[l]
        h1 = jnp.maximum(h1, 0.0)
        m = jnp.dot(w2_ref[l], h1, preferred_element_type=jnp.float32) + b2_ref[l]

        x = x3 + m                                      # residual 2

    # ---- final decoder LayerNorm; lane-dense (N >= 128) unmasked store ----
    o_ref[0] = _layernorm_t(x, decg_ref[...], decb_ref[...])


# ----------------------------------------------------------------------------
# pallas_call wrapper
# ----------------------------------------------------------------------------
def make_fused_call(num_blocks, nb, T, C, F, L, n_head):
    N = nb * T

    def full_spec(shape):
        n = len(shape)
        return pl.BlockSpec(shape, lambda i, n=n: (0,) * n)

    in_specs = [
        pl.BlockSpec((1, C, N), lambda i: (i, 0, 0)),         # folded activation
        full_spec((C, N)),                                    # positional emb (tiled)
        full_spec((L, C, 1)), full_spec((L, C, 1)),           # ln1 gamma, beta
        full_spec((L, 3 * C, C)), full_spec((L, 3 * C, 1)),   # fused Wqkv, bqkv
        full_spec((L, C, C)), full_spec((L, C, 1)),           # W0, b0
        full_spec((L, C, 1)), full_spec((L, C, 1)),           # ln2 gamma, beta
        full_spec((L, F * C, C)), full_spec((L, F * C, 1)),   # W1, b1
        full_spec((L, C, F * C)), full_spec((L, C, 1)),       # W2, b2
        full_spec((C, 1)), full_spec((C, 1)),                 # decoder LN gamma, beta
    ]
    return pl.pallas_call(
        functools.partial(fused_transformer_kernel,
                          n_layers=L, n_head=n_head, nb=nb, T=T),
        out_shape=jax.ShapeDtypeStruct((num_blocks, C, N), jnp.float32),
        grid=(num_blocks,),
        in_specs=in_specs,
        out_specs=pl.BlockSpec((1, C, N), lambda i: (i, 0, 0)),
        scratch_shapes=[pltpu.VMEM((C, N), jnp.float32)],     # attention accumulator
        compiler_params=pltpu.CompilerParams(dimension_semantics=("parallel",)),
    )


def _batches_per_block(BS):
    """nb = 1 (grid parallel over batch -> 2 TensorCores) on v7x; fold the whole
    batch into the lane axis (nb = BS, single grid step) on single-TC v5e/v6e."""
    try:
        kind = jax.devices()[0].device_kind.lower()
    except Exception:
        kind = ""
    if "v7" in kind:
        return 1
    return BS


# ----------------------------------------------------------------------------
# Parameter initialization (mirrors Transformer._init_weights, PyTorch layout)
# ----------------------------------------------------------------------------
def init_params(key, n_layers, n_seq, n_emb, fexpansion):
    C, F = n_emb, fexpansion

    def linear(k, din, dout):
        # nn.Linear: weight (out, in) ~ N(0, 0.02); bias = 0.
        w = (jax.random.normal(k, (dout, din)) * 0.02).astype(jnp.float32)
        return w, jnp.zeros((dout,), jnp.float32)

    params = {
        "pos": jnp.zeros((1, n_seq, C), jnp.float32),   # zeros, as in torch __init__
        "dec_g": jnp.ones((C,), jnp.float32),
        "dec_b": jnp.zeros((C,), jnp.float32),
        "blocks": [],
    }
    for _ in range(n_layers):
        key, *ks = jax.random.split(key, 7)
        wq, bq = linear(ks[0], C, C)
        wk, bk = linear(ks[1], C, C)
        wv, bv = linear(ks[2], C, C)
        w0, b0 = linear(ks[3], C, C)
        w1, b1 = linear(ks[4], C, F * C)
        w2, b2 = linear(ks[5], F * C, C)
        params["blocks"].append(dict(
            ln1g=jnp.ones((C,), jnp.float32), ln1b=jnp.zeros((C,), jnp.float32),
            wq=wq, bq=bq, wk=wk, bk=bk, wv=wv, bv=bv, w0=w0, b0=b0,
            ln2g=jnp.ones((C,), jnp.float32), ln2b=jnp.zeros((C,), jnp.float32),
            w1=w1, b1=b1, w2=w2, b2=b2,
        ))
    return params


def _pack_params(params, L, C, F, nb):
    """Stack per-layer weights into layer-major arrays for the fused kernel."""
    blocks = params["blocks"]
    stack = lambda name: jnp.stack([blk[name] for blk in blocks])
    pos_t = params["pos"][0].T                                        # (C, T)
    pos_t = jnp.tile(pos_t, (1, nb))                                  # (C, nb*T)
    ln1g = stack("ln1g").reshape(L, C, 1)
    ln1b = stack("ln1b").reshape(L, C, 1)
    wqkv = jnp.stack([jnp.concatenate([blk["wq"], blk["wk"], blk["wv"]], axis=0)
                      for blk in blocks])                             # (L, 3C, C)
    bqkv = jnp.stack([jnp.concatenate([blk["bq"], blk["bk"], blk["bv"]], axis=0)
                      for blk in blocks]).reshape(L, 3 * C, 1)
    w0 = stack("w0")
    b0 = stack("b0").reshape(L, C, 1)
    ln2g = stack("ln2g").reshape(L, C, 1)
    ln2b = stack("ln2b").reshape(L, C, 1)
    w1 = stack("w1")
    b1 = stack("b1").reshape(L, F * C, 1)
    w2 = stack("w2")
    b2 = stack("b2").reshape(L, C, 1)
    dec_g = params["dec_g"].reshape(C, 1)
    dec_b = params["dec_b"].reshape(C, 1)
    return (pos_t, ln1g, ln1b, wqkv, bqkv, w0, b0, ln2g, ln2b,
            w1, b1, w2, b2, dec_g, dec_b)


# ----------------------------------------------------------------------------
# Full Transformer forward
# ----------------------------------------------------------------------------
def transformer_forward(MAC, MIC, params, n_head):
    BS, C, H, W = MAC.shape
    HW = H * W
    T = 2 * HW
    L = len(params["blocks"])
    F = params["blocks"][0]["w1"].shape[0] // C

    nb = _batches_per_block(BS)
    if BS % nb:
        nb = 1
    num_blocks = BS // nb

    # One contiguous lane-dense (BS, C, T) sequence array (MAC pixels then MIC
    # pixels along the time axis), then fold nb batches into the lane axis:
    # (num_blocks, C, nb*T).  At nb=1 the transpose is a no-op.
    x_seq = jnp.concatenate([MAC.reshape(BS, C, HW), MIC.reshape(BS, C, HW)], axis=-1)
    x_fold = (x_seq.reshape(num_blocks, nb, C, T)
              .transpose(0, 2, 1, 3)
              .reshape(num_blocks, C, nb * T))

    packed = _pack_params(params, L, C, F, nb)
    call = make_fused_call(num_blocks, nb, T, C, F, L, n_head)
    out = call(x_fold, *packed)                          # (num_blocks, C, nb*T)

    out = (out.reshape(num_blocks, C, nb, T)
           .transpose(0, 2, 1, 3)
           .reshape(BS, C, 2, H, W))
    return out[:, :, 0], out[:, :, 1]


# ----------------------------------------------------------------------------
# Pure-JAX reference (mirrors the PyTorch forward, eval mode) for verification
# ----------------------------------------------------------------------------
def reference_forward(MAC, MIC, params, n_head):
    BS, C, H, W = MAC.shape
    T = 2 * H * W
    hd = C // n_head

    def ln(v, g, b):
        mu = v.mean(-1, keepdims=True)
        var = ((v - mu) ** 2).mean(-1, keepdims=True)
        return (v - mu) / jnp.sqrt(var + 1e-5) * g + b

    x = jnp.concatenate([MAC[:, None], MIC[:, None]], axis=1)       # (BS,2,C,H,W)
    x = jnp.transpose(x, (0, 1, 3, 4, 2)).reshape(BS, T, C) + params["pos"]

    for p in params["blocks"]:
        x2 = ln(x, p["ln1g"], p["ln1b"])
        q = x2 @ p["wq"].T + p["bq"]
        k = x2 @ p["wk"].T + p["bk"]
        v = x2 @ p["wv"].T + p["bv"]
        q = q.reshape(BS, T, n_head, hd).transpose(0, 2, 1, 3)
        k = k.reshape(BS, T, n_head, hd).transpose(0, 2, 1, 3)
        v = v.reshape(BS, T, n_head, hd).transpose(0, 2, 1, 3)
        s = jnp.einsum("bhqd,bhkd->bhqk", q, k) * (hd ** -0.5)
        w = jax.nn.softmax(s, axis=-1)
        a = jnp.einsum("bhqk,bhkd->bhqd", w, v).transpose(0, 2, 1, 3).reshape(BS, T, C)
        a = a @ p["w0"].T + p["b0"]
        x3 = a + x
        x4 = ln(x3, p["ln2g"], p["ln2b"])
        m = jnp.maximum(x4 @ p["w1"].T + p["b1"], 0.0) @ p["w2"].T + p["b2"]
        x = x3 + m

    x = ln(x, params["dec_g"], params["dec_b"])
    out = jnp.transpose(x.reshape(BS, 2, H, W, C), (0, 1, 4, 2, 3))
    return out[:, 0], out[:, 1]


if __name__ == "__main__":
    # Config consistent with the module: feature maps 8x8 -> T = 2*8*8 = 128
    n_layers, n_head, fexpansion = 2, 4, 4
    BS, C, H, W = 2, 32, 8, 8
    n_seq = 2 * H * W

    key = jax.random.PRNGKey(0)
    kp, kmac, kmic = jax.random.split(key, 3)
    params = init_params(kp, n_layers, n_seq, C, fexpansion)
    MAC = jax.random.normal(kmac, (BS, C, H, W), jnp.float32)
    MIC = jax.random.normal(kmic, (BS, C, H, W), jnp.float32)

    fwd = jax.jit(functools.partial(transformer_forward, n_head=n_head))
    mac_out, mic_out = fwd(MAC, MIC, params)
    jax.block_until_ready((mac_out, mic_out))

    ref_mac, ref_mic = reference_forward(MAC, MIC, params, n_head)
    # 1e-3 tolerance: the softmax denominator uses the EUP approximate
    # reciprocal (pl.reciprocal(approx=True)); everything else is f32.
    np.testing.assert_allclose(np.asarray(mac_out), np.asarray(ref_mac), rtol=1e-3, atol=1e-3)
    np.testing.assert_allclose(np.asarray(mic_out), np.asarray(ref_mic), rtol=1e-3, atol=1e-3)

    assert mac_out.shape == (BS, C, H, W) and mic_out.shape == (BS, C, H, W)
    print("KERNEL_OK")
</pallas_src>

<mosaic_0001>
module attributes {stable_mosaic.version = 11 : i64} {
  func.func @fused_transformer_kernel(%arg0: i32, %arg1: memref<1x32x256xf32, #tpu.memory_space<vmem>>, %arg2: memref<32x256xf32, #tpu.memory_space<vmem>>, %arg3: memref<2x32x1xf32, #tpu.memory_space<vmem>>, %arg4: memref<2x32x1xf32, #tpu.memory_space<vmem>>, %arg5: memref<2x96x32xf32, #tpu.memory_space<vmem>>, %arg6: memref<2x96x1xf32, #tpu.memory_space<vmem>>, %arg7: memref<2x32x32xf32, #tpu.memory_space<vmem>>, %arg8: memref<2x32x1xf32, #tpu.memory_space<vmem>>, %arg9: memref<2x32x1xf32, #tpu.memory_space<vmem>>, %arg10: memref<2x32x1xf32, #tpu.memory_space<vmem>>, %arg11: memref<2x128x32xf32, #tpu.memory_space<vmem>>, %arg12: memref<2x128x1xf32, #tpu.memory_space<vmem>>, %arg13: memref<2x32x128xf32, #tpu.memory_space<vmem>>, %arg14: memref<2x32x1xf32, #tpu.memory_space<vmem>>, %arg15: memref<32x1xf32, #tpu.memory_space<vmem>>, %arg16: memref<32x1xf32, #tpu.memory_space<vmem>>, %arg17: memref<1x32x256xf32, #tpu.memory_space<vmem>>, %arg18: memref<32x256xf32, #tpu.memory_space<vmem>>) attributes {dimension_semantics = [#tpu.dimension_semantics<parallel>], iteration_bounds = array<i64: 1>, scalar_prefetch = 0 : i64, scratch_operands = 1 : i64, tpu.core_type = #tpu.core_type<tc>, window_params = [{transform_indices = @transform_0, window_bounds = array<i64: 1, 32, 256>}, {pipeline_mode = #tpu.pipeline_mode<synchronous>, transform_indices = @transform_1, window_bounds = array<i64: 32, 256>}, {pipeline_mode = #tpu.pipeline_mode<synchronous>, transform_indices = @transform_2, window_bounds = array<i64: 2, 32, 1>}, {pipeline_mode = #tpu.pipeline_mode<synchronous>, transform_indices = @transform_3, window_bounds = array<i64: 2, 32, 1>}, {pipeline_mode = #tpu.pipeline_mode<synchronous>, transform_indices = @transform_4, window_bounds = array<i64: 2, 96, 32>}, {pipeline_mode = #tpu.pipeline_mode<synchronous>, transform_indices = @transform_5, window_bounds = array<i64: 2, 96, 1>}, {pipeline_mode = #tpu.pipeline_mode<synchronous>, transform_indices = @transform_6, window_bounds = array<i64: 2, 32, 32>}, {pipeline_mode = #tpu.pipeline_mode<synchronous>, transform_indices = @transform_7, window_bounds = array<i64: 2, 32, 1>}, {pipeline_mode = #tpu.pipeline_mode<synchronous>, transform_indices = @transform_8, window_bounds = array<i64: 2, 32, 1>}, {pipeline_mode = #tpu.pipeline_mode<synchronous>, transform_indices = @transform_9, window_bounds = array<i64: 2, 32, 1>}, {pipeline_mode = #tpu.pipeline_mode<synchronous>, transform_indices = @transform_10, window_bounds = array<i64: 2, 128, 32>}, {pipeline_mode = #tpu.pipeline_mode<synchronous>, transform_indices = @transform_11, window_bounds = array<i64: 2, 128, 1>}, {pipeline_mode = #tpu.pipeline_mode<synchronous>, transform_indices = @transform_12, window_bounds = array<i64: 2, 32, 128>}, {pipeline_mode = #tpu.pipeline_mode<synchronous>, transform_indices = @transform_13, window_bounds = array<i64: 2, 32, 1>}, {pipeline_mode = #tpu.pipeline_mode<synchronous>, transform_indices = @transform_14, window_bounds = array<i64: 32, 1>}, {pipeline_mode = #tpu.pipeline_mode<synchronous>, transform_indices = @transform_15, window_bounds = array<i64: 32, 1>}, {transform_indices = @transform_16, window_bounds = array<i64: 1, 32, 256>}]} {
    %c0 = arith.constant 0 : index
    %c0_0 = arith.constant 0 : index
    %c0_1 = arith.constant 0 : index
    %0 = vector.load %arg1[%c0, %c0_0, %c0_1] : memref<1x32x256xf32, #tpu.memory_space<vmem>>, vector<1x32x256xf32>
    %1 = vector.shape_cast %0 : vector<1x32x256xf32> to vector<32x256xf32>
    %c0_2 = arith.constant 0 : index
    %c0_3 = arith.constant 0 : index
    %2 = vector.load %arg2[%c0_2, %c0_3] : memref<32x256xf32, #tpu.memory_space<vmem>>, vector<32x256xf32>
    %3 = arith.addf %1, %2 : vector<32x256xf32>
    %c0_4 = arith.constant 0 : index
    %c0_5 = arith.constant 0 : index
    %c0_6 = arith.constant 0 : index
    %4 = vector.load %arg3[%c0_4, %c0_5, %c0_6] : memref<2x32x1xf32, #tpu.memory_space<vmem>>, vector<1x32x1xf32>
    %5 = vector.shape_cast %4 : vector<1x32x1xf32> to vector<32x1xf32>
    %c0_7 = arith.constant 0 : index
    %c0_8 = arith.constant 0 : index
    %c0_9 = arith.constant 0 : index
    %6 = vector.load %arg4[%c0_7, %c0_8, %c0_9] : memref<2x32x1xf32, #tpu.memory_space<vmem>>, vector<1x32x1xf32>
    %7 = vector.shape_cast %6 : vector<1x32x1xf32> to vector<32x1xf32>
    %cst = arith.constant dense<0.000000e+00> : vector<256xf32>
    %8 = vector.multi_reduction <add>, %3, %cst [0] : vector<32x256xf32> to vector<256xf32>
    %9 = vector.shape_cast %8 : vector<256xf32> to vector<1x256xf32>
    %cst_10 = arith.constant 3.125000e-02 : f32
    %10 = vector.broadcast %cst_10 : f32 to vector<1x256xf32>
    %11 = arith.mulf %9, %10 : vector<1x256xf32>
    %12 = arith.mulf %3, %3 : vector<32x256xf32>
    %cst_11 = arith.constant dense<0.000000e+00> : vector<256xf32>
    %13 = vector.multi_reduction <add>, %12, %cst_11 [0] : vector<32x256xf32> to vector<256xf32>
    %14 = vector.shape_cast %13 : vector<256xf32> to vector<1x256xf32>
    %cst_12 = arith.constant 3.125000e-02 : f32
    %15 = vector.broadcast %cst_12 : f32 to vector<1x256xf32>
    %16 = arith.mulf %14, %15 : vector<1x256xf32>
    %17 = arith.mulf %11, %11 : vector<1x256xf32>
    %18 = arith.subf %16, %17 : vector<1x256xf32>
    %19 = vector.broadcast %11 : vector<1x256xf32> to vector<32x256xf32>
    %20 = arith.subf %3, %19 : vector<32x256xf32>
    %cst_13 = arith.constant 9.99999974E-6 : f32
    %21 = vector.broadcast %cst_13 : f32 to vector<1x256xf32>
    %22 = arith.addf %18, %21 : vector<1x256xf32>
    %23 = math.rsqrt %22 : vector<1x256xf32>
    %24 = vector.broadcast %23 : vector<1x256xf32> to vector<32x256xf32>
    %25 = arith.mulf %20, %24 : vector<32x256xf32>
    %26 = vector.broadcast %5 : vector<32x1xf32> to vector<32x256xf32>
    %27 = arith.mulf %25, %26 : vector<32x256xf32>
    %28 = vector.broadcast %7 : vector<32x1xf32> to vector<32x256xf32>
    %29 = arith.addf %27, %28 : vector<32x256xf32>
    %c0_14 = arith.constant 0 : index
    %c0_15 = arith.constant 0 : index
    %c0_16 = arith.constant 0 : index
    %30 = vector.load %arg5[%c0_14, %c0_15, %c0_16] : memref<2x96x32xf32, #tpu.memory_space<vmem>>, vector<1x96x32xf32>
    %31 = vector.shape_cast %30 : vector<1x96x32xf32> to vector<96x32xf32>
    %cst_17 = arith.constant dense<0.000000e+00> : vector<96x256xf32>
    %32 = tpu.matmul %31, %29, %cst_17 {dimension_numbers = #tpu.dot_dimension_numbers<[1], [0], [0], [1], [0, 0, 1, 1], [], []>} : vector<96x32xf32>, vector<32x256xf32>, vector<96x256xf32> -> vector<96x256xf32>
    %c0_18 = arith.constant 0 : index
    %c0_19 = arith.constant 0 : index
    %c0_20 = arith.constant 0 : index
    %33 = vector.load %arg6[%c0_18, %c0_19, %c0_20] : memref<2x96x1xf32, #tpu.memory_space<vmem>>, vector<1x96x1xf32>
    %34 = vector.shape_cast %33 : vector<1x96x1xf32> to vector<96x1xf32>
    %35 = vector.broadcast %34 : vector<96x1xf32> to vector<96x256xf32>
    %36 = arith.addf %32, %35 : vector<96x256xf32>
    %37 = vector.extract_strided_slice %36 {offsets = [0, 0], sizes = [32, 256], strides = [1, 1]} : vector<96x256xf32> to vector<32x256xf32>
    %38 = vector.extract_strided_slice %36 {offsets = [32, 0], sizes = [32, 256], strides = [1, 1]} : vector<96x256xf32> to vector<32x256xf32>
    %39 = vector.extract_strided_slice %36 {offsets = [64, 0], sizes = [32, 256], strides = [1, 1]} : vector<96x256xf32> to vector<32x256xf32>
    %40 = vector.extract_strided_slice %37 {offsets = [0, 0], sizes = [8, 128], strides = [1, 1]} : vector<32x256xf32> to vector<8x128xf32>
    %41 = vector.extract_strided_slice %38 {offsets = [0, 0], sizes = [8, 128], strides = [1, 1]} : vector<32x256xf32> to vector<8x128xf32>
    %42 = vector.extract_strided_slice %39 {offsets = [0, 0], sizes = [8, 128], strides = [1, 1]} : vector<32x256xf32> to vector<8x128xf32>
    %cst_21 = arith.constant dense<0.000000e+00> : vector<128x128xf32>
    %43 = tpu.matmul %41, %40, %cst_21 {dimension_numbers = #tpu.dot_dimension_numbers<[0], [0], [1], [1], [0, 1, 1, 1], [], []>} : vector<8x128xf32>, vector<8x128xf32>, vector<128x128xf32> -> vector<128x128xf32>
    %cst_22 = arith.constant 0.353553385 : f32
    %44 = vector.broadcast %cst_22 : f32 to vector<128x128xf32>
    %45 = arith.mulf %43, %44 : vector<128x128xf32>
    %cst_23 = arith.constant dense<0xFF800000> : vector<128xf32>
    %46 = vector.multi_reduction <maximumf>, %45, %cst_23 [0] : vector<128x128xf32> to vector<128xf32>
    %47 = vector.shape_cast %46 : vector<128xf32> to vector<1x128xf32>
    %48 = vector.broadcast %47 : vector<1x128xf32> to vector<128x128xf32>
    %49 = arith.subf %45, %48 : vector<128x128xf32>
    %50 = math.exp %49 : vector<128x128xf32>
    %cst_24 = arith.constant dense<0.000000e+00> : vector<128xf32>
    %51 = vector.multi_reduction <add>, %50, %cst_24 [0] : vector<128x128xf32> to vector<128xf32>
    %52 = vector.shape_cast %51 : vector<128xf32> to vector<1x128xf32>
    %53 = tpu.reciprocal %52 {approx = true} : vector<1x128xf32> -> vector<1x128xf32>
    %54 = vector.broadcast %53 : vector<1x128xf32> to vector<128x128xf32>
    %55 = arith.mulf %50, %54 : vector<128x128xf32>
    %cst_25 = arith.constant dense<0.000000e+00> : vector<8x128xf32>
    %56 = tpu.matmul %42, %55, %cst_25 {dimension_numbers = #tpu.dot_dimension_numbers<[1], [0], [0], [1], [0, 0, 1, 1], [], []>} : vector<8x128xf32>, vector<128x128xf32>, vector<8x128xf32> -> vector<8x128xf32>
    %c0_26 = arith.constant 0 : index
    %c0_27 = arith.constant 0 : index
    %57 = vector.load %arg18[%c0_26, %c0_27] : memref<32x256xf32, #tpu.memory_space<vmem>>, vector<8x128xf32>
    tpu.vector_store %arg18[%c0_26, %c0_27], %56 {strides = array<i32>} : memref<32x256xf32, #tpu.memory_space<vmem>>, vector<8x128xf32>,
    %58 = vector.extract_strided_slice %37 {offsets = [8, 0], sizes = [8, 128], strides = [1, 1]} : vector<32x256xf32> to vector<8x128xf32>
    %59 = vector.extract_strided_slice %38 {offsets = [8, 0], sizes = [8, 128], strides = [1, 1]} : vector<32x256xf32> to vector<8x128xf32>
    %60 = vector.extract_strided_slice %39 {offsets = [8, 0], sizes = [8, 128], strides = [1, 1]} : vector<32x256xf32> to vector<8x128xf32>
    %cst_28 = arith.constant dense<0.000000e+00> : vector<128x128xf32>
    %61 = tpu.matmul %59, %58, %cst_28 {dimension_numbers = #tpu.dot_dimension_numbers<[0], [0], [1], [1], [0, 1, 1, 1], [], []>} : vector<8x128xf32>, vector<8x128xf32>, vector<128x128xf32> -> vector<128x128xf32>
    %cst_29 = arith.constant 0.353553385 : f32
    %62 = vector.broadcast %cst_29 : f32 to vector<128x128xf32>
    %63 = arith.mulf %61, %62 : vector<128x128xf32>
    %cst_30 = arith.constant dense<0xFF800000> : vector<128xf32>
    %64 = vector.multi_reduction <maximumf>, %63, %cst_30 [0] : vector<128x128xf32> to vector<128xf32>
    %65 = vector.shape_cast %64 : vector<128xf32> to vector<1x128xf32>
    %66 = vector.broadcast %65 : vector<1x128xf32> to vector<128x128xf32>
    %67 = arith.subf %63, %66 : vector<128x128xf32>
    %68 = math.exp %67 : vector<128x128xf32>
    %cst_31 = arith.constant dense<0.000000e+00> : vector<128xf32>
    %69 = vector.multi_reduction <add>, %68, %cst_31 [0] : vector<128x128xf32> to vector<128xf32>
    %70 = vector.shape_cast %69 : vector<128xf32> to vector<1x128xf32>
    %71 = tpu.reciprocal %70 {approx = true} : vector<1x128xf32> -> vector<1x128xf32>
    %72 = vector.broadcast %71 : vector<1x128xf32> to vector<128x128xf32>
    %73 = arith.mulf %68, %72 : vector<128x128xf32>
    %cst_32 = arith.constant dense<0.000000e+00> : vector<8x128xf32>
    %74 = tpu.matmul %60, %73, %cst_32 {dimension_numbers = #tpu.dot_dimension_numbers<[1], [0], [0], [1], [0, 0, 1, 1], [], []>} : vector<8x128xf32>, vector<128x128xf32>, vector<8x128xf32> -> vector<8x128xf32>
    %c8 = arith.constant 8 : index
    %c0_33 = arith.constant 0 : index
    %75 = vector.load %arg18[%c8, %c0_33] : memref<32x256xf32, #tpu.memory_space<vmem>>, vector<8x128xf32>
    tpu.vector_store %arg18[%c8, %c0_33], %74 {strides = array<i32>} : memref<32x256xf32, #tpu.memory_space<vmem>>, vector<8x128xf32>,
    %76 = vector.extract_strided_slice %37 {offsets = [16, 0], sizes = [8, 128], strides = [1, 1]} : vector<32x256xf32> to vector<8x128xf32>
    %77 = vector.extract_strided_slice %38 {offsets = [16, 0], sizes = [8, 128], strides = [1, 1]} : vector<32x256xf32> to vector<8x128xf32>
    %78 = vector.extract_strided_slice %39 {offsets = [16, 0], sizes = [8, 128], strides = [1, 1]} : vector<32x256xf32> to vector<8x128xf32>
    %cst_34 = arith.constant dense<0.000000e+00> : vector<128x128xf32>
    %79 = tpu.matmul %77, %76, %cst_34 {dimension_numbers = #tpu.dot_dimension_numbers<[0], [0], [1], [1], [0, 1, 1, 1], [], []>} : vector<8x128xf32>, vector<8x128xf32>, vector<128x128xf32> -> vector<128x128xf32>
    %cst_35 = arith.constant 0.353553385 : f32
    %80 = vector.broadcast %cst_35 : f32 to vector<128x128xf32>
    %81 = arith.mulf %79, %80 : vector<128x128xf32>
    %cst_36 = arith.constant dense<0xFF800000> : vector<128xf32>
    %82 = vector.multi_reduction <maximumf>, %81, %cst_36 [0] : vector<128x128xf32> to vector<128xf32>
    %83 = vector.shape_cast %82 : vector<128xf32> to vector<1x128xf32>
    %84 = vector.broadcast %83 : vector<1x128xf32> to vector<128x128xf32>
    %85 = arith.subf %81, %84 : vector<128x128xf32>
    %86 = math.exp %85 : vector<128x128xf32>
    %cst_37 = arith.constant dense<0.000000e+00> : vector<128xf32>
    %87 = vector.multi_reduction <add>, %86, %cst_37 [0] : vector<128x128xf32> to vector<128xf32>
    %88 = vector.shape_cast %87 : vector<128xf32> to vector<1x128xf32>
    %89 = tpu.reciprocal %88 {approx = true} : vector<1x128xf32> -> vector<1x128xf32>
    %90 = vector.broadcast %89 : vector<1x128xf32> to vector<128x128xf32>
    %91 = arith.mulf %86, %90 : vector<128x128xf32>
    %cst_38 = arith.constant dense<0.000000e+00> : vector<8x128xf32>
    %92 = tpu.matmul %78, %91, %cst_38 {dimension_numbers = #tpu.dot_dimension_numbers<[1], [0], [0], [1], [0, 0, 1, 1], [], []>} : vector<8x128xf32>, vector<128x128xf32>, vector<8x128xf32> -> vector<8x128xf32>
    %c16 = arith.constant 16 : index
    %c0_39 = arith.constant 0 : index
    %93 = vector.load %arg18[%c16, %c0_39] : memref<32x256xf32, #tpu.memory_space<vmem>>, vector<8x128xf32>
    tpu.vector_store %arg18[%c16, %c0_39], %92 {strides = array<i32>} : memref<32x256xf32, #tpu.memory_space<vmem>>, vector<8x128xf32>,
    %94 = vector.extract_strided_slice %37 {offsets = [24, 0], sizes = [8, 128], strides = [1, 1]} : vector<32x256xf32> to vector<8x128xf32>
    %95 = vector.extract_strided_slice %38 {offsets = [24, 0], sizes = [8, 128], strides = [1, 1]} : vector<32x256xf32> to vector<8x128xf32>
    %96 = vector.extract_strided_slice %39 {offsets = [24, 0], sizes = [8, 128], strides = [1, 1]} : vector<32x256xf32> to vector<8x128xf32>
    %cst_40 = arith.constant dense<0.000000e+00> : vector<128x128xf32>
    %97 = tpu.matmul %95, %94, %cst_40 {dimension_numbers = #tpu.dot_dimension_numbers<[0], [0], [1], [1], [0, 1, 1, 1], [], []>} : vector<8x128xf32>, vector<8x128xf32>, vector<128x128xf32> -> vector<128x128xf32>
    %cst_41 = arith.constant 0.353553385 : f32
    %98 = vector.broadcast %cst_41 : f32 to vector<128x128xf32>
    %99 = arith.mulf %97, %98 : vector<128x128xf32>
    %cst_42 = arith.constant dense<0xFF800000> : vector<128xf32>
    %100 = vector.multi_reduction <maximumf>, %99, %cst_42 [0] : vector<128x128xf32> to vector<128xf32>
    %101 = vector.shape_cast %100 : vector<128xf32> to vector<1x128xf32>
    %102 = vector.broadcast %101 : vector<1x128xf32> to vector<128x128xf32>
    %103 = arith.subf %99, %102 : vector<128x128xf32>
    %104 = math.exp %103 : vector<128x128xf32>
    %cst_43 = arith.constant dense<0.000000e+00> : vector<128xf32>
    %105 = vector.multi_reduction <add>, %104, %cst_43 [0] : vector<128x128xf32> to vector<128xf32>
    %106 = vector.shape_cast %105 : vector<128xf32> to vector<1x128xf32>
    %107 = tpu.reciprocal %106 {approx = true} : vector<1x128xf32> -> vector<1x128xf32>
    %108 = vector.broadcast %107 : vector<1x128xf32> to vector<128x128xf32>
    %109 = arith.mulf %104, %108 : vector<128x128xf32>
    %cst_44 = arith.constant dense<0.000000e+00> : vector<8x128xf32>
    %110 = tpu.matmul %96, %109, %cst_44 {dimension_numbers = #tpu.dot_dimension_numbers<[1], [0], [0], [1], [0, 0, 1, 1], [], []>} : vector<8x128xf32>, vector<128x128xf32>, vector<8x128xf32> -> vector<8x128xf32>
    %c24 = arith.constant 24 : index
    %c0_45 = arith.constant 0 : index
    %111 = vector.load %arg18[%c24, %c0_45] : memref<32x256xf32, #tpu.memory_space<vmem>>, vector<8x128xf32>
    tpu.vector_store %arg18[%c24, %c0_45], %110 {strides = array<i32>} : memref<32x256xf32, #tpu.memory_space<vmem>>, vector<8x128xf32>,
    %112 = vector.extract_strided_slice %37 {offsets = [0, 128], sizes = [8, 128], strides = [1, 1]} : vector<32x256xf32> to vector<8x128xf32>
    %113 = vector.extract_strided_slice %38 {offsets = [0, 128], sizes = [8, 128], strides = [1, 1]} : vector<32x256xf32> to vector<8x128xf32>
    %114 = vector.extract_strided_slice %39 {offsets = [0, 128], sizes = [8, 128], strides = [1, 1]} : vector<32x256xf32> to vector<8x128xf32>
    %cst_46 = arith.constant dense<0.000000e+00> : vector<128x128xf32>
    %115 = tpu.matmul %113, %112, %cst_46 {dimension_numbers = #tpu.dot_dimension_numbers<[0], [0], [1], [1], [0, 1, 1, 1], [], []>} : vector<8x128xf32>, vector<8x128xf32>, vector<128x128xf32> -> vector<128x128xf32>
    %cst_47 = arith.constant 0.353553385 : f32
    %116 = vector.broadcast %cst_47 : f32 to vector<128x128xf32>
    %117 = arith.mulf %115, %116 : vector<128x128xf32>
    %cst_48 = arith.constant dense<0xFF800000> : vector<128xf32>
    %118 = vector.multi_reduction <maximumf>, %117, %cst_48 [0] : vector<128x128xf32> to vector<128xf32>
    %119 = vector.shape_cast %118 : vector<128xf32> to vector<1x128xf32>
    %120 = vector.broadcast %119 : vector<1x128xf32> to vector<128x128xf32>
    %121 = arith.subf %117, %120 : vector<128x128xf32>
    %122 = math.exp %121 : vector<128x128xf32>
    %cst_49 = arith.constant dense<0.000000e+00> : vector<128xf32>
    %123 = vector.multi_reduction <add>, %122, %cst_49 [0] : vector<128x128xf32> to vector<128xf32>
    %124 = vector.shape_cast %123 : vector<128xf32> to vector<1x128xf32>
    %125 = tpu.reciprocal %124 {approx = true} : vector<1x128xf32> -> vector<1x128xf32>
    %126 = vector.broadcast %125 : vector<1x128xf32> to vector<128x128xf32>
    %127 = arith.mulf %122, %126 : vector<128x128xf32>
    %cst_50 = arith.constant dense<0.000000e+00> : vector<8x128xf32>
    %128 = tpu.matmul %114, %127, %cst_50 {dimension_numbers = #tpu.dot_dimension_numbers<[1], [0], [0], [1], [0, 0, 1, 1], [], []>} : vector<8x128xf32>, vector<128x128xf32>, vector<8x128xf32> -> vector<8x128xf32>
    %c0_51 = arith.constant 0 : index
    %c128 = arith.constant 128 : index
    %129 = vector.load %arg18[%c0_51, %c128] : memref<32x256xf32, #tpu.memory_space<vmem>>, vector<8x128xf32>
    tpu.vector_store %arg18[%c0_51, %c128], %128 {strides = array<i32>} : memref<32x256xf32, #tpu.memory_space<vmem>>, vector<8x128xf32>,
    %130 = vector.extract_strided_slice %37 {offsets = [8, 128], sizes = [8, 128], strides = [1, 1]} : vector<32x256xf32> to vector<8x128xf32>
    %131 = vector.extract_strided_slice %38 {offsets = [8, 128], sizes = [8, 128], strides = [1, 1]} : vector<32x256xf32> to vector<8x128xf32>
    %132 = vector.extract_strided_slice %39 {offsets = [8, 128], sizes = [8, 128], strides = [1, 1]} : vector<32x256xf32> to vector<8x128xf32>
    %cst_52 = arith.constant dense<0.000000e+00> : vector<128x128xf32>
    %133 = tpu.matmul %131, %130, %cst_52 {dimension_numbers = #tpu.dot_dimension_numbers<[0], [0], [1], [1], [0, 1, 1, 1], [], []>} : vector<8x128xf32>, vector<8x128xf32>, vector<128x128xf32> -> vector<128x128xf32>
    %cst_53 = arith.constant 0.353553385 : f32
    %134 = vector.broadcast %cst_53 : f32 to vector<128x128xf32>
    %135 = arith.mulf %133, %134 : vector<128x128xf32>
    %cst_54 = arith.constant dense<0xFF800000> : vector<128xf32>
    %136 = vector.multi_reduction <maximumf>, %135, %cst_54 [0] : vector<128x128xf32> to vector<128xf32>
    %137 = vector.shape_cast %136 : vector<128xf32> to vector<1x128xf32>
    %138 = vector.broadcast %137 : vector<1x128xf32> to vector<128x128xf32>
    %139 = arith.subf %135, %138 : vector<128x128xf32>
    %140 = math.exp %139 : vector<128x128xf32>
    %cst_55 = arith.constant dense<0.000000e+00> : vector<128xf32>
    %141 = vector.multi_reduction <add>, %140, %cst_55 [0] : vector<128x128xf32> to vector<128xf32>
    %142 = vector.shape_cast %141 : vector<128xf32> to vector<1x128xf32>
    %143 = tpu.reciprocal %142 {approx = true} : vector<1x128xf32> -> vector<1x128xf32>
    %144 = vector.broadcast %143 : vector<1x128xf32> to vector<128x128xf32>
    %145 = arith.mulf %140, %144 : vector<128x128xf32>
    %cst_56 = arith.constant dense<0.000000e+00> : vector<8x128xf32>
    %146 = tpu.matmul %132, %145, %cst_56 {dimension_numbers = #tpu.dot_dimension_numbers<[1], [0], [0], [1], [0, 0, 1, 1], [], []>} : vector<8x128xf32>, vector<128x128xf32>, vector<8x128xf32> -> vector<8x128xf32>
    %c8_57 = arith.constant 8 : index
    %c128_58 = arith.constant 128 : index
    %147 = vector.load %arg18[%c8_57, %c128_58] : memref<32x256xf32, #tpu.memory_space<vmem>>, vector<8x128xf32>
    tpu.vector_store %arg18[%c8_57, %c128_58], %146 {strides = array<i32>} : memref<32x256xf32, #tpu.memory_space<vmem>>, vector<8x128xf32>,
    %148 = vector.extract_strided_slice %37 {offsets = [16, 128], sizes = [8, 128], strides = [1, 1]} : vector<32x256xf32> to vector<8x128xf32>
    %149 = vector.extract_strided_slice %38 {offsets = [16, 128], sizes = [8, 128], strides = [1, 1]} : vector<32x256xf32> to vector<8x128xf32>
    %150 = vector.extract_strided_slice %39 {offsets = [16, 128], sizes = [8, 128], strides = [1, 1]} : vector<32x256xf32> to vector<8x128xf32>
    %cst_59 = arith.constant dense<0.000000e+00> : vector<128x128xf32>
    %151 = tpu.matmul %149, %148, %cst_59 {dimension_numbers = #tpu.dot_dimension_numbers<[0], [0], [1], [1], [0, 1, 1, 1], [], []>} : vector<8x128xf32>, vector<8x128xf32>, vector<128x128xf32> -> vector<128x128xf32>
    %cst_60 = arith.constant 0.353553385 : f32
    %152 = vector.broadcast %cst_60 : f32 to vector<128x128xf32>
    %153 = arith.mulf %151, %152 : vector<128x128xf32>
    %cst_61 = arith.constant dense<0xFF800000> : vector<128xf32>
    %154 = vector.multi_reduction <maximumf>, %153, %cst_61 [0] : vector<128x128xf32> to vector<128xf32>
    %155 = vector.shape_cast %154 : vector<128xf32> to vector<1x128xf32>
    %156 = vector.broadcast %155 : vector<1x128xf32> to vector<128x128xf32>
    %157 = arith.subf %153, %156 : vector<128x128xf32>
    %158 = math.exp %157 : vector<128x128xf32>
    %cst_62 = arith.constant dense<0.000000e+00> : vector<128xf32>
    %159 = vector.multi_reduction <add>, %158, %cst_62 [0] : vector<128x128xf32> to vector<128xf32>
    %160 = vector.shape_cast %159 : vector<128xf32> to vector<1x128xf32>
    %161 = tpu.reciprocal %160 {approx = true} : vector<1x128xf32> -> vector<1x128xf32>
    %162 = vector.broadcast %161 : vector<1x128xf32> to vector<128x128xf32>
    %163 = arith.mulf %158, %162 : vector<128x128xf32>
    %cst_63 = arith.constant dense<0.000000e+00> : vector<8x128xf32>
    %164 = tpu.matmul %150, %163, %cst_63 {dimension_numbers = #tpu.dot_dimension_numbers<[1], [0], [0], [1], [0, 0, 1, 1], [], []>} : vector<8x128xf32>, vector<128x128xf32>, vector<8x128xf32> -> vector<8x128xf32>
    %c16_64 = arith.constant 16 : index
    %c128_65 = arith.constant 128 : index
    %165 = vector.load %arg18[%c16_64, %c128_65] : memref<32x256xf32, #tpu.memory_space<vmem>>, vector<8x128xf32>
    tpu.vector_store %arg18[%c16_64, %c128_65], %164 {strides = array<i32>} : memref<32x256xf32, #tpu.memory_space<vmem>>, vector<8x128xf32>,
    %166 = vector.extract_strided_slice %37 {offsets = [24, 128], sizes = [8, 128], strides = [1, 1]} : vector<32x256xf32> to vector<8x128xf32>
    %167 = vector.extract_strided_slice %38 {offsets = [24, 128], sizes = [8, 128], strides = [1, 1]} : vector<32x256xf32> to vector<8x128xf32>
    %168 = vector.extract_strided_slice %39 {offsets = [24, 128], sizes = [8, 128], strides = [1, 1]} : vector<32x256xf32> to vector<8x128xf32>
    %cst_66 = arith.constant dense<0.000000e+00> : vector<128x128xf32>
    %169 = tpu.matmul %167, %166, %cst_66 {dimension_numbers = #tpu.dot_dimension_numbers<[0], [0], [1], [1], [0, 1, 1, 1], [], []>} : vector<8x128xf32>, vector<8x128xf32>, vector<128x128xf32> -> vector<128x128xf32>
    %cst_67 = arith.constant 0.353553385 : f32
    %170 = vector.broadcast %cst_67 : f32 to vector<128x128xf32>
    %171 = arith.mulf %169, %170 : vector<128x128xf32>
    %cst_68 = arith.constant dense<0xFF800000> : vector<128xf32>
    %172 = vector.multi_reduction <maximumf>, %171, %cst_68 [0] : vector<128x128xf32> to vector<128xf32>
    %173 = vector.shape_cast %172 : vector<128xf32> to vector<1x128xf32>
    %174 = vector.broadcast %173 : vector<1x128xf32> to vector<128x128xf32>
    %175 = arith.subf %171, %174 : vector<128x128xf32>
    %176 = math.exp %175 : vector<128x128xf32>
    %cst_69 = arith.constant dense<0.000000e+00> : vector<128xf32>
    %177 = vector.multi_reduction <add>, %176, %cst_69 [0] : vector<128x128xf32> to vector<128xf32>
    %178 = vector.shape_cast %177 : vector<128xf32> to vector<1x128xf32>
    %179 = tpu.reciprocal %178 {approx = true} : vector<1x128xf32> -> vector<1x128xf32>
    %180 = vector.broadcast %179 : vector<1x128xf32> to vector<128x128xf32>
    %181 = arith.mulf %176, %180 : vector<128x128xf32>
    %cst_70 = arith.constant dense<0.000000e+00> : vector<8x128xf32>
    %182 = tpu.matmul %168, %181, %cst_70 {dimension_numbers = #tpu.dot_dimension_numbers<[1], [0], [0], [1], [0, 0, 1, 1], [], []>} : vector<8x128xf32>, vector<128x128xf32>, vector<8x128xf32> -> vector<8x128xf32>
    %c24_71 = arith.constant 24 : index
    %c128_72 = arith.constant 128 : index
    %183 = vector.load %arg18[%c24_71, %c128_72] : memref<32x256xf32, #tpu.memory_space<vmem>>, vector<8x128xf32>
    tpu.vector_store %arg18[%c24_71, %c128_72], %182 {strides = array<i32>} : memref<32x256xf32, #tpu.memory_space<vmem>>, vector<8x128xf32>,
    %c0_73 = arith.constant 0 : index
    %c0_74 = arith.constant 0 : index
    %c0_75 = arith.constant 0 : index
    %184 = vector.load %arg7[%c0_73, %c0_74, %c0_75] : memref<2x32x32xf32, #tpu.memory_space<vmem>>, vector<1x32x32xf32>
    %185 = vector.shape_cast %184 : vector<1x32x32xf32> to vector<32x32xf32>
    %c0_76 = arith.constant 0 : index
    %c0_77 = arith.constant 0 : index
    %186 = vector.load %arg18[%c0_76, %c0_77] : memref<32x256xf32, #tpu.memory_space<vmem>>, vector<32x256xf32>
    %cst_78 = arith.constant dense<0.000000e+00> : vector<32x256xf32>
    %187 = tpu.matmul %185, %186, %cst_78 {dimension_numbers = #tpu.dot_dimension_numbers<[1], [0], [0], [1], [0, 0, 1, 1], [], []>} : vector<32x32xf32>, vector<32x256xf32>, vector<32x256xf32> -> vector<32x256xf32>
    %c0_79 = arith.constant 0 : index
    %c0_80 = arith.constant 0 : index
    %c0_81 = arith.constant 0 : index
    %188 = vector.load %arg8[%c0_79, %c0_80, %c0_81] : memref<2x32x1xf32, #tpu.memory_space<vmem>>, vector<1x32x1xf32>
    %189 = vector.shape_cast %188 : vector<1x32x1xf32> to vector<32x1xf32>
    %190 = vector.broadcast %189 : vector<32x1xf32> to vector<32x256xf32>
    %191 = arith.addf %187, %190 : vector<32x256xf32>
    %192 = arith.addf %191, %3 : vector<32x256xf32>
    %c0_82 = arith.constant 0 : index
    %c0_83 = arith.constant 0 : index
    %c0_84 = arith.constant 0 : index
    %193 = vector.load %arg9[%c0_82, %c0_83, %c0_84] : memref<2x32x1xf32, #tpu.memory_space<vmem>>, vector<1x32x1xf32>
    %194 = vector.shape_cast %193 : vector<1x32x1xf32> to vector<32x1xf32>
    %c0_85 = arith.constant 0 : index
    %c0_86 = arith.constant 0 : index
    %c0_87 = arith.constant 0 : index
    %195 = vector.load %arg10[%c0_85, %c0_86, %c0_87] : memref<2x32x1xf32, #tpu.memory_space<vmem>>, vector<1x32x1xf32>
    %196 = vector.shape_cast %195 : vector<1x32x1xf32> to vector<32x1xf32>
    %cst_88 = arith.constant dense<0.000000e+00> : vector<256xf32>
    %197 = vector.multi_reduction <add>, %192, %cst_88 [0] : vector<32x256xf32> to vector<256xf32>
    %198 = vector.shape_cast %197 : vector<256xf32> to vector<1x256xf32>
    %cst_89 = arith.constant 3.125000e-02 : f32
    %199 = vector.broadcast %cst_89 : f32 to vector<1x256xf32>
    %200 = arith.mulf %198, %199 : vector<1x256xf32>
    %201 = arith.mulf %192, %192 : vector<32x256xf32>
    %cst_90 = arith.constant dense<0.000000e+00> : vector<256xf32>
    %202 = vector.multi_reduction <add>, %201, %cst_90 [0] : vector<32x256xf32> to vector<256xf32>
    %203 = vector.shape_cast %202 : vector<256xf32> to vector<1x256xf32>
    %cst_91 = arith.constant 3.125000e-02 : f32
    %204 = vector.broadcast %cst_91 : f32 to vector<1x256xf32>
    %205 = arith.mulf %203, %204 : vector<1x256xf32>
    %206 = arith.mulf %200, %200 : vector<1x256xf32>
    %207 = arith.subf %205, %206 : vector<1x256xf32>
    %208 = vector.broadcast %200 : vector<1x256xf32> to vector<32x256xf32>
    %209 = arith.subf %192, %208 : vector<32x256xf32>
    %cst_92 = arith.constant 9.99999974E-6 : f32
    %210 = vector.broadcast %cst_92 : f32 to vector<1x256xf32>
    %211 = arith.addf %207, %210 : vector<1x256xf32>
    %212 = math.rsqrt %211 : vector<1x256xf32>
    %213 = vector.broadcast %212 : vector<1x256xf32> to vector<32x256xf32>
    %214 = arith.mulf %209, %213 : vector<32x256xf32>
    %215 = vector.broadcast %194 : vector<32x1xf32> to vector<32x256xf32>
    %216 = arith.mulf %214, %215 : vector<32x256xf32>
    %217 = vector.broadcast %196 : vector<32x1xf32> to vector<32x256xf32>
    %218 = arith.addf %216, %217 : vector<32x256xf32>
    %c0_93 = arith.constant 0 : index
    %c0_94 = arith.constant 0 : index
    %c0_95 = arith.constant 0 : index
    %219 = vector.load %arg11[%c0_93, %c0_94, %c0_95] : memref<2x128x32xf32, #tpu.memory_space<vmem>>, vector<1x128x32xf32>
    %220 = vector.shape_cast %219 : vector<1x128x32xf32> to vector<128x32xf32>
    %cst_96 = arith.constant dense<0.000000e+00> : vector<128x256xf32>
    %221 = tpu.matmul %220, %218, %cst_96 {dimension_numbers = #tpu.dot_dimension_numbers<[1], [0], [0], [1], [0, 0, 1, 1], [], []>} : vector<128x32xf32>, vector<32x256xf32>, vector<128x256xf32> -> vector<128x256xf32>
    %c0_97 = arith.constant 0 : index
    %c0_98 = arith.constant 0 : index
    %c0_99 = arith.constant 0 : index
    %222 = vector.load %arg12[%c0_97, %c0_98, %c0_99] : memref<2x128x1xf32, #tpu.memory_space<vmem>>, vector<1x128x1xf32>
    %223 = vector.shape_cast %222 : vector<1x128x1xf32> to vector<128x1xf32>
    %224 = vector.broadcast %223 : vector<128x1xf32> to vector<128x256xf32>
    %225 = arith.addf %221, %224 : vector<128x256xf32>
    %cst_100 = arith.constant 0.000000e+00 : f32
    %226 = vector.broadcast %cst_100 : f32 to vector<128x256xf32>
    %227 = arith.maximumf %225, %226 : vector<128x256xf32>
    %c0_101 = arith.constant 0 : index
    %c0_102 = arith.constant 0 : index
    %c0_103 = arith.constant 0 : index
    %228 = vector.load %arg13[%c0_101, %c0_102, %c0_103] : memref<2x32x128xf32, #tpu.memory_space<vmem>>, vector<1x32x128xf32>
    %229 = vector.shape_cast %228 : vector<1x32x128xf32> to vector<32x128xf32>
    %cst_104 = arith.constant dense<0.000000e+00> : vector<32x256xf32>
    %230 = tpu.matmul %229, %227, %cst_104 {dimension_numbers = #tpu.dot_dimension_numbers<[1], [0], [0], [1], [0, 0, 1, 1], [], []>} : vector<32x128xf32>, vector<128x256xf32>, vector<32x256xf32> -> vector<32x256xf32>
    %c0_105 = arith.constant 0 : index
    %c0_106 = arith.constant 0 : index
    %c0_107 = arith.constant 0 : index
    %231 = vector.load %arg14[%c0_105, %c0_106, %c0_107] : memref<2x32x1xf32, #tpu.memory_space<vmem>>, vector<1x32x1xf32>
    %232 = vector.shape_cast %231 : vector<1x32x1xf32> to vector<32x1xf32>
    %233 = vector.broadcast %232 : vector<32x1xf32> to vector<32x256xf32>
    %234 = arith.addf %230, %233 : vector<32x256xf32>
    %235 = arith.addf %192, %234 : vector<32x256xf32>
    %c1 = arith.constant 1 : index
    %c0_108 = arith.constant 0 : index
    %c0_109 = arith.constant 0 : index
    %236 = vector.load %arg3[%c1, %c0_108, %c0_109] : memref<2x32x1xf32, #tpu.memory_space<vmem>>, vector<1x32x1xf32>
    %237 = vector.shape_cast %236 : vector<1x32x1xf32> to vector<32x1xf32>
    %c1_110 = arith.constant 1 : index
    %c0_111 = arith.constant 0 : index
    %c0_112 = arith.constant 0 : index
    %238 = vector.load %arg4[%c1_110, %c0_111, %c0_112] : memref<2x32x1xf32, #tpu.memory_space<vmem>>, vector<1x32x1xf32>
    %239 = vector.shape_cast %238 : vector<1x32x1xf32> to vector<32x1xf32>
    %cst_113 = arith.constant dense<0.000000e+00> : vector<256xf32>
    %240 = vector.multi_reduction <add>, %235, %cst_113 [0] : vector<32x256xf32> to vector<256xf32>
    %241 = vector.shape_cast %240 : vector<256xf32> to vector<1x256xf32>
    %cst_114 = arith.constant 3.125000e-02 : f32
    %242 = vector.broadcast %cst_114 : f32 to vector<1x256xf32>
    %243 = arith.mulf %241, %242 : vector<1x256xf32>
    %244 = arith.mulf %235, %235 : vector<32x256xf32>
    %cst_115 = arith.constant dense<0.000000e+00> : vector<256xf32>
    %245 = vector.multi_reduction <add>, %244, %cst_115 [0] : vector<32x256xf32> to vector<256xf32>
    %246 = vector.shape_cast %245 : vector<256xf32> to vector<1x256xf32>
    %cst_116 = arith.constant 3.125000e-02 : f32
    %247 = vector.broadcast %cst_116 : f32 to vector<1x256xf32>
    %248 = arith.mulf %246, %247 : vector<1x256xf32>
    %249 = arith.mulf %243, %243 : vector<1x256xf32>
    %250 = arith.subf %248, %249 : vector<1x256xf32>
    %251 = vector.broadcast %243 : vector<1x256xf32> to vector<32x256xf32>
    %252 = arith.subf %235, %251 : vector<32x256xf32>
    %cst_117 = arith.constant 9.99999974E-6 : f32
    %253 = vector.broadcast %cst_117 : f32 to vector<1x256xf32>
    %254 = arith.addf %250, %253 : vector<1x256xf32>
    %255 = math.rsqrt %254 : vector<1x256xf32>
    %256 = vector.broadcast %255 : vector<1x256xf32> to vector<32x256xf32>
    %257 = arith.mulf %252, %256 : vector<32x256xf32>
    %258 = vector.broadcast %237 : vector<32x1xf32> to vector<32x256xf32>
    %259 = arith.mulf %257, %258 : vector<32x256xf32>
    %260 = vector.broadcast %239 : vector<32x1xf32> to vector<32x256xf32>
    %261 = arith.addf %259, %260 : vector<32x256xf32>
    %c1_118 = arith.constant 1 : index
    %c0_119 = arith.constant 0 : index
    %c0_120 = arith.constant 0 : index
    %262 = vector.load %arg5[%c1_118, %c0_119, %c0_120] : memref<2x96x32xf32, #tpu.memory_space<vmem>>, vector<1x96x32xf32>
    %263 = vector.shape_cast %262 : vector<1x96x32xf32> to vector<96x32xf32>
    %cst_121 = arith.constant dense<0.000000e+00> : vector<96x256xf32>
    %264 = tpu.matmul %263, %261, %cst_121 {dimension_numbers = #tpu.dot_dimension_numbers<[1], [0], [0], [1], [0, 0, 1, 1], [], []>} : vector<96x32xf32>, vector<32x256xf32>, vector<96x256xf32> -> vector<96x256xf32>
    %c1_122 = arith.constant 1 : index
    %c0_123 = arith.constant 0 : index
    %c0_124 = arith.constant 0 : index
    %265 = vector.load %arg6[%c1_122, %c0_123, %c0_124] : memref<2x96x1xf32, #tpu.memory_space<vmem>>, vector<1x96x1xf32>
    %266 = vector.shape_cast %265 : vector<1x96x1xf32> to vector<96x1xf32>
    %267 = vector.broadcast %266 : vector<96x1xf32> to vector<96x256xf32>
    %268 = arith.addf %264, %267 : vector<96x256xf32>
    %269 = vector.extract_strided_slice %268 {offsets = [0, 0], sizes = [32, 256], strides = [1, 1]} : vector<96x256xf32> to vector<32x256xf32>
    %270 = vector.extract_strided_slice %268 {offsets = [32, 0], sizes = [32, 256], strides = [1, 1]} : vector<96x256xf32> to vector<32x256xf32>
    %271 = vector.extract_strided_slice %268 {offsets = [64, 0], sizes = [32, 256], strides = [1, 1]} : vector<96x256xf32> to vector<32x256xf32>
    %272 = vector.extract_strided_slice %269 {offsets = [0, 0], sizes = [8, 128], strides = [1, 1]} : vector<32x256xf32> to vector<8x128xf32>
    %273 = vector.extract_strided_slice %270 {offsets = [0, 0], sizes = [8, 128], strides = [1, 1]} : vector<32x256xf32> to vector<8x128xf32>
    %274 = vector.extract_strided_slice %271 {offsets = [0, 0], sizes = [8, 128], strides = [1, 1]} : vector<32x256xf32> to vector<8x128xf32>
    %cst_125 = arith.constant dense<0.000000e+00> : vector<128x128xf32>
    %275 = tpu.matmul %273, %272, %cst_125 {dimension_numbers = #tpu.dot_dimension_numbers<[0], [0], [1], [1], [0, 1, 1, 1], [], []>} : vector<8x128xf32>, vector<8x128xf32>, vector<128x128xf32> -> vector<128x128xf32>
    %cst_126 = arith.constant 0.353553385 : f32
    %276 = vector.broadcast %cst_126 : f32 to vector<128x128xf32>
    %277 = arith.mulf %275, %276 : vector<128x128xf32>
    %cst_127 = arith.constant dense<0xFF800000> : vector<128xf32>
    %278 = vector.multi_reduction <maximumf>, %277, %cst_127 [0] : vector<128x128xf32> to vector<128xf32>
    %279 = vector.shape_cast %278 : vector<128xf32> to vector<1x128xf32>
    %280 = vector.broadcast %279 : vector<1x128xf32> to vector<128x128xf32>
    %281 = arith.subf %277, %280 : vector<128x128xf32>
    %282 = math.exp %281 : vector<128x128xf32>
    %cst_128 = arith.constant dense<0.000000e+00> : vector<128xf32>
    %283 = vector.multi_reduction <add>, %282, %cst_128 [0] : vector<128x128xf32> to vector<128xf32>
    %284 = vector.shape_cast %283 : vector<128xf32> to vector<1x128xf32>
    %285 = tpu.reciprocal %284 {approx = true} : vector<1x128xf32> -> vector<1x128xf32>
    %286 = vector.broadcast %285 : vector<1x128xf32> to vector<128x128xf32>
    %287 = arith.mulf %282, %286 : vector<128x128xf32>
    %cst_129 = arith.constant dense<0.000000e+00> : vector<8x128xf32>
    %288 = tpu.matmul %274, %287, %cst_129 {dimension_numbers = #tpu.dot_dimension_numbers<[1], [0], [0], [1], [0, 0, 1, 1], [], []>} : vector<8x128xf32>, vector<128x128xf32>, vector<8x128xf32> -> vector<8x128xf32>
    %c0_130 = arith.constant 0 : index
    %c0_131 = arith.constant 0 : index
    %289 = vector.load %arg18[%c0_130, %c0_131] : memref<32x256xf32, #tpu.memory_space<vmem>>, vector<8x128xf32>
    tpu.vector_store %arg18[%c0_130, %c0_131], %288 {strides = array<i32>} : memref<32x256xf32, #tpu.memory_space<vmem>>, vector<8x128xf32>,
    %290 = vector.extract_strided_slice %269 {offsets = [8, 0], sizes = [8, 128], strides = [1, 1]} : vector<32x256xf32> to vector<8x128xf32>
    %291 = vector.extract_strided_slice %270 {offsets = [8, 0], sizes = [8, 128], strides = [1, 1]} : vector<32x256xf32> to vector<8x128xf32>
    %292 = vector.extract_strided_slice %271 {offsets = [8, 0], sizes = [8, 128], strides = [1, 1]} : vector<32x256xf32> to vector<8x128xf32>
    %cst_132 = arith.constant dense<0.000000e+00> : vector<128x128xf32>
    %293 = tpu.matmul %291, %290, %cst_132 {dimension_numbers = #tpu.dot_dimension_numbers<[0], [0], [1], [1], [0, 1, 1, 1], [], []>} : vector<8x128xf32>, vector<8x128xf32>, vector<128x128xf32> -> vector<128x128xf32>
    %cst_133 = arith.constant 0.353553385 : f32
    %294 = vector.broadcast %cst_133 : f32 to vector<128x128xf32>
    %295 = arith.mulf %293, %294 : vector<128x128xf32>
    %cst_134 = arith.constant dense<0xFF800000> : vector<128xf32>
    %296 = vector.multi_reduction <maximumf>, %295, %cst_134 [0] : vector<128x128xf32> to vector<128xf32>
    %297 = vector.shape_cast %296 : vector<128xf32> to vector<1x128xf32>
    %298 = vector.broadcast %297 : vector<1x128xf32> to vector<128x128xf32>
    %299 = arith.subf %295, %298 : vector<128x128xf32>
    %300 = math.exp %299 : vector<128x128xf32>
    %cst_135 = arith.constant dense<0.000000e+00> : vector<128xf32>
    %301 = vector.multi_reduction <add>, %300, %cst_135 [0] : vector<128x128xf32> to vector<128xf32>
    %302 = vector.shape_cast %301 : vector<128xf32> to vector<1x128xf32>
    %303 = tpu.reciprocal %302 {approx = true} : vector<1x128xf32> -> vector<1x128xf32>
    %304 = vector.broadcast %303 : vector<1x128xf32> to vector<128x128xf32>
    %305 = arith.mulf %300, %304 : vector<128x128xf32>
    %cst_136 = arith.constant dense<0.000000e+00> : vector<8x128xf32>
    %306 = tpu.matmul %292, %305, %cst_136 {dimension_numbers = #tpu.dot_dimension_numbers<[1], [0], [0], [1], [0, 0, 1, 1], [], []>} : vector<8x128xf32>, vector<128x128xf32>, vector<8x128xf32> -> vector<8x128xf32>
    %c8_137 = arith.constant 8 : index
    %c0_138 = arith.constant 0 : index
    %307 = vector.load %arg18[%c8_137, %c0_138] : memref<32x256xf32, #tpu.memory_space<vmem>>, vector<8x128xf32>
    tpu.vector_store %arg18[%c8_137, %c0_138], %306 {strides = array<i32>} : memref<32x256xf32, #tpu.memory_space<vmem>>, vector<8x128xf32>,
    %308 = vector.extract_strided_slice %269 {offsets = [16, 0], sizes = [8, 128], strides = [1, 1]} : vector<32x256xf32> to vector<8x128xf32>
    %309 = vector.extract_strided_slice %270 {offsets = [16, 0], sizes = [8, 128], strides = [1, 1]} : vector<32x256xf32> to vector<8x128xf32>
    %310 = vector.extract_strided_slice %271 {offsets = [16, 0], sizes = [8, 128], strides = [1, 1]} : vector<32x256xf32> to vector<8x128xf32>
    %cst_139 = arith.constant dense<0.000000e+00> : vector<128x128xf32>
    %311 = tpu.matmul %309, %308, %cst_139 {dimension_numbers = #tpu.dot_dimension_numbers<[0], [0], [1], [1], [0, 1, 1, 1], [], []>} : vector<8x128xf32>, vector<8x128xf32>, vector<128x128xf32> -> vector<128x128xf32>
    %cst_140 = arith.constant 0.353553385 : f32
    %312 = vector.broadcast %cst_140 : f32 to vector<128x128xf32>
    %313 = arith.mulf %311, %312 : vector<128x128xf32>
    %cst_141 = arith.constant dense<0xFF800000> : vector<128xf32>
    %314 = vector.multi_reduction <maximumf>, %313, %cst_141 [0] : vector<128x128xf32> to vector<128xf32>
    %315 = vector.shape_cast %314 : vector<128xf32> to vector<1x128xf32>
    %316 = vector.broadcast %315 : vector<1x128xf32> to vector<128x128xf32>
    %317 = arith.subf %313, %316 : vector<128x128xf32>
    %318 = math.exp %317 : vector<128x128xf32>
    %cst_142 = arith.constant dense<0.000000e+00> : vector<128xf32>
    %319 = vector.multi_reduction <add>, %318, %cst_142 [0] : vector<128x128xf32> to vector<128xf32>
    %320 = vector.shape_cast %319 : vector<128xf32> to vector<1x128xf32>
    %321 = tpu.reciprocal %320 {approx = true} : vector<1x128xf32> -> vector<1x128xf32>
    %322 = vector.broadcast %321 : vector<1x128xf32> to vector<128x128xf32>
    %323 = arith.mulf %318, %322 : vector<128x128xf32>
    %cst_143 = arith.constant dense<0.000000e+00> : vector<8x128xf32>
    %324 = tpu.matmul %310, %323, %cst_143 {dimension_numbers = #tpu.dot_dimension_numbers<[1], [0], [0], [1], [0, 0, 1, 1], [], []>} : vector<8x128xf32>, vector<128x128xf32>, vector<8x128xf32> -> vector<8x128xf32>
    %c16_144 = arith.constant 16 : index
    %c0_145 = arith.constant 0 : index
    %325 = vector.load %arg18[%c16_144, %c0_145] : memref<32x256xf32, #tpu.memory_space<vmem>>, vector<8x128xf32>
    tpu.vector_store %arg18[%c16_144, %c0_145], %324 {strides = array<i32>} : memref<32x256xf32, #tpu.memory_space<vmem>>, vector<8x128xf32>,
    %326 = vector.extract_strided_slice %269 {offsets = [24, 0], sizes = [8, 128], strides = [1, 1]} : vector<32x256xf32> to vector<8x128xf32>
    %327 = vector.extract_strided_slice %270 {offsets = [24, 0], sizes = [8, 128], strides = [1, 1]} : vector<32x256xf32> to vector<8x128xf32>
    %328 = vector.extract_strided_slice %271 {offsets = [24, 0], sizes = [8, 128], strides = [1, 1]} : vector<32x256xf32> to vector<8x128xf32>
    %cst_146 = arith.constant dense<0.000000e+00> : vector<128x128xf32>
    %329 = tpu.matmul %327, %326, %cst_146 {dimension_numbers = #tpu.dot_dimension_numbers<[0], [0], [1], [1], [0, 1, 1, 1], [], []>} : vector<8x128xf32>, vector<8x128xf32>, vector<128x128xf32> -> vector<128x128xf32>
    %cst_147 = arith.constant 0.353553385 : f32
    %330 = vector.broadcast %cst_147 : f32 to vector<128x128xf32>
    %331 = arith.mulf %329, %330 : vector<128x128xf32>
    %cst_148 = arith.constant dense<0xFF800000> : vector<128xf32>
    %332 = vector.multi_reduction <maximumf>, %331, %cst_148 [0] : vector<128x128xf32> to vector<128xf32>
    %333 = vector.shape_cast %332 : vector<128xf32> to vector<1x128xf32>
    %334 = vector.broadcast %333 : vector<1x128xf32> to vector<128x128xf32>
    %335 = arith.subf %331, %334 : vector<128x128xf32>
    %336 = math.exp %335 : vector<128x128xf32>
    %cst_149 = arith.constant dense<0.000000e+00> : vector<128xf32>
    %337 = vector.multi_reduction <add>, %336, %cst_149 [0] : vector<128x128xf32> to vector<128xf32>
    %338 = vector.shape_cast %337 : vector<128xf32> to vector<1x128xf32>
    %339 = tpu.reciprocal %338 {approx = true} : vector<1x128xf32> -> vector<1x128xf32>
    %340 = vector.broadcast %339 : vector<1x128xf32> to vector<128x128xf32>
    %341 = arith.mulf %336, %340 : vector<128x128xf32>
    %cst_150 = arith.constant dense<0.000000e+00> : vector<8x128xf32>
    %342 = tpu.matmul %328, %341, %cst_150 {dimension_numbers = #tpu.dot_dimension_numbers<[1], [0], [0], [1], [0, 0, 1, 1], [], []>} : vector<8x128xf32>, vector<128x128xf32>, vector<8x128xf32> -> vector<8x128xf32>
    %c24_151 = arith.constant 24 : index
    %c0_152 = arith.constant 0 : index
    %343 = vector.load %arg18[%c24_151, %c0_152] : memref<32x256xf32, #tpu.memory_space<vmem>>, vector<8x128xf32>
    tpu.vector_store %arg18[%c24_151, %c0_152], %342 {strides = array<i32>} : memref<32x256xf32, #tpu.memory_space<vmem>>, vector<8x128xf32>,
    %344 = vector.extract_strided_slice %269 {offsets = [0, 128], sizes = [8, 128], strides = [1, 1]} : vector<32x256xf32> to vector<8x128xf32>
    %345 = vector.extract_strided_slice %270 {offsets = [0, 128], sizes = [8, 128], strides = [1, 1]} : vector<32x256xf32> to vector<8x128xf32>
    %346 = vector.extract_strided_slice %271 {offsets = [0, 128], sizes = [8, 128], strides = [1, 1]} : vector<32x256xf32> to vector<8x128xf32>
    %cst_153 = arith.constant dense<0.000000e+00> : vector<128x128xf32>
    %347 = tpu.matmul %345, %344, %cst_153 {dimension_numbers = #tpu.dot_dimension_numbers<[0], [0], [1], [1], [0, 1, 1, 1], [], []>} : vector<8x128xf32>, vector<8x128xf32>, vector<128x128xf32> -> vector<128x128xf32>
    %cst_154 = arith.constant 0.353553385 : f32
    %348 = vector.broadcast %cst_154 : f32 to vector<128x128xf32>
    %349 = arith.mulf %347, %348 : vector<128x128xf32>
    %cst_155 = arith.constant dense<0xFF800000> : vector<128xf32>
    %350 = vector.multi_reduction <maximumf>, %349, %cst_155 [0] : vector<128x128xf32> to vector<128xf32>
    %351 = vector.shape_cast %350 : vector<128xf32> to vector<1x128xf32>
    %352 = vector.broadcast %351 : vector<1x128xf32> to vector<128x128xf32>
    %353 = arith.subf %349, %352 : vector<128x128xf32>
    %354 = math.exp %353 : vector<128x128xf32>
    %cst_156 = arith.constant dense<0.000000e+00> : vector<128xf32>
    %355 = vector.multi_reduction <add>, %354, %cst_156 [0] : vector<128x128xf32> to vector<128xf32>
    %356 = vector.shape_cast %355 : vector<128xf32> to vector<1x128xf32>
    %357 = tpu.reciprocal %356 {approx = true} : vector<1x128xf32> -> vector<1x128xf32>
    %358 = vector.broadcast %357 : vector<1x128xf32> to vector<128x128xf32>
    %359 = arith.mulf %354, %358 : vector<128x128xf32>
    %cst_157 = arith.constant dense<0.000000e+00> : vector<8x128xf32>
    %360 = tpu.matmul %346, %359, %cst_157 {dimension_numbers = #tpu.dot_dimension_numbers<[1], [0], [0], [1], [0, 0, 1, 1], [], []>} : vector<8x128xf32>, vector<128x128xf32>, vector<8x128xf32> -> vector<8x128xf32>
    %c0_158 = arith.constant 0 : index
    %c128_159 = arith.constant 128 : index
    %361 = vector.load %arg18[%c0_158, %c128_159] : memref<32x256xf32, #tpu.memory_space<vmem>>, vector<8x128xf32>
    tpu.vector_store %arg18[%c0_158, %c128_159], %360 {strides = array<i32>} : memref<32x256xf32, #tpu.memory_space<vmem>>, vector<8x128xf32>,
    %362 = vector.extract_strided_slice %269 {offsets = [8, 128], sizes = [8, 128], strides = [1, 1]} : vector<32x256xf32> to vector<8x128xf32>
    %363 = vector.extract_strided_slice %270 {offsets = [8, 128], sizes = [8, 128], strides = [1, 1]} : vector<32x256xf32> to vector<8x128xf32>
    %364 = vector.extract_strided_slice %271 {offsets = [8, 128], sizes = [8, 128], strides = [1, 1]} : vector<32x256xf32> to vector<8x128xf32>
    %cst_160 = arith.constant dense<0.000000e+00> : vector<128x128xf32>
    %365 = tpu.matmul %363, %362, %cst_160 {dimension_numbers = #tpu.dot_dimension_numbers<[0], [0], [1], [1], [0, 1, 1, 1], [], []>} : vector<8x128xf32>, vector<8x128xf32>, vector<128x128xf32> -> vector<128x128xf32>
    %cst_161 = arith.constant 0.353553385 : f32
    %366 = vector.broadcast %cst_161 : f32 to vector<128x128xf32>
    %367 = arith.mulf %365, %366 : vector<128x128xf32>
    %cst_162 = arith.constant dense<0xFF800000> : vector<128xf32>
    %368 = vector.multi_reduction <maximumf>, %367, %cst_162 [0] : vector<128x128xf32> to vector<128xf32>
    %369 = vector.shape_cast %368 : vector<128xf32> to vector<1x128xf32>
    %370 = vector.broadcast %369 : vector<1x128xf32> to vector<128x128xf32>
    %371 = arith.subf %367, %370 : vector<128x128xf32>
    %372 = math.exp %371 : vector<128x128xf32>
    %cst_163 = arith.constant dense<0.000000e+00> : vector<128xf32>
    %373 = vector.multi_reduction <add>, %372, %cst_163 [0] : vector<128x128xf32> to vector<128xf32>
    %374 = vector.shape_cast %373 : vector<128xf32> to vector<1x128xf32>
    %375 = tpu.reciprocal %374 {approx = true} : vector<1x128xf32> -> vector<1x128xf32>
    %376 = vector.broadcast %375 : vector<1x128xf32> to vector<128x128xf32>
    %377 = arith.mulf %372, %376 : vector<128x128xf32>
    %cst_164 = arith.constant dense<0.000000e+00> : vector<8x128xf32>
    %378 = tpu.matmul %364, %377, %cst_164 {dimension_numbers = #tpu.dot_dimension_numbers<[1], [0], [0], [1], [0, 0, 1, 1], [], []>} : vector<8x128xf32>, vector<128x128xf32>, vector<8x128xf32> -> vector<8x128xf32>
    %c8_165 = arith.constant 8 : index
    %c128_166 = arith.constant 128 : index
    %379 = vector.load %arg18[%c8_165, %c128_166] : memref<32x256xf32, #tpu.memory_space<vmem>>, vector<8x128xf32>
    tpu.vector_store %arg18[%c8_165, %c128_166], %378 {strides = array<i32>} : memref<32x256xf32, #tpu.memory_space<vmem>>, vector<8x128xf32>,
    %380 = vector.extract_strided_slice %269 {offsets = [16, 128], sizes = [8, 128], strides = [1, 1]} : vector<32x256xf32> to vector<8x128xf32>
    %381 = vector.extract_strided_slice %270 {offsets = [16, 128], sizes = [8, 128], strides = [1, 1]} : vector<32x256xf32> to vector<8x128xf32>
    %382 = vector.extract_strided_slice %271 {offsets = [16, 128], sizes = [8, 128], strides = [1, 1]} : vector<32x256xf32> to vector<8x128xf32>
    %cst_167 = arith.constant dense<0.000000e+00> : vector<128x128xf32>
    %383 = tpu.matmul %381, %380, %cst_167 {dimension_numbers = #tpu.dot_dimension_numbers<[0], [0], [1], [1], [0, 1, 1, 1], [], []>} : vector<8x128xf32>, vector<8x128xf32>, vector<128x128xf32> -> vector<128x128xf32>
    %cst_168 = arith.constant 0.353553385 : f32
    %384 = vector.broadcast %cst_168 : f32 to vector<128x128xf32>
    %385 = arith.mulf %383, %384 : vector<128x128xf32>
    %cst_169 = arith.constant dense<0xFF800000> : vector<128xf32>
    %386 = vector.multi_reduction <maximumf>, %385, %cst_169 [0] : vector<128x128xf32> to vector<128xf32>
    %387 = vector.shape_cast %386 : vector<128xf32> to vector<1x128xf32>
    %388 = vector.broadcast %387 : vector<1x128xf32> to vector<128x128xf32>
    %389 = arith.subf %385, %388 : vector<128x128xf32>
    %390 = math.exp %389 : vector<128x128xf32>
    %cst_170 = arith.constant dense<0.000000e+00> : vector<128xf32>
    %391 = vector.multi_reduction <add>, %390, %cst_170 [0] : vector<128x128xf32> to vector<128xf32>
    %392 = vector.shape_cast %391 : vector<128xf32> to vector<1x128xf32>
    %393 = tpu.reciprocal %392 {approx = true} : vector<1x128xf32> -> vector<1x128xf32>
    %394 = vector.broadcast %393 : vector<1x128xf32> to vector<128x128xf32>
    %395 = arith.mulf %390, %394 : vector<128x128xf32>
    %cst_171 = arith.constant dense<0.000000e+00> : vector<8x128xf32>
    %396 = tpu.matmul %382, %395, %cst_171 {dimension_numbers = #tpu.dot_dimension_numbers<[1], [0], [0], [1], [0, 0, 1, 1], [], []>} : vector<8x128xf32>, vector<128x128xf32>, vector<8x128xf32> -> vector<8x128xf32>
    %c16_172 = arith.constant 16 : index
    %c128_173 = arith.constant 128 : index
    %397 = vector.load %arg18[%c16_172, %c128_173] : memref<32x256xf32, #tpu.memory_space<vmem>>, vector<8x128xf32>
    tpu.vector_store %arg18[%c16_172, %c128_173], %396 {strides = array<i32>} : memref<32x256xf32, #tpu.memory_space<vmem>>, vector<8x128xf32>,
    %398 = vector.extract_strided_slice %269 {offsets = [24, 128], sizes = [8, 128], strides = [1, 1]} : vector<32x256xf32> to vector<8x128xf32>
    %399 = vector.extract_strided_slice %270 {offsets = [24, 128], sizes = [8, 128], strides = [1, 1]} : vector<32x256xf32> to vector<8x128xf32>
    %400 = vector.extract_strided_slice %271 {offsets = [24, 128], sizes = [8, 128], strides = [1, 1]} : vector<32x256xf32> to vector<8x128xf32>
    %cst_174 = arith.constant dense<0.000000e+00> : vector<128x128xf32>
    %401 = tpu.matmul %399, %398, %cst_174 {dimension_numbers = #tpu.dot_dimension_numbers<[0], [0], [1], [1], [0, 1, 1, 1], [], []>} : vector<8x128xf32>, vector<8x128xf32>, vector<128x128xf32> -> vector<128x128xf32>
    %cst_175 = arith.constant 0.353553385 : f32
    %402 = vector.broadcast %cst_175 : f32 to vector<128x128xf32>
    %403 = arith.mulf %401, %402 : vector<128x128xf32>
    %cst_176 = arith.constant dense<0xFF800000> : vector<128xf32>
    %404 = vector.multi_reduction <maximumf>, %403, %cst_176 [0] : vector<128x128xf32> to vector<128xf32>
    %405 = vector.shape_cast %404 : vector<128xf32> to vector<1x128xf32>
    %406 = vector.broadcast %405 : vector<1x128xf32> to vector<128x128xf32>
    %407 = arith.subf %403, %406 : vector<128x128xf32>
    %408 = math.exp %407 : vector<128x128xf32>
    %cst_177 = arith.constant dense<0.000000e+00> : vector<128xf32>
    %409 = vector.multi_reduction <add>, %408, %cst_177 [0] : vector<128x128xf32> to vector<128xf32>
    %410 = vector.shape_cast %409 : vector<128xf32> to vector<1x128xf32>
    %411 = tpu.reciprocal %410 {approx = true} : vector<1x128xf32> -> vector<1x128xf32>
    %412 = vector.broadcast %411 : vector<1x128xf32> to vector<128x128xf32>
    %413 = arith.mulf %408, %412 : vector<128x128xf32>
    %cst_178 = arith.constant dense<0.000000e+00> : vector<8x128xf32>
    %414 = tpu.matmul %400, %413, %cst_178 {dimension_numbers = #tpu.dot_dimension_numbers<[1], [0], [0], [1], [0, 0, 1, 1], [], []>} : vector<8x128xf32>, vector<128x128xf32>, vector<8x128xf32> -> vector<8x128xf32>
    %c24_179 = arith.constant 24 : index
    %c128_180 = arith.constant 128 : index
    %415 = vector.load %arg18[%c24_179, %c128_180] : memref<32x256xf32, #tpu.memory_space<vmem>>, vector<8x128xf32>
    tpu.vector_store %arg18[%c24_179, %c128_180], %414 {strides = array<i32>} : memref<32x256xf32, #tpu.memory_space<vmem>>, vector<8x128xf32>,
    %c1_181 = arith.constant 1 : index
    %c0_182 = arith.constant 0 : index
    %c0_183 = arith.constant 0 : index
    %416 = vector.load %arg7[%c1_181, %c0_182, %c0_183] : memref<2x32x32xf32, #tpu.memory_space<vmem>>, vector<1x32x32xf32>
    %417 = vector.shape_cast %416 : vector<1x32x32xf32> to vector<32x32xf32>
    %c0_184 = arith.constant 0 : index
    %c0_185 = arith.constant 0 : index
    %418 = vector.load %arg18[%c0_184, %c0_185] : memref<32x256xf32, #tpu.memory_space<vmem>>, vector<32x256xf32>
    %cst_186 = arith.constant dense<0.000000e+00> : vector<32x256xf32>
    %419 = tpu.matmul %417, %418, %cst_186 {dimension_numbers = #tpu.dot_dimension_numbers<[1], [0], [0], [1], [0, 0, 1, 1], [], []>} : vector<32x32xf32>, vector<32x256xf32>, vector<32x256xf32> -> vector<32x256xf32>
    %c1_187 = arith.constant 1 : index
    %c0_188 = arith.constant 0 : index
    %c0_189 = arith.constant 0 : index
    %420 = vector.load %arg8[%c1_187, %c0_188, %c0_189] : memref<2x32x1xf32, #tpu.memory_space<vmem>>, vector<1x32x1xf32>
    %421 = vector.shape_cast %420 : vector<1x32x1xf32> to vector<32x1xf32>
    %422 = vector.broadcast %421 : vector<32x1xf32> to vector<32x256xf32>
    %423 = arith.addf %419, %422 : vector<32x256xf32>
    %424 = arith.addf %423, %235 : vector<32x256xf32>
    %c1_190 = arith.constant 1 : index
    %c0_191 = arith.constant 0 : index
    %c0_192 = arith.constant 0 : index
    %425 = vector.load %arg9[%c1_190, %c0_191, %c0_192] : memref<2x32x1xf32, #tpu.memory_space<vmem>>, vector<1x32x1xf32>
    %426 = vector.shape_cast %425 : vector<1x32x1xf32> to vector<32x1xf32>
    %c1_193 = arith.constant 1 : index
    %c0_194 = arith.constant 0 : index
    %c0_195 = arith.constant 0 : index
    %427 = vector.load %arg10[%c1_193, %c0_194, %c0_195] : memref<2x32x1xf32, #tpu.memory_space<vmem>>, vector<1x32x1xf32>
    %428 = vector.shape_cast %427 : vector<1x32x1xf32> to vector<32x1xf32>
    %cst_196 = arith.constant dense<0.000000e+00> : vector<256xf32>
    %429 = vector.multi_reduction <add>, %424, %cst_196 [0] : vector<32x256xf32> to vector<256xf32>
    %430 = vector.shape_cast %429 : vector<256xf32> to vector<1x256xf32>
    %cst_197 = arith.constant 3.125000e-02 : f32
    %431 = vector.broadcast %cst_197 : f32 to vector<1x256xf32>
    %432 = arith.mulf %430, %431 : vector<1x256xf32>
    %433 = arith.mulf %424, %424 : vector<32x256xf32>
    %cst_198 = arith.constant dense<0.000000e+00> : vector<256xf32>
    %434 = vector.multi_reduction <add>, %433, %cst_198 [0] : vector<32x256xf32> to vector<256xf32>
    %435 = vector.shape_cast %434 : vector<256xf32> to vector<1x256xf32>
    %cst_199 = arith.constant 3.125000e-02 : f32
    %436 = vector.broadcast %cst_199 : f32 to vector<1x256xf32>
    %437 = arith.mulf %435, %436 : vector<1x256xf32>
    %438 = arith.mulf %432, %432 : vector<1x256xf32>
    %439 = arith.subf %437, %438 : vector<1x256xf32>
    %440 = vector.broadcast %432 : vector<1x256xf32> to vector<32x256xf32>
    %441 = arith.subf %424, %440 : vector<32x256xf32>
    %cst_200 = arith.constant 9.99999974E-6 : f32
    %442 = vector.broadcast %cst_200 : f32 to vector<1x256xf32>
    %443 = arith.addf %439, %442 : vector<1x256xf32>
    %444 = math.rsqrt %443 : vector<1x256xf32>
    %445 = vector.broadcast %444 : vector<1x256xf32> to vector<32x256xf32>
    %446 = arith.mulf %441, %445 : vector<32x256xf32>
    %447 = vector.broadcast %426 : vector<32x1xf32> to vector<32x256xf32>
    %448 = arith.mulf %446, %447 : vector<32x256xf32>
    %449 = vector.broadcast %428 : vector<32x1xf32> to vector<32x256xf32>
    %450 = arith.addf %448, %449 : vector<32x256xf32>
    %c1_201 = arith.constant 1 : index
    %c0_202 = arith.constant 0 : index
    %c0_203 = arith.constant 0 : index
    %451 = vector.load %arg11[%c1_201, %c0_202, %c0_203] : memref<2x128x32xf32, #tpu.memory_space<vmem>>, vector<1x128x32xf32>
    %452 = vector.shape_cast %451 : vector<1x128x32xf32> to vector<128x32xf32>
    %cst_204 = arith.constant dense<0.000000e+00> : vector<128x256xf32>
    %453 = tpu.matmul %452, %450, %cst_204 {dimension_numbers = #tpu.dot_dimension_numbers<[1], [0], [0], [1], [0, 0, 1, 1], [], []>} : vector<128x32xf32>, vector<32x256xf32>, vector<128x256xf32> -> vector<128x256xf32>
    %c1_205 = arith.constant 1 : index
    %c0_206 = arith.constant 0 : index
    %c0_207 = arith.constant 0 : index
    %454 = vector.load %arg12[%c1_205, %c0_206, %c0_207] : memref<2x128x1xf32, #tpu.memory_space<vmem>>, vector<1x128x1xf32>
    %455 = vector.shape_cast %454 : vector<1x128x1xf32> to vector<128x1xf32>
    %456 = vector.broadcast %455 : vector<128x1xf32> to vector<128x256xf32>
    %457 = arith.addf %453, %456 : vector<128x256xf32>
    %cst_208 = arith.constant 0.000000e+00 : f32
    %458 = vector.broadcast %cst_208 : f32 to vector<128x256xf32>
    %459 = arith.maximumf %457, %458 : vector<128x256xf32>
    %c1_209 = arith.constant 1 : index
    %c0_210 = arith.constant 0 : index
    %c0_211 = arith.constant 0 : index
    %460 = vector.load %arg13[%c1_209, %c0_210, %c0_211] : memref<2x32x128xf32, #tpu.memory_space<vmem>>, vector<1x32x128xf32>
    %461 = vector.shape_cast %460 : vector<1x32x128xf32> to vector<32x128xf32>
    %cst_212 = arith.constant dense<0.000000e+00> : vector<32x256xf32>
    %462 = tpu.matmul %461, %459, %cst_212 {dimension_numbers = #tpu.dot_dimension_numbers<[1], [0], [0], [1], [0, 0, 1, 1], [], []>} : vector<32x128xf32>, vector<128x256xf32>, vector<32x256xf32> -> vector<32x256xf32>
    %c1_213 = arith.constant 1 : index
    %c0_214 = arith.constant 0 : index
    %c0_215 = arith.constant 0 : index
    %463 = vector.load %arg14[%c1_213, %c0_214, %c0_215] : memref<2x32x1xf32, #tpu.memory_space<vmem>>, vector<1x32x1xf32>
    %464 = vector.shape_cast %463 : vector<1x32x1xf32> to vector<32x1xf32>
    %465 = vector.broadcast %464 : vector<32x1xf32> to vector<32x256xf32>
    %466 = arith.addf %462, %465 : vector<32x256xf32>
    %467 = arith.addf %424, %466 : vector<32x256xf32>
    %c0_216 = arith.constant 0 : index
    %c0_217 = arith.constant 0 : index
    %468 = vector.load %arg15[%c0_216, %c0_217] : memref<32x1xf32, #tpu.memory_space<vmem>>, vector<32x1xf32>
    %c0_218 = arith.constant 0 : index
    %c0_219 = arith.constant 0 : index
    %469 = vector.load %arg16[%c0_218, %c0_219] : memref<32x1xf32, #tpu.memory_space<vmem>>, vector<32x1xf32>
    %cst_220 = arith.constant dense<0.000000e+00> : vector<256xf32>
    %470 = vector.multi_reduction <add>, %467, %cst_220 [0] : vector<32x256xf32> to vector<256xf32>
    %471 = vector.shape_cast %470 : vector<256xf32> to vector<1x256xf32>
    %cst_221 = arith.constant 3.125000e-02 : f32
    %472 = vector.broadcast %cst_221 : f32 to vector<1x256xf32>
    %473 = arith.mulf %471, %472 : vector<1x256xf32>
    %474 = arith.mulf %467, %467 : vector<32x256xf32>
    %cst_222 = arith.constant dense<0.000000e+00> : vector<256xf32>
    %475 = vector.multi_reduction <add>, %474, %cst_222 [0] : vector<32x256xf32> to vector<256xf32>
    %476 = vector.shape_cast %475 : vector<256xf32> to vector<1x256xf32>
    %cst_223 = arith.constant 3.125000e-02 : f32
    %477 = vector.broadcast %cst_223 : f32 to vector<1x256xf32>
    %478 = arith.mulf %476, %477 : vector<1x256xf32>
    %479 = arith.mulf %473, %473 : vector<1x256xf32>
    %480 = arith.subf %478, %479 : vector<1x256xf32>
    %481 = vector.broadcast %473 : vector<1x256xf32> to vector<32x256xf32>
    %482 = arith.subf %467, %481 : vector<32x256xf32>
    %cst_224 = arith.constant 9.99999974E-6 : f32
    %483 = vector.broadcast %cst_224 : f32 to vector<1x256xf32>
    %484 = arith.addf %480, %483 : vector<1x256xf32>
    %485 = math.rsqrt %484 : vector<1x256xf32>
    %486 = vector.broadcast %485 : vector<1x256xf32> to vector<32x256xf32>
    %487 = arith.mulf %482, %486 : vector<32x256xf32>
    %488 = vector.broadcast %468 : vector<32x1xf32> to vector<32x256xf32>
    %489 = arith.mulf %487, %488 : vector<32x256xf32>
    %490 = vector.broadcast %469 : vector<32x1xf32> to vector<32x256xf32>
    %491 = arith.addf %489, %490 : vector<32x256xf32>
    %c0_225 = arith.constant 0 : index
    %c0_226 = arith.constant 0 : index
    %c0_227 = arith.constant 0 : index
    %492 = vector.load %arg17[%c0_225, %c0_226, %c0_227] : memref<1x32x256xf32, #tpu.memory_space<vmem>>, vector<1x32x256xf32>
    %493 = vector.shape_cast %492 : vector<1x32x256xf32> to vector<32x256xf32>
    %494 = vector.shape_cast %491 : vector<32x256xf32> to vector<1x32x256xf32>
    tpu.vector_store %arg17[%c0_225, %c0_226, %c0_227], %494 {strides = array<i32>} : memref<1x32x256xf32, #tpu.memory_space<vmem>>, vector<1x32x256xf32>,
    return
  }
  func.func @transform_0(%arg0: i32) -> (i32, i32, i32) {
    %c0_i32 = arith.constant 0 : i32
    %c0_i32_0 = arith.constant 0 : i32
    %c0_i32_1 = arith.constant 0 : i32
    return %arg0, %c0_i32, %c0_i32_0 : i32, i32, i32
  }
  func.func @transform_1(%arg0: i32) -> (i32, i32) {
    %c0_i32 = arith.constant 0 : i32
    %c0_i32_0 = arith.constant 0 : i32
    %c0_i32_1 = arith.constant 0 : i32
    return %c0_i32, %c0_i32_0 : i32, i32
  }
  func.func @transform_2(%arg0: i32) -> (i32, i32, i32) {
    %c0_i32 = arith.constant 0 : i32
    %c0_i32_0 = arith.constant 0 : i32
    %c0_i32_1 = arith.constant 0 : i32
    %c0_i32_2 = arith.constant 0 : i32
    return %c0_i32, %c0_i32_0, %c0_i32_1 : i32, i32, i32
  }
  func.func @transform_3(%arg0: i32) -> (i32, i32, i32) {
    %c0_i32 = arith.constant 0 : i32
    %c0_i32_0 = arith.constant 0 : i32
    %c0_i32_1 = arith.constant 0 : i32
    %c0_i32_2 = arith.constant 0 : i32
    return %c0_i32, %c0_i32_0, %c0_i32_1 : i32, i32, i32
  }
  func.func @transform_4(%arg0: i32) -> (i32, i32, i32) {
    %c0_i32 = arith.constant 0 : i32
    %c0_i32_0 = arith.constant 0 : i32
    %c0_i32_1 = arith.constant 0 : i32
    %c0_i32_2 = arith.constant 0 : i32
    return %c0_i32, %c0_i32_0, %c0_i32_1 : i32, i32, i32
  }
  func.func @transform_5(%arg0: i32) -> (i32, i32, i32) {
    %c0_i32 = arith.constant 0 : i32
    %c0_i32_0 = arith.constant 0 : i32
    %c0_i32_1 = arith.constant 0 : i32
    %c0_i32_2 = arith.constant 0 : i32
    return %c0_i32, %c0_i32_0, %c0_i32_1 : i32, i32, i32
  }
  func.func @transform_6(%arg0: i32) -> (i32, i32, i32) {
    %c0_i32 = arith.constant 0 : i32
    %c0_i32_0 = arith.constant 0 : i32
    %c0_i32_1 = arith.constant 0 : i32
    %c0_i32_2 = arith.constant 0 : i32
    return %c0_i32, %c0_i32_0, %c0_i32_1 : i32, i32, i32
  }
  func.func @transform_7(%arg0: i32) -> (i32, i32, i32) {
    %c0_i32 = arith.constant 0 : i32
    %c0_i32_0 = arith.constant 0 : i32
    %c0_i32_1 = arith.constant 0 : i32
    %c0_i32_2 = arith.constant 0 : i32
    return %c0_i32, %c0_i32_0, %c0_i32_1 : i32, i32, i32
  }
  func.func @transform_8(%arg0: i32) -> (i32, i32, i32) {
    %c0_i32 = arith.constant 0 : i32
    %c0_i32_0 = arith.constant 0 : i32
    %c0_i32_1 = arith.constant 0 : i32
    %c0_i32_2 = arith.constant 0 : i32
    return %c0_i32, %c0_i32_0, %c0_i32_1 : i32, i32, i32
  }
  func.func @transform_9(%arg0: i32) -> (i32, i32, i32) {
    %c0_i32 = arith.constant 0 : i32
    %c0_i32_0 = arith.constant 0 : i32
    %c0_i32_1 = arith.constant 0 : i32
    %c0_i32_2 = arith.constant 0 : i32
    return %c0_i32, %c0_i32_0, %c0_i32_1 : i32, i32, i32
  }
  func.func @transform_10(%arg0: i32) -> (i32, i32, i32) {
    %c0_i32 = arith.constant 0 : i32
    %c0_i32_0 = arith.constant 0 : i32
    %c0_i32_1 = arith.constant 0 : i32
    %c0_i32_2 = arith.constant 0 : i32
    return %c0_i32, %c0_i32_0, %c0_i32_1 : i32, i32, i32
  }
  func.func @transform_11(%arg0: i32) -> (i32, i32, i32) {
    %c0_i32 = arith.constant 0 : i32
    %c0_i32_0 = arith.constant 0 : i32
    %c0_i32_1 = arith.constant 0 : i32
    %c0_i32_2 = arith.constant 0 : i32
    return %c0_i32, %c0_i32_0, %c0_i32_1 : i32, i32, i32
  }
  func.func @transform_12(%arg0: i32) -> (i32, i32, i32) {
    %c0_i32 = arith.constant 0 : i32
    %c0_i32_0 = arith.constant 0 : i32
    %c0_i32_1 = arith.constant 0 : i32
    %c0_i32_2 = arith.constant 0 : i32
    return %c0_i32, %c0_i32_0, %c0_i32_1 : i32, i32, i32
  }
  func.func @transform_13(%arg0: i32) -> (i32, i32, i32) {
    %c0_i32 = arith.constant 0 : i32
    %c0_i32_0 = arith.constant 0 : i32
    %c0_i32_1 = arith.constant 0 : i32
    %c0_i32_2 = arith.constant 0 : i32
    return %c0_i32, %c0_i32_0, %c0_i32_1 : i32, i32, i32
  }
  func.func @transform_14(%arg0: i32) -> (i32, i32) {
    %c0_i32 = arith.constant 0 : i32
    %c0_i32_0 = arith.constant 0 : i32
    %c0_i32_1 = arith.constant 0 : i32
    return %c0_i32, %c0_i32_0 : i32, i32
  }
  func.func @transform_15(%arg0: i32) -> (i32, i32) {
    %c0_i32 = arith.constant 0 : i32
    %c0_i32_0 = arith.constant 0 : i32
    %c0_i32_1 = arith.constant 0 : i32
    return %c0_i32, %c0_i32_0 : i32, i32
  }
  func.func @transform_16(%arg0: i32) -> (i32, i32, i32) {
    %c0_i32 = arith.constant 0 : i32
    %c0_i32_0 = arith.constant 0 : i32
    %c0_i32_1 = arith.constant 0 : i32
    return %arg0, %c0_i32, %c0_i32_0 : i32, i32, i32
  }
}

</mosaic_0001>

<bundles_post_ra>
// kernel: transformer_forward.1
= control target key start
LH: loop header
LB: loop body
LE: loop exit
PB: predicated region body
PF: predicated region fallthrough
CT: control target
= control target key end

     0   :  { %v12257_v0 = vmov 0   ;;  %v15703_v12 = vmov 0.0   ;;  %vm297_vm0 = vcmask 261120   ;;  %vm503_vm1 = vcmask 64512   ;;  %s15683_s3 = inlined_call_operand.vmem [shape: f32[2,32,1], index: 3, kind: input, shape index: {}]   ;;  %s15684_s2 = inlined_call_operand.vmem [shape: f32[2,32,1], index: 2, kind: input, shape index: {}]   ;;  %s15685_s5 = inlined_call_operand.vmem [shape: f32[2,96,1], index: 5, kind: input, shape index: {}]   ;;  %s15686_s0 = inlined_call_operand.vmem [shape: f32[1,32,256], index: 0, kind: input, shape index: {}]   ;;  %s15687_s1 = inlined_call_operand.vmem [shape: f32[32,256], index: 1, kind: input, shape index: {}]   ;;  %s15688_s4 = inlined_call_operand.vmem [shape: f32[2,96,32], index: 4, kind: input, shape index: {}]   ;;  %s15689_s7 = inlined_call_operand.vmem [shape: f32[2,32,1], index: 7, kind: input, shape index: {}]   ;;  %s15690_s8 = inlined_call_operand.vmem [shape: f32[2,32,1], index: 8, kind: input, shape index: {}]   ;;  %s15691_s9 = inlined_call_operand.vmem [shape: f32[2,32,1], index: 9, kind: input, shape index: {}]   ;;  %s15692_s11 = inlined_call_operand.vmem [shape: f32[2,128,1], index: 11, kind: input, shape index: {}]   ;;  %s15693_s13 = inlined_call_operand.vmem [shape: f32[2,32,1], index: 13, kind: input, shape index: {}]   ;;  %s15694_s6 = inlined_call_operand.vmem [shape: f32[2,32,32], index: 6, kind: input, shape index: {}]   ;;  %s15695_s10 = inlined_call_operand.vmem [shape: f32[2,128,32], index: 10, kind: input, shape index: {}]   ;;  %s15696_s12 = inlined_call_operand.vmem [shape: f32[2,32,128], index: 12, kind: input, shape index: {}]   ;;  %s15697_s14 = inlined_call_operand.vmem [shape: f32[32,1], index: 14, kind: input, shape index: {}]   ;;  %s15698_s15 = inlined_call_operand.vmem [shape: f32[32,1], index: 15, kind: input, shape index: {}]   ;;  %s15699_s16 = inlined_call_operand.vmem [shape: f32[1,32,256], index: 16, kind: output, shape index: {}]  }
   0x1   :  { %15730 = sst [smem:[#allocation50_spill]] %s15683_s3  ;;  %11692 = vset.pattern.permute.xlu1 %v12257_v0  ;;  %11691 = vset.pattern.permute.xlu0 %v12257_v0  ;;  %v77_v2 = vld [vmem:[%s15684_s2] sm:$0xff]  ;;  %v78_v4 = vld [vmem:[%s15684_s2 + $0x8] sm:$0xff]  ;;  %v80_v5 = vld [vmem:[%s15684_s2 + $0x18] sm:$0xff]  ;;  %vm12260_vm2 = vmmov 0  }
   0x2   :  { %s15731_s23 = sld [smem:[#allocation50_spill]]  ;;  %159 = vperm.xlu0 %11691, %v77_v2   ;;  %v79_v6 = vld [vmem:[%s15684_s2 + $0x10] sm:$0xff]  ;;  %v225_v9 = vld [vmem:[%s15685_s5] sm:$0xff]  ;;  %v230_v11 = vld [vmem:[%s15685_s5 + $0x28] sm:$0xff]  ;;  %398 = vmatprep.mubr.f32.mxu0 %v15703_v12 }
   0x3   :  { %v229_v10 = vld [vmem:[%s15685_s5 + $0x20] sm:$0xff]  ;;  %v226_v14 = vld [vmem:[%s15685_s5 + $0x8] sm:$0xff]  ;;  %v55_v17 = vld [vmem:[%s15686_s0 + $0x10] sm:$0xff] }
   0x4   :  { %v233_v13 = vld [vmem:[%s15685_s5 + $0x40] sm:$0xff]  ;;  %v54_v16 = vld [vmem:[%s15686_s0 + $0x8] sm:$0xff]  ;;  %v63_v19 = vld [vmem:[%s15687_s1 + $0x10] sm:$0xff] }
   0x5   :  { %v53_v15 = vld [vmem:[%s15686_s0] sm:$0xff]  ;;  %v56_v20 = vld [vmem:[%s15686_s0 + $0x18] sm:$0xff]  ;;  %v62_v21 = vld [vmem:[%s15687_s1 + $0x8] sm:$0xff]  ;;  %v12412_v24 = vadd.f32 %v63_v19, %v55_v17 }
   0x6   :  { %164 = vperm.xlu0 %11691, %v78_v4   ;;  %v61_v18 = vld [vmem:[%s15687_s1] sm:$0xff]  ;;  %v64_v22 = vld [vmem:[%s15687_s1 + $0x18] sm:$0xff]  ;;  %v12420_v27 = vadd.f32 %v62_v21, %v54_v16  ;;  %v58_v29 = vld [vmem:[%s15686_s0 + $0x28] sm:$0xff] }
   0x7   :  { %v12410_v23 = vadd.f32 %v61_v18, %v53_v15  ;;  %15733 = vst [vmem:[#allocation4_spill] sm:$0xff] %v12412_v24  ;;  %v57_v25 = vld [vmem:[%s15686_s0 + $0x20] sm:$0xff]  ;;  %v12422_v28 = vadd.f32 %v64_v22, %v56_v20  ;;  %v66_v30 = vld [vmem:[%s15687_s1 + $0x28] sm:$0xff]  ;;  %v107_v34 = vmul.f32 %v12412_v24, %v12412_v24  ;;  %v59_v35 = vld [vmem:[%s15686_s0 + $0x30] sm:$0xff] }
   0x8   :  { %v81_v1 = vld [vmem:[%s15731_s23] sm:$0xff]  ;;  %v82_v3 = vld [vmem:[%s15731_s23 + $0x8] sm:$0xff]  ;;  %v84_v7 = vld [vmem:[%s15731_s23 + $0x18] sm:$0xff]  ;;  %15734 = vst [vmem:[#allocation5_spill] sm:$0xff] %v12420_v27  ;;  %v12444_v37 = vadd.f32 %v66_v30, %v58_v29  ;;  %v106_v39 = vmul.f32 %v12420_v27, %v12420_v27 }
   0x9   :  { %187 = vperm.xlu1 %11692, %v81_v1   ;;  %v83_v8 = vld [vmem:[%s15731_s23 + $0x10] sm:$0xff]  ;;  %15732 = vst [vmem:[#allocation3_spill] sm:$0xff] %v12410_v23  ;;  %v65_v26 = vld [vmem:[%s15687_s1 + $0x20] sm:$0xff]  ;;  %15735 = vst [vmem:[#allocation6_spill] sm:$0xff] %v12422_v28  ;;  %v85_v32 = vadd.f32 %v12412_v24, %v12410_v23  ;;  %v105_v33 = vmul.f32 %v12410_v23, %v12410_v23  ;;  %v94_v38 = vadd.f32 %v12422_v28, %v12420_v27 }
   0xa   :  { %169 = vperm.xlu0 %11691, %v79_v6   ;;  %v12430_v31 = vadd.f32 %v65_v26, %v57_v25  ;;  %v67_v36 = vld [vmem:[%s15687_s1 + $0x30] sm:$0xff]  ;;  %15737 = vst [vmem:[#allocation8_spill] sm:$0xff] %v12444_v37  ;;  %v108_v40 = vmul.f32 %v12422_v28, %v12422_v28  ;;  %v60_v41 = vld [vmem:[%s15686_s0 + $0x38] sm:$0xff]  ;;  %v110_v49 = vmul.f32 %v12444_v37, %v12444_v37 }
   0xb   :  { %v68_v42 = vld [vmem:[%s15687_s1 + $0x38] sm:$0xff]  ;;  %v12458_v43 = vadd.f32 %v67_v36, %v59_v35  ;;  %v113_v46 = vadd.f32 %v107_v34, %v105_v33  ;;  %v95_v48 = vadd.f32 %v94_v38, %v12444_v37 }
   0xc   :  { %15736 = vst [vmem:[#allocation7_spill] sm:$0xff] %v12430_v31  ;;  %v86_v44 = vadd.f32 %v85_v32, %v12430_v31  ;;  %v109_v45 = vmul.f32 %v12430_v31, %v12430_v31  ;;  %v12463_v47 = vadd.f32 %v68_v42, %v60_v41  ;;  %v122_v50 = vadd.f32 %v108_v40, %v106_v39 }
   0xd   :  { %192 = vperm.xlu1 %11692, %v82_v3   ;;  %15738 = vst [vmem:[#allocation9_spill] sm:$0xff] %v12458_v43  ;;  %v111_v52 = vmul.f32 %v12458_v43, %v12458_v43 }
   0xe   :  { %197 = vperm.xlu0 %11691, %v83_v8   ;;  %15739 = vst [vmem:[#allocation10_spill] sm:$0xff] %v12463_v47  ;;  %v87_v51 = vadd.f32 %v86_v44, %v12458_v43  ;;  %v114_v53 = vadd.f32 %v113_v46, %v109_v45  ;;  %v96_v54 = vadd.f32 %v95_v48, %v12463_v47 }
   0xf   :  { %v112_v55 = vmul.f32 %v12463_v47, %v12463_v47  ;;  %v123_v56 = vadd.f32 %v122_v50, %v110_v49 }
  0x10   :  { %v88_v57 = vrot.slane %v87_v51, 4  ;;  %v115_v58 = vadd.f32 %v114_v53, %v111_v52  ;;  %v97_v59 = vrot.slane %v96_v54, 4 }
  0x11   :  { %174 = vperm.xlu1 %11692, %v80_v5   ;;  %v124_v60 = vadd.f32 %v123_v56, %v112_v55 }
  0x12   :  { %259 = vperm.xlu0 %11691, %v229_v10   ;;  %v89_v61 = vadd.f32 %v88_v57, %v87_v51  ;;  %v116_v62 = vrot.slane %v115_v58, 4  ;;  %v98_v63 = vadd.f32 %v97_v59, %v96_v54 }
  0x13   :  { %v125_v0 = vrot.slane %v124_v60, 4 }
  0x14   :  { %v90_v1 = vrot.slane %v89_v61, 2  ;;  %v117_v2 = vadd.f32 %v116_v62, %v115_v58  ;;  %v99_v3 = vrot.slane %v98_v63, 2 }
  0x15   :  { %202 = vperm.xlu1 %11692, %v84_v7   ;;  %v126_v4 = vadd.f32 %v125_v0, %v124_v60 }
  0x16   :  { %v91_v5 = vadd.f32 %v90_v1, %v89_v61  ;;  %v118_v6 = vrot.slane %v117_v2, 2  ;;  %v100_v7 = vadd.f32 %v99_v3, %v98_v63 }
  0x17   :  { %v127_v8 = vrot.slane %v126_v4, 2 }
  0x18   :  { %v119_v10 = vadd.f32 %v118_v6, %v117_v2 }
  0x19   :  { %239 = vperm.xlu1 %11692, %v225_v9   ;;  %v92_v9 = vrot.slane %v91_v5, 1 }
  0x1a   :  { %v120_v15 = vrot.slane %v119_v10, 1 }
  0x1c   :  { %v121_v19 = vadd.f32 %v120_v15, %v119_v10 }
  0x1d   :  { %264 = vperm.xlu1 %11692, %v230_v11   ;;  %v101_v11 = vrot.slane %v100_v7, 1 }
  0x1e   :  { %v131_v22 = vmul.f32 0.03125, %v121_v19 }
  0x1f   :  { %v102_v16 = vadd.f32 %v101_v11, %v100_v7 }
  0x21   :  { %279 = vperm.xlu1 %11692, %v233_v13   ;;  %v128_v13 = vadd.f32 %v127_v8, %v126_v4  ;;  %v104_v20 = vmul.f32 0.03125, %v102_v16 }
  0x23   :  { %v129_v17 = vrot.slane %v128_v13, 1  ;;  %v134_v29 = vmul.f32 %v104_v20, %v104_v20  ;;  %v138_v38 = vsub.f32 %v12420_v27, %v104_v20  ;;  %v140_v41 = vsub.f32 %v12422_v28, %v104_v20 }
  0x24   :  { %v144_v52 = vsub.f32 %v12463_v47, %v104_v20  ;;  %v142_v53 = vsub.f32 %v12444_v37, %v104_v20 }
  0x25   :  { %244 = vperm.xlu1 %11692, %v226_v14   ;;  %v93_v14 = vadd.f32 %v92_v9, %v91_v5  ;;  %v130_v21 = vadd.f32 %v129_v17, %v128_v13 }
  0x27   :  { %v103_v18 = vmul.f32 0.03125, %v93_v14  ;;  %v132_v26 = vmul.f32 0.03125, %v130_v21  ;;  %v213_v21 = vld [vmem:[%s15688_s4] sm:$0xff] }
  0x29   :  { %v133_v25 = vmul.f32 %v103_v18, %v103_v18  ;;  %v136_v32 = vsub.f32 %v132_v26, %v134_v29  ;;  %v137_v36 = vsub.f32 %v12410_v23, %v103_v18  ;;  %v139_v40 = vsub.f32 %v12412_v24, %v103_v18  ;;  %v216_v26 = vld [vmem:[%s15688_s4 + $0x18] sm:$0xff]  ;;  %v217_v29 = vld [vmem:[%s15688_s4 + $0x20] sm:$0xff] }
  0x2a   :  { %v143_v50 = vsub.f32 %v12458_v43, %v103_v18  ;;  %v141_v51 = vsub.f32 %v12430_v31, %v103_v18  ;;  %v15752_v24 = vmov 0.0  }
  0x2b   :  { %v135_v30 = vsub.f32 %v131_v22, %v133_v25  ;;  %v146_v34 = vadd.f32 1e-05, %v136_v32  ;;  %v214_v22 = vld [vmem:[%s15688_s4 + $0x8] sm:$0xff]  ;;  %v215_v25 = vld [vmem:[%s15688_s4 + $0x10] sm:$0xff] }
  0x2c   :  { %v219_v32 = vld [vmem:[%s15688_s4 + $0x30] sm:$0xff] }
  0x2d   :  { %v145_v33 = vadd.f32 1e-05, %v135_v30  ;;  %v218_v30 = vld [vmem:[%s15688_s4 + $0x28] sm:$0xff] }
  0x2f   :  { %11693 = vrsqrt.f32 %v145_v33  ;;  %v220_v33 = vld [vmem:[%s15688_s4 + $0x38] sm:$0xff] }
  0x30   :  { %11695 = vrsqrt.f32 %v146_v34  ;;  %v221_v34 = vld [vmem:[%s15688_s4 + $0x40] sm:$0xff] }
  0x39   :  { %v11694_v35 = vpop.eup %11693 }
  0x3a   :  { %v11696_v39 = vpop.eup %11695  ;;  %v149_v45 = vmul.f32 %v11694_v35, %v137_v36  ;;  %v151_v48 = vmul.f32 %v11694_v35, %v139_v40  ;;  %v155_v60 = vmul.f32 %v11694_v35, %v143_v50  ;;  %v153_v61 = vmul.f32 %v11694_v35, %v141_v51  ;;  %v222_v35 = vld [vmem:[%s15688_s4 + $0x48] sm:$0xff]  ;;  %v223_v36 = vld [vmem:[%s15688_s4 + $0x50] sm:$0xff] }
  0x3b   :  { %v150_v46 = vmul.f32 %v11696_v39, %v138_v38  ;;  %v152_v49 = vmul.f32 %v11696_v39, %v140_v41  ;;  %v156_v62 = vmul.f32 %v11696_v39, %v144_v52  ;;  %v154_v63 = vmul.f32 %v11696_v39, %v142_v53 }
  0x81   :  { %v160_v44 = vpop.permute.xlu0 %159 }
  0x82   :  { %v177_v54 = vmul.f32 %v160_v44, %v149_v45  ;;  %v178_v55 = vmul.f32 %v160_v44, %v150_v46 }
  0x85   :  { %v165_v57 = vpop.permute.xlu0 %164 }
  0x86   :  { %v179_v58 = vmul.f32 %v165_v57, %v151_v48  ;;  %v180_v59 = vmul.f32 %v165_v57, %v152_v49 }
  0x88   :  { %v188_v42 = vpop.permute.xlu1 %187 }
  0x89   :  { %v170_v3 = vpop.permute.xlu0 %169  ;;  %v206_v4 = vadd.f32 %v188_v42, %v178_v55  ;;  %v205_v5 = vadd.f32 %v188_v42, %v177_v54 }
  0x8a   :  { %v181_v10 = vmul.f32 %v170_v3, %v153_v61  ;;  %v182_v11 = vmul.f32 %v170_v3, %v154_v63  ;;  %v232_v3 = vld [vmem:[%s15685_s5 + $0x38] sm:$0xff] }
  0x8c   :  { %v193_v56 = vpop.permute.xlu1 %192 }
  0x8d   :  { %v208_v0 = vadd.f32 %v193_v56, %v180_v59  ;;  %v207_v1 = vadd.f32 %v193_v56, %v179_v58  ;;  %v198_v14 = vpop.permute.xlu0 %197 }
  0x8e   :  { %v209_v17 = vadd.f32 %v198_v14, %v181_v10  ;;  %v210_v18 = vadd.f32 %v198_v14, %v182_v11  ;;  %v224_v10 = vld [vmem:[%s15688_s4 + $0x58] sm:$0xff] }
  0x8f   :  { %v11175_v6 = vpack.c.bf16 %v208_v0, %v206_v4  ;;  %v11177_v7 = vpack.c.bf16 %v207_v1, %v205_v5  ;;  %v231_v4 = vld [vmem:[%s15685_s5 + $0x30] sm:$0xff] }
  0x90   :  { %v175_v2 = vpop.permute.xlu1 %174  ;;  %v235_v5 = vld [vmem:[%s15685_s5 + $0x50] sm:$0xff] }
  0x91   :  { %v183_v8 = vmul.f32 %v175_v2, %v155_v60  ;;  %v184_v9 = vmul.f32 %v175_v2, %v156_v62  ;;  %11176 = vmatprep.subr.bf16.mxu0 %v11175_v6  ;;  %v12554_v50 = vpop.permute.xlu0 %259  ;;  %v234_v2 = vld [vmem:[%s15685_s5 + $0x48] sm:$0xff] }
  0x92   :  { %11178 = vmatpush1.bf16.msra.mxu0 %v11177_v7 }
  0x94   :  { %v203_v13 = vpop.permute.xlu1 %202 }
  0x95   :  { %v211_v15 = vadd.f32 %v203_v13, %v183_v8  ;;  %v212_v16 = vadd.f32 %v203_v13, %v184_v9  ;;  %v227_v8 = vld [vmem:[%s15685_s5 + $0x10] sm:$0xff]  ;;  %v228_v9 = vld [vmem:[%s15685_s5 + $0x18] sm:$0xff] }
  0x97   :  { %v11179_v19 = vpack.c.bf16 %v212_v16, %v210_v18  ;;  %v11181_v20 = vpack.c.bf16 %v211_v15, %v209_v17 }
  0x98   :  { %v12537_v38 = vpop.permute.xlu1 %239 }
  0x99   :  { %11180 = vmatprep.subr.bf16.mxu0 %v11179_v19  ;;  %15740 = vst [vmem:[#allocation11_spill] sm:$0xff] %v12537_v38 }
  0x9a   :  { %11182 = vmatpush1.bf16.msra.mxu0 %v11181_v20 }
  0x9c   :  { %v12559_v54 = vpop.permute.xlu1 %264 }
  0x9d   :  { %9247 = vmatmul.mubr.msk.f32.vlgmr.msra.gmra.mrb[0].mxu0 %vm297_vm0, %v213_v21 }
  0x9e   :  { %404 = vmatprep.mubr.f32.mxu0 %v15703_v12 }
  0xa0   :  { %v12606_v11 = vpop.permute.xlu1 %279 }
  0xa1   :  { %9248 = vmatmul.mubr.msk.f32.gmra.mrb[2].mxu0 %vm297_vm0, %v214_v22  ;;  %15747 = vst [vmem:[#allocation18_spill] sm:$0xff] %v12606_v11 }
  0xa2   :  { %410 = vmatprep.mubr.f32.mxu0 %v15703_v12 }
  0xa4   :  { %v12608_v13 = vpop.permute.xlu1 %244 }
  0xa5   :  { %9249 = vmatmul.mubr.msk.f32.gmra.mrb[4].mxu0 %vm297_vm0, %v215_v25  ;;  %15748 = vst [vmem:[#allocation19_spill] sm:$0xff] %v12608_v13 }
  0xa6   :  { %416 = vmatprep.mubr.f32.mxu0 %v15703_v12 }
  0xa9   :  { %9250 = vmatmul.mubr.msk.f32.gmra.mrb[6].mxu0 %vm297_vm0, %v216_v26 }
  0xaa   :  { %422 = vmatprep.mubr.f32.mxu0 %v15703_v12 }
  0xad   :  { %9251 = vmatmul.mubr.msk.f32.gmra.mrb[8].mxu0 %vm297_vm0, %v217_v29 }
  0xae   :  { %428 = vmatprep.mubr.f32.mxu0 %v15703_v12 }
  0xb1   :  { %9252 = vmatmul.mubr.msk.f32.gmra.mrb[10].mxu0 %vm297_vm0, %v218_v30 }
  0xb2   :  { %434 = vmatprep.mubr.f32.mxu0 %v15703_v12 }
  0xb5   :  { %9253 = vmatmul.mubr.msk.f32.gmra.mrb[12].mxu0 %vm297_vm0, %v219_v32 }
  0xb6   :  { %440 = vmatprep.mubr.f32.mxu0 %v15703_v12 }
  0xb9   :  { %9254 = vmatmul.mubr.msk.f32.gmra.mrb[14].mxu0 %vm297_vm0, %v220_v33 }
  0xba   :  { %446 = vmatprep.mubr.f32.mxu0 %v15703_v12 }
  0xbd   :  { %9255 = vmatmul.mubr.msk.f32.gmra.mrb[16].mxu0 %vm297_vm0, %v221_v34 }
  0xbe   :  { %452 = vmatprep.mubr.f32.mxu0 %v15703_v12 }
  0xc1   :  { %9256 = vmatmul.mubr.msk.f32.gmra.mrb[18].mxu0 %vm297_vm0, %v222_v35 }
  0xc2   :  { %458 = vmatprep.mubr.f32.mxu0 %v15703_v12 }
  0xc5   :  { %9257 = vmatmul.mubr.msk.f32.gmra.mrb[20].mxu0 %vm297_vm0, %v223_v36 }
  0xc6   :  { %464 = vmatprep.mubr.f32.mxu0 %v15703_v12 }
  0xc9   :  { %9258 = vmatmul.mubr.msk.f32.gmra.mrb[22].mxu0 %vm297_vm0, %v224_v10 }
  0xca   :  { %10318 = vmatprep.mubr.msk.f32.mxu0 %vm12260_vm2, %v15752_v24 }
 0x170   :  { %v400_v39 = vpop.f32.mrb[0].mxu0 }
 0x171   :  { %v401_v40 = vadd.f32 %v400_v39, %v12537_v38  ;;  %v12540_v41 = vpop.f32.mrb[1].mxu0 }
 0x172   :  { %15741 = vst [vmem:[#allocation12_spill] sm:$0xff] %v12540_v41 }
 0x173   :  { %10199 = vmatprep.subr.mxu1 %v401_v40 }
 0x174   :  { %v12542_v42 = vpop.f32.mrb[2].mxu0  ;;  %10200 = vmatpush3.msra.mxu1 %v401_v40 }
 0x175   :  { %v12544_v44 = vpop.f32.mrb[3].mxu0 }
 0x176   :  { %15742 = vst [vmem:[#allocation13_spill] sm:$0xff] %v12544_v44 }
 0x178   :  { %v12546_v45 = vpop.f32.mrb[4].mxu0 }
 0x179   :  { %v12548_v46 = vpop.f32.mrb[5].mxu0 }
 0x17a   :  { %15743 = vst [vmem:[#allocation14_spill] sm:$0xff] %v12548_v46 }
 0x17c   :  { %v12550_v48 = vpop.f32.mrb[6].mxu0 }
 0x17d   :  { %v12552_v49 = vpop.f32.mrb[7].mxu0 }
 0x17e   :  { %15744 = vst [vmem:[#allocation15_spill] sm:$0xff] %v12552_v49 }
 0x180   :  { %v424_v51 = vpop.f32.mrb[8].mxu0 }
 0x181   :  { %v425_v52 = vadd.f32 %v424_v51, %v12554_v50  ;;  %v12557_v53 = vpop.f32.mrb[9].mxu0 }
 0x183   :  { %471 = vxpose.xlu0.b32.start.end [1/1] (short) %v425_v52, 128 }
 0x184   :  { %v430_v55 = vpop.f32.mrb[10].mxu0 }
 0x185   :  { %v431_v56 = vadd.f32 %v430_v55, %v12559_v54  ;;  %v12562_v57 = vpop.f32.mrb[11].mxu0 }
 0x187   :  { %891 = vxpose.xlu1.b32.start.end [1/1] (short) %v431_v56, 128 }
 0x188   :  { %v12564_v58 = vpop.f32.mrb[12].mxu0 }
 0x189   :  { %v12566_v59 = vpop.f32.mrb[13].mxu0 }
 0x18c   :  { %v12568_v60 = vpop.f32.mrb[14].mxu0 }
 0x18d   :  { %v12570_v61 = vpop.f32.mrb[15].mxu0 }
 0x190   :  { %v12572_v62 = vpop.f32.mrb[16].mxu0 }
 0x191   :  { %v12574_v63 = vpop.f32.mrb[17].mxu0 }
 0x192   :  { %15745 = vst [vmem:[#allocation16_spill] sm:$0xff] %v12574_v63 }
 0x194   :  { %v12576_v0 = vpop.f32.mrb[18].mxu0 }
 0x195   :  { %v12578_v1 = vpop.f32.mrb[19].mxu0 }
 0x198   :  { %v12592_v6 = vpop.f32.mrb[20].mxu0 }
 0x199   :  { %v12594_v7 = vpop.f32.mrb[21].mxu0 }
 0x19a   :  { %15746 = vst [vmem:[#allocation17_spill] sm:$0xff] %v12594_v7 }
 0x1e1   :  { %284 = vperm.xlu1 %11692, %v234_v2  }
 0x1e5   :  { %274 = vperm.xlu1 %11692, %v232_v3  }
 0x1e8   :  { %269 = vperm.xlu0 %11691, %v231_v4  }
 0x1e9   :  { %289 = vperm.xlu1 %11692, %v235_v5  }
 0x1ec   :  { %249 = vperm.xlu0 %11691, %v227_v8  }
 0x1ed   :  { %254 = vperm.xlu1 %11692, %v228_v9  }
 0x203   :  { %v487_v14 = vpop.trf.xlu0 }
 0x204   :  { %10201 = vmatprep.mubr.msk.f32.mxu1 %vm503_vm1, %v487_v14 }
 0x207   :  { %v488_v15 = vpop.trf.xlu0  ;;  %v12611_v16 = vpop.trf.xlu1 }
 0x208   :  { %10202 = vmatmul.mubr.msk.f32.vlgmr.msra.gmra.mrb[0].mxu1 %vm503_vm1, %v488_v15 }
 0x20b   :  { %v489_v17 = vpop.trf.xlu0  ;;  %v12614_v18 = vpop.trf.xlu1 }
 0x20c   :  { %10204 = vmatprep.mubr.msk.f32.mxu1 %vm503_vm1, %v489_v17 }
 0x20f   :  { %v490_v19 = vpop.trf.xlu0  ;;  %v12617_v20 = vpop.trf.xlu1 }
 0x210   :  { %10205 = vmatmul.mubr.msk.f32.gmra.mrb[2].mxu1 %vm503_vm1, %v490_v19 }
 0x213   :  { %v491_v21 = vpop.trf.xlu0  ;;  %v12620_v22 = vpop.trf.xlu1 }
 0x214   :  { %10207 = vmatprep.mubr.msk.f32.mxu1 %vm503_vm1, %v491_v21 }
 0x217   :  { %v492_v25 = vpop.trf.xlu0  ;;  %v12624_v26 = vpop.trf.xlu1 }
 0x218   :  { %10208 = vmatmul.mubr.msk.f32.gmra.mrb[4].mxu1 %vm503_vm1, %v492_v25 }
 0x21b   :  { %v493_v29 = vpop.trf.xlu0  ;;  %v12627_v30 = vpop.trf.xlu1 }
 0x21c   :  { %10210 = vmatprep.mubr.msk.f32.mxu1 %vm503_vm1, %v493_v29 }
 0x21f   :  { %v494_v32 = vpop.trf.xlu0  ;;  %v12631_v34 = vpop.trf.xlu1 }
 0x220   :  { %10211 = vmatmul.mubr.msk.f32.gmra.mrb[6].mxu1 %vm503_vm1, %v494_v32 }
 0x223   :  { %v495_v33 = vpop.trf.xlu0  ;;  %v12634_v36 = vpop.trf.xlu1 }
 0x224   :  { %10213 = vmatprep.mubr.msk.f32.mxu1 %vm503_vm1, %v495_v33 }
 0x227   :  { %v496_v35 = vpop.trf.xlu0  ;;  %v12638_v51 = vpop.trf.xlu1 }
 0x228   :  { %10214 = vmatmul.mubr.msk.f32.gmra.mrb[8].mxu1 %vm503_vm1, %v496_v35 }
 0x22b   :  { %v497_v39 = vpop.trf.xlu0  ;;  %v12641_v55 = vpop.trf.xlu1 }
 0x22c   :  { %10216 = vmatprep.mubr.msk.f32.mxu1 %vm503_vm1, %v497_v39 }
 0x22f   :  { %v498_v40 = vpop.trf.xlu0  ;;  %v12645_v3 = vpop.trf.xlu1 }
 0x230   :  { %10217 = vmatmul.mubr.msk.f32.gmra.mrb[10].mxu1 %vm503_vm1, %v498_v40  ;;  %v433_v40 = vadd.f32 %v12562_v57, %v12559_v54 }
 0x233   :  { %v499_v52 = vpop.trf.xlu0  ;;  %v12648_v5 = vpop.trf.xlu1 }
 0x234   :  { %10219 = vmatprep.mubr.msk.f32.mxu1 %vm503_vm1, %v499_v52 }
 0x237   :  { %v500_v56 = vpop.trf.xlu0  ;;  %v12650_v8 = vpop.trf.xlu1 }
 0x238   :  { %10220 = vmatmul.mubr.msk.f32.gmra.mrb[12].mxu1 %vm503_vm1, %v500_v56 }
 0x23b   :  { %v501_v2 = vpop.trf.xlu0  ;;  %v12652_v9 = vpop.trf.xlu1 }
 0x23c   :  { %10222 = vmatprep.mubr.msk.f32.mxu1 %vm503_vm1, %v501_v2 }
 0x23f   :  { %v502_v4 = vpop.trf.xlu0  ;;  %v12654_v10 = vpop.trf.xlu1 }
 0x240   :  { %10223 = vmatmul.mubr.msk.f32.gmra.mrb[14].mxu1 %vm503_vm1, %v502_v4 }
 0x241   :  { %10257 = vmatprep.mubr.msk.f32.mxu1 %vm12260_vm2, %v15752_v24 }
 0x243   :  { %v12656_v14 = vpop.trf.xlu1 }
 0x260   :  { %v285_v15 = vpop.permute.xlu1 %284 }
 0x261   :  { %v12659_v17 = vadd.f32 %v12576_v0, %v285_v15  ;;  %v12662_v19 = vadd.f32 %v12578_v1, %v285_v15  ;;  %v427_v0 = vadd.f32 %v12557_v53, %v12554_v50  ;;  %v236_v1 = vld [vmem:[%s15685_s5 + $0x58] sm:$0xff] }
 0x263   :  { %15749 = vst [vmem:[#allocation20_spill] sm:$0xff] %v12662_v19 }
 0x264   :  { %v275_v21 = vpop.permute.xlu1 %274 }
 0x265   :  { %v443_v25 = vadd.f32 %v12568_v60, %v275_v21  ;;  %v12666_v29 = vadd.f32 %v12570_v61, %v275_v21  ;;  %v12675_v61 = vpop.f32.mrb[22].mxu0 }
 0x266   :  { %15750 = vst [vmem:[#allocation21_spill] sm:$0xff] %v12675_v61 }
 0x267   :  { %1729 = vxpose.xlu1.b32.start.end [1/1] (short) %v443_v25, 128  ;;  %v270_v32 = vpop.permute.xlu0 %269  ;;  %v15701_v25 = vmov 0.0|0.0  }
 0x268   :  { %v437_v33 = vadd.f32 %v12564_v58, %v270_v32  ;;  %v439_v35 = vadd.f32 %v12566_v59, %v270_v32  ;;  %v12679_v58 = vpop.f32.mrb[23].mxu0  ;;  %v12681_v59 = vpop.permute.xlu1 %289  ;;  %11183 = vmatprep.subr.bf16.mxu1 %v15701_v25  ;;  %11207 = vmatprep.subr.bf16.mxu0 %v15701_v25 }
 0x269   :  { %15751 = vst [vmem:[#allocation22_spill] sm:$0xff] %v12679_v58 }
 0x26a   :  { %1310 = vxpose.xlu0.b32.start.end [1/1] (short) %v437_v33, 128 }
 0x26c   :  { %v12721_v27 = vpop.permute.xlu1 %254 }
 0x2a4   :  { %2148 = vxpose.xlu1.b32.start.end [1/1] (short) %v427_v0, 128 }
 0x2cf   :  { %294 = vperm.xlu0 %11691, %v236_v1  }
 0x2db   :  { %v10203_v60 = vpop.f32.mrb[0].mxu1 }
 0x2dc   :  { %v618_v39 = vpop.f32.mrb[1].mxu1  ;;  %v12683_v56 = vmul.f32 0.35355338, %v10203_v60 }
 0x2dd   :  { %v12687_v15 = vmul.f32 0.35355338, %v618_v39 }
 0x2e1   :  { %2567 = vxpose.xlu1.b32.start.end [1/1] (short) %v433_v40, 128 }
 0x2e3   :  { %v10206_v52 = vpop.f32.mrb[2].mxu1 }
 0x2e4   :  { %v628_v50 = vpop.f32.mrb[3].mxu1  ;;  %v12697_v33 = vmul.f32 0.35355338, %v10206_v52 }
 0x2e5   :  { %v12701_v60 = vmul.f32 0.35355338, %v628_v50 }
 0x2e7   :  { %v12725_v28 = vpop.trf.xlu1 }
 0x2eb   :  { %v10209_v53 = vpop.f32.mrb[4].mxu1 }
 0x2ec   :  { %v12685_v2 = vmul.f32 0.35355338, %v10209_v53  ;;  %v638_v4 = vpop.f32.mrb[5].mxu1 }
 0x2ed   :  { %v12689_v21 = vmul.f32 0.35355338, %v638_v4  ;;  %2986 = vxpose.xlu0.b32.start.end [1/1] (short) %v439_v35, 128 }
 0x2ee   :  { %v714_v54 = vmax.f32 %v12683_v56, %v12685_v2 }
 0x2ef   :  { %v713_v57 = vmax.f32 %v12687_v15, %v12689_v21 }
 0x2f3   :  { %v10212_v32 = vpop.f32.mrb[6].mxu1 }
 0x2f4   :  { %v12699_v0 = vmul.f32 0.35355338, %v10212_v32  ;;  %v648_v1 = vpop.f32.mrb[7].mxu1 }
 0x2f5   :  { %v12703_v35 = vmul.f32 0.35355338, %v648_v1 }
 0x2f6   :  { %v716_v39 = vmax.f32 %v12697_v33, %v12699_v0 }
 0x2f7   :  { %v715_v40 = vmax.f32 %v12701_v60, %v12703_v35 }
 0x2fb   :  { %v10215_v53 = vpop.f32.mrb[8].mxu1 }
 0x2fc   :  { %v12709_v4 = vmul.f32 0.35355338, %v10215_v53  ;;  %v658_v25 = vpop.f32.mrb[9].mxu1 }
 0x2fd   :  { %v12711_v12 = vmul.f32 0.35355338, %v658_v25 }
 0x2fe   :  { %v718_v52 = vmax.f32 %v714_v54, %v12709_v4 }
 0x2ff   :  { %v717_v32 = vmax.f32 %v713_v57, %v12711_v12 }
 0x303   :  { %v10218_v50 = vpop.f32.mrb[10].mxu1 }
 0x304   :  { %v12715_v47 = vmul.f32 0.35355338, %v10218_v50  ;;  %v668_v1 = vpop.f32.mrb[11].mxu1 }
 0x305   :  { %v12717_v43 = vmul.f32 0.35355338, %v668_v1 }
 0x306   :  { %v720_v37 = vmax.f32 %v716_v39, %v12715_v47  ;;  %v12735_v39 = vpop.trf.xlu1 }
 0x307   :  { %v719_v31 = vmax.f32 %v715_v40, %v12717_v43  ;;  %15753 = vst [vmem:[#allocation23_spill] sm:$0xff] %v12735_v39 }
 0x30b   :  { %v10221_v53 = vpop.f32.mrb[12].mxu1 }
 0x30c   :  { %v12723_v23 = vmul.f32 0.35355338, %v10221_v53  ;;  %v678_v25 = vpop.f32.mrb[13].mxu1 }
 0x30d   :  { %v12727_v54 = vmul.f32 0.35355338, %v678_v25 }
 0x30e   :  { %v722_v57 = vmax.f32 %v718_v52, %v12723_v23 }
 0x30f   :  { %v721_v50 = vmax.f32 %v717_v32, %v12727_v54 }
 0x311   :  { %v725_v1 = vmax.f32 %v721_v50, %v722_v57  ;;  %v12743_v57 = vpop.trf.xlu1 }
 0x312   :  { %15754 = vst [vmem:[#allocation24_spill] sm:$0xff] %v12743_v57 }
 0x313   :  { %v10224_v40 = vpop.f32.mrb[14].mxu1 }
 0x314   :  { %v12737_v53 = vmul.f32 0.35355338, %v10224_v40  ;;  %v688_v58 = vpop.f32.mrb[15].mxu1 }
 0x315   :  { %v12739_v25 = vmul.f32 0.35355338, %v688_v58  ;;  %v12745_v49 = vpop.trf.xlu1 }
 0x316   :  { %v724_v52 = vmax.f32 %v720_v37, %v12737_v53  ;;  %15755 = vst [vmem:[#allocation25_spill] sm:$0xff] %v12745_v49 }
 0x317   :  { %v723_v32 = vmax.f32 %v719_v31, %v12739_v25 }
 0x319   :  { %v726_v50 = vmax.f32 %v723_v32, %v724_v52  ;;  %v12747_v61 = vpop.trf.xlu1 }
 0x31a   :  { %15756 = vst [vmem:[#allocation26_spill] sm:$0xff] %v12747_v61 }
 0x31b   :  { %v727_v7 = vmax.f32 %v725_v1, %v726_v50 }
 0x31d   :  { %v728_v19 = vrot.slane %v727_v7, 4 }
 0x31f   :  { %v729_v46 = vmax.f32 %v727_v7, %v728_v19  ;;  %v12759_v7 = vpop.permute.xlu0 %249 }
 0x321   :  { %v730_v63 = vrot.slane %v729_v46, 2 }
 0x323   :  { %v731_v44 = vmax.f32 %v729_v46, %v730_v63 }
 0x325   :  { %v732_v40 = vrot.slane %v731_v44, 1 }
 0x327   :  { %v12749_v41 = vmax.f32 %v731_v44, %v732_v40 }
 0x329   :  { %v734_v37 = vsub.f32 %v12687_v15, %v12749_v41  ;;  %v735_v31 = vsub.f32 %v12683_v56, %v12749_v41  ;;  %v736_v58 = vsub.f32 %v12701_v60, %v12749_v41  ;;  %v737_v1 = vsub.f32 %v12697_v33, %v12749_v41  ;;  %v12770_v56 = vpop.trf.xlu1 }
 0x32a   :  { %v738_v46 = vsub.f32 %v12689_v21, %v12749_v41  ;;  %v739_v44 = vsub.f32 %v12685_v2, %v12749_v41  ;;  %v740_v63 = vsub.f32 %v12703_v35, %v12749_v41  ;;  %v741_v19 = vsub.f32 %v12699_v0, %v12749_v41  ;;  %3405 = vxpose.xlu0.b32.start.end [1/1] (short) %v12666_v29, 128 }
 0x32b   :  { %15757 = vst [vmem:[#allocation27_spill] sm:$0xff] %v12770_v56  ;;  %v742_v15 = vsub.f32 %v12711_v12, %v12749_v41  ;;  %v743_v33 = vsub.f32 %v12709_v4, %v12749_v41  ;;  %v744_v21 = vsub.f32 %v12717_v43, %v12749_v41  ;;  %v745_v2 = vsub.f32 %v12715_v47, %v12749_v41 }
 0x32c   :  { %v746_v60 = vsub.f32 %v12727_v54, %v12749_v41  ;;  %v747_v29 = vsub.f32 %v12723_v23, %v12749_v41  ;;  %v748_v0 = vsub.f32 %v12739_v25, %v12749_v41  ;;  %v749_v12 = vsub.f32 %v12737_v53, %v12749_v41  ;;  %v3836_v41 = vld [vmem:[%s15689_s7] sm:$0xff] }
 0x32d   :  { %v750_v35 = vmul.f32 1.442695, %v734_v37  ;;  %v752_v4 = vmul.f32 1.442695, %v735_v31  ;;  %v754_v52 = vmul.f32 1.442695, %v736_v58  ;;  %v12788_v32 = vpop.trf.xlu1 }
 0x32e   :  { %v756_v43 = vmul.f32 1.442695, %v737_v1  ;;  %15758 = vst [vmem:[#allocation28_spill] sm:$0xff] %v12788_v32  ;;  %v758_v47 = vmul.f32 1.442695, %v738_v46  ;;  %v3838_v46 = vld [vmem:[%s15689_s7 + $0x10] sm:$0xff] }
 0x32f   :  { %11697 = vpow2.f32 %v750_v35  ;;  %v760_v54 = vmul.f32 1.442695, %v739_v44  ;;  %v762_v23 = vmul.f32 1.442695, %v740_v63  ;;  %v764_v25 = vmul.f32 1.442695, %v741_v19 }
 0x330   :  { %11699 = vpow2.f32 %v752_v4  ;;  %v766_v37 = vmul.f32 1.442695, %v742_v15  ;;  %v768_v1 = vmul.f32 1.442695, %v743_v33  ;;  %v770_v15 = vmul.f32 1.442695, %v744_v21 }
 0x331   :  { %11701 = vpow2.f32 %v754_v52  ;;  %v12790_v50 = vpop.trf.xlu1  ;;  %v772_v52 = vmul.f32 1.442695, %v745_v2  ;;  %v3839_v33 = vld [vmem:[%s15689_s7 + $0x18] sm:$0xff]  ;;  %v3969_v2 = vld [vmem:[%s15690_s8] sm:$0xff] }
 0x332   :  { %11703 = vpow2.f32 %v756_v43  ;;  %15759 = vst [vmem:[#allocation29_spill] sm:$0xff] %v12790_v50 }
 0x333   :  { %11705 = vpow2.f32 %v758_v47 }
 0x334   :  { %11707 = vpow2.f32 %v760_v54  ;;  %v774_v54 = vmul.f32 1.442695, %v746_v60 }
 0x335   :  { %11709 = vpow2.f32 %v762_v23  ;;  %v12807_v63 = vpop.trf.xlu1 }
 0x336   :  { %11711 = vpow2.f32 %v764_v25  ;;  %15760 = vst [vmem:[#allocation30_spill] sm:$0xff] %v12807_v63 }
 0x337   :  { %11713 = vpow2.f32 %v766_v37 }
 0x338   :  { %11715 = vpow2.f32 %v768_v1  ;;  %v778_v1 = vmul.f32 1.442695, %v748_v0 }
 0x339   :  { %v12795_v53 = vpop.eup %11697  ;;  %11717 = vpow2.f32 %v770_v15  ;;  %v12821_v21 = vpop.trf.xlu1 }
 0x33a   :  { %v12797_v40 = vpop.eup %11699  ;;  %15761 = vst [vmem:[#allocation31_spill] sm:$0xff] %v12821_v21  ;;  %11719 = vpow2.f32 %v772_v52 }
 0x33b   :  { %v782_v31 = vadd.f32 %v12797_v40, %v12795_v53  ;;  %3842 = vperm.xlu1 %11692, %v3836_v41   ;;  %v12801_v58 = vpop.eup %11701  ;;  %v776_v41 = vmul.f32 1.442695, %v747_v29  ;;  %11721 = vpow2.f32 %v774_v54  ;;  %v3970_v29 = vld [vmem:[%s15690_s8 + $0x8] sm:$0xff] }
 0x33c   :  { %v12809_v19 = vpop.eup %11703 }
 0x33d   :  { %v783_v44 = vadd.f32 %v12801_v58, %v782_v31  ;;  %v12812_v4 = vpop.eup %11705  ;;  %11723 = vpow2.f32 %v776_v41 }
 0x33e   :  { %v12818_v47 = vpop.eup %11707  ;;  %11725 = vpow2.f32 %v778_v1 }
 0x33f   :  { %v784_v35 = vadd.f32 %v12809_v19, %v783_v44  ;;  %3852 = vperm.xlu1 %11692, %v3838_v46   ;;  %v12823_v25 = vpop.eup %11709  ;;  %v780_v44 = vmul.f32 1.442695, %v749_v12  ;;  %v3973_v12 = vld [vmem:[%s15691_s9] sm:$0xff] }
 0x340   :  { %v12829_v31 = vpop.eup %11711 }
 0x341   :  { %v785_v43 = vadd.f32 %v12812_v4, %v784_v35  ;;  %v12832_v46 = vpop.eup %11713  ;;  %v12838_v35 = vpop.trf.xlu1  ;;  %11727 = vpow2.f32 %v780_v44 }
 0x342   :  { %15762 = vst [vmem:[#allocation32_spill] sm:$0xff] %v12838_v35  ;;  %v12840_v52 = vpop.eup %11715 }
 0x343   :  { %v786_v23 = vadd.f32 %v12818_v47, %v785_v43  ;;  %3857 = vperm.xlu1 %11692, %v3839_v33   ;;  %v12843_v33 = vpop.eup %11717 }
 0x344   :  { %v11720_v54 = vpop.eup %11719 }
 0x345   :  { %v787_v37 = vadd.f32 %v12823_v25, %v786_v23  ;;  %v12849_v41 = vpop.trf.xlu1 }
 0x346   :  { %15763 = vst [vmem:[#allocation33_spill] sm:$0xff] %v12849_v41 }
 0x347   :  { %v788_v60 = vadd.f32 %v12829_v31, %v787_v37  ;;  %4051 = vperm.xlu1 %11692, %v3969_v2   ;;  %v11722_v2 = vpop.eup %11721  ;;  %v3974_v37 = vld [vmem:[%s15691_s9 + $0x8] sm:$0xff] }
 0x349   :  { %v789_v15 = vadd.f32 %v12832_v46, %v788_v60  ;;  %v11724_v60 = vpop.eup %11723  ;;  %v12857_v38 = vpop.trf.xlu1 }
 0x34a   :  { %v11726_v44 = vpop.eup %11725  ;;  %15764 = vst [vmem:[#allocation34_spill] sm:$0xff] %v12857_v38 }
 0x34b   :  { %v790_v0 = vadd.f32 %v12840_v52, %v789_v15  ;;  %4056 = vperm.xlu1 %11692, %v3970_v29   ;;  %v3971_v15 = vld [vmem:[%s15690_s8 + $0x10] sm:$0xff] }
 0x34d   :  { %v791_v43 = vadd.f32 %v12843_v33, %v790_v0  ;;  %v12862_v21 = vpop.trf.xlu1 }
 0x34e   :  { %15765 = vst [vmem:[#allocation35_spill] sm:$0xff] %v12862_v21 }
 0x34f   :  { %v792_v23 = vadd.f32 %v11720_v54, %v791_v43  ;;  %4079 = vperm.xlu1 %11692, %v3973_v12   ;;  %v11728_v43 = vpop.eup %11727  ;;  %v3972_v12 = vld [vmem:[%s15690_s8 + $0x18] sm:$0xff] }
 0x351   :  { %v793_v1 = vadd.f32 %v11722_v2, %v792_v23  ;;  %v12870_v38 = vpop.trf.xlu1 }
 0x352   :  { %15766 = vst [vmem:[#allocation36_spill] sm:$0xff] %v12870_v38 }
 0x353   :  { %v794_v29 = vadd.f32 %v11724_v60, %v793_v1  ;;  %4084 = vperm.xlu1 %11692, %v3974_v37   ;;  %v3975_v37 = vld [vmem:[%s15691_s9 + $0x10] sm:$0xff] }
 0x355   :  { %v795_v0 = vadd.f32 %v11726_v44, %v794_v29 }
 0x357   :  { %v796_v41 = vadd.f32 %v11728_v43, %v795_v0  ;;  %4061 = vperm.xlu1 %11692, %v3971_v15   ;;  %v3976_v15 = vld [vmem:[%s15691_s9 + $0x18] sm:$0xff] }
 0x359   :  { %v797_v35 = vrot.slane %v796_v41, 4 }
 0x35b   :  { %v798_v23 = vadd.f32 %v797_v35, %v796_v41  ;;  %4066 = vperm.xlu1 %11692, %v3972_v12   ;;  %v4121_v35 = vld [vmem:[%s15692_s11] sm:$0xff]  ;;  %v12875_v41 = vpop.trf.xlu1  ;;  %v4122_v12 = vld [vmem:[%s15692_s11 + $0x8] sm:$0xff] }
 0x35c   :  { %15767 = vst [vmem:[#allocation37_spill] sm:$0xff] %v12875_v41 }
 0x35d   :  { %v799_v1 = vrot.slane %v798_v23, 2 }
 0x35f   :  { %v800_v29 = vadd.f32 %v799_v1, %v798_v23  ;;  %4089 = vperm.xlu1 %11692, %v3975_v37   ;;  %v4123_v23 = vld [vmem:[%s15692_s11 + $0x10] sm:$0xff]  ;;  %v12883_v37 = vpop.trf.xlu1 }
 0x360   :  { %15768 = vst [vmem:[#allocation38_spill] sm:$0xff] %v12883_v37 }
 0x361   :  { %v801_v0 = vrot.slane %v800_v29, 1 }
 0x363   :  { %v802_v63 = vadd.f32 %v801_v0, %v800_v29  ;;  %4094 = vperm.xlu1 %11692, %v3976_v15   ;;  %v4125_v15 = vld [vmem:[%s15692_s11 + $0x20] sm:$0xff]  ;;  %v12900_v32 = vpop.trf.xlu1 }
 0x364   :  { %15769 = vst [vmem:[#allocation39_spill] sm:$0xff] %v12900_v32 }
 0x365   :  { %11729 = vrcp.f32 %v802_v63 }
 0x367   :  { %4139 = vperm.xlu1 %11692, %v4121_v35  }
 0x36b   :  { %4144 = vperm.xlu1 %11692, %v4122_v12   ;;  %v12892_v12 = vpop.trf.xlu0 }
 0x36f   :  { %v11730_v1 = vpop.eup %11729  ;;  %4149 = vperm.xlu1 %11692, %v4123_v23  }
 0x370   :  { %v804_v29 = vmul.f32 %v11730_v1, %v12795_v53  ;;  %v805_v63 = vmul.f32 %v11730_v1, %v12797_v40  ;;  %v806_v0 = vmul.f32 %v11730_v1, %v12801_v58  ;;  %v807_v35 = vmul.f32 %v11730_v1, %v12809_v19 }
 0x371   :  { %v808_v41 = vmul.f32 %v11730_v1, %v12812_v4  ;;  %v809_v37 = vmul.f32 %v11730_v1, %v12818_v47  ;;  %v810_v23 = vmul.f32 %v11730_v1, %v12823_v25  ;;  %v811_v53 = vmul.f32 %v11730_v1, %v12829_v31  ;;  %v4127_v47 = vld [vmem:[%s15692_s11 + $0x30] sm:$0xff] }
 0x372   :  { %v11184_v38 = vpack.c.bf16 %v805_v63, %v804_v29  ;;  %v11187_v40 = vpack.c.bf16 %v807_v35, %v806_v0  ;;  %v812_v21 = vmul.f32 %v11730_v1, %v12832_v46  ;;  %v813_v50 = vmul.f32 %v11730_v1, %v12840_v52 }
 0x373   :  { %4159 = vperm.xlu1 %11692, %v4125_v15   ;;  %v11190_v58 = vpack.c.bf16 %v809_v37, %v808_v41  ;;  %v11193_v19 = vpack.c.bf16 %v811_v53, %v810_v23  ;;  %v814_v56 = vmul.f32 %v11730_v1, %v12843_v33  ;;  %v815_v4 = vmul.f32 %v11730_v1, %v11720_v54  ;;  %v12907_v15 = vpop.trf.xlu0  ;;  %v12912_v33 = vpop.trf.xlu1  ;;  %v4133_v54 = vld [vmem:[%s15692_s11 + $0x60] sm:$0xff]  ;;  %v4464_v23 = vld [vmem:[%s15693_s13 + $0x10] sm:$0xff]  ;;  %v3837_v53 = vld [vmem:[%s15689_s7 + $0x8] sm:$0xff] }
 0x374   :  { %11185 = vmatpush3.bf16.msra.mxu1 %v11184_v38  ;;  %v11196_v25 = vpack.c.bf16 %v813_v50, %v812_v21  ;;  %v816_v31 = vmul.f32 %v11730_v1, %v11722_v2  ;;  %v817_v29 = vmul.f32 %v11730_v1, %v11724_v60  ;;  %v818_v63 = vmul.f32 %v11730_v1, %v11726_v44  ;;  %v4129_v38 = vld [vmem:[%s15692_s11 + $0x40] sm:$0xff]  ;;  %v4135_v60 = vld [vmem:[%s15692_s11 + $0x70] sm:$0xff] }
 0x375   :  { %v15770_v46 = vmov 0.0|0.0   ;;  %v11199_v52 = vpack.c.bf16 %v815_v4, %v814_v56  ;;  %v819_v0 = vmul.f32 %v11730_v1, %v11728_v43  ;;  %15771 = vst [vmem:[#allocation40_spill] sm:$0xff] %v12912_v33  ;;  %v4131_v56 = vld [vmem:[%s15692_s11 + $0x50] sm:$0xff]  ;;  %v4462_v43 = vld [vmem:[%s15693_s13] sm:$0xff]  ;;  %v449_v4 = vadd.f32 %v12572_v62, %v12606_v11  ;;  %v4126_v62 = vld [vmem:[%s15692_s11 + $0x28] sm:$0xff] }
 0x376   :  { %11186 = vmatprep.subr.bf16.mxu1 %v15770_v46  ;;  %v11202_v35 = vpack.c.bf16 %v817_v29, %v816_v31 }
 0x377   :  { %4169 = vperm.xlu1 %11692, %v4127_v47   ;;  %v11205_v41 = vpack.c.bf16 %v819_v0, %v818_v63  ;;  %v12918_v50 = vpop.trf.xlu0  ;;  %v12921_v21 = vpop.trf.xlu1  ;;  %v4128_v63 = vld [vmem:[%s15692_s11 + $0x38] sm:$0xff]  ;;  %v4130_v0 = vld [vmem:[%s15692_s11 + $0x48] sm:$0xff] }
 0x378   :  { %11188 = vmatpush3.bf16.msra.mxu1 %v11187_v40  ;;  %15772 = vst [vmem:[#allocation41_spill] sm:$0xff] %v12921_v21  ;;  %v407_v40 = vadd.f32 %v12542_v42, %v12608_v13  ;;  %v9411_v42 = vld [vmem:[%s15731_s23 + $0x20] sm:$0xff] }
 0x379   :  { %11189 = vmatprep.subr.bf16.mxu1 %v15770_v46 }
 0x37b   :  { %4179 = vperm.xlu1 %11692, %v4129_v38   ;;  %v12927_v2 = vpop.trf.xlu0  ;;  %v12932_v44 = vpop.trf.xlu1 }
 0x37c   :  { %11191 = vmatpush3.bf16.msra.mxu1 %v11190_v58  ;;  %15773 = vst [vmem:[#allocation42_spill] sm:$0xff] %v12932_v44 }
 0x37d   :  { %11192 = vmatprep.subr.bf16.mxu1 %v15770_v46 }
 0x37f   :  { %4189 = vperm.xlu1 %11692, %v4131_v56   ;;  %v12938_v37 = vpop.trf.xlu0  ;;  %v12941_v1 = vpop.trf.xlu1  ;;  %v9414_v56 = vld [vmem:[%s15731_s23 + $0x38] sm:$0xff] }
 0x380   :  { %11194 = vmatpush3.bf16.msra.mxu1 %v11193_v19  ;;  %15774 = vst [vmem:[#allocation43_spill] sm:$0xff] %v12941_v1  ;;  %v9407_v19 = vld [vmem:[%s15684_s2 + $0x20] sm:$0xff] }
 0x381   :  { %11195 = vmatprep.subr.bf16.mxu1 %v15770_v46 }
 0x383   :  { %4199 = vperm.xlu1 %11692, %v4133_v54   ;;  %v12952_v58 = vpop.trf.xlu0  ;;  %v12959_v47 = vpop.trf.xlu1 }
 0x384   :  { %11197 = vmatpush3.bf16.msra.mxu1 %v11196_v25  ;;  %15775 = vst [vmem:[#allocation44_spill] sm:$0xff] %v12959_v47  ;;  %v4124_v25 = vld [vmem:[%s15692_s11 + $0x18] sm:$0xff] }
 0x385   :  { %11198 = vmatprep.subr.bf16.mxu1 %v15770_v46 }
 0x387   :  { %4209 = vperm.xlu1 %11692, %v4135_v60   ;;  %v12969_v31 = vpop.trf.xlu0  ;;  %v12975_v29 = vpop.trf.xlu1  ;;  %v9427_v60 = vld [vmem:[%s15685_s5 + $0x60] sm:$0xff] }
 0x388   :  { %11200 = vmatpush3.bf16.msra.mxu1 %v11199_v52  ;;  %15776 = vst [vmem:[#allocation45_spill] sm:$0xff] %v12975_v29 }
 0x389   :  { %11201 = vmatprep.subr.bf16.mxu1 %v15770_v46 }
 0x38b   :  { %4468 = vperm.xlu1 %11692, %v4462_v43   ;;  %v12987_v52 = vpop.trf.xlu0  ;;  %v9432_v43 = vld [vmem:[%s15685_s5 + $0x88] sm:$0xff] }
 0x38c   :  { %11203 = vmatpush3.bf16.msra.mxu1 %v11202_v35  ;;  %v4132_v35 = vld [vmem:[%s15692_s11 + $0x58] sm:$0xff] }
 0x38d   :  { %11204 = vmatprep.subr.bf16.mxu1 %v15770_v46 }
 0x38f   :  { %4478 = vperm.xlu1 %11692, %v4464_v23   ;;  %3847 = vperm.xlu0 %11691, %v3837_v53   ;;  %v9435_v53 = vld [vmem:[%s15685_s5 + $0xa0] sm:$0xff] }
 0x390   :  { %11206 = vmatpush3.bf16.msra.mxu1 %v11205_v41 }
 0x391   :  { %10260 = vmatprep.subr.mxu1 %v407_v40 }
 0x393   :  { %10258 = vmatmul.mubr.f32.vlgmr.msra.gmra.mrb[16].mxu1 %v449_v4  ;;  %4667 = vperm.xlu1 %11692, %v9407_v19   ;;  %v9428_v19 = vld [vmem:[%s15685_s5 + $0x68] sm:$0xff] }
 0x394   :  { %10261 = vmatpush3.msra.mxu1 %v407_v40  ;;  %10262 = vmatprep.mubr.msk.f32.mxu1 %vm503_vm1, %v12611_v16  ;;  %v9409_v16 = vld [vmem:[%s15684_s2 + $0x30] sm:$0xff] }
 0x395   :  { %4154 = vperm.xlu0 %11691, %v4124_v25   ;;  %11231 = vmatprep.subr.bf16.mxu1 %v15770_v46 }
 0x397   :  { %10263 = vmatmul.mubr.msk.f32.vlgmr.msra.gmra.mrb[18].mxu1 %vm503_vm1, %v12614_v18  ;;  %4695 = vperm.xlu1 %11692, %v9411_v42   ;;  %v9413_v18 = vld [vmem:[%s15731_s23 + $0x30] sm:$0xff] }
 0x398   :  { %10265 = vmatprep.mubr.msk.f32.mxu1 %vm503_vm1, %v12617_v20  ;;  %v12996_v20 = vpop.trf.xlu1 }
 0x399   :  { %4164 = vperm.xlu0 %11691, %v4126_v62   ;;  %15777 = vst [vmem:[#allocation46_spill] sm:$0xff] %v12996_v20 }
 0x39b   :  { %10266 = vmatmul.mubr.msk.f32.gmra.mrb[20].mxu1 %vm503_vm1, %v12620_v22  ;;  %4677 = vperm.xlu1 %11692, %v9409_v16   ;;  %v9431_v22 = vld [vmem:[%s15685_s5 + $0x80] sm:$0xff] }
 0x39c   :  { %10268 = vmatprep.mubr.msk.f32.mxu1 %vm503_vm1, %v12624_v26  ;;  %v13008_v26 = vpop.trf.xlu0  ;;  %v13013_v41 = vpop.trf.xlu1 }
 0x39d   :  { %4174 = vperm.xlu0 %11691, %v4128_v63   ;;  %15778 = vst [vmem:[#allocation47_spill] sm:$0xff] %v13013_v41 }
 0x39f   :  { %10269 = vmatmul.mubr.msk.f32.gmra.mrb[22].mxu1 %vm503_vm1, %v12627_v30  ;;  %4705 = vperm.xlu1 %11692, %v9413_v18   ;;  %v4134_v30 = vld [vmem:[%s15692_s11 + $0x68] sm:$0xff] }
 0x3a0   :  { %10271 = vmatprep.mubr.msk.f32.mxu1 %vm503_vm1, %v12631_v34  ;;  %v13022_v34 = vpop.trf.xlu0 }
 0x3a1   :  { %4184 = vperm.xlu0 %11691, %v4130_v0  }
 0x3a3   :  { %10272 = vmatmul.mubr.msk.f32.gmra.mrb[24].mxu1 %vm503_vm1, %v12634_v36  ;;  %4769 = vperm.xlu1 %11692, %v9431_v22   ;;  %v4136_v36 = vld [vmem:[%s15692_s11 + $0x78] sm:$0xff] }
 0x3a4   :  { %10274 = vmatprep.mubr.msk.f32.mxu1 %vm503_vm1, %v12638_v51  ;;  %v13035_v51 = vpop.trf.xlu0 }
 0x3a5   :  { %4194 = vperm.xlu0 %11691, %v4132_v35  }
 0x3a7   :  { %10275 = vmatmul.mubr.msk.f32.gmra.mrb[26].mxu1 %vm503_vm1, %v12641_v55  ;;  %v4463_v55 = vld [vmem:[%s15693_s13 + $0x8] sm:$0xff] }
 0x3a8   :  { %10277 = vmatprep.mubr.msk.f32.mxu1 %vm503_vm1, %v12645_v3  ;;  %v4465_v3 = vld [vmem:[%s15693_s13 + $0x18] sm:$0xff] }
 0x3a9   :  { %4204 = vperm.xlu0 %11691, %v4134_v30  }
 0x3ab   :  { %10278 = vmatmul.mubr.msk.f32.gmra.mrb[28].mxu1 %vm503_vm1, %v12648_v5  ;;  %v13047_v5 = vpop.trf.xlu0 }
 0x3ac   :  { %10280 = vmatprep.mubr.msk.f32.mxu1 %vm503_vm1, %v12650_v8  ;;  %v9408_v8 = vld [vmem:[%s15684_s2 + $0x28] sm:$0xff] }
 0x3ad   :  { %4214 = vperm.xlu0 %11691, %v4136_v36  }
 0x3af   :  { %10281 = vmatmul.mubr.msk.f32.gmra.mrb[30].mxu1 %vm503_vm1, %v12652_v9  ;;  %v13056_v9 = vpop.trf.xlu0 }
 0x3b0   :  { %10283 = vmatprep.mubr.msk.f32.mxu1 %vm503_vm1, %v12654_v10  ;;  %v9412_v10 = vld [vmem:[%s15731_s23 + $0x28] sm:$0xff] }
 0x3b1   :  { %4473 = vperm.xlu0 %11691, %v4463_v55  }
 0x3b3   :  { %10284 = vmatmul.mubr.msk.f32.gmra.mrb[32].mxu1 %vm503_vm1, %v12656_v14  ;;  %v9410_v14 = vld [vmem:[%s15684_s2 + $0x38] sm:$0xff]  ;;  %v13064_v38 = vpop.trf.xlu0 }
 0x3b4   :  { %10379 = vmatprep.mubr.msk.f32.mxu1 %vm12260_vm2, %v15752_v24 }
 0x3b5   :  { %4483 = vperm.xlu0 %11691, %v4465_v3  }
 0x3b7   :  { %v13069_v54 = vpop.trf.xlu0 }
 0x3b9   :  { %4672 = vperm.xlu0 %11691, %v9408_v8  }
 0x3bb   :  { %v13077_v23 = vpop.trf.xlu0 }
 0x3bd   :  { %4700 = vperm.xlu0 %11691, %v9412_v10  }
 0x3bf   :  { %v13082_v40 = vpop.permute.xlu0 %294 }
 0x3c0   :  { %15779 = vst [vmem:[#allocation48_spill] sm:$0xff] %v13082_v40 }
 0x3c1   :  { %4682 = vperm.xlu0 %11691, %v9410_v14  }
 0x3c3   :  { %v13087_v4 = vpop.trf.xlu0 }
 0x3c4   :  { %15780 = vst [vmem:[#allocation49_spill] sm:$0xff] %v13087_v4 }
 0x3c5   :  { %4710 = vperm.xlu0 %11691, %v9414_v56  }
 0x3c9   :  { %4749 = vperm.xlu0 %11691, %v9427_v60  }
 0x3cd   :  { %4774 = vperm.xlu0 %11691, %v9432_v43  }
 0x3d1   :  { %4789 = vperm.xlu0 %11691, %v9435_v53  }
 0x3d5   :  { %4754 = vperm.xlu0 %11691, %v9428_v19  }
 0x466   :  { %v13089_v25 = vpop.f32.mrb[16].mxu1 }
 0x467   :  { %v10259_v42 = vpop.f32.mrb[17].mxu1 }
 0x46a   :  { %v10264_v62 = vpop.f32.mrb[18].mxu1 }
 0x46b   :  { %v1037_v16 = vpop.f32.mrb[19].mxu1  ;;  %v13091_v22 = vmul.f32 0.35355338, %v10264_v62 }
 0x46c   :  { %v1116_v36 = vmul.f32 0.35355338, %v1037_v16 }
 0x46e   :  { %v10267_v63 = vpop.f32.mrb[20].mxu1 }
 0x46f   :  { %v1047_v18 = vpop.f32.mrb[21].mxu1  ;;  %v1119_v14 = vmul.f32 0.35355338, %v10267_v63 }
 0x470   :  { %v1118_v43 = vmul.f32 0.35355338, %v1047_v18 }
 0x472   :  { %v10270_v0 = vpop.f32.mrb[22].mxu1 }
 0x473   :  { %v13093_v35 = vmul.f32 0.35355338, %v10270_v0  ;;  %v1057_v30 = vpop.f32.mrb[23].mxu1 }
 0x474   :  { %v13095_v55 = vmul.f32 0.35355338, %v1057_v30 }
 0x475   :  { %v1133_v3 = vmax.f32 %v13091_v22, %v13093_v35 }
 0x476   :  { %v1132_v8 = vmax.f32 %v1116_v36, %v13095_v55  ;;  %v10273_v10 = vpop.f32.mrb[24].mxu1 }
 0x477   :  { %v13100_v56 = vmul.f32 0.35355338, %v10273_v10  ;;  %v1067_v60 = vpop.f32.mrb[25].mxu1 }
 0x478   :  { %v13102_v53 = vmul.f32 0.35355338, %v1067_v60 }
 0x479   :  { %v1135_v19 = vmax.f32 %v1119_v14, %v13100_v56 }
 0x47a   :  { %v1134_v42 = vmax.f32 %v1118_v43, %v13102_v53  ;;  %v10276_v62 = vpop.f32.mrb[26].mxu1 }
 0x47b   :  { %v13106_v16 = vmul.f32 0.35355338, %v10276_v62  ;;  %v1077_v0 = vpop.f32.mrb[27].mxu1 }
 0x47c   :  { %v13108_v30 = vmul.f32 0.35355338, %v1077_v0 }
 0x47d   :  { %v1137_v4 = vmax.f32 %v1133_v3, %v13106_v16 }
 0x47e   :  { %v1136_v63 = vmax.f32 %v1132_v8, %v13108_v30  ;;  %v10279_v10 = vpop.f32.mrb[28].mxu1 }
 0x47f   :  { %v13112_v11 = vmul.f32 0.35355338, %v10279_v10  ;;  %v1087_v18 = vpop.f32.mrb[29].mxu1 }
 0x480   :  { %v13114_v60 = vmul.f32 0.35355338, %v1087_v18 }
 0x481   :  { %v1139_v13 = vmax.f32 %v1135_v19, %v13112_v11 }
 0x482   :  { %v1138_v41 = vmax.f32 %v1134_v42, %v13114_v60  ;;  %v10282_v20 = vpop.f32.mrb[30].mxu1 }
 0x483   :  { %v13118_v62 = vmul.f32 0.35355338, %v10282_v20  ;;  %v1097_v29 = vpop.f32.mrb[31].mxu1 }
 0x484   :  { %v13120_v0 = vmul.f32 0.35355338, %v1097_v29 }
 0x485   :  { %v1141_v3 = vmax.f32 %v1137_v4, %v13118_v62 }
 0x486   :  { %v1140_v8 = vmax.f32 %v1136_v63, %v13120_v0  ;;  %v10285_v47 = vpop.f32.mrb[32].mxu1 }
 0x487   :  { %v13124_v10 = vmul.f32 0.35355338, %v10285_v47  ;;  %v1107_v1 = vpop.f32.mrb[33].mxu1 }
 0x488   :  { %v1144_v18 = vmax.f32 %v1140_v8, %v1141_v3  ;;  %v13126_v44 = vmul.f32 0.35355338, %v1107_v1 }
 0x489   :  { %v1143_v19 = vmax.f32 %v1139_v13, %v13124_v10 }
 0x48a   :  { %v1142_v42 = vmax.f32 %v1138_v41, %v13126_v44 }
 0x48c   :  { %v1145_v20 = vmax.f32 %v1142_v42, %v1143_v19 }
 0x48e   :  { %v1146_v21 = vmax.f32 %v1144_v18, %v1145_v20 }
 0x490   :  { %v1147_v33 = vrot.slane %v1146_v21, 4 }
 0x492   :  { %v1148_v29 = vmax.f32 %v1146_v21, %v1147_v33 }
 0x494   :  { %v1149_v32 = vrot.slane %v1148_v29, 2 }
 0x496   :  { %v1150_v40 = vmax.f32 %v1148_v29, %v1149_v32 }
 0x498   :  { %v1151_v4 = vrot.slane %v1150_v40, 1 }
 0x49a   :  { %v1152_v61 = vmax.f32 %v1150_v40, %v1151_v4 }
 0x49c   :  { %v1153_v63 = vsub.f32 %v1116_v36, %v1152_v61  ;;  %v1154_v47 = vsub.f32 %v13091_v22, %v1152_v61  ;;  %v1155_v49 = vsub.f32 %v1118_v43, %v1152_v61  ;;  %v1156_v57 = vsub.f32 %v1119_v14, %v1152_v61 }
 0x49d   :  { %v1157_v1 = vsub.f32 %v13095_v55, %v1152_v61  ;;  %v1158_v3 = vsub.f32 %v13093_v35, %v1152_v61  ;;  %v1159_v13 = vsub.f32 %v13102_v53, %v1152_v61  ;;  %v1160_v41 = vsub.f32 %v13100_v56, %v1152_v61 }
 0x49e   :  { %v1161_v8 = vsub.f32 %v13108_v30, %v1152_v61  ;;  %v1162_v33 = vsub.f32 %v13106_v16, %v1152_v61  ;;  %v1163_v32 = vsub.f32 %v13114_v60, %v1152_v61  ;;  %v1164_v21 = vsub.f32 %v13112_v11, %v1152_v61 }
 0x49f   :  { %v1165_v40 = vsub.f32 %v13120_v0, %v1152_v61  ;;  %v1166_v22 = vsub.f32 %v13118_v62, %v1152_v61  ;;  %v1167_v36 = vsub.f32 %v13126_v44, %v1152_v61  ;;  %v1168_v35 = vsub.f32 %v13124_v10, %v1152_v61 }
 0x4a0   :  { %v1169_v55 = vmul.f32 1.442695, %v1153_v63  ;;  %v1171_v14 = vmul.f32 1.442695, %v1154_v47  ;;  %v1173_v43 = vmul.f32 1.442695, %v1155_v49 }
 0x4a1   :  { %v1175_v56 = vmul.f32 1.442695, %v1156_v57  ;;  %v1177_v53 = vmul.f32 1.442695, %v1157_v1  ;;  %v1179_v16 = vmul.f32 1.442695, %v1158_v3 }
 0x4a2   :  { %11731 = vpow2.f32 %v1169_v55  ;;  %v1181_v11 = vmul.f32 1.442695, %v1159_v13  ;;  %v1183_v30 = vmul.f32 1.442695, %v1160_v41  ;;  %v1185_v44 = vmul.f32 1.442695, %v1161_v8 }
 0x4a3   :  { %11733 = vpow2.f32 %v1171_v14  ;;  %v1187_v10 = vmul.f32 1.442695, %v1162_v33  ;;  %v1189_v57 = vmul.f32 1.442695, %v1163_v32  ;;  %v1191_v20 = vmul.f32 1.442695, %v1164_v21 }
 0x4a4   :  { %11735 = vpow2.f32 %v1173_v43  ;;  %v1193_v63 = vmul.f32 1.442695, %v1165_v40  ;;  %v1195_v3 = vmul.f32 1.442695, %v1166_v22  ;;  %v1197_v8 = vmul.f32 1.442695, %v1167_v36 }
 0x4a5   :  { %11737 = vpow2.f32 %v1175_v56  ;;  %v1199_v32 = vmul.f32 1.442695, %v1168_v35 }
 0x4a6   :  { %11739 = vpow2.f32 %v1177_v53 }
 0x4a7   :  { %11741 = vpow2.f32 %v1179_v16 }
 0x4a8   :  { %11743 = vpow2.f32 %v1181_v11 }
 0x4a9   :  { %11745 = vpow2.f32 %v1183_v30 }
 0x4aa   :  { %11747 = vpow2.f32 %v1185_v44 }
 0x4ab   :  { %11749 = vpow2.f32 %v1187_v10 }
 0x4ac   :  { %v11732_v60 = vpop.eup %11731  ;;  %11751 = vpow2.f32 %v1189_v57 }
 0x4ad   :  { %v11734_v62 = vpop.eup %11733  ;;  %11753 = vpow2.f32 %v1191_v20 }
 0x4ae   :  { %v1201_v0 = vadd.f32 %v11734_v62, %v11732_v60  ;;  %v11736_v61 = vpop.eup %11735  ;;  %11755 = vpow2.f32 %v1193_v63 }
 0x4af   :  { %v11738_v18 = vpop.eup %11737  ;;  %11757 = vpow2.f32 %v1195_v3 }
 0x4b0   :  { %v1202_v49 = vadd.f32 %v11736_v61, %v1201_v0  ;;  %v11740_v42 = vpop.eup %11739  ;;  %11759 = vpow2.f32 %v1197_v8 }
 0x4b1   :  { %v11742_v4 = vpop.eup %11741  ;;  %11761 = vpow2.f32 %v1199_v32 }
 0x4b2   :  { %v1203_v19 = vadd.f32 %v11738_v18, %v1202_v49  ;;  %v11744_v1 = vpop.eup %11743 }
 0x4b3   :  { %v11746_v41 = vpop.eup %11745 }
 0x4b4   :  { %v1204_v29 = vadd.f32 %v11740_v42, %v1203_v19  ;;  %v11748_v55 = vpop.eup %11747 }
 0x4b5   :  { %v11750_v43 = vpop.eup %11749 }
 0x4b6   :  { %v1205_v47 = vadd.f32 %v11742_v4, %v1204_v29  ;;  %v11752_v56 = vpop.eup %11751 }
 0x4b7   :  { %v11754_v40 = vpop.eup %11753 }
 0x4b8   :  { %v1206_v13 = vadd.f32 %v11744_v1, %v1205_v47  ;;  %v11756_v11 = vpop.eup %11755 }
 0x4b9   :  { %v11758_v22 = vpop.eup %11757 }
 0x4ba   :  { %v1207_v33 = vadd.f32 %v11746_v41, %v1206_v13  ;;  %v11760_v0 = vpop.eup %11759 }
 0x4bb   :  { %v11762_v36 = vpop.eup %11761 }
 0x4bc   :  { %v1208_v14 = vadd.f32 %v11748_v55, %v1207_v33 }
 0x4be   :  { %v1209_v21 = vadd.f32 %v11750_v43, %v1208_v14 }
 0x4c0   :  { %v1210_v53 = vadd.f32 %v11752_v56, %v1209_v21 }
 0x4c2   :  { %v1211_v16 = vadd.f32 %v11754_v40, %v1210_v53 }
 0x4c4   :  { %v1212_v30 = vadd.f32 %v11756_v11, %v1211_v16 }
 0x4c6   :  { %v1213_v44 = vadd.f32 %v11758_v22, %v1212_v30 }
 0x4c8   :  { %v1214_v10 = vadd.f32 %v11760_v0, %v1213_v44 }
 0x4ca   :  { %v1215_v49 = vadd.f32 %v11762_v36, %v1214_v10 }
 0x4cc   :  { %v1216_v57 = vrot.slane %v1215_v49, 4 }
 0x4ce   :  { %v1217_v19 = vadd.f32 %v1216_v57, %v1215_v49 }
 0x4d0   :  { %v1218_v35 = vrot.slane %v1217_v19, 2 }
 0x4d2   :  { %v1219_v20 = vadd.f32 %v1218_v35, %v1217_v19 }
 0x4d4   :  { %v1220_v29 = vrot.slane %v1219_v20, 1 }
 0x4d6   :  { %v1221_v63 = vadd.f32 %v1220_v29, %v1219_v20 }
 0x4d8   :  { %11763 = vrcp.f32 %v1221_v63 }
 0x4e2   :  { %v11764_v47 = vpop.eup %11763 }
 0x4e3   :  { %v1223_v3 = vmul.f32 %v11764_v47, %v11732_v60  ;;  %v1224_v13 = vmul.f32 %v11764_v47, %v11734_v62  ;;  %v1225_v8 = vmul.f32 %v11764_v47, %v11736_v61  ;;  %v1226_v33 = vmul.f32 %v11764_v47, %v11738_v18 }
 0x4e4   :  { %v1227_v32 = vmul.f32 %v11764_v47, %v11740_v42  ;;  %v1228_v14 = vmul.f32 %v11764_v47, %v11742_v4  ;;  %v1229_v21 = vmul.f32 %v11764_v47, %v11744_v1  ;;  %v1230_v53 = vmul.f32 %v11764_v47, %v11746_v41 }
 0x4e5   :  { %v11208_v16 = vpack.c.bf16 %v1224_v13, %v1223_v3  ;;  %v11211_v30 = vpack.c.bf16 %v1226_v33, %v1225_v8  ;;  %v1231_v44 = vmul.f32 %v11764_v47, %v11748_v55  ;;  %v1232_v10 = vmul.f32 %v11764_v47, %v11750_v43 }
 0x4e6   :  { %v11214_v39 = vpack.c.bf16 %v1228_v14, %v1227_v32  ;;  %v11217_v49 = vpack.c.bf16 %v1230_v53, %v1229_v21  ;;  %v1233_v57 = vmul.f32 %v11764_v47, %v11752_v56  ;;  %v1234_v19 = vmul.f32 %v11764_v47, %v11754_v40 }
 0x4e7   :  { %11209 = vmatpush3.bf16.msra.mxu0 %v11208_v16  ;;  %v11220_v35 = vpack.c.bf16 %v1232_v10, %v1231_v44  ;;  %v1235_v20 = vmul.f32 %v11764_v47, %v11756_v11  ;;  %v1236_v29 = vmul.f32 %v11764_v47, %v11758_v22  ;;  %v1237_v60 = vmul.f32 %v11764_v47, %v11760_v0 }
 0x4e8   :  { %11210 = vmatprep.subr.bf16.mxu0 %v15770_v46  ;;  %v11223_v62 = vpack.c.bf16 %v1234_v19, %v1233_v57  ;;  %v1238_v61 = vmul.f32 %v11764_v47, %v11762_v36  ;;  %v413_v4 = vadd.f32 %v12546_v45, %v12759_v7 }
 0x4e9   :  { %v11226_v18 = vpack.c.bf16 %v1236_v29, %v1235_v20 }
 0x4ea   :  { %v11229_v42 = vpack.c.bf16 %v1238_v61, %v1237_v60 }
 0x4eb   :  { %11212 = vmatpush3.bf16.msra.mxu0 %v11211_v30 }
 0x4ec   :  { %11213 = vmatprep.subr.bf16.mxu0 %v15770_v46 }
 0x4ef   :  { %11215 = vmatpush3.bf16.msra.mxu0 %v11214_v39 }
 0x4f0   :  { %11216 = vmatprep.subr.bf16.mxu0 %v15770_v46 }
 0x4f3   :  { %11218 = vmatpush3.bf16.msra.mxu0 %v11217_v49 }
 0x4f4   :  { %11219 = vmatprep.subr.bf16.mxu0 %v15770_v46 }
 0x4f7   :  { %11221 = vmatpush3.bf16.msra.mxu0 %v11220_v35 }
 0x4f8   :  { %11222 = vmatprep.subr.bf16.mxu0 %v15770_v46 }
 0x4fb   :  { %11224 = vmatpush3.bf16.msra.mxu0 %v11223_v62 }
 0x4fc   :  { %11225 = vmatprep.subr.bf16.mxu0 %v15770_v46 }
 0x4ff   :  { %11227 = vmatpush3.bf16.msra.mxu0 %v11226_v18 }
 0x500   :  { %11228 = vmatprep.subr.bf16.mxu0 %v15770_v46 }
 0x503   :  { %11230 = vmatpush3.bf16.msra.mxu0 %v11229_v42 }
 0x504   :  { %10321 = vmatprep.subr.mxu0 %v413_v4 }
 0x506   :  { %10319 = vmatmul.mubr.f32.vlgmr.msra.gmra.mrb[24].mxu0 %v12659_v17 }
 0x507   :  { %10322 = vmatpush3.msra.mxu0 %v413_v4  ;;  %10323 = vmatprep.mubr.msk.f32.mxu0 %vm503_vm1, %v12892_v12 }
 0x508   :  { %11255 = vmatprep.subr.bf16.mxu0 %v15770_v46 }
 0x50a   :  { %10324 = vmatmul.mubr.msk.f32.vlgmr.msra.gmra.mrb[26].mxu0 %vm503_vm1, %v12907_v15 }
 0x50b   :  { %10326 = vmatprep.mubr.msk.f32.mxu0 %vm503_vm1, %v12918_v50 }
 0x50e   :  { %10327 = vmatmul.mubr.msk.f32.gmra.mrb[28].mxu0 %vm503_vm1, %v12927_v2 }
 0x50f   :  { %10329 = vmatprep.mubr.msk.f32.mxu0 %vm503_vm1, %v12938_v37 }
 0x512   :  { %10330 = vmatmul.mubr.msk.f32.gmra.mrb[30].mxu0 %vm503_vm1, %v12952_v58 }
 0x513   :  { %10332 = vmatprep.mubr.msk.f32.mxu0 %vm503_vm1, %v12969_v31 }
 0x516   :  { %10333 = vmatmul.mubr.msk.f32.gmra.mrb[32].mxu0 %vm503_vm1, %v12987_v52 }
 0x517   :  { %10335 = vmatprep.mubr.msk.f32.mxu0 %vm503_vm1, %v13008_v26 }
 0x51a   :  { %10336 = vmatmul.mubr.msk.f32.gmra.mrb[34].mxu0 %vm503_vm1, %v13022_v34 }
 0x51b   :  { %10338 = vmatprep.mubr.msk.f32.mxu0 %vm503_vm1, %v13035_v51 }
 0x51e   :  { %10339 = vmatmul.mubr.msk.f32.gmra.mrb[36].mxu0 %vm503_vm1, %v13047_v5 }
 0x51f   :  { %10341 = vmatprep.mubr.msk.f32.mxu0 %vm503_vm1, %v13056_v9 }
 0x522   :  { %10342 = vmatmul.mubr.msk.f32.gmra.mrb[38].mxu0 %vm503_vm1, %v13064_v38 }
 0x523   :  { %10344 = vmatprep.mubr.msk.f32.mxu0 %vm503_vm1, %v13069_v54 }
 0x526   :  { %10345 = vmatmul.mubr.msk.f32.gmra.mrb[40].mxu0 %vm503_vm1, %v13077_v23 }
 0x527   :  { %10440 = vmatprep.mubr.msk.f32.mxu0 %vm12260_vm2, %v15752_v24 }
 0x5d9   :  { %v13188_v45 = vpop.f32.mrb[24].mxu0 }
 0x5da   :  { %v11377_v17 = vpack.c.bf16 %v13188_v45, %v13089_v25  ;;  %v10320_v39 = vpop.f32.mrb[25].mxu0  ;;  %v3825_v25 = vld [vmem:[%s15694_s6 + $0x8] sm:$0xff]  ;;  %v3826_v45 = vld [vmem:[%s15694_s6 + $0x10] sm:$0xff] }
 0x5dd   :  { %v10325_v12 = vpop.f32.mrb[26].mxu0 }
 0x5de   :  { %v1456_v15 = vpop.f32.mrb[27].mxu0  ;;  %v13192_v58 = vmul.f32 0.35355338, %v10325_v12 }
 0x5df   :  { %v1535_v26 = vmul.f32 0.35355338, %v1456_v15 }
 0x5e1   :  { %v10328_v50 = vpop.f32.mrb[28].mxu0 }
 0x5e2   :  { %v1466_v2 = vpop.f32.mrb[29].mxu0  ;;  %v1538_v38 = vmul.f32 0.35355338, %v10328_v50 }
 0x5e3   :  { %v1537_v1 = vmul.f32 0.35355338, %v1466_v2 }
 0x5e5   :  { %v10331_v37 = vpop.f32.mrb[30].mxu0 }
 0x5e6   :  { %v13194_v31 = vmul.f32 0.35355338, %v10331_v37  ;;  %v1476_v52 = vpop.f32.mrb[31].mxu0 }
 0x5e7   :  { %v13196_v34 = vmul.f32 0.35355338, %v1476_v52 }
 0x5e8   :  { %v1552_v51 = vmax.f32 %v13192_v58, %v13194_v31 }
 0x5e9   :  { %v1551_v5 = vmax.f32 %v1535_v26, %v13196_v34  ;;  %v10334_v9 = vpop.f32.mrb[32].mxu0 }
 0x5ea   :  { %v13201_v54 = vmul.f32 0.35355338, %v10334_v9  ;;  %v1486_v23 = vpop.f32.mrb[33].mxu0 }
 0x5eb   :  { %v13203_v41 = vmul.f32 0.35355338, %v1486_v23 }
 0x5ec   :  { %v1554_v55 = vmax.f32 %v1538_v38, %v13201_v54 }
 0x5ed   :  { %v1553_v43 = vmax.f32 %v1537_v1, %v13203_v41  ;;  %v10337_v56 = vpop.f32.mrb[34].mxu0 }
 0x5ee   :  { %v13207_v40 = vmul.f32 0.35355338, %v10337_v56  ;;  %v1496_v11 = vpop.f32.mrb[35].mxu0 }
 0x5ef   :  { %v13209_v22 = vmul.f32 0.35355338, %v1496_v11 }
 0x5f0   :  { %v1556_v0 = vmax.f32 %v1552_v51, %v13207_v40 }
 0x5f1   :  { %v1555_v36 = vmax.f32 %v1551_v5, %v13209_v22  ;;  %v10340_v63 = vpop.f32.mrb[36].mxu0 }
 0x5f2   :  { %v13213_v47 = vmul.f32 0.35355338, %v10340_v63  ;;  %v1506_v3 = vpop.f32.mrb[37].mxu0 }
 0x5f3   :  { %v13215_v13 = vmul.f32 0.35355338, %v1506_v3 }
 0x5f4   :  { %v1558_v8 = vmax.f32 %v1554_v55, %v13213_v47 }
 0x5f5   :  { %v1557_v33 = vmax.f32 %v1553_v43, %v13215_v13  ;;  %v10343_v32 = vpop.f32.mrb[38].mxu0 }
 0x5f6   :  { %v13219_v14 = vmul.f32 0.35355338, %v10343_v32  ;;  %v1516_v21 = vpop.f32.mrb[39].mxu0 }
 0x5f7   :  { %v13221_v53 = vmul.f32 0.35355338, %v1516_v21 }
 0x5f8   :  { %v1560_v16 = vmax.f32 %v1556_v0, %v13219_v14 }
 0x5f9   :  { %v1559_v30 = vmax.f32 %v1555_v36, %v13221_v53  ;;  %v10346_v44 = vpop.f32.mrb[40].mxu0 }
 0x5fa   :  { %v13225_v10 = vmul.f32 0.35355338, %v10346_v44  ;;  %v1526_v49 = vpop.f32.mrb[41].mxu0 }
 0x5fb   :  { %v1563_v57 = vmax.f32 %v1559_v30, %v1560_v16  ;;  %v13227_v19 = vmul.f32 0.35355338, %v1526_v49 }
 0x5fc   :  { %v1562_v35 = vmax.f32 %v1558_v8, %v13225_v10 }
 0x5fd   :  { %v1561_v20 = vmax.f32 %v1557_v33, %v13227_v19 }
 0x5ff   :  { %v1564_v29 = vmax.f32 %v1561_v20, %v1562_v35 }
 0x601   :  { %v1565_v60 = vmax.f32 %v1563_v57, %v1564_v29 }
 0x603   :  { %v1566_v62 = vrot.slane %v1565_v60, 4 }
 0x605   :  { %v1567_v61 = vmax.f32 %v1565_v60, %v1566_v62 }
 0x607   :  { %v1568_v18 = vrot.slane %v1567_v61, 2 }
 0x609   :  { %v1569_v42 = vmax.f32 %v1567_v61, %v1568_v18 }
 0x60b   :  { %v1570_v4 = vrot.slane %v1569_v42, 1 }
 0x60d   :  { %v1571_v39 = vmax.f32 %v1569_v42, %v1570_v4 }
 0x60f   :  { %v1572_v12 = vsub.f32 %v1535_v26, %v1571_v39  ;;  %v1573_v15 = vsub.f32 %v13192_v58, %v1571_v39  ;;  %v1574_v50 = vsub.f32 %v1537_v1, %v1571_v39  ;;  %v1575_v2 = vsub.f32 %v1538_v38, %v1571_v39 }
 0x610   :  { %v1576_v37 = vsub.f32 %v13196_v34, %v1571_v39  ;;  %v1577_v52 = vsub.f32 %v13194_v31, %v1571_v39  ;;  %v1578_v51 = vsub.f32 %v13203_v41, %v1571_v39  ;;  %v1579_v5 = vsub.f32 %v13201_v54, %v1571_v39 }
 0x611   :  { %v1580_v9 = vsub.f32 %v13209_v22, %v1571_v39  ;;  %v1581_v23 = vsub.f32 %v13207_v40, %v1571_v39  ;;  %v1582_v55 = vsub.f32 %v13215_v13, %v1571_v39  ;;  %v1583_v26 = vsub.f32 %v13213_v47, %v1571_v39 }
 0x612   :  { %v1584_v58 = vsub.f32 %v13221_v53, %v1571_v39  ;;  %v1585_v38 = vsub.f32 %v13219_v14, %v1571_v39  ;;  %v1586_v34 = vsub.f32 %v13227_v19, %v1571_v39  ;;  %v1587_v31 = vsub.f32 %v13225_v10, %v1571_v39 }
 0x613   :  { %v1588_v1 = vmul.f32 1.442695, %v1572_v12  ;;  %v1590_v41 = vmul.f32 1.442695, %v1573_v15  ;;  %v1592_v43 = vmul.f32 1.442695, %v1574_v50 }
 0x614   :  { %v1594_v54 = vmul.f32 1.442695, %v1575_v2  ;;  %v1596_v56 = vmul.f32 1.442695, %v1576_v37  ;;  %v1598_v40 = vmul.f32 1.442695, %v1577_v52 }
 0x615   :  { %11765 = vpow2.f32 %v1588_v1  ;;  %v1600_v11 = vmul.f32 1.442695, %v1578_v51  ;;  %v1602_v22 = vmul.f32 1.442695, %v1579_v5  ;;  %v1604_v63 = vmul.f32 1.442695, %v1580_v9 }
 0x616   :  { %11767 = vpow2.f32 %v1590_v41  ;;  %v1606_v13 = vmul.f32 1.442695, %v1581_v23  ;;  %v1608_v32 = vmul.f32 1.442695, %v1582_v55  ;;  %v1610_v53 = vmul.f32 1.442695, %v1583_v26 }
 0x617   :  { %11769 = vpow2.f32 %v1592_v43  ;;  %v1612_v44 = vmul.f32 1.442695, %v1584_v58  ;;  %v1614_v57 = vmul.f32 1.442695, %v1585_v38  ;;  %v1616_v20 = vmul.f32 1.442695, %v1586_v34 }
 0x618   :  { %11771 = vpow2.f32 %v1594_v54  ;;  %v1618_v62 = vmul.f32 1.442695, %v1587_v31 }
 0x619   :  { %11773 = vpow2.f32 %v1596_v56 }
 0x61a   :  { %11775 = vpow2.f32 %v1598_v40 }
 0x61b   :  { %11777 = vpow2.f32 %v1600_v11 }
 0x61c   :  { %11779 = vpow2.f32 %v1602_v22 }
 0x61d   :  { %11781 = vpow2.f32 %v1604_v63 }
 0x61e   :  { %11783 = vpow2.f32 %v1606_v13 }
 0x61f   :  { %v11766_v0 = vpop.eup %11765  ;;  %11785 = vpow2.f32 %v1608_v32 }
 0x620   :  { %v11768_v36 = vpop.eup %11767  ;;  %11787 = vpow2.f32 %v1610_v53 }
 0x621   :  { %v1620_v47 = vadd.f32 %v11768_v36, %v11766_v0  ;;  %v11770_v3 = vpop.eup %11769  ;;  %11789 = vpow2.f32 %v1612_v44 }
 0x622   :  { %v11772_v33 = vpop.eup %11771  ;;  %11791 = vpow2.f32 %v1614_v57 }
 0x623   :  { %v1621_v8 = vadd.f32 %v11770_v3, %v1620_v47  ;;  %v11774_v21 = vpop.eup %11773  ;;  %11793 = vpow2.f32 %v1616_v20  ;;  %v15782_v20 = vld [vmem:[#allocation24_spill] sm:$0xff] }
 0x624   :  { %v11776_v30 = vpop.eup %11775  ;;  %11795 = vpow2.f32 %v1618_v62  ;;  %v15788_v62 = vld [vmem:[#allocation30_spill] sm:$0xff] }
 0x625   :  { %v1622_v14 = vadd.f32 %v11772_v33, %v1621_v8  ;;  %v11778_v49 = vpop.eup %11777 }
 0x626   :  { %v11780_v35 = vpop.eup %11779 }
 0x627   :  { %v1623_v16 = vadd.f32 %v11774_v21, %v1622_v14  ;;  %v11782_v60 = vpop.eup %11781 }
 0x628   :  { %v11784_v18 = vpop.eup %11783 }
 0x629   :  { %v1624_v10 = vadd.f32 %v11776_v30, %v1623_v16  ;;  %v11786_v4 = vpop.eup %11785 }
 0x62a   :  { %v11788_v12 = vpop.eup %11787 }
 0x62b   :  { %v1625_v19 = vadd.f32 %v11778_v49, %v1624_v10  ;;  %v11790_v50 = vpop.eup %11789 }
 0x62c   :  { %v11792_v37 = vpop.eup %11791 }
 0x62d   :  { %v1626_v29 = vadd.f32 %v11780_v35, %v1625_v19  ;;  %v11794_v51 = vpop.eup %11793 }
 0x62e   :  { %v11796_v9 = vpop.eup %11795 }
 0x62f   :  { %v1627_v61 = vadd.f32 %v11782_v60, %v1626_v29  ;;  %v15783_v29 = vld [vmem:[#allocation25_spill] sm:$0xff] }
 0x631   :  { %v1628_v42 = vadd.f32 %v11784_v18, %v1627_v61  ;;  %v15789_v61 = vld [vmem:[#allocation31_spill] sm:$0xff] }
 0x633   :  { %v1629_v39 = vadd.f32 %v11786_v4, %v1628_v42  ;;  %v15791_v42 = vld [vmem:[#allocation33_spill] sm:$0xff] }
 0x635   :  { %v1630_v15 = vadd.f32 %v11788_v12, %v1629_v39  ;;  %v15793_v39 = vld [vmem:[#allocation35_spill] sm:$0xff] }
 0x637   :  { %v1631_v2 = vadd.f32 %v11790_v50, %v1630_v15  ;;  %v15795_v15 = vld [vmem:[#allocation37_spill] sm:$0xff] }
 0x639   :  { %v1632_v52 = vadd.f32 %v11792_v37, %v1631_v2 }
 0x63b   :  { %v1633_v5 = vadd.f32 %v11794_v51, %v1632_v52 }
 0x63d   :  { %v1634_v23 = vadd.f32 %v11796_v9, %v1633_v5 }
 0x63f   :  { %v1635_v55 = vrot.slane %v1634_v23, 4 }
 0x641   :  { %v1636_v26 = vadd.f32 %v1635_v55, %v1634_v23 }
 0x643   :  { %v1637_v58 = vrot.slane %v1636_v26, 2 }
 0x645   :  { %v1638_v38 = vadd.f32 %v1637_v58, %v1636_v26 }
 0x647   :  { %v1639_v34 = vrot.slane %v1638_v38, 1 }
 0x649   :  { %v1640_v31 = vadd.f32 %v1639_v34, %v1638_v38 }
 0x64b   :  { %11797 = vrcp.f32 %v1640_v31 }
 0x655   :  { %v11798_v1 = vpop.eup %11797 }
 0x656   :  { %v1642_v41 = vmul.f32 %v11798_v1, %v11766_v0  ;;  %v1643_v43 = vmul.f32 %v11798_v1, %v11768_v36  ;;  %v1644_v54 = vmul.f32 %v11798_v1, %v11770_v3  ;;  %v1645_v56 = vmul.f32 %v11798_v1, %v11772_v33 }
 0x657   :  { %v1646_v40 = vmul.f32 %v11798_v1, %v11774_v21  ;;  %v1647_v11 = vmul.f32 %v11798_v1, %v11776_v30  ;;  %v1648_v22 = vmul.f32 %v11798_v1, %v11778_v49  ;;  %v1649_v63 = vmul.f32 %v11798_v1, %v11780_v35  ;;  %v15781_v35 = vld [vmem:[#allocation23_spill] sm:$0xff] }
 0x658   :  { %v11232_v47 = vpack.c.bf16 %v1643_v43, %v1642_v41  ;;  %v11235_v13 = vpack.c.bf16 %v1645_v56, %v1644_v54  ;;  %v1650_v8 = vmul.f32 %v11798_v1, %v11782_v60  ;;  %v1651_v32 = vmul.f32 %v11798_v1, %v11784_v18  ;;  %v15786_v60 = vld [vmem:[#allocation28_spill] sm:$0xff] }
 0x659   :  { %v11238_v14 = vpack.c.bf16 %v1647_v11, %v1646_v40  ;;  %v11241_v53 = vpack.c.bf16 %v1649_v63, %v1648_v22  ;;  %v1652_v16 = vmul.f32 %v11798_v1, %v11786_v4  ;;  %v1653_v44 = vmul.f32 %v11798_v1, %v11788_v12  ;;  %v15790_v18 = vld [vmem:[#allocation32_spill] sm:$0xff]  ;;  %v15792_v4 = vld [vmem:[#allocation34_spill] sm:$0xff] }
 0x65a   :  { %11233 = vmatpush3.bf16.msra.mxu1 %v11232_v47  ;;  %v11244_v10 = vpack.c.bf16 %v1651_v32, %v1650_v8  ;;  %v1654_v57 = vmul.f32 %v11798_v1, %v11790_v50  ;;  %v1655_v19 = vmul.f32 %v11798_v1, %v11792_v37  ;;  %v1656_v0 = vmul.f32 %v11798_v1, %v11794_v51  ;;  %v15794_v12 = vld [vmem:[#allocation36_spill] sm:$0xff] }
 0x65b   :  { %11234 = vmatprep.subr.bf16.mxu1 %v15770_v46  ;;  %v11247_v36 = vpack.c.bf16 %v1653_v44, %v1652_v16  ;;  %v1657_v3 = vmul.f32 %v11798_v1, %v11796_v9  ;;  %v419_v30 = vadd.f32 %v12550_v48, %v12721_v27  ;;  %v461_v49 = vadd.f32 %v12592_v6, %v12681_v59  ;;  %v15784_v48 = vld [vmem:[#allocation26_spill] sm:$0xff]  ;;  %v15785_v6 = vld [vmem:[#allocation27_spill] sm:$0xff] }
 0x65c   :  { %v11250_v33 = vpack.c.bf16 %v1655_v19, %v1654_v57 }
 0x65d   :  { %v11253_v21 = vpack.c.bf16 %v1657_v3, %v1656_v0 }
 0x65e   :  { %11236 = vmatpush3.bf16.msra.mxu1 %v11235_v13 }
 0x65f   :  { %11237 = vmatprep.subr.bf16.mxu1 %v15770_v46 }
 0x662   :  { %11239 = vmatpush3.bf16.msra.mxu1 %v11238_v14 }
 0x663   :  { %11240 = vmatprep.subr.bf16.mxu1 %v15770_v46 }
 0x666   :  { %11242 = vmatpush3.bf16.msra.mxu1 %v11241_v53 }
 0x667   :  { %11243 = vmatprep.subr.bf16.mxu1 %v15770_v46 }
 0x66a   :  { %11245 = vmatpush3.bf16.msra.mxu1 %v11244_v10 }
 0x66b   :  { %11246 = vmatprep.subr.bf16.mxu1 %v15770_v46 }
 0x66e   :  { %11248 = vmatpush3.bf16.msra.mxu1 %v11247_v36 }
 0x66f   :  { %11249 = vmatprep.subr.bf16.mxu1 %v15770_v46 }
 0x672   :  { %11251 = vmatpush3.bf16.msra.mxu1 %v11250_v33 }
 0x673   :  { %11252 = vmatprep.subr.bf16.mxu1 %v15770_v46 }
 0x676   :  { %11254 = vmatpush3.bf16.msra.mxu1 %v11253_v21 }
 0x677   :  { %10382 = vmatprep.subr.mxu1 %v419_v30 }
 0x679   :  { %10380 = vmatmul.mubr.f32.vlgmr.msra.gmra.mrb[34].mxu1 %v461_v49 }
 0x67a   :  { %10383 = vmatpush3.msra.mxu1 %v419_v30  ;;  %10384 = vmatprep.mubr.msk.f32.mxu1 %vm503_vm1, %v12725_v28  ;;  %v15787_v28 = vld [vmem:[#allocation29_spill] sm:$0xff] }
 0x67b   :  { %11279 = vmatprep.subr.bf16.mxu1 %v15770_v46 }
 0x67d   :  { %10385 = vmatmul.mubr.msk.f32.vlgmr.msra.gmra.mrb[36].mxu1 %vm503_vm1, %v15781_v35 }
 0x67e   :  { %10387 = vmatprep.mubr.msk.f32.mxu1 %vm503_vm1, %v15782_v20 }
 0x681   :  { %10388 = vmatmul.mubr.msk.f32.gmra.mrb[38].mxu1 %vm503_vm1, %v15783_v29 }
 0x682   :  { %10390 = vmatprep.mubr.msk.f32.mxu1 %vm503_vm1, %v15784_v48 }
 0x685   :  { %10391 = vmatmul.mubr.msk.f32.gmra.mrb[40].mxu1 %vm503_vm1, %v15785_v6 }
 0x686   :  { %10393 = vmatprep.mubr.msk.f32.mxu1 %vm503_vm1, %v15786_v60 }
 0x689   :  { %10394 = vmatmul.mubr.msk.f32.gmra.mrb[42].mxu1 %vm503_vm1, %v15787_v28 }
 0x68a   :  { %10396 = vmatprep.mubr.msk.f32.mxu1 %vm503_vm1, %v15788_v62 }
 0x68d   :  { %10397 = vmatmul.mubr.msk.f32.gmra.mrb[44].mxu1 %vm503_vm1, %v15789_v61 }
 0x68e   :  { %10399 = vmatprep.mubr.msk.f32.mxu1 %vm503_vm1, %v15790_v18 }
 0x691   :  { %10400 = vmatmul.mubr.msk.f32.gmra.mrb[46].mxu1 %vm503_vm1, %v15791_v42 }
 0x692   :  { %10402 = vmatprep.mubr.msk.f32.mxu1 %vm503_vm1, %v15792_v4 }
 0x695   :  { %10403 = vmatmul.mubr.msk.f32.gmra.mrb[48].mxu1 %vm503_vm1, %v15793_v39 }
 0x696   :  { %10405 = vmatprep.mubr.msk.f32.mxu1 %vm503_vm1, %v15794_v12 }
 0x699   :  { %10406 = vmatmul.mubr.msk.f32.gmra.mrb[50].mxu1 %vm503_vm1, %v15795_v15 }
 0x69a   :  { %10501 = vmatprep.mubr.msk.f32.mxu1 %vm12260_vm2, %v15752_v24 }
 0x74c   :  { %v13290_v50 = vpop.f32.mrb[34].mxu1 }
 0x74d   :  { %v10381_v2 = vpop.f32.mrb[35].mxu1 }
 0x750   :  { %v10386_v37 = vpop.f32.mrb[36].mxu1 }
 0x751   :  { %v1875_v52 = vpop.f32.mrb[37].mxu1  ;;  %v13292_v23 = vmul.f32 0.35355338, %v10386_v37 }
 0x752   :  { %v1954_v58 = vmul.f32 0.35355338, %v1875_v52 }
 0x754   :  { %v10389_v51 = vpop.f32.mrb[38].mxu1 }
 0x755   :  { %v1885_v5 = vpop.f32.mrb[39].mxu1  ;;  %v1957_v41 = vmul.f32 0.35355338, %v10389_v51 }
 0x756   :  { %v1956_v56 = vmul.f32 0.35355338, %v1885_v5 }
 0x758   :  { %v10392_v9 = vpop.f32.mrb[40].mxu1 }
 0x759   :  { %v13294_v55 = vmul.f32 0.35355338, %v10392_v9  ;;  %v1895_v26 = vpop.f32.mrb[41].mxu1 }
 0x75a   :  { %v13296_v38 = vmul.f32 0.35355338, %v1895_v26 }
 0x75b   :  { %v1971_v34 = vmax.f32 %v13292_v23, %v13294_v55 }
 0x75c   :  { %v1970_v31 = vmax.f32 %v1954_v58, %v13296_v38  ;;  %v10395_v1 = vpop.f32.mrb[42].mxu1 }
 0x75d   :  { %v13301_v43 = vmul.f32 0.35355338, %v10395_v1  ;;  %v1905_v54 = vpop.f32.mrb[43].mxu1 }
 0x75e   :  { %v13303_v40 = vmul.f32 0.35355338, %v1905_v54 }
 0x75f   :  { %v1973_v11 = vmax.f32 %v1957_v41, %v13301_v43 }
 0x760   :  { %v1972_v22 = vmax.f32 %v1956_v56, %v13303_v40  ;;  %v10398_v63 = vpop.f32.mrb[44].mxu1 }
 0x761   :  { %v13307_v47 = vmul.f32 0.35355338, %v10398_v63  ;;  %v1915_v13 = vpop.f32.mrb[45].mxu1 }
 0x762   :  { %v13309_v8 = vmul.f32 0.35355338, %v1915_v13 }
 0x763   :  { %v1975_v32 = vmax.f32 %v1971_v34, %v13307_v47 }
 0x764   :  { %v1974_v14 = vmax.f32 %v1970_v31, %v13309_v8  ;;  %v10401_v53 = vpop.f32.mrb[46].mxu1 }
 0x765   :  { %v13313_v16 = vmul.f32 0.35355338, %v10401_v53  ;;  %v1925_v44 = vpop.f32.mrb[47].mxu1 }
 0x766   :  { %v13315_v10 = vmul.f32 0.35355338, %v1925_v44 }
 0x767   :  { %v1977_v57 = vmax.f32 %v1973_v11, %v13313_v16 }
 0x768   :  { %v1976_v19 = vmax.f32 %v1972_v22, %v13315_v10  ;;  %v10404_v0 = vpop.f32.mrb[48].mxu1 }
 0x769   :  { %v13319_v36 = vmul.f32 0.35355338, %v10404_v0  ;;  %v1935_v3 = vpop.f32.mrb[49].mxu1 }
 0x76a   :  { %v13321_v33 = vmul.f32 0.35355338, %v1935_v3 }
 0x76b   :  { %v1979_v21 = vmax.f32 %v1975_v32, %v13319_v36 }
 0x76c   :  { %v1978_v30 = vmax.f32 %v1974_v14, %v13321_v33  ;;  %v10407_v49 = vpop.f32.mrb[50].mxu1 }
 0x76d   :  { %v13325_v35 = vmul.f32 0.35355338, %v10407_v49  ;;  %v1945_v20 = vpop.f32.mrb[51].mxu1 }
 0x76e   :  { %v1982_v29 = vmax.f32 %v1978_v30, %v1979_v21  ;;  %v13327_v48 = vmul.f32 0.35355338, %v1945_v20 }
 0x76f   :  { %v1981_v6 = vmax.f32 %v1977_v57, %v13325_v35 }
 0x770   :  { %v1980_v60 = vmax.f32 %v1976_v19, %v13327_v48 }
 0x772   :  { %v1983_v28 = vmax.f32 %v1980_v60, %v1981_v6 }
 0x774   :  { %v1984_v62 = vmax.f32 %v1982_v29, %v1983_v28 }
 0x776   :  { %v1985_v61 = vrot.slane %v1984_v62, 4 }
 0x778   :  { %v1986_v18 = vmax.f32 %v1984_v62, %v1985_v61 }
 0x77a   :  { %v1987_v42 = vrot.slane %v1986_v18, 2 }
 0x77c   :  { %v1988_v4 = vmax.f32 %v1986_v18, %v1987_v42 }
 0x77e   :  { %v1989_v39 = vrot.slane %v1988_v4, 1 }
 0x780   :  { %v1990_v12 = vmax.f32 %v1988_v4, %v1989_v39 }
 0x782   :  { %v1991_v15 = vsub.f32 %v1954_v58, %v1990_v12  ;;  %v1992_v2 = vsub.f32 %v13292_v23, %v1990_v12  ;;  %v1993_v37 = vsub.f32 %v1956_v56, %v1990_v12  ;;  %v1994_v52 = vsub.f32 %v1957_v41, %v1990_v12 }
 0x783   :  { %v1995_v51 = vsub.f32 %v13296_v38, %v1990_v12  ;;  %v1996_v5 = vsub.f32 %v13294_v55, %v1990_v12  ;;  %v1997_v9 = vsub.f32 %v13303_v40, %v1990_v12  ;;  %v1998_v26 = vsub.f32 %v13301_v43, %v1990_v12 }
 0x784   :  { %v1999_v34 = vsub.f32 %v13309_v8, %v1990_v12  ;;  %v2000_v31 = vsub.f32 %v13307_v47, %v1990_v12  ;;  %v2001_v1 = vsub.f32 %v13315_v10, %v1990_v12  ;;  %v2002_v58 = vsub.f32 %v13313_v16, %v1990_v12 }
 0x785   :  { %v2003_v23 = vsub.f32 %v13321_v33, %v1990_v12  ;;  %v2004_v41 = vsub.f32 %v13319_v36, %v1990_v12  ;;  %v2005_v38 = vsub.f32 %v13327_v48, %v1990_v12  ;;  %v2006_v55 = vsub.f32 %v13325_v35, %v1990_v12 }
 0x786   :  { %v2007_v54 = vmul.f32 1.442695, %v1991_v15  ;;  %v2009_v56 = vmul.f32 1.442695, %v1992_v2  ;;  %v2011_v40 = vmul.f32 1.442695, %v1993_v37 }
 0x787   :  { %v2013_v43 = vmul.f32 1.442695, %v1994_v52  ;;  %v2015_v11 = vmul.f32 1.442695, %v1995_v51  ;;  %v2017_v22 = vmul.f32 1.442695, %v1996_v5 }
 0x788   :  { %11799 = vpow2.f32 %v2007_v54  ;;  %v2019_v63 = vmul.f32 1.442695, %v1997_v9  ;;  %v2021_v47 = vmul.f32 1.442695, %v1998_v26  ;;  %v2023_v32 = vmul.f32 1.442695, %v1999_v34 }
 0x789   :  { %11801 = vpow2.f32 %v2009_v56  ;;  %v2025_v16 = vmul.f32 1.442695, %v2000_v31  ;;  %v2027_v57 = vmul.f32 1.442695, %v2001_v1  ;;  %v2029_v36 = vmul.f32 1.442695, %v2002_v58 }
 0x78a   :  { %11803 = vpow2.f32 %v2011_v40  ;;  %v2031_v21 = vmul.f32 1.442695, %v2003_v23  ;;  %v2033_v35 = vmul.f32 1.442695, %v2004_v41  ;;  %v2035_v48 = vmul.f32 1.442695, %v2005_v38 }
 0x78b   :  { %11805 = vpow2.f32 %v2013_v43  ;;  %v2037_v28 = vmul.f32 1.442695, %v2006_v55 }
 0x78c   :  { %11807 = vpow2.f32 %v2015_v11 }
 0x78d   :  { %11809 = vpow2.f32 %v2017_v22 }
 0x78e   :  { %11811 = vpow2.f32 %v2019_v63 }
 0x78f   :  { %11813 = vpow2.f32 %v2021_v47 }
 0x790   :  { %11815 = vpow2.f32 %v2023_v32 }
 0x791   :  { %11817 = vpow2.f32 %v2025_v16 }
 0x792   :  { %v11800_v13 = vpop.eup %11799  ;;  %11819 = vpow2.f32 %v2027_v57 }
 0x793   :  { %v11802_v8 = vpop.eup %11801  ;;  %11821 = vpow2.f32 %v2029_v36 }
 0x794   :  { %v2039_v14 = vadd.f32 %v11802_v8, %v11800_v13  ;;  %v11804_v53 = vpop.eup %11803  ;;  %11823 = vpow2.f32 %v2031_v21 }
 0x795   :  { %v11806_v10 = vpop.eup %11805  ;;  %11825 = vpow2.f32 %v2033_v35 }
 0x796   :  { %v2040_v44 = vadd.f32 %v11804_v53, %v2039_v14  ;;  %v11808_v0 = vpop.eup %11807  ;;  %11827 = vpow2.f32 %v2035_v48 }
 0x797   :  { %v11810_v33 = vpop.eup %11809  ;;  %11829 = vpow2.f32 %v2037_v28  ;;  %v15801_v28 = vld [vmem:[#allocation39_spill] sm:$0xff] }
 0x798   :  { %v2041_v19 = vadd.f32 %v11806_v10, %v2040_v44  ;;  %v11812_v49 = vpop.eup %11811 }
 0x799   :  { %v11814_v29 = vpop.eup %11813 }
 0x79a   :  { %v2042_v3 = vadd.f32 %v11808_v0, %v2041_v19  ;;  %v11816_v60 = vpop.eup %11815 }
 0x79b   :  { %v11818_v61 = vpop.eup %11817 }
 0x79c   :  { %v2043_v30 = vadd.f32 %v11810_v33, %v2042_v3  ;;  %v11820_v42 = vpop.eup %11819 }
 0x79d   :  { %v11822_v39 = vpop.eup %11821 }
 0x79e   :  { %v2044_v20 = vadd.f32 %v11812_v49, %v2043_v30  ;;  %v11824_v15 = vpop.eup %11823 }
 0x79f   :  { %v11826_v37 = vpop.eup %11825 }
 0x7a0   :  { %v2045_v6 = vadd.f32 %v11814_v29, %v2044_v20  ;;  %v11828_v51 = vpop.eup %11827  ;;  %v15798_v20 = vld [vmem:[#allocation48_spill] sm:$0xff] }
 0x7a1   :  { %v11830_v9 = vpop.eup %11829 }
 0x7a2   :  { %v2046_v62 = vadd.f32 %v11816_v60, %v2045_v6  ;;  %v2174_v6 = vpop.trf.xlu1 }
 0x7a4   :  { %v2047_v18 = vadd.f32 %v11818_v61, %v2046_v62  ;;  %v15802_v62 = vld [vmem:[#allocation40_spill] sm:$0xff] }
 0x7a6   :  { %v2048_v4 = vadd.f32 %v11820_v42, %v2047_v18  ;;  %v15803_v18 = vld [vmem:[#allocation41_spill] sm:$0xff] }
 0x7a8   :  { %v2049_v12 = vadd.f32 %v11822_v39, %v2048_v4  ;;  %v15805_v4 = vld [vmem:[#allocation43_spill] sm:$0xff] }
 0x7aa   :  { %v2050_v2 = vadd.f32 %v11824_v15, %v2049_v12  ;;  %v15806_v12 = vld [vmem:[#allocation44_spill] sm:$0xff] }
 0x7ac   :  { %v2051_v52 = vadd.f32 %v11826_v37, %v2050_v2  ;;  %v15808_v2 = vld [vmem:[#allocation46_spill] sm:$0xff] }
 0x7ae   :  { %v2052_v5 = vadd.f32 %v11828_v51, %v2051_v52  ;;  %v15809_v52 = vld [vmem:[#allocation47_spill] sm:$0xff] }
 0x7b0   :  { %v2053_v26 = vadd.f32 %v11830_v9, %v2052_v5 }
 0x7b2   :  { %v2054_v34 = vrot.slane %v2053_v26, 4 }
 0x7b4   :  { %v2055_v31 = vadd.f32 %v2054_v34, %v2053_v26 }
 0x7b6   :  { %v2056_v1 = vrot.slane %v2055_v31, 2 }
 0x7b8   :  { %v2057_v58 = vadd.f32 %v2056_v1, %v2055_v31 }
 0x7ba   :  { %v2058_v23 = vrot.slane %v2057_v58, 1 }
 0x7bc   :  { %v2059_v41 = vadd.f32 %v2058_v23, %v2057_v58 }
 0x7be   :  { %11831 = vrcp.f32 %v2059_v41 }
 0x7c8   :  { %v11832_v38 = vpop.eup %11831 }
 0x7c9   :  { %v2061_v55 = vmul.f32 %v11832_v38, %v11800_v13  ;;  %v2062_v54 = vmul.f32 %v11832_v38, %v11802_v8  ;;  %v2063_v56 = vmul.f32 %v11832_v38, %v11804_v53  ;;  %v2064_v40 = vmul.f32 %v11832_v38, %v11806_v10 }
 0x7ca   :  { %v2065_v43 = vmul.f32 %v11832_v38, %v11808_v0  ;;  %v2066_v11 = vmul.f32 %v11832_v38, %v11810_v33  ;;  %v2067_v22 = vmul.f32 %v11832_v38, %v11812_v49  ;;  %v2068_v63 = vmul.f32 %v11832_v38, %v11814_v29  ;;  %v15796_v33 = vld [vmem:[#allocation11_spill] sm:$0xff]  ;;  %v15797_v49 = vld [vmem:[#allocation12_spill] sm:$0xff]  ;;  %v15799_v29 = vld [vmem:[#allocation21_spill] sm:$0xff] }
 0x7cb   :  { %v11256_v47 = vpack.c.bf16 %v2062_v54, %v2061_v55  ;;  %v11259_v32 = vpack.c.bf16 %v2064_v40, %v2063_v56  ;;  %v2069_v14 = vmul.f32 %v11832_v38, %v11816_v60  ;;  %v2070_v16 = vmul.f32 %v11832_v38, %v11818_v61  ;;  %v15800_v60 = vld [vmem:[#allocation38_spill] sm:$0xff]  ;;  %v2175_v61 = vpop.trf.xlu1 }
 0x7cc   :  { %v11262_v44 = vpack.c.bf16 %v2066_v11, %v2065_v43  ;;  %v11265_v57 = vpack.c.bf16 %v2068_v63, %v2067_v22  ;;  %v2071_v19 = vmul.f32 %v11832_v38, %v11820_v42  ;;  %v2072_v36 = vmul.f32 %v11832_v38, %v11822_v39  ;;  %v15804_v42 = vld [vmem:[#allocation42_spill] sm:$0xff] }
 0x7cd   :  { %11257 = vmatpush3.bf16.msra.mxu0 %v11256_v47  ;;  %v11268_v3 = vpack.c.bf16 %v2070_v16, %v2069_v14  ;;  %v2073_v21 = vmul.f32 %v11832_v38, %v11824_v15  ;;  %v2074_v30 = vmul.f32 %v11832_v38, %v11826_v37  ;;  %v2075_v13 = vmul.f32 %v11832_v38, %v11828_v51  ;;  %v15807_v15 = vld [vmem:[#allocation45_spill] sm:$0xff] }
 0x7ce   :  { %11258 = vmatprep.subr.bf16.mxu0 %v15770_v46  ;;  %v11271_v8 = vpack.c.bf16 %v2072_v36, %v2071_v19  ;;  %v2076_v53 = vmul.f32 %v11832_v38, %v11830_v9  ;;  %v403_v35 = vadd.f32 %v15797_v49, %v15796_v33  ;;  %v467_v48 = vadd.f32 %v15799_v29, %v15798_v20 }
 0x7cf   :  { %v11274_v10 = vpack.c.bf16 %v2074_v30, %v2073_v21  ;;  %v2176_v39 = vpop.trf.xlu1 }
 0x7d0   :  { %v11277_v0 = vpack.c.bf16 %v2076_v53, %v2075_v13 }
 0x7d1   :  { %11260 = vmatpush3.bf16.msra.mxu0 %v11259_v32 }
 0x7d2   :  { %11261 = vmatprep.subr.bf16.mxu0 %v15770_v46 }
 0x7d3   :  { %v2177_v37 = vpop.trf.xlu1 }
 0x7d5   :  { %11263 = vmatpush3.bf16.msra.mxu0 %v11262_v44 }
 0x7d6   :  { %11264 = vmatprep.subr.bf16.mxu0 %v15770_v46 }
 0x7d7   :  { %v2178_v51 = vpop.trf.xlu1 }
 0x7d9   :  { %11266 = vmatpush3.bf16.msra.mxu0 %v11265_v57 }
 0x7da   :  { %11267 = vmatprep.subr.bf16.mxu0 %v15770_v46 }
 0x7db   :  { %v2179_v5 = vpop.trf.xlu1 }
 0x7dd   :  { %11269 = vmatpush3.bf16.msra.mxu0 %v11268_v3 }
 0x7de   :  { %11270 = vmatprep.subr.bf16.mxu0 %v15770_v46 }
 0x7e1   :  { %11272 = vmatpush3.bf16.msra.mxu0 %v11271_v8 }
 0x7e2   :  { %11273 = vmatprep.subr.bf16.mxu0 %v15770_v46 }
 0x7e5   :  { %11275 = vmatpush3.bf16.msra.mxu0 %v11274_v10 }
 0x7e6   :  { %11276 = vmatprep.subr.bf16.mxu0 %v15770_v46 }
 0x7e9   :  { %11278 = vmatpush3.bf16.msra.mxu0 %v11277_v0 }
 0x7ea   :  { %10443 = vmatprep.subr.mxu0 %v403_v35 }
 0x7ec   :  { %10441 = vmatmul.mubr.f32.vlgmr.msra.gmra.mrb[42].mxu0 %v467_v48 }
 0x7ed   :  { %10444 = vmatpush3.msra.mxu0 %v403_v35  ;;  %10445 = vmatprep.mubr.msk.f32.mxu0 %vm503_vm1, %v15800_v60 }
 0x7ee   :  { %11303 = vmatprep.subr.bf16.mxu0 %v15770_v46 }
 0x7f0   :  { %10446 = vmatmul.mubr.msk.f32.vlgmr.msra.gmra.mrb[44].mxu0 %vm503_vm1, %v15801_v28 }
 0x7f1   :  { %10448 = vmatprep.mubr.msk.f32.mxu0 %vm503_vm1, %v15802_v62 }
 0x7f4   :  { %10449 = vmatmul.mubr.msk.f32.gmra.mrb[46].mxu0 %vm503_vm1, %v15803_v18 }
 0x7f5   :  { %10451 = vmatprep.mubr.msk.f32.mxu0 %vm503_vm1, %v15804_v42 }
 0x7f8   :  { %10452 = vmatmul.mubr.msk.f32.gmra.mrb[48].mxu0 %vm503_vm1, %v15805_v4 }
 0x7f9   :  { %10454 = vmatprep.mubr.msk.f32.mxu0 %vm503_vm1, %v15806_v12 }
 0x7fc   :  { %10455 = vmatmul.mubr.msk.f32.gmra.mrb[50].mxu0 %vm503_vm1, %v15807_v15 }
 0x7fd   :  { %10457 = vmatprep.mubr.msk.f32.mxu0 %vm503_vm1, %v15808_v2 }
 0x800   :  { %10458 = vmatmul.mubr.msk.f32.gmra.mrb[52].mxu0 %vm503_vm1, %v15809_v52 }
 0x801   :  { %10460 = vmatprep.mubr.msk.f32.mxu0 %vm503_vm1, %v2174_v6 }
 0x804   :  { %10461 = vmatmul.mubr.msk.f32.gmra.mrb[54].mxu0 %vm503_vm1, %v2175_v61 }
 0x805   :  { %10463 = vmatprep.mubr.msk.f32.mxu0 %vm503_vm1, %v2176_v39 }
 0x808   :  { %10464 = vmatmul.mubr.msk.f32.gmra.mrb[56].mxu0 %vm503_vm1, %v2177_v37 }
 0x809   :  { %10466 = vmatprep.mubr.msk.f32.mxu0 %vm503_vm1, %v2178_v51 }
 0x80c   :  { %10467 = vmatmul.mubr.msk.f32.gmra.mrb[58].mxu0 %vm503_vm1, %v2179_v5 }
 0x80d   :  { %10562 = vmatprep.mubr.msk.f32.mxu0 %vm12260_vm2, %v15752_v24 }
 0x8bf   :  { %v13384_v9 = vpop.f32.mrb[42].mxu0 }
 0x8c0   :  { %v11381_v26 = vpack.c.bf16 %v13384_v9, %v13290_v50  ;;  %v10442_v34 = vpop.f32.mrb[43].mxu0 }
 0x8c3   :  { %v10447_v31 = vpop.f32.mrb[44].mxu0 }
 0x8c4   :  { %v2294_v1 = vpop.f32.mrb[45].mxu0  ;;  %v13388_v38 = vmul.f32 0.35355338, %v10447_v31 }
 0x8c5   :  { %v2373_v56 = vmul.f32 0.35355338, %v2294_v1 }
 0x8c7   :  { %v10450_v58 = vpop.f32.mrb[46].mxu0 }
 0x8c8   :  { %v2304_v23 = vpop.f32.mrb[47].mxu0  ;;  %v2376_v63 = vmul.f32 0.35355338, %v10450_v58 }
 0x8c9   :  { %v2375_v14 = vmul.f32 0.35355338, %v2304_v23 }
 0x8cb   :  { %v10453_v41 = vpop.f32.mrb[48].mxu0 }
 0x8cc   :  { %v13390_v55 = vmul.f32 0.35355338, %v10453_v41  ;;  %v2314_v54 = vpop.f32.mrb[49].mxu0 }
 0x8cd   :  { %v13392_v40 = vmul.f32 0.35355338, %v2314_v54 }
 0x8ce   :  { %v2390_v43 = vmax.f32 %v13388_v38, %v13390_v55 }
 0x8cf   :  { %v2389_v11 = vmax.f32 %v2373_v56, %v13392_v40  ;;  %v10456_v22 = vpop.f32.mrb[50].mxu0 }
 0x8d0   :  { %v13397_v47 = vmul.f32 0.35355338, %v10456_v22  ;;  %v2324_v32 = vpop.f32.mrb[51].mxu0 }
 0x8d1   :  { %v13399_v16 = vmul.f32 0.35355338, %v2324_v32 }
 0x8d2   :  { %v2392_v44 = vmax.f32 %v2376_v63, %v13397_v47 }
 0x8d3   :  { %v2391_v57 = vmax.f32 %v2375_v14, %v13399_v16  ;;  %v10459_v19 = vpop.f32.mrb[52].mxu0 }
 0x8d4   :  { %v13403_v36 = vmul.f32 0.35355338, %v10459_v19  ;;  %v2334_v3 = vpop.f32.mrb[53].mxu0 }
 0x8d5   :  { %v13405_v21 = vmul.f32 0.35355338, %v2334_v3 }
 0x8d6   :  { %v2394_v30 = vmax.f32 %v2390_v43, %v13403_v36 }
 0x8d7   :  { %v2393_v13 = vmax.f32 %v2389_v11, %v13405_v21  ;;  %v10462_v8 = vpop.f32.mrb[54].mxu0 }
 0x8d8   :  { %v13409_v53 = vmul.f32 0.35355338, %v10462_v8  ;;  %v2344_v10 = vpop.f32.mrb[55].mxu0 }
 0x8d9   :  { %v13411_v0 = vmul.f32 0.35355338, %v2344_v10 }
 0x8da   :  { %v2396_v33 = vmax.f32 %v2392_v44, %v13409_v53 }
 0x8db   :  { %v2395_v49 = vmax.f32 %v2391_v57, %v13411_v0  ;;  %v10465_v35 = vpop.f32.mrb[56].mxu0 }
 0x8dc   :  { %v13415_v29 = vmul.f32 0.35355338, %v10465_v35  ;;  %v2354_v48 = vpop.f32.mrb[57].mxu0 }
 0x8dd   :  { %v13417_v6 = vmul.f32 0.35355338, %v2354_v48 }
 0x8de   :  { %v2398_v60 = vmax.f32 %v2394_v30, %v13415_v29 }
 0x8df   :  { %v2397_v28 = vmax.f32 %v2393_v13, %v13417_v6  ;;  %v10468_v62 = vpop.f32.mrb[58].mxu0 }
 0x8e0   :  { %v13421_v61 = vmul.f32 0.35355338, %v10468_v62  ;;  %v2364_v18 = vpop.f32.mrb[59].mxu0 }
 0x8e1   :  { %v2401_v42 = vmax.f32 %v2397_v28, %v2398_v60  ;;  %v13423_v4 = vmul.f32 0.35355338, %v2364_v18 }
 0x8e2   :  { %v2400_v39 = vmax.f32 %v2396_v33, %v13421_v61 }
 0x8e3   :  { %v2399_v12 = vmax.f32 %v2395_v49, %v13423_v4 }
 0x8e5   :  { %v2402_v15 = vmax.f32 %v2399_v12, %v2400_v39 }
 0x8e7   :  { %v2403_v2 = vmax.f32 %v2401_v42, %v2402_v15 }
 0x8e9   :  { %v2404_v37 = vrot.slane %v2403_v2, 4 }
 0x8eb   :  { %v2405_v52 = vmax.f32 %v2403_v2, %v2404_v37 }
 0x8ed   :  { %v2406_v51 = vrot.slane %v2405_v52, 2 }
 0x8ef   :  { %v2407_v5 = vmax.f32 %v2405_v52, %v2406_v51 }
 0x8f1   :  { %v2408_v34 = vrot.slane %v2407_v5, 1 }
 0x8f3   :  { %v2409_v31 = vmax.f32 %v2407_v5, %v2408_v34 }
 0x8f5   :  { %v2410_v1 = vsub.f32 %v2373_v56, %v2409_v31  ;;  %v2411_v58 = vsub.f32 %v13388_v38, %v2409_v31  ;;  %v2412_v23 = vsub.f32 %v2375_v14, %v2409_v31  ;;  %v2413_v41 = vsub.f32 %v2376_v63, %v2409_v31 }
 0x8f6   :  { %v2414_v54 = vsub.f32 %v13392_v40, %v2409_v31  ;;  %v2415_v43 = vsub.f32 %v13390_v55, %v2409_v31  ;;  %v2416_v11 = vsub.f32 %v13399_v16, %v2409_v31  ;;  %v2417_v22 = vsub.f32 %v13397_v47, %v2409_v31 }
 0x8f7   :  { %v2418_v32 = vsub.f32 %v13405_v21, %v2409_v31  ;;  %v2419_v44 = vsub.f32 %v13403_v36, %v2409_v31  ;;  %v2420_v57 = vsub.f32 %v13411_v0, %v2409_v31  ;;  %v2421_v56 = vsub.f32 %v13409_v53, %v2409_v31 }
 0x8f8   :  { %v2422_v38 = vsub.f32 %v13417_v6, %v2409_v31  ;;  %v2423_v63 = vsub.f32 %v13415_v29, %v2409_v31  ;;  %v2424_v40 = vsub.f32 %v13423_v4, %v2409_v31  ;;  %v2425_v55 = vsub.f32 %v13421_v61, %v2409_v31 }
 0x8f9   :  { %v2426_v14 = vmul.f32 1.442695, %v2410_v1  ;;  %v2428_v16 = vmul.f32 1.442695, %v2411_v58  ;;  %v2430_v19 = vmul.f32 1.442695, %v2412_v23 }
 0x8fa   :  { %v2432_v47 = vmul.f32 1.442695, %v2413_v41  ;;  %v2434_v36 = vmul.f32 1.442695, %v2414_v54  ;;  %v2436_v3 = vmul.f32 1.442695, %v2415_v43 }
 0x8fb   :  { %11833 = vpow2.f32 %v2426_v14  ;;  %v2438_v21 = vmul.f32 1.442695, %v2416_v11  ;;  %v2440_v30 = vmul.f32 1.442695, %v2417_v22  ;;  %v2442_v53 = vmul.f32 1.442695, %v2418_v32 }
 0x8fc   :  { %11835 = vpow2.f32 %v2428_v16  ;;  %v2444_v33 = vmul.f32 1.442695, %v2419_v44  ;;  %v2446_v29 = vmul.f32 1.442695, %v2420_v57  ;;  %v2448_v60 = vmul.f32 1.442695, %v2421_v56  ;;  %v13440_v56 = vpop.trf.xlu1 }
 0x8fd   :  { %11837 = vpow2.f32 %v2430_v19  ;;  %v2450_v61 = vmul.f32 1.442695, %v2422_v38  ;;  %v2452_v4 = vmul.f32 1.442695, %v2423_v63  ;;  %v2454_v15 = vmul.f32 1.442695, %v2424_v40 }
 0x8fe   :  { %11839 = vpow2.f32 %v2432_v47  ;;  %v2456_v52 = vmul.f32 1.442695, %v2425_v55 }
 0x8ff   :  { %11841 = vpow2.f32 %v2434_v36 }
 0x900   :  { %11843 = vpow2.f32 %v2436_v3  ;;  %v2584_v55 = vpop.trf.xlu1 }
 0x901   :  { %11845 = vpow2.f32 %v2438_v21 }
 0x902   :  { %11847 = vpow2.f32 %v2440_v30 }
 0x903   :  { %11849 = vpow2.f32 %v2442_v53 }
 0x904   :  { %11851 = vpow2.f32 %v2444_v33  ;;  %v2585_v47 = vpop.trf.xlu1 }
 0x905   :  { %v11834_v13 = vpop.eup %11833  ;;  %11853 = vpow2.f32 %v2446_v29 }
 0x906   :  { %v11836_v8 = vpop.eup %11835  ;;  %11855 = vpow2.f32 %v2448_v60 }
 0x907   :  { %v2458_v10 = vadd.f32 %v11836_v8, %v11834_v13  ;;  %v11838_v0 = vpop.eup %11837  ;;  %11857 = vpow2.f32 %v2450_v61 }
 0x908   :  { %v11840_v35 = vpop.eup %11839  ;;  %11859 = vpow2.f32 %v2452_v4  ;;  %v2586_v36 = vpop.trf.xlu1 }
 0x909   :  { %v2459_v49 = vadd.f32 %v11838_v0, %v2458_v10  ;;  %v11842_v6 = vpop.eup %11841  ;;  %11861 = vpow2.f32 %v2454_v15 }
 0x90a   :  { %v11844_v62 = vpop.eup %11843  ;;  %11863 = vpow2.f32 %v2456_v52 }
 0x90b   :  { %v2460_v48 = vadd.f32 %v11840_v35, %v2459_v49  ;;  %v11846_v42 = vpop.eup %11845 }
 0x90c   :  { %v11848_v12 = vpop.eup %11847  ;;  %v2587_v21 = vpop.trf.xlu1 }
 0x90d   :  { %v2461_v28 = vadd.f32 %v11842_v6, %v2460_v48  ;;  %v11850_v37 = vpop.eup %11849 }
 0x90e   :  { %v11852_v5 = vpop.eup %11851 }
 0x90f   :  { %v2462_v18 = vadd.f32 %v11844_v62, %v2461_v28  ;;  %v11854_v31 = vpop.eup %11853 }
 0x910   :  { %v11856_v58 = vpop.eup %11855 }
 0x911   :  { %v2463_v39 = vadd.f32 %v11846_v42, %v2462_v18  ;;  %v11858_v41 = vpop.eup %11857 }
 0x912   :  { %v11860_v43 = vpop.eup %11859 }
 0x913   :  { %v2464_v2 = vadd.f32 %v11848_v12, %v2463_v39  ;;  %v11862_v22 = vpop.eup %11861 }
 0x914   :  { %v11864_v44 = vpop.eup %11863 }
 0x915   :  { %v2465_v51 = vadd.f32 %v11850_v37, %v2464_v2 }
 0x917   :  { %v2466_v34 = vadd.f32 %v11852_v5, %v2465_v51 }
 0x919   :  { %v2467_v1 = vadd.f32 %v11854_v31, %v2466_v34 }
 0x91b   :  { %v2468_v23 = vadd.f32 %v11856_v58, %v2467_v1 }
 0x91d   :  { %v2469_v54 = vadd.f32 %v11858_v41, %v2468_v23 }
 0x91f   :  { %v2470_v11 = vadd.f32 %v11860_v43, %v2469_v54  ;;  %v15813_v54 = vld [vmem:[#allocation16_spill] sm:$0xff] }
 0x921   :  { %v2471_v32 = vadd.f32 %v11862_v22, %v2470_v11 }
 0x923   :  { %v2472_v57 = vadd.f32 %v11864_v44, %v2471_v32 }
 0x925   :  { %v2473_v38 = vrot.slane %v2472_v57, 4 }
 0x927   :  { %v2474_v63 = vadd.f32 %v2473_v38, %v2472_v57 }
 0x929   :  { %v2475_v40 = vrot.slane %v2474_v63, 2 }
 0x92b   :  { %v2476_v14 = vadd.f32 %v2475_v40, %v2474_v63 }
 0x92d   :  { %v2477_v16 = vrot.slane %v2476_v14, 1 }
 0x92f   :  { %v2478_v19 = vadd.f32 %v2477_v16, %v2476_v14 }
 0x931   :  { %11865 = vrcp.f32 %v2478_v19 }
 0x93b   :  { %v11866_v3 = vpop.eup %11865 }
 0x93c   :  { %v2480_v30 = vmul.f32 %v11866_v3, %v11834_v13  ;;  %v2481_v53 = vmul.f32 %v11866_v3, %v11836_v8  ;;  %v2482_v10 = vmul.f32 %v11866_v3, %v11838_v0  ;;  %v2483_v33 = vmul.f32 %v11866_v3, %v11840_v35  ;;  %v2588_v35 = vpop.trf.xlu1 }
 0x93d   :  { %v2484_v49 = vmul.f32 %v11866_v3, %v11842_v6  ;;  %v2485_v29 = vmul.f32 %v11866_v3, %v11844_v62  ;;  %v2486_v48 = vmul.f32 %v11866_v3, %v11846_v42  ;;  %v2487_v60 = vmul.f32 %v11866_v3, %v11848_v12 }
 0x93e   :  { %v11280_v28 = vpack.c.bf16 %v2481_v53, %v2480_v30  ;;  %v11283_v61 = vpack.c.bf16 %v2483_v33, %v2482_v10  ;;  %v2488_v18 = vmul.f32 %v11866_v3, %v11850_v37  ;;  %v2489_v4 = vmul.f32 %v11866_v3, %v11852_v5 }
 0x93f   :  { %v11286_v39 = vpack.c.bf16 %v2485_v29, %v2484_v49  ;;  %v11289_v15 = vpack.c.bf16 %v2487_v60, %v2486_v48  ;;  %v2490_v2 = vmul.f32 %v11866_v3, %v11854_v31  ;;  %v2491_v52 = vmul.f32 %v11866_v3, %v11856_v58  ;;  %v15810_v31 = vld [vmem:[#allocation19_spill] sm:$0xff]  ;;  %v15811_v58 = vld [vmem:[#allocation13_spill] sm:$0xff] }
 0x940   :  { %11281 = vmatpush3.bf16.msra.mxu1 %v11280_v28  ;;  %v11292_v51 = vpack.c.bf16 %v2489_v4, %v2488_v18  ;;  %v2492_v34 = vmul.f32 %v11866_v3, %v11858_v41  ;;  %v2493_v1 = vmul.f32 %v11866_v3, %v11860_v43  ;;  %v2494_v13 = vmul.f32 %v11866_v3, %v11862_v22  ;;  %v2589_v42 = vpop.trf.xlu1  ;;  %v15812_v41 = vld [vmem:[#allocation18_spill] sm:$0xff] }
 0x941   :  { %11282 = vmatprep.subr.bf16.mxu1 %v15770_v46  ;;  %v11295_v8 = vpack.c.bf16 %v2491_v52, %v2490_v2  ;;  %v2495_v0 = vmul.f32 %v11866_v3, %v11864_v44  ;;  %v409_v23 = vadd.f32 %v15811_v58, %v15810_v31  ;;  %v451_v43 = vadd.f32 %v15813_v54, %v15812_v41 }
 0x942   :  { %v11298_v6 = vpack.c.bf16 %v2493_v1, %v2492_v34 }
 0x943   :  { %v11301_v62 = vpack.c.bf16 %v2495_v0, %v2494_v13 }
 0x944   :  { %11284 = vmatpush3.bf16.msra.mxu1 %v11283_v61  ;;  %v2590_v12 = vpop.trf.xlu1 }
 0x945   :  { %11285 = vmatprep.subr.bf16.mxu1 %v15770_v46 }
 0x948   :  { %11287 = vmatpush3.bf16.msra.mxu1 %v11286_v39  ;;  %v2591_v37 = vpop.trf.xlu1 }
 0x949   :  { %11288 = vmatprep.subr.bf16.mxu1 %v15770_v46 }
 0x94c   :  { %11290 = vmatpush3.bf16.msra.mxu1 %v11289_v15  ;;  %v2592_v5 = vpop.trf.xlu1 }
 0x94d   :  { %11291 = vmatprep.subr.bf16.mxu1 %v15770_v46 }
 0x950   :  { %11293 = vmatpush3.bf16.msra.mxu1 %v11292_v51  ;;  %v2593_v11 = vpop.trf.xlu1 }
 0x951   :  { %11294 = vmatprep.subr.bf16.mxu1 %v15770_v46 }
 0x954   :  { %11296 = vmatpush3.bf16.msra.mxu1 %v11295_v8  ;;  %v2594_v22 = vpop.trf.xlu1 }
 0x955   :  { %11297 = vmatprep.subr.bf16.mxu1 %v15770_v46 }
 0x958   :  { %11299 = vmatpush3.bf16.msra.mxu1 %v11298_v6  ;;  %v2595_v32 = vpop.trf.xlu1 }
 0x959   :  { %11300 = vmatprep.subr.bf16.mxu1 %v15770_v46 }
 0x95c   :  { %11302 = vmatpush3.bf16.msra.mxu1 %v11301_v62  ;;  %v2596_v44 = vpop.trf.xlu1 }
 0x95d   :  { %10504 = vmatprep.subr.mxu1 %v409_v23 }
 0x95f   :  { %10502 = vmatmul.mubr.f32.vlgmr.msra.gmra.mrb[52].mxu1 %v451_v43 }
 0x960   :  { %10505 = vmatpush3.msra.mxu1 %v409_v23  ;;  %10506 = vmatprep.mubr.msk.f32.mxu1 %vm503_vm1, %v13440_v56  ;;  %v2597_v57 = vpop.trf.xlu1 }
 0x961   :  { %11327 = vmatprep.subr.bf16.mxu1 %v15770_v46 }
 0x963   :  { %10507 = vmatmul.mubr.msk.f32.vlgmr.msra.gmra.mrb[54].mxu1 %vm503_vm1, %v2584_v55 }
 0x964   :  { %10509 = vmatprep.mubr.msk.f32.mxu1 %vm503_vm1, %v2585_v47  ;;  %v2598_v56 = vpop.trf.xlu1 }
 0x967   :  { %10510 = vmatmul.mubr.msk.f32.gmra.mrb[56].mxu1 %vm503_vm1, %v2586_v36 }
 0x968   :  { %10512 = vmatprep.mubr.msk.f32.mxu1 %vm503_vm1, %v2587_v21  ;;  %v3843_v50 = vpop.permute.xlu1 %3842 }
 0x96b   :  { %10513 = vmatmul.mubr.msk.f32.gmra.mrb[58].mxu1 %vm503_vm1, %v2588_v35 }
 0x96c   :  { %10515 = vmatprep.mubr.msk.f32.mxu1 %vm503_vm1, %v2589_v42  ;;  %v3853_v9 = vpop.permute.xlu1 %3852 }
 0x96f   :  { %10516 = vmatmul.mubr.msk.f32.gmra.mrb[60].mxu1 %vm503_vm1, %v2590_v12 }
 0x970   :  { %10518 = vmatprep.mubr.msk.f32.mxu1 %vm503_vm1, %v2591_v37 }
 0x973   :  { %10519 = vmatmul.mubr.msk.f32.gmra.mrb[62].mxu1 %vm503_vm1, %v2592_v5 }
 0x974   :  { %10521 = vmatprep.mubr.msk.f32.mxu1 %vm503_vm1, %v2593_v11 }
 0x977   :  { %10522 = vmatmul.mubr.msk.f32.gmra.mrb[64].mxu1 %vm503_vm1, %v2594_v22 }
 0x978   :  { %10524 = vmatprep.mubr.msk.f32.mxu1 %vm503_vm1, %v2595_v32 }
 0x97b   :  { %10525 = vmatmul.mubr.msk.f32.gmra.mrb[66].mxu1 %vm503_vm1, %v2596_v44 }
 0x97c   :  { %10527 = vmatprep.mubr.msk.f32.mxu1 %vm503_vm1, %v2597_v57  ;;  %v13520_v57 = vpop.trf.xlu0 }
 0x97f   :  { %10528 = vmatmul.mubr.msk.f32.gmra.mrb[68].mxu1 %vm503_vm1, %v2598_v56 }
 0x980   :  { %10623 = vmatprep.mubr.msk.f32.mxu1 %vm12260_vm2, %v15752_v24 }
 0xa32   :  { %v13473_v38 = vpop.f32.mrb[52].mxu1 }
 0xa33   :  { %v10503_v63 = vpop.f32.mrb[53].mxu1 }
 0xa36   :  { %v10508_v40 = vpop.f32.mrb[54].mxu1 }
 0xa37   :  { %v2713_v55 = vpop.f32.mrb[55].mxu1  ;;  %v13475_v47 = vmul.f32 0.35355338, %v10508_v40 }
 0xa38   :  { %v13479_v21 = vmul.f32 0.35355338, %v2713_v55  ;;  %v13522_v55 = vpop.trf.xlu0 }
 0xa3a   :  { %v10511_v14 = vpop.f32.mrb[56].mxu1 }
 0xa3b   :  { %v2723_v16 = vpop.f32.mrb[57].mxu1  ;;  %v13487_v49 = vmul.f32 0.35355338, %v10511_v14 }
 0xa3c   :  { %v2794_v60 = vmul.f32 0.35355338, %v2723_v16 }
 0xa3e   :  { %v10514_v19 = vpop.f32.mrb[58].mxu1 }
 0xa3f   :  { %v13477_v36 = vmul.f32 0.35355338, %v10514_v19  ;;  %v2733_v3 = vpop.f32.mrb[59].mxu1 }
 0xa40   :  { %v13481_v30 = vmul.f32 0.35355338, %v2733_v3 }
 0xa41   :  { %v2809_v53 = vmax.f32 %v13475_v47, %v13477_v36 }
 0xa42   :  { %v2808_v10 = vmax.f32 %v13479_v21, %v13481_v30  ;;  %v10517_v33 = vpop.f32.mrb[60].mxu1 }
 0xa43   :  { %v13489_v29 = vmul.f32 0.35355338, %v10517_v33  ;;  %v2743_v48 = vpop.f32.mrb[61].mxu1  ;;  %v13533_v33 = vpop.trf.xlu0 }
 0xa44   :  { %v13491_v28 = vmul.f32 0.35355338, %v2743_v48 }
 0xa45   :  { %v2811_v61 = vmax.f32 %v13487_v49, %v13489_v29 }
 0xa46   :  { %v2810_v18 = vmax.f32 %v2794_v60, %v13491_v28  ;;  %v10520_v4 = vpop.f32.mrb[62].mxu1 }
 0xa47   :  { %v13496_v39 = vmul.f32 0.35355338, %v10520_v4  ;;  %v2753_v15 = vpop.f32.mrb[63].mxu1 }
 0xa48   :  { %v13498_v2 = vmul.f32 0.35355338, %v2753_v15 }
 0xa49   :  { %v2813_v52 = vmax.f32 %v2809_v53, %v13496_v39 }
 0xa4a   :  { %v2812_v51 = vmax.f32 %v2808_v10, %v13498_v2  ;;  %v10523_v34 = vpop.f32.mrb[64].mxu1 }
 0xa4b   :  { %v13502_v1 = vmul.f32 0.35355338, %v10523_v34  ;;  %v2763_v13 = vpop.f32.mrb[65].mxu1 }
 0xa4c   :  { %v13504_v8 = vmul.f32 0.35355338, %v2763_v13 }
 0xa4d   :  { %v2815_v0 = vmax.f32 %v2811_v61, %v13502_v1 }
 0xa4e   :  { %v2814_v35 = vmax.f32 %v2810_v18, %v13504_v8  ;;  %v10526_v6 = vpop.f32.mrb[66].mxu1 }
 0xa4f   :  { %v13508_v62 = vmul.f32 0.35355338, %v10526_v6  ;;  %v2773_v42 = vpop.f32.mrb[67].mxu1 }
 0xa50   :  { %v13510_v12 = vmul.f32 0.35355338, %v2773_v42 }
 0xa51   :  { %v2817_v37 = vmax.f32 %v2813_v52, %v13508_v62  ;;  %v13559_v52 = vpop.trf.xlu0 }
 0xa52   :  { %v2816_v5 = vmax.f32 %v2812_v51, %v13510_v12  ;;  %v10529_v31 = vpop.f32.mrb[68].mxu1 }
 0xa53   :  { %v13514_v58 = vmul.f32 0.35355338, %v10529_v31  ;;  %v2783_v23 = vpop.f32.mrb[69].mxu1 }
 0xa54   :  { %v2820_v41 = vmax.f32 %v2816_v5, %v2817_v37  ;;  %v13516_v54 = vmul.f32 0.35355338, %v2783_v23 }
 0xa55   :  { %v2819_v43 = vmax.f32 %v2815_v0, %v13514_v58  ;;  %v13561_v13 = vpop.trf.xlu0 }
 0xa56   :  { %v2818_v11 = vmax.f32 %v2814_v35, %v13516_v54 }
 0xa58   :  { %v2821_v22 = vmax.f32 %v2818_v11, %v2819_v43 }
 0xa59   :  { %v13571_v37 = vpop.trf.xlu0 }
 0xa5a   :  { %v2822_v32 = vmax.f32 %v2820_v41, %v2821_v22 }
 0xa5c   :  { %v2823_v44 = vrot.slane %v2822_v32, 4 }
 0xa5e   :  { %v2824_v56 = vmax.f32 %v2822_v32, %v2823_v44  ;;  %v13574_v32 = vpop.trf.xlu0 }
 0xa60   :  { %v2825_v63 = vrot.slane %v2824_v56, 2 }
 0xa62   :  { %v2826_v40 = vmax.f32 %v2824_v56, %v2825_v63 }
 0xa64   :  { %v2827_v14 = vrot.slane %v2826_v40, 1 }
 0xa66   :  { %v13524_v16 = vmax.f32 %v2826_v40, %v2827_v14 }
 0xa68   :  { %v2829_v19 = vsub.f32 %v13479_v21, %v13524_v16  ;;  %v2830_v3 = vsub.f32 %v13475_v47, %v13524_v16  ;;  %v2831_v53 = vsub.f32 %v2794_v60, %v13524_v16  ;;  %v2832_v10 = vsub.f32 %v13487_v49, %v13524_v16 }
 0xa69   :  { %v2833_v48 = vsub.f32 %v13481_v30, %v13524_v16  ;;  %v2834_v61 = vsub.f32 %v13477_v36, %v13524_v16  ;;  %v2835_v18 = vsub.f32 %v13491_v28, %v13524_v16  ;;  %v2836_v21 = vsub.f32 %v13489_v29, %v13524_v16 }
 0xa6a   :  { %v2837_v47 = vsub.f32 %v13498_v2, %v13524_v16  ;;  %v2838_v49 = vsub.f32 %v13496_v39, %v13524_v16  ;;  %v2839_v60 = vsub.f32 %v13504_v8, %v13524_v16  ;;  %v2840_v30 = vsub.f32 %v13502_v1, %v13524_v16 }
 0xa6b   :  { %v2841_v36 = vsub.f32 %v13510_v12, %v13524_v16  ;;  %v2842_v28 = vsub.f32 %v13508_v62, %v13524_v16  ;;  %v2843_v29 = vsub.f32 %v13516_v54, %v13524_v16  ;;  %v2844_v4 = vsub.f32 %v13514_v58, %v13524_v16 }
 0xa6c   :  { %v2845_v15 = vmul.f32 1.442695, %v2829_v19  ;;  %v2847_v39 = vmul.f32 1.442695, %v2830_v3  ;;  %v2849_v2 = vmul.f32 1.442695, %v2831_v53 }
 0xa6d   :  { %v2851_v51 = vmul.f32 1.442695, %v2832_v10  ;;  %v2853_v34 = vmul.f32 1.442695, %v2833_v48  ;;  %v2855_v1 = vmul.f32 1.442695, %v2834_v61  ;;  %v13576_v10 = vpop.trf.xlu0 }
 0xa6e   :  { %11867 = vpow2.f32 %v2845_v15  ;;  %v2857_v8 = vmul.f32 1.442695, %v2835_v18  ;;  %v2859_v0 = vmul.f32 1.442695, %v2836_v21  ;;  %v2861_v62 = vmul.f32 1.442695, %v2837_v47 }
 0xa6f   :  { %11869 = vpow2.f32 %v2847_v39  ;;  %v2863_v5 = vmul.f32 1.442695, %v2838_v49  ;;  %v2865_v23 = vmul.f32 1.442695, %v2839_v60  ;;  %v2867_v43 = vmul.f32 1.442695, %v2840_v30 }
 0xa70   :  { %11871 = vpow2.f32 %v2849_v2  ;;  %v2869_v44 = vmul.f32 1.442695, %v2841_v36  ;;  %v2871_v40 = vmul.f32 1.442695, %v2842_v28  ;;  %v2873_v19 = vmul.f32 1.442695, %v2843_v29 }
 0xa71   :  { %11873 = vpow2.f32 %v2851_v51  ;;  %v2875_v48 = vmul.f32 1.442695, %v2844_v4  ;;  %v13578_v30 = vpop.trf.xlu0 }
 0xa72   :  { %11875 = vpow2.f32 %v2853_v34 }
 0xa73   :  { %11877 = vpow2.f32 %v2855_v1 }
 0xa74   :  { %11879 = vpow2.f32 %v2857_v8 }
 0xa75   :  { %11881 = vpow2.f32 %v2859_v0  ;;  %v13580_v51 = vpop.trf.xlu0 }
 0xa76   :  { %11883 = vpow2.f32 %v2861_v62 }
 0xa77   :  { %11885 = vpow2.f32 %v2863_v5 }
 0xa78   :  { %v13563_v35 = vpop.eup %11867  ;;  %11887 = vpow2.f32 %v2865_v23 }
 0xa79   :  { %v13565_v6 = vpop.eup %11869  ;;  %11889 = vpow2.f32 %v2867_v43  ;;  %v13582_v0 = vpop.trf.xlu0 }
 0xa7a   :  { %v2877_v42 = vadd.f32 %v13565_v6, %v13563_v35  ;;  %v13569_v12 = vpop.eup %11871  ;;  %11891 = vpow2.f32 %v2869_v44 }
 0xa7b   :  { %v11874_v58 = vpop.eup %11873  ;;  %11893 = vpow2.f32 %v2871_v40 }
 0xa7c   :  { %v2878_v31 = vadd.f32 %v13569_v12, %v2877_v42  ;;  %v11876_v54 = vpop.eup %11875  ;;  %11895 = vpow2.f32 %v2873_v19 }
 0xa7d   :  { %v11878_v22 = vpop.eup %11877  ;;  %11897 = vpow2.f32 %v2875_v48 }
 0xa7e   :  { %v2879_v41 = vadd.f32 %v11874_v58, %v2878_v31  ;;  %v11880_v63 = vpop.eup %11879  ;;  %v13584_v31 = vpop.trf.xlu0 }
 0xa7f   :  { %v11882_v16 = vpop.eup %11881 }
 0xa80   :  { %v2880_v11 = vadd.f32 %v11876_v54, %v2879_v41  ;;  %v11884_v53 = vpop.eup %11883 }
 0xa81   :  { %v11886_v18 = vpop.eup %11885 }
 0xa82   :  { %v2881_v56 = vadd.f32 %v11878_v22, %v2880_v11  ;;  %v11888_v47 = vpop.eup %11887  ;;  %v13586_v43 = vpop.trf.xlu0 }
 0xa83   :  { %v11890_v60 = vpop.eup %11889 }
 0xa84   :  { %v2882_v14 = vadd.f32 %v11880_v63, %v2881_v56  ;;  %v11892_v28 = vpop.eup %11891 }
 0xa85   :  { %v11894_v29 = vpop.eup %11893 }
 0xa86   :  { %v2883_v3 = vadd.f32 %v11882_v16, %v2882_v14  ;;  %v11896_v2 = vpop.eup %11895  ;;  %v13588_v11 = vpop.trf.xlu0 }
 0xa87   :  { %v11898_v4 = vpop.eup %11897 }
 0xa88   :  { %v2884_v61 = vadd.f32 %v11884_v53, %v2883_v3 }
 0xa8a   :  { %v2885_v21 = vadd.f32 %v11886_v18, %v2884_v61 }
 0xa8c   :  { %v2886_v49 = vadd.f32 %v11888_v47, %v2885_v21 }
 0xa8e   :  { %v2887_v36 = vadd.f32 %v11890_v60, %v2886_v49  ;;  %v13593_v49 = vpop.trf.xlu0 }
 0xa90   :  { %v2888_v15 = vadd.f32 %v11892_v28, %v2887_v36 }
 0xa92   :  { %v2889_v39 = vadd.f32 %v11894_v29, %v2888_v15 }
 0xa94   :  { %v2890_v34 = vadd.f32 %v11896_v2, %v2889_v39 }
 0xa96   :  { %v2891_v1 = vadd.f32 %v11898_v4, %v2890_v34 }
 0xa98   :  { %v2892_v8 = vrot.slane %v2891_v1, 4 }
 0xa9a   :  { %v2893_v62 = vadd.f32 %v2892_v8, %v2891_v1 }
 0xa9c   :  { %v2894_v42 = vrot.slane %v2893_v62, 2 }
 0xa9e   :  { %v2895_v5 = vadd.f32 %v2894_v42, %v2893_v62 }
 0xaa0   :  { %v2896_v23 = vrot.slane %v2895_v5, 1 }
 0xaa2   :  { %v2897_v41 = vadd.f32 %v2896_v23, %v2895_v5  ;;  %v15816_v23 = vld [vmem:[#allocation20_spill] sm:$0xff] }
 0xaa4   :  { %11899 = vrcp.f32 %v2897_v41  ;;  %v15817_v41 = vld [vmem:[#allocation49_spill] sm:$0xff] }
 0xaae   :  { %v11900_v44 = vpop.eup %11899 }
 0xaaf   :  { %v2899_v56 = vmul.f32 %v11900_v44, %v13563_v35  ;;  %v2900_v40 = vmul.f32 %v11900_v44, %v13565_v6  ;;  %v2901_v14 = vmul.f32 %v11900_v44, %v13569_v12  ;;  %v2902_v19 = vmul.f32 %v11900_v44, %v11874_v58 }
 0xab0   :  { %v2903_v3 = vmul.f32 %v11900_v44, %v11876_v54  ;;  %v2904_v48 = vmul.f32 %v11900_v44, %v11878_v22  ;;  %v2905_v61 = vmul.f32 %v11900_v44, %v11880_v63  ;;  %v2906_v21 = vmul.f32 %v11900_v44, %v11882_v16  ;;  %v3421_v16 = vpop.trf.xlu0 }
 0xab1   :  { %v11304_v36 = vpack.c.bf16 %v2900_v40, %v2899_v56  ;;  %v11307_v15 = vpack.c.bf16 %v2902_v19, %v2901_v14  ;;  %v2907_v39 = vmul.f32 %v11900_v44, %v11884_v53  ;;  %v2908_v34 = vmul.f32 %v11900_v44, %v11886_v18 }
 0xab2   :  { %v11310_v1 = vpack.c.bf16 %v2904_v48, %v2903_v3  ;;  %v11313_v8 = vpack.c.bf16 %v2906_v21, %v2905_v61  ;;  %v2909_v62 = vmul.f32 %v11900_v44, %v11888_v47  ;;  %v2910_v42 = vmul.f32 %v11900_v44, %v11890_v60  ;;  %v15814_v60 = vld [vmem:[#allocation14_spill] sm:$0xff] }
 0xab3   :  { %11305 = vmatpush3.bf16.msra.mxu0 %v11304_v36  ;;  %v11316_v35 = vpack.c.bf16 %v2908_v34, %v2907_v39  ;;  %v2911_v6 = vmul.f32 %v11900_v44, %v11892_v28  ;;  %v2912_v5 = vmul.f32 %v11900_v44, %v11894_v29  ;;  %v2913_v12 = vmul.f32 %v11900_v44, %v11896_v2  ;;  %v15815_v2 = vld [vmem:[#allocation15_spill] sm:$0xff] }
 0xab4   :  { %11306 = vmatprep.subr.bf16.mxu0 %v15770_v46  ;;  %v11319_v58 = vpack.c.bf16 %v2910_v42, %v2909_v62  ;;  %v2914_v54 = vmul.f32 %v11900_v44, %v11898_v4  ;;  %v3422_v53 = vpop.trf.xlu0  ;;  %v415_v28 = vadd.f32 %v15814_v60, %v12759_v7  ;;  %v421_v4 = vadd.f32 %v15815_v2, %v12721_v27 }
 0xab5   :  { %v11322_v22 = vpack.c.bf16 %v2912_v5, %v2911_v6 }
 0xab6   :  { %v11325_v63 = vpack.c.bf16 %v2914_v54, %v2913_v12 }
 0xab7   :  { %11308 = vmatpush3.bf16.msra.mxu0 %v11307_v15 }
 0xab8   :  { %11309 = vmatprep.subr.bf16.mxu0 %v15770_v46  ;;  %v3423_v18 = vpop.trf.xlu0 }
 0xabb   :  { %11311 = vmatpush3.bf16.msra.mxu0 %v11310_v1 }
 0xabc   :  { %11312 = vmatprep.subr.bf16.mxu0 %v15770_v46  ;;  %v3424_v47 = vpop.trf.xlu0 }
 0xabf   :  { %11314 = vmatpush3.bf16.msra.mxu0 %v11313_v8 }
 0xac0   :  { %11315 = vmatprep.subr.bf16.mxu0 %v15770_v46  ;;  %v3425_v29 = vpop.trf.xlu0 }
 0xac3   :  { %11317 = vmatpush3.bf16.msra.mxu0 %v11316_v35 }
 0xac4   :  { %11318 = vmatprep.subr.bf16.mxu0 %v15770_v46  ;;  %v3426_v44 = vpop.trf.xlu0 }
 0xac7   :  { %11320 = vmatpush3.bf16.msra.mxu0 %v11319_v58 }
 0xac8   :  { %11321 = vmatprep.subr.bf16.mxu0 %v15770_v46  ;;  %v3427_v27 = vpop.trf.xlu0 }
 0xacb   :  { %11323 = vmatpush3.bf16.msra.mxu0 %v11322_v22 }
 0xacc   :  { %11324 = vmatprep.subr.bf16.mxu0 %v15770_v46  ;;  %v3428_v7 = vpop.trf.xlu0 }
 0xacf   :  { %11326 = vmatpush3.bf16.msra.mxu0 %v11325_v63 }
 0xad0   :  { %10565 = vmatprep.subr.mxu0 %v415_v28 }
 0xad2   :  { %10563 = vmatmul.mubr.f32.vlgmr.msra.gmra.mrb[60].mxu0 %v15816_v23 }
 0xad3   :  { %10566 = vmatpush3.msra.mxu0 %v415_v28  ;;  %10567 = vmatprep.mubr.msk.f32.mxu0 %vm503_vm1, %v15817_v41 }
 0xad4   :  { %10626 = vmatprep.subr.mxu0 %v421_v4 }
 0xad6   :  { %10568 = vmatmul.mubr.msk.f32.vlgmr.msra.gmra.mrb[62].mxu0 %vm503_vm1, %v13520_v57  ;;  %v3429_v57 = vpop.trf.xlu0 }
 0xad7   :  { %10627 = vmatpush3.msra.mxu0 %v421_v4  ;;  %10570 = vmatprep.mubr.msk.f32.mxu0 %vm503_vm1, %v13522_v55 }
 0xad8   :  { %11351 = vmatprep.subr.bf16.mxu0 %v15770_v46 }
 0xada   :  { %10571 = vmatmul.mubr.msk.f32.gmra.mrb[64].mxu0 %vm503_vm1, %v13533_v33  ;;  %v3430_v55 = vpop.trf.xlu0 }
 0xadb   :  { %10573 = vmatprep.mubr.msk.f32.mxu0 %vm503_vm1, %v13559_v52 }
 0xade   :  { %10574 = vmatmul.mubr.msk.f32.gmra.mrb[66].mxu0 %vm503_vm1, %v13561_v13  ;;  %v3431_v33 = vpop.trf.xlu0 }
 0xadf   :  { %10576 = vmatprep.mubr.msk.f32.mxu0 %vm503_vm1, %v13571_v37 }
 0xae2   :  { %10577 = vmatmul.mubr.msk.f32.gmra.mrb[68].mxu0 %vm503_vm1, %v13574_v32  ;;  %v3432_v52 = vpop.trf.xlu0 }
 0xae3   :  { %10579 = vmatprep.mubr.msk.f32.mxu0 %vm503_vm1, %v13576_v10 }
 0xae6   :  { %10580 = vmatmul.mubr.msk.f32.gmra.mrb[70].mxu0 %vm503_vm1, %v13578_v30  ;;  %v3433_v13 = vpop.trf.xlu0 }
 0xae7   :  { %10582 = vmatprep.mubr.msk.f32.mxu0 %vm503_vm1, %v13580_v51 }
 0xaea   :  { %10583 = vmatmul.mubr.msk.f32.gmra.mrb[72].mxu0 %vm503_vm1, %v13582_v0  ;;  %v3434_v37 = vpop.trf.xlu0 }
 0xaeb   :  { %10585 = vmatprep.mubr.msk.f32.mxu0 %vm503_vm1, %v13584_v31 }
 0xaee   :  { %10586 = vmatmul.mubr.msk.f32.gmra.mrb[74].mxu0 %vm503_vm1, %v13586_v43  ;;  %v3435_v32 = vpop.trf.xlu0 }
 0xaef   :  { %10588 = vmatprep.mubr.msk.f32.mxu0 %vm503_vm1, %v13588_v11 }
 0xaf2   :  { %10589 = vmatmul.mubr.msk.f32.gmra.mrb[76].mxu0 %vm503_vm1, %v13593_v49  ;;  %v3436_v10 = vpop.trf.xlu0 }
 0xaf3   :  { %10628 = vmatprep.mubr.msk.f32.mxu0 %vm503_vm1, %v3421_v16 }
 0xaf6   :  { %10629 = vmatmul.mubr.msk.f32.vlgmr.msra.gmra.mrb[78].mxu0 %vm503_vm1, %v3422_v53 }
 0xaf7   :  { %10631 = vmatprep.mubr.msk.f32.mxu0 %vm503_vm1, %v3423_v18 }
 0xafa   :  { %10632 = vmatmul.mubr.msk.f32.gmra.mrb[80].mxu0 %vm503_vm1, %v3424_v47 }
 0xafb   :  { %10634 = vmatprep.mubr.msk.f32.mxu0 %vm503_vm1, %v3425_v29 }
 0xafe   :  { %10635 = vmatmul.mubr.msk.f32.gmra.mrb[82].mxu0 %vm503_vm1, %v3426_v44 }
 0xaff   :  { %10637 = vmatprep.mubr.msk.f32.mxu0 %vm503_vm1, %v3427_v27 }
 0xb02   :  { %10638 = vmatmul.mubr.msk.f32.gmra.mrb[84].mxu0 %vm503_vm1, %v3428_v7 }
 0xb03   :  { %10640 = vmatprep.mubr.msk.f32.mxu0 %vm503_vm1, %v3429_v57 }
 0xb06   :  { %10641 = vmatmul.mubr.msk.f32.gmra.mrb[86].mxu0 %vm503_vm1, %v3430_v55 }
 0xb07   :  { %10643 = vmatprep.mubr.msk.f32.mxu0 %vm503_vm1, %v3431_v33 }
 0xb0a   :  { %10644 = vmatmul.mubr.msk.f32.gmra.mrb[88].mxu0 %vm503_vm1, %v3432_v52 }
 0xb0b   :  { %10646 = vmatprep.mubr.msk.f32.mxu0 %vm503_vm1, %v3433_v13 }
 0xb0e   :  { %10647 = vmatmul.mubr.msk.f32.gmra.mrb[90].mxu0 %vm503_vm1, %v3434_v37 }
 0xb0f   :  { %10649 = vmatprep.mubr.msk.f32.mxu0 %vm503_vm1, %v3435_v32 }
 0xb12   :  { %10650 = vmatmul.mubr.msk.f32.gmra.mrb[92].mxu0 %vm503_vm1, %v3436_v10 }
 0xb13   :  { %10684 = vmatprep.mubr.msk.f32.mxu0 %vm12260_vm2, %v15752_v24 }
 0xba5   :  { %v13658_v30 = vpop.f32.mrb[60].mxu0 }
 0xba6   :  { %v11375_v51 = vpack.c.bf16 %v13658_v30, %v13473_v38  ;;  %v10564_v0 = vpop.f32.mrb[61].mxu0  ;;  %v3848_v30 = vpop.permute.xlu0 %3847 }
 0xba9   :  { %v10569_v31 = vpop.f32.mrb[62].mxu0 }
 0xbaa   :  { %v3132_v43 = vpop.f32.mrb[63].mxu0  ;;  %v13662_v14 = vmul.f32 0.35355338, %v10569_v31 }
 0xbab   :  { %v13666_v48 = vmul.f32 0.35355338, %v3132_v43 }
 0xbad   :  { %v10572_v11 = vpop.f32.mrb[64].mxu0 }
 0xbae   :  { %v3142_v56 = vpop.f32.mrb[65].mxu0  ;;  %v13674_v15 = vmul.f32 0.35355338, %v10572_v11 }
 0xbaf   :  { %v13678_v1 = vmul.f32 0.35355338, %v3142_v56 }
 0xbb1   :  { %v10575_v40 = vpop.f32.mrb[66].mxu0 }
 0xbb2   :  { %v13664_v19 = vmul.f32 0.35355338, %v10575_v40  ;;  %v3152_v3 = vpop.f32.mrb[67].mxu0 }
 0xbb3   :  { %v13668_v61 = vmul.f32 0.35355338, %v3152_v3 }
 0xbb4   :  { %v3228_v21 = vmax.f32 %v13662_v14, %v13664_v19 }
 0xbb5   :  { %v3227_v49 = vmax.f32 %v13666_v48, %v13668_v61  ;;  %v10578_v36 = vpop.f32.mrb[68].mxu0 }
 0xbb6   :  { %v13676_v39 = vmul.f32 0.35355338, %v10578_v36  ;;  %v3162_v34 = vpop.f32.mrb[69].mxu0 }
 0xbb7   :  { %v13680_v8 = vmul.f32 0.35355338, %v3162_v34 }
 0xbb8   :  { %v3230_v62 = vmax.f32 %v13674_v15, %v13676_v39 }
 0xbb9   :  { %v3229_v42 = vmax.f32 %v13678_v1, %v13680_v8  ;;  %v10581_v35 = vpop.f32.mrb[70].mxu0 }
 0xbba   :  { %v13686_v6 = vmul.f32 0.35355338, %v10581_v35  ;;  %v3172_v5 = vpop.f32.mrb[71].mxu0 }
 0xbbb   :  { %v13688_v12 = vmul.f32 0.35355338, %v3172_v5 }
 0xbbc   :  { %v3232_v58 = vmax.f32 %v3228_v21, %v13686_v6 }
 0xbbd   :  { %v3231_v54 = vmax.f32 %v3227_v49, %v13688_v12  ;;  %v10584_v22 = vpop.f32.mrb[72].mxu0 }
 0xbbe   :  { %v13692_v63 = vmul.f32 0.35355338, %v10584_v22  ;;  %v3182_v16 = vpop.f32.mrb[73].mxu0 }
 0xbbf   :  { %v13694_v53 = vmul.f32 0.35355338, %v3182_v16 }
 0xbc0   :  { %v3234_v18 = vmax.f32 %v3230_v62, %v13692_v63 }
 0xbc1   :  { %v3233_v47 = vmax.f32 %v3229_v42, %v13694_v53  ;;  %v10587_v60 = vpop.f32.mrb[74].mxu0 }
 0xbc2   :  { %v13698_v28 = vmul.f32 0.35355338, %v10587_v60  ;;  %v3192_v29 = vpop.f32.mrb[75].mxu0 }
 0xbc3   :  { %v13700_v2 = vmul.f32 0.35355338, %v3192_v29 }
 0xbc4   :  { %v3236_v4 = vmax.f32 %v3232_v58, %v13698_v28 }
 0xbc5   :  { %v3235_v23 = vmax.f32 %v3231_v54, %v13700_v2  ;;  %v10590_v41 = vpop.f32.mrb[76].mxu0 }
 0xbc6   :  { %v13704_v44 = vmul.f32 0.35355338, %v10590_v41  ;;  %v3202_v27 = vpop.f32.mrb[77].mxu0 }
 0xbc7   :  { %v3239_v7 = vmax.f32 %v3235_v23, %v3236_v4  ;;  %v13706_v57 = vmul.f32 0.35355338, %v3202_v27 }
 0xbc8   :  { %v3238_v55 = vmax.f32 %v3234_v18, %v13704_v44 }
 0xbc9   :  { %v3237_v33 = vmax.f32 %v3233_v47, %v13706_v57  ;;  %v10630_v52 = vpop.f32.mrb[78].mxu0 }
 0xbca   :  { %v3551_v13 = vpop.f32.mrb[79].mxu0  ;;  %v13710_v56 = vmul.f32 0.35355338, %v10630_v52 }
 0xbcb   :  { %v3240_v37 = vmax.f32 %v3237_v33, %v3238_v55  ;;  %v13714_v49 = vmul.f32 0.35355338, %v3551_v13 }
 0xbcd   :  { %v3241_v32 = vmax.f32 %v3239_v7, %v3240_v37  ;;  %v10633_v10 = vpop.f32.mrb[80].mxu0 }
 0xbce   :  { %v3561_v0 = vpop.f32.mrb[81].mxu0  ;;  %v13722_v5 = vmul.f32 0.35355338, %v10633_v10 }
 0xbcf   :  { %v3242_v31 = vrot.slane %v3241_v32, 4  ;;  %v13726_v16 = vmul.f32 0.35355338, %v3561_v0 }
 0xbd1   :  { %v3243_v43 = vmax.f32 %v3241_v32, %v3242_v31  ;;  %v10636_v11 = vpop.f32.mrb[82].mxu0 }
 0xbd2   :  { %v13712_v40 = vmul.f32 0.35355338, %v10636_v11  ;;  %v3571_v3 = vpop.f32.mrb[83].mxu0 }
 0xbd3   :  { %v3244_v21 = vrot.slane %v3243_v43, 2  ;;  %v13716_v36 = vmul.f32 0.35355338, %v3571_v3 }
 0xbd4   :  { %v3647_v34 = vmax.f32 %v13710_v56, %v13712_v40 }
 0xbd5   :  { %v3245_v62 = vmax.f32 %v3243_v43, %v3244_v21  ;;  %v3646_v42 = vmax.f32 %v13714_v49, %v13716_v36  ;;  %v10639_v35 = vpop.f32.mrb[84].mxu0 }
 0xbd6   :  { %v13724_v58 = vmul.f32 0.35355338, %v10639_v35  ;;  %v3581_v54 = vpop.f32.mrb[85].mxu0 }
 0xbd7   :  { %v3246_v22 = vrot.slane %v3245_v62, 1  ;;  %v13728_v18 = vmul.f32 0.35355338, %v3581_v54 }
 0xbd8   :  { %v3649_v47 = vmax.f32 %v13722_v5, %v13724_v58 }
 0xbd9   :  { %v13732_v60 = vmax.f32 %v3245_v62, %v3246_v22  ;;  %v3648_v29 = vmax.f32 %v13726_v16, %v13728_v18  ;;  %v10642_v4 = vpop.f32.mrb[86].mxu0 }
 0xbda   :  { %v13736_v23 = vmul.f32 0.35355338, %v10642_v4  ;;  %v3591_v41 = vpop.f32.mrb[87].mxu0 }
 0xbdb   :  { %v3248_v27 = vsub.f32 %v13666_v48, %v13732_v60  ;;  %v3249_v7 = vsub.f32 %v13662_v14, %v13732_v60  ;;  %v3250_v55 = vsub.f32 %v13678_v1, %v13732_v60  ;;  %v3251_v33 = vsub.f32 %v13674_v15, %v13732_v60 }
 0xbdc   :  { %v3252_v52 = vsub.f32 %v13668_v61, %v13732_v60  ;;  %v3253_v13 = vsub.f32 %v13664_v19, %v13732_v60  ;;  %v3254_v37 = vsub.f32 %v13680_v8, %v13732_v60  ;;  %v3255_v48 = vsub.f32 %v13676_v39, %v13732_v60 }
 0xbdd   :  { %v3256_v14 = vsub.f32 %v13688_v12, %v13732_v60  ;;  %v3257_v1 = vsub.f32 %v13686_v6, %v13732_v60  ;;  %v3258_v15 = vsub.f32 %v13694_v53, %v13732_v60  ;;  %v3259_v61 = vsub.f32 %v13692_v63, %v13732_v60  ;;  %v10645_v32 = vpop.f32.mrb[88].mxu0 }
 0xbde   :  { %v3260_v19 = vsub.f32 %v13700_v2, %v13732_v60  ;;  %v3261_v8 = vsub.f32 %v13698_v28, %v13732_v60  ;;  %v3262_v39 = vsub.f32 %v13706_v57, %v13732_v60  ;;  %v3263_v12 = vsub.f32 %v13704_v44, %v13732_v60  ;;  %v3601_v6 = vpop.f32.mrb[89].mxu0 }
 0xbdf   :  { %v3264_v10 = vmul.f32 1.442695, %v3248_v27  ;;  %v3266_v0 = vmul.f32 1.442695, %v3249_v7  ;;  %v3651_v53 = vmax.f32 %v3647_v34, %v13736_v23  ;;  %v3268_v31 = vmul.f32 1.442695, %v3250_v55 }
 0xbe0   :  { %v3270_v63 = vmul.f32 1.442695, %v3251_v33  ;;  %v3272_v2 = vmul.f32 1.442695, %v3252_v52  ;;  %v13771_v43 = vmul.f32 0.35355338, %v3591_v41 }
 0xbe1   :  { %11901 = vpow2.f32 %v3264_v10  ;;  %v13773_v11 = vmul.f32 0.35355338, %v10645_v32  ;;  %v3274_v3 = vmul.f32 1.442695, %v3253_v13  ;;  %v13775_v21 = vmul.f32 0.35355338, %v3601_v6 }
 0xbe2   :  { %11903 = vpow2.f32 %v3266_v0  ;;  %v10648_v62 = vpop.f32.mrb[90].mxu0  ;;  %v3650_v35 = vmax.f32 %v3646_v42, %v13771_v43  ;;  %v3276_v7 = vmul.f32 1.442695, %v3254_v37  ;;  %v3280_v37 = vmul.f32 1.442695, %v3256_v14 }
 0xbe3   :  { %11905 = vpow2.f32 %v3268_v31  ;;  %v3653_v54 = vmax.f32 %v3649_v47, %v13773_v11  ;;  %v13779_v34 = vmul.f32 0.35355338, %v10648_v62  ;;  %v3611_v22 = vpop.f32.mrb[91].mxu0  ;;  %v3652_v4 = vmax.f32 %v3648_v29, %v13775_v21 }
 0xbe4   :  { %11907 = vpow2.f32 %v3270_v63  ;;  %v13782_v27 = vmul.f32 0.35355338, %v3611_v22  ;;  %v3278_v47 = vmul.f32 1.442695, %v3255_v48  ;;  %v3286_v14 = vmul.f32 1.442695, %v3259_v61 }
 0xbe5   :  { %v10651_v41 = vpop.f32.mrb[92].mxu0  ;;  %11909 = vpow2.f32 %v3272_v2  ;;  %v3655_v55 = vmax.f32 %v3651_v53, %v13779_v34  ;;  %v3282_v2 = vmul.f32 1.442695, %v3257_v1  ;;  %v3288_v1 = vmul.f32 1.442695, %v3260_v19 }
 0xbe6   :  { %v13785_v33 = vmul.f32 0.35355338, %v10651_v41  ;;  %v3621_v52 = vpop.f32.mrb[93].mxu0  ;;  %v3654_v13 = vmax.f32 %v3650_v35, %v13782_v27  ;;  %11911 = vpow2.f32 %v3274_v3  ;;  %v3284_v35 = vmul.f32 1.442695, %v3258_v15 }
 0xbe7   :  { %v13788_v42 = vmul.f32 0.35355338, %v3621_v52  ;;  %11913 = vpow2.f32 %v3276_v7  ;;  %v3290_v15 = vmul.f32 1.442695, %v3261_v8  ;;  %v3292_v61 = vmul.f32 1.442695, %v3262_v39 }
 0xbe8   :  { %v3657_v32 = vmax.f32 %v3653_v54, %v13785_v33  ;;  %v3658_v29 = vmax.f32 %v3654_v13, %v3655_v55  ;;  %11915 = vpow2.f32 %v3278_v47  ;;  %v3294_v19 = vmul.f32 1.442695, %v3263_v12 }
 0xbe9   :  { %v3656_v10 = vmax.f32 %v3652_v4, %v13788_v42  ;;  %11917 = vpow2.f32 %v3280_v37 }
 0xbea   :  { %11919 = vpow2.f32 %v3282_v2 }
 0xbeb   :  { %v13791_v6 = vpop.eup %11901  ;;  %v3659_v31 = vmax.f32 %v3656_v10, %v3657_v32  ;;  %11921 = vpow2.f32 %v3284_v35 }
 0xbec   :  { %v13794_v0 = vpop.eup %11903  ;;  %11923 = vpow2.f32 %v3286_v14 }
 0xbed   :  { %v3296_v53 = vadd.f32 %v13794_v0, %v13791_v6  ;;  %v13798_v63 = vpop.eup %11905  ;;  %v3660_v3 = vmax.f32 %v3658_v29, %v3659_v31  ;;  %11925 = vpow2.f32 %v3288_v1 }
 0xbee   :  { %v13801_v62 = vpop.eup %11907  ;;  %11927 = vpow2.f32 %v3290_v15 }
 0xbef   :  { %v3297_v48 = vadd.f32 %v13798_v63, %v3296_v53  ;;  %v3661_v22 = vrot.slane %v3660_v3, 4  ;;  %v13804_v4 = vpop.eup %11909  ;;  %11929 = vpow2.f32 %v3292_v61 }
 0xbf0   :  { %v13807_v55 = vpop.eup %11911  ;;  %11931 = vpow2.f32 %v3294_v19 }
 0xbf1   :  { %v3298_v54 = vadd.f32 %v13801_v62, %v3297_v48  ;;  %v3662_v7 = vmax.f32 %v3660_v3, %v3661_v22  ;;  %v13810_v47 = vpop.eup %11913 }
 0xbf2   :  { %v13819_v10 = vpop.eup %11915 }
 0xbf3   :  { %v3299_v41 = vadd.f32 %v13804_v4, %v3298_v54  ;;  %v3663_v13 = vrot.slane %v3662_v7, 2  ;;  %v13825_v31 = vpop.eup %11917 }
 0xbf4   :  { %v13830_v8 = vpop.eup %11919 }
 0xbf5   :  { %v3300_v52 = vadd.f32 %v13807_v55, %v3299_v41  ;;  %v3664_v29 = vmax.f32 %v3662_v7, %v3663_v13  ;;  %v13839_v2 = vpop.eup %11921 }
 0xbf6   :  { %v13856_v22 = vpop.eup %11923 }
 0xbf7   :  { %v3301_v32 = vadd.f32 %v13810_v47, %v3300_v52  ;;  %v3665_v53 = vrot.slane %v3664_v29, 1  ;;  %v13871_v7 = vpop.eup %11925 }
 0xbf9   :  { %v3302_v37 = vadd.f32 %v13819_v10, %v3301_v32  ;;  %v13828_v57 = vmax.f32 %v3664_v29, %v3665_v53 }
 0xbfb   :  { %v3303_v28 = vadd.f32 %v13825_v31, %v3302_v37  ;;  %v3667_v44 = vsub.f32 %v13714_v49, %v13828_v57  ;;  %v3668_v60 = vsub.f32 %v13710_v56, %v13828_v57  ;;  %v3669_v12 = vsub.f32 %v13726_v16, %v13828_v57 }
 0xbfc   :  { %v3670_v48 = vsub.f32 %v13722_v5, %v13828_v57  ;;  %v3671_v3 = vsub.f32 %v13716_v36, %v13828_v57  ;;  %v3672_v35 = vsub.f32 %v13712_v40, %v13828_v57  ;;  %v3673_v49 = vsub.f32 %v13728_v18, %v13828_v57 }
 0xbfd   :  { %v3304_v39 = vadd.f32 %v13830_v8, %v3303_v28  ;;  %v3674_v56 = vsub.f32 %v13724_v58, %v13828_v57  ;;  %v3675_v16 = vsub.f32 %v13771_v43, %v13828_v57  ;;  %v3676_v5 = vsub.f32 %v13736_v23, %v13828_v57 }
 0xbfe   :  { %v3677_v36 = vsub.f32 %v13775_v21, %v13828_v57  ;;  %v3678_v40 = vsub.f32 %v13773_v11, %v13828_v57  ;;  %v3679_v18 = vsub.f32 %v13782_v27, %v13828_v57  ;;  %v3680_v58 = vsub.f32 %v13779_v34, %v13828_v57  ;;  %v13874_v27 = vpop.eup %11927 }
 0xbff   :  { %v3305_v54 = vadd.f32 %v13839_v2, %v3304_v39  ;;  %v3681_v43 = vsub.f32 %v13788_v42, %v13828_v57  ;;  %v3682_v23 = vsub.f32 %v13785_v33, %v13828_v57  ;;  %v3683_v41 = vmul.f32 1.442695, %v3667_v44  ;;  %v13876_v52 = vpop.eup %11929 }
 0xc00   :  { %v3685_v21 = vmul.f32 1.442695, %v3668_v60  ;;  %v3687_v1 = vmul.f32 1.442695, %v3669_v12  ;;  %v3689_v34 = vmul.f32 1.442695, %v3670_v48  ;;  %v13879_v42 = vpop.eup %11931 }
 0xc01   :  { %v3306_v14 = vadd.f32 %v13856_v22, %v3305_v54  ;;  %11933 = vpow2.f32 %v3683_v41  ;;  %v3691_v33 = vmul.f32 1.442695, %v3671_v3  ;;  %v3693_v61 = vmul.f32 1.442695, %v3672_v35 }
 0xc02   :  { %11935 = vpow2.f32 %v3685_v21  ;;  %v3695_v29 = vmul.f32 1.442695, %v3673_v49  ;;  %v3697_v37 = vmul.f32 1.442695, %v3674_v56  ;;  %v3699_v39 = vmul.f32 1.442695, %v3675_v16 }
 0xc03   :  { %v3307_v11 = vadd.f32 %v13871_v7, %v3306_v14  ;;  %11937 = vpow2.f32 %v3687_v1  ;;  %v3701_v48 = vmul.f32 1.442695, %v3676_v5  ;;  %v3703_v54 = vmul.f32 1.442695, %v3677_v36 }
 0xc04   :  { %11939 = vpow2.f32 %v3689_v34  ;;  %v3705_v16 = vmul.f32 1.442695, %v3678_v40  ;;  %v3707_v5 = vmul.f32 1.442695, %v3679_v18  ;;  %v3709_v36 = vmul.f32 1.442695, %v3680_v58 }
 0xc05   :  { %v3308_v13 = vadd.f32 %v13874_v27, %v3307_v11  ;;  %11941 = vpow2.f32 %v3691_v33  ;;  %v3711_v40 = vmul.f32 1.442695, %v3681_v43 }
 0xc06   :  { %11943 = vpow2.f32 %v3693_v61 }
 0xc07   :  { %v3309_v15 = vadd.f32 %v13876_v52, %v3308_v13  ;;  %11945 = vpow2.f32 %v3695_v29  ;;  %v3713_v29 = vmul.f32 1.442695, %v3682_v23 }
 0xc08   :  { %11947 = vpow2.f32 %v3697_v37 }
 0xc09   :  { %v3310_v32 = vadd.f32 %v13879_v42, %v3309_v15  ;;  %11949 = vpow2.f32 %v3699_v39 }
 0xc0a   :  { %11951 = vpow2.f32 %v3701_v48 }
 0xc0b   :  { %v3311_v19 = vrot.slane %v3310_v32, 4  ;;  %v13883_v53 = vpop.eup %11933  ;;  %11953 = vpow2.f32 %v3703_v54 }
 0xc0c   :  { %v13885_v57 = vpop.eup %11935 }
 0xc0d   :  { %v3312_v28 = vadd.f32 %v3311_v19, %v3310_v32  ;;  %v3715_v60 = vadd.f32 %v13885_v57, %v13883_v53  ;;  %v13889_v12 = vpop.eup %11937 }
 0xc0e   :  { %v13892_v49 = vpop.eup %11939 }
 0xc0f   :  { %v3313_v44 = vrot.slane %v3312_v28, 2  ;;  %v3716_v35 = vadd.f32 %v13889_v12, %v3715_v60  ;;  %v13895_v41 = vpop.eup %11941 }
 0xc10   :  { %v13898_v11 = vpop.eup %11943 }
 0xc11   :  { %v3314_v3 = vadd.f32 %v3313_v44, %v3312_v28  ;;  %v3717_v14 = vadd.f32 %v13892_v49, %v3716_v35  ;;  %v13901_v13 = vpop.eup %11945 }
 0xc12   :  { %v13904_v15 = vpop.eup %11947 }
 0xc13   :  { %v3315_v56 = vrot.slane %v3314_v3, 1  ;;  %v3718_v1 = vadd.f32 %v13895_v41, %v3717_v14  ;;  %v13907_v32 = vpop.eup %11949 }
 0xc14   :  { %v13910_v19 = vpop.eup %11951 }
 0xc15   :  { %v3316_v21 = vadd.f32 %v3315_v56, %v3314_v3  ;;  %v3719_v34 = vadd.f32 %v13898_v11, %v3718_v1  ;;  %v13913_v58 = vpop.eup %11953 }
 0xc17   :  { %11955 = vrcp.f32 %v3316_v21  ;;  %v3720_v33 = vadd.f32 %v13901_v13, %v3719_v34 }
 0xc18   :  { %11957 = vpow2.f32 %v3705_v16 }
 0xc19   :  { %11959 = vpow2.f32 %v3707_v5  ;;  %v3721_v61 = vadd.f32 %v13904_v15, %v3720_v33 }
 0xc1a   :  { %11961 = vpow2.f32 %v3709_v36 }
 0xc1b   :  { %v3722_v18 = vadd.f32 %v13907_v32, %v3721_v61  ;;  %11963 = vpow2.f32 %v3711_v40 }
 0xc1c   :  { %11965 = vpow2.f32 %v3713_v29 }
 0xc1d   :  { %v3723_v37 = vadd.f32 %v13910_v19, %v3722_v18 }
 0xc1f   :  { %v3724_v39 = vadd.f32 %v13913_v58, %v3723_v37 }
 0xc21   :  { %v11956_v28 = vpop.eup %11955 }
 0xc22   :  { %v13916_v43 = vpop.eup %11957  ;;  %v3318_v44 = vmul.f32 %v11956_v28, %v13791_v6  ;;  %v3319_v60 = vmul.f32 %v11956_v28, %v13794_v0  ;;  %v3320_v23 = vmul.f32 %v11956_v28, %v13798_v63  ;;  %v3321_v48 = vmul.f32 %v11956_v28, %v13801_v62 }
 0xc23   :  { %v3725_v3 = vadd.f32 %v13916_v43, %v3724_v39  ;;  %v3322_v35 = vmul.f32 %v11956_v28, %v13804_v4  ;;  %v3323_v54 = vmul.f32 %v11956_v28, %v13807_v55  ;;  %v3324_v56 = vmul.f32 %v11956_v28, %v13810_v47  ;;  %v13926_v14 = vpop.eup %11959 }
 0xc24   :  { %v11328_v16 = vpack.c.bf16 %v3319_v60, %v3318_v44  ;;  %v11331_v21 = vpack.c.bf16 %v3321_v48, %v3320_v23  ;;  %v3325_v6 = vmul.f32 %v11956_v28, %v13819_v10  ;;  %v3326_v0 = vmul.f32 %v11956_v28, %v13825_v31  ;;  %v11962_v4 = vpop.eup %11961  ;;  %v15818_v60 = vld [vmem:[#allocation17_spill] sm:$0xff] }
 0xc25   :  { %v3726_v63 = vadd.f32 %v13926_v14, %v3725_v3  ;;  %v11334_v1 = vpack.c.bf16 %v3323_v54, %v3322_v35  ;;  %v3327_v62 = vmul.f32 %v11956_v28, %v13830_v8  ;;  %v3328_v5 = vmul.f32 %v11956_v28, %v13839_v2  ;;  %v11964_v8 = vpop.eup %11963 }
 0xc26   :  { %11329 = vmatpush3.bf16.msra.mxu1 %v11328_v16  ;;  %v11337_v55 = vpack.c.bf16 %v3325_v6, %v3324_v56  ;;  %v3329_v47 = vmul.f32 %v11956_v28, %v13856_v22  ;;  %v3330_v34 = vmul.f32 %v11956_v28, %v13871_v7  ;;  %v3331_v36 = vmul.f32 %v11956_v28, %v13874_v27  ;;  %v11966_v37 = vpop.eup %11965 }
 0xc27   :  { %v3727_v33 = vadd.f32 %v11962_v4, %v3726_v63  ;;  %11330 = vmatprep.subr.bf16.mxu1 %v15770_v46  ;;  %v11340_v10 = vpack.c.bf16 %v3327_v62, %v3326_v0  ;;  %v3332_v31 = vmul.f32 %v11956_v28, %v13876_v52  ;;  %v3333_v40 = vmul.f32 %v11956_v28, %v13879_v42 }
 0xc28   :  { %v11343_v61 = vpack.c.bf16 %v3329_v47, %v3328_v5  ;;  %v11346_v2 = vpack.c.bf16 %v3331_v36, %v3330_v34  ;;  %v463_v23 = vadd.f32 %v15818_v60, %v12681_v59  ;;  %v15824_v60 = vld [vmem:[#allocation7_spill] sm:$0xff] }
 0xc29   :  { %v3728_v29 = vadd.f32 %v11964_v8, %v3727_v33  ;;  %v11349_v18 = vpack.c.bf16 %v3333_v40, %v3332_v31  ;;  %v3858_v31 = vpop.permute.xlu1 %3857 }
 0xc2a   :  { %11332 = vmatpush3.bf16.msra.mxu1 %v11331_v21 }
 0xc2b   :  { %v3729_v22 = vadd.f32 %v11966_v37, %v3728_v29  ;;  %11333 = vmatprep.subr.bf16.mxu1 %v15770_v46  ;;  %v15821_v29 = vld [vmem:[#allocation6_spill] sm:$0xff] }
 0xc2d   :  { %v3730_v7 = vrot.slane %v3729_v22, 4 }
 0xc2e   :  { %11335 = vmatpush3.bf16.msra.mxu1 %v11334_v1 }
 0xc2f   :  { %v3731_v27 = vadd.f32 %v3730_v7, %v3729_v22  ;;  %11336 = vmatprep.subr.bf16.mxu1 %v15770_v46  ;;  %v15822_v22 = vld [vmem:[#allocation3_spill] sm:$0xff] }
 0xc31   :  { %v3732_v39 = vrot.slane %v3731_v27, 2 }
 0xc32   :  { %11338 = vmatpush3.bf16.msra.mxu1 %v11337_v55 }
 0xc33   :  { %v3733_v52 = vadd.f32 %v3732_v39, %v3731_v27  ;;  %11339 = vmatprep.subr.bf16.mxu1 %v15770_v46 }
 0xc35   :  { %v3734_v42 = vrot.slane %v3733_v52, 1 }
 0xc36   :  { %11341 = vmatpush3.bf16.msra.mxu1 %v11340_v10 }
 0xc37   :  { %v3735_v28 = vadd.f32 %v3734_v42, %v3733_v52  ;;  %11342 = vmatprep.subr.bf16.mxu1 %v15770_v46  ;;  %v15823_v52 = vld [vmem:[#allocation5_spill] sm:$0xff] }
 0xc39   :  { %11967 = vrcp.f32 %v3735_v28 }
 0xc3a   :  { %11344 = vmatpush3.bf16.msra.mxu1 %v11343_v61  ;;  %v15820_v61 = vld [vmem:[#allocation4_spill] sm:$0xff] }
 0xc3b   :  { %11345 = vmatprep.subr.bf16.mxu1 %v15770_v46 }
 0xc3e   :  { %11347 = vmatpush3.bf16.msra.mxu1 %v11346_v2 }
 0xc3f   :  { %11348 = vmatprep.subr.bf16.mxu1 %v15770_v46 }
 0xc42   :  { %11350 = vmatpush3.bf16.msra.mxu1 %v11349_v18 }
 0xc43   :  { %v11968_v44 = vpop.eup %11967 }
 0xc44   :  { %v3737_v48 = vmul.f32 %v11968_v44, %v13883_v53  ;;  %v3738_v3 = vmul.f32 %v11968_v44, %v13885_v57  ;;  %v3739_v35 = vmul.f32 %v11968_v44, %v13889_v12  ;;  %v3740_v54 = vmul.f32 %v11968_v44, %v13892_v49 }
 0xc45   :  { %10624 = vmatmul.mubr.f32.vlgmr.msra.gmra.mrb[70].mxu1 %v463_v23  ;;  %v3741_v56 = vmul.f32 %v11968_v44, %v13895_v41  ;;  %v3742_v16 = vmul.f32 %v11968_v44, %v13898_v11  ;;  %v3743_v21 = vmul.f32 %v11968_v44, %v13901_v13  ;;  %v3744_v6 = vmul.f32 %v11968_v44, %v13904_v15 }
 0xc46   :  { %v11352_v0 = vpack.c.bf16 %v3738_v3, %v3737_v48  ;;  %v11355_v63 = vpack.c.bf16 %v3740_v54, %v3739_v35  ;;  %v3745_v59 = vmul.f32 %v11968_v44, %v13907_v32  ;;  %v3746_v53 = vmul.f32 %v11968_v44, %v13910_v19  ;;  %4329 = vmatprep.mubr.f32.mxu1 %v15752_v24  ;;  %v14017_v48 = vpop.permute.xlu1 %4051  ;;  %v15825_v35 = vld [vmem:[#allocation8_spill] sm:$0xff] }
 0xc47   :  { %v11358_v57 = vpack.c.bf16 %v3742_v16, %v3741_v56  ;;  %v11361_v12 = vpack.c.bf16 %v3744_v6, %v3743_v21  ;;  %v3747_v49 = vmul.f32 %v11968_v44, %v13913_v58  ;;  %v3748_v41 = vmul.f32 %v11968_v44, %v13916_v43  ;;  %v15819_v58 = vld [vmem:[#allocation22_spill] sm:$0xff] }
 0xc48   :  { %11353 = vmatpush3.bf16.msra.mxu0 %v11352_v0  ;;  %v11364_v11 = vpack.c.bf16 %v3746_v53, %v3745_v59  ;;  %v3749_v13 = vmul.f32 %v11968_v44, %v13926_v14  ;;  %v3750_v1 = vmul.f32 %v11968_v44, %v11962_v4  ;;  %v3751_v15 = vmul.f32 %v11968_v44, %v11964_v8 }
 0xc49   :  { %11354 = vmatprep.subr.bf16.mxu0 %v15770_v46  ;;  %v11367_v62 = vpack.c.bf16 %v3748_v41, %v3747_v49  ;;  %v3752_v32 = vmul.f32 %v11968_v44, %v11966_v37  ;;  %v469_v43 = vadd.f32 %v15819_v58, %v15798_v20  ;;  %v3824_v20 = vld [vmem:[%s15694_s6] sm:$0xff] }
 0xc4a   :  { %v11370_v5 = vpack.c.bf16 %v3750_v1, %v3749_v13 }
 0xc4b   :  { %v11373_v19 = vpack.c.bf16 %v3752_v32, %v3751_v15 }
 0xc4c   :  { %11356 = vmatpush3.bf16.msra.mxu0 %v11355_v63 }
 0xc4d   :  { %11357 = vmatprep.subr.bf16.mxu0 %v15770_v46 }
 0xc50   :  { %11359 = vmatpush3.bf16.msra.mxu0 %v11358_v57 }
 0xc51   :  { %11360 = vmatprep.subr.bf16.mxu0 %v15770_v46 }
 0xc54   :  { %11362 = vmatpush3.bf16.msra.mxu0 %v11361_v12 }
 0xc55   :  { %11363 = vmatprep.subr.bf16.mxu0 %v15770_v46 }
 0xc58   :  { %11365 = vmatpush3.bf16.msra.mxu0 %v11364_v11  ;;  %v15826_v11 = vld [vmem:[#allocation9_spill] sm:$0xff] }
 0xc59   :  { %11366 = vmatprep.subr.bf16.mxu0 %v15770_v46 }
 0xc5c   :  { %11368 = vmatpush3.bf16.msra.mxu0 %v11367_v62  ;;  %v15827_v62 = vld [vmem:[#allocation10_spill] sm:$0xff] }
 0xc5d   :  { %11369 = vmatprep.subr.bf16.mxu0 %v15770_v46 }
 0xc60   :  { %11371 = vmatpush3.bf16.msra.mxu0 %v11370_v5 }
 0xc61   :  { %11372 = vmatprep.subr.bf16.mxu0 %v15770_v46 }
 0xc64   :  { %11374 = vmatpush3.bf16.msra.mxu0 %v11373_v19 }
 0xc65   :  { %11376 = vmatprep.subr.bf16.mxu0 %v11375_v51 }
 0xc67   :  { %10685 = vmatmul.mubr.f32.vlgmr.msra.gmra.mrb[94].mxu0 %v469_v43  ;;  %v14047_v43 = vpop.permute.xlu1 %4056 }
 0xc68   :  { %11378 = vmatpush1.bf16.msra.mxu0 %v11377_v17  ;;  %3936 = vmatprep.mubr.f32.mxu0 %v15752_v24  ;;  %v3827_v17 = vld [vmem:[%s15694_s6 + $0x18] sm:$0xff] }
 0xd18   :  { %v3400_v14 = vpop.f32.mrb[70].mxu1 }
 0xd19   :  { %v10625_v4 = vpop.f32.mrb[71].mxu1 }
 0xd3a   :  { %v3819_v55 = vpop.f32.mrb[94].mxu0 }
 0xd3b   :  { %v11379_v47 = vpack.c.bf16 %v3819_v55, %v3400_v14  ;;  %v10686_v34 = vpop.f32.mrb[95].mxu0 }
 0xd3d   :  { %11380 = vmatprep.subr.bf16.mxu0 %v11379_v47 }
 0xd3e   :  { %11382 = vmatpush1.bf16.msra.mxu0 %v11381_v26 }
 0xd41   :  { %9387 = vmatmul.mubr.msk.f32.vlgmr.msra.gmra.mrb[96].mxu0 %vm297_vm0, %v3824_v20 }
 0xd42   :  { %3942 = vmatprep.mubr.f32.mxu0 %v15752_v24 }
 0xd45   :  { %9388 = vmatmul.mubr.msk.f32.gmra.mrb[98].mxu0 %vm297_vm0, %v3825_v25 }
 0xd46   :  { %3948 = vmatprep.mubr.f32.mxu0 %v15752_v24 }
 0xd49   :  { %9389 = vmatmul.mubr.msk.f32.gmra.mrb[100].mxu0 %vm297_vm0, %v3826_v45 }
 0xd4a   :  { %3954 = vmatprep.mubr.f32.mxu0 %v15752_v24 }
 0xd4d   :  { %9390 = vmatmul.mubr.msk.f32.gmra.mrb[102].mxu0 %vm297_vm0, %v3827_v17 }
 0xd4e   :  { %4550 = vmatprep.mubr.f32.mxu0 %v15752_v24 }
 0xe14   :  { %v3938_v26 = vpop.f32.mrb[96].mxu0 }
 0xe15   :  { %v3940_v38 = vpop.f32.mrb[97].mxu0  ;;  %v3939_v36 = vadd.f32 %v3938_v26, %v3843_v50 }
 0xe16   :  { %v3941_v40 = vadd.f32 %v3940_v38, %v3843_v50 }
 0xe17   :  { %v14007_v7 = vadd.f32 %v3939_v36, %v15822_v22 }
 0xe18   :  { %v3944_v51 = vpop.f32.mrb[98].mxu0  ;;  %v14010_v42 = vadd.f32 %v3941_v40, %v15823_v52 }
 0xe19   :  { %v3945_v33 = vadd.f32 %v3944_v51, %v3848_v30  ;;  %v3946_v10 = vpop.f32.mrb[99].mxu0  ;;  %v3997_v16 = vmul.f32 %v14007_v7, %v14007_v7 }
 0xe1a   :  { %v3947_v8 = vadd.f32 %v3946_v10, %v3848_v30  ;;  %v3998_v59 = vmul.f32 %v14010_v42, %v14010_v42  ;;  %v4080_v30 = vpop.permute.xlu1 %4079 }
 0xe1b   :  { %v14001_v2 = vadd.f32 %v3945_v33, %v15820_v61 }
 0xe1c   :  { %v14004_v18 = vadd.f32 %v3947_v8, %v15821_v29  ;;  %v3950_v37 = vpop.f32.mrb[100].mxu0 }
 0xe1d   :  { %v3951_v27 = vadd.f32 %v3950_v37, %v3853_v9  ;;  %v3952_v39 = vpop.f32.mrb[101].mxu0  ;;  %v3999_v44 = vmul.f32 %v14001_v2, %v14001_v2  ;;  %v3977_v21 = vadd.f32 %v14001_v2, %v14007_v7 }
 0xe1e   :  { %v3953_v28 = vadd.f32 %v3952_v39, %v3853_v9  ;;  %v4000_v3 = vmul.f32 %v14004_v18, %v14004_v18  ;;  %v3986_v53 = vadd.f32 %v14004_v18, %v14010_v42  ;;  %v4085_v39 = vpop.permute.xlu1 %4084 }
 0xe1f   :  { %v14015_v23 = vadd.f32 %v3951_v27, %v15824_v60  ;;  %v4005_v49 = vadd.f32 %v3999_v44, %v3997_v16 }
 0xe20   :  { %v14022_v54 = vadd.f32 %v3953_v28, %v15825_v35  ;;  %v3956_v56 = vpop.f32.mrb[102].mxu0  ;;  %v4014_v1 = vadd.f32 %v4000_v3, %v3998_v59 }
 0xe21   :  { %v4001_v6 = vmul.f32 %v14015_v23, %v14015_v23  ;;  %v3957_v0 = vadd.f32 %v3956_v56, %v3858_v31  ;;  %v3958_v63 = vpop.f32.mrb[103].mxu0  ;;  %v3978_v41 = vadd.f32 %v3977_v21, %v14015_v23 }
 0xe22   :  { %v4002_v57 = vmul.f32 %v14022_v54, %v14022_v54  ;;  %v3959_v12 = vadd.f32 %v3958_v63, %v3858_v31  ;;  %v3987_v15 = vadd.f32 %v3986_v53, %v14022_v54  ;;  %v4062_v63 = vpop.permute.xlu1 %4061 }
 0xe23   :  { %v14038_v13 = vadd.f32 %v3957_v0, %v15826_v11  ;;  %v4006_v5 = vadd.f32 %v4005_v49, %v4001_v6 }
 0xe24   :  { %v14042_v32 = vadd.f32 %v3959_v12, %v15827_v62  ;;  %v4015_v14 = vadd.f32 %v4014_v1, %v4002_v57 }
 0xe25   :  { %v3979_v19 = vadd.f32 %v3978_v41, %v14038_v13  ;;  %v4003_v58 = vmul.f32 %v14038_v13, %v14038_v13 }
 0xe26   :  { %v3988_v4 = vadd.f32 %v3987_v15, %v14042_v32  ;;  %v4004_v55 = vmul.f32 %v14042_v32, %v14042_v32  ;;  %v4067_v12 = vpop.permute.xlu1 %4066 }
 0xe27   :  { %v3980_v47 = vrot.slane %v3979_v19, 4  ;;  %v4007_v34 = vadd.f32 %v4006_v5, %v4003_v58 }
 0xe28   :  { %v3989_v20 = vrot.slane %v3988_v4, 4  ;;  %v4016_v25 = vadd.f32 %v4015_v14, %v4004_v55 }
 0xe29   :  { %v3981_v45 = vadd.f32 %v3980_v47, %v3979_v19  ;;  %v4008_v17 = vrot.slane %v4007_v34, 4 }
 0xe2a   :  { %v3990_v50 = vadd.f32 %v3989_v20, %v3988_v4  ;;  %v4017_v9 = vrot.slane %v4016_v25, 4  ;;  %v4090_v49 = vpop.permute.xlu1 %4089 }
 0xe2b   :  { %v3982_v26 = vrot.slane %v3981_v45, 2  ;;  %v4009_v38 = vadd.f32 %v4008_v17, %v4007_v34 }
 0xe2c   :  { %v3991_v51 = vrot.slane %v3990_v50, 2  ;;  %v4018_v36 = vadd.f32 %v4017_v9, %v4016_v25 }
 0xe2d   :  { %v3983_v33 = vadd.f32 %v3982_v26, %v3981_v45  ;;  %v4010_v10 = vrot.slane %v4009_v38, 2 }
 0xe2e   :  { %v3992_v31 = vadd.f32 %v3991_v51, %v3990_v50  ;;  %v4019_v40 = vrot.slane %v4018_v36, 2 }
 0xe2f   :  { %v3984_v8 = vrot.slane %v3983_v33, 1  ;;  %v4011_v61 = vadd.f32 %v4010_v10, %v4009_v38  ;;  %v4095_v10 = vpop.permute.xlu1 %4094 }
 0xe30   :  { %v3993_v29 = vrot.slane %v3992_v31, 1  ;;  %v4020_v37 = vadd.f32 %v4019_v40, %v4018_v36 }
 0xe31   :  { %v3985_v22 = vadd.f32 %v3984_v8, %v3983_v33  ;;  %v4012_v27 = vrot.slane %v4011_v61, 1 }
 0xe32   :  { %v3994_v52 = vadd.f32 %v3993_v29, %v3992_v31  ;;  %v4021_v28 = vrot.slane %v4020_v37, 1 }
 0xe33   :  { %v3995_v44 = vmul.f32 0.03125, %v3985_v22  ;;  %v4013_v60 = vadd.f32 %v4012_v27, %v4011_v61 }
 0xe34   :  { %v3996_v3 = vmul.f32 0.03125, %v3994_v52  ;;  %v4022_v35 = vadd.f32 %v4021_v28, %v4020_v37 }
 0xe35   :  { %v4023_v56 = vmul.f32 0.03125, %v4013_v60  ;;  %v4025_v16 = vmul.f32 %v3995_v44, %v3995_v44  ;;  %v4035_v41 = vsub.f32 %v14038_v13, %v3995_v44  ;;  %v4029_v11 = vsub.f32 %v14007_v7, %v3995_v44 }
 0xe36   :  { %v4024_v21 = vmul.f32 0.03125, %v4022_v35  ;;  %v4026_v6 = vmul.f32 %v3996_v3, %v3996_v3  ;;  %v4031_v1 = vsub.f32 %v14001_v2, %v3995_v44  ;;  %v4033_v15 = vsub.f32 %v14015_v23, %v3995_v44  ;;  %v4108_v35 = vld [vmem:[%s15695_s10 + $0x18] sm:$0xff] }
 0xe37   :  { %v4027_v0 = vsub.f32 %v4023_v56, %v4025_v16  ;;  %v4036_v5 = vsub.f32 %v14042_v32, %v3996_v3  ;;  %v4030_v19 = vsub.f32 %v14010_v42, %v3996_v3  ;;  %v4032_v58 = vsub.f32 %v14004_v18, %v3996_v3  ;;  %v4109_v56 = vld [vmem:[%s15695_s10 + $0x20] sm:$0xff]  ;;  %v4110_v16 = vld [vmem:[%s15695_s10 + $0x28] sm:$0xff] }
 0xe38   :  { %v4028_v59 = vsub.f32 %v4024_v21, %v4026_v6  ;;  %v4034_v14 = vsub.f32 %v14022_v54, %v3996_v3  ;;  %v4111_v21 = vld [vmem:[%s15695_s10 + $0x30] sm:$0xff]  ;;  %v4112_v6 = vld [vmem:[%s15695_s10 + $0x38] sm:$0xff] }
 0xe39   :  { %v4037_v53 = vadd.f32 1e-05, %v4027_v0  ;;  %v4113_v0 = vld [vmem:[%s15695_s10 + $0x40] sm:$0xff] }
 0xe3a   :  { %v4038_v57 = vadd.f32 1e-05, %v4028_v59  ;;  %v4115_v59 = vld [vmem:[%s15695_s10 + $0x50] sm:$0xff] }
 0xe3b   :  { %11969 = vrsqrt.f32 %v4037_v53  ;;  %v4116_v53 = vld [vmem:[%s15695_s10 + $0x58] sm:$0xff] }
 0xe3c   :  { %11971 = vrsqrt.f32 %v4038_v57  ;;  %v4117_v57 = vld [vmem:[%s15695_s10 + $0x60] sm:$0xff] }
 0xe45   :  { %v11970_v62 = vpop.eup %11969 }
 0xe46   :  { %v11972_v4 = vpop.eup %11971  ;;  %v4047_v55 = vmul.f32 %v11970_v62, %v4035_v41  ;;  %v4041_v47 = vmul.f32 %v11970_v62, %v4029_v11  ;;  %v4043_v34 = vmul.f32 %v11970_v62, %v4031_v1  ;;  %v4045_v20 = vmul.f32 %v11970_v62, %v4033_v15  ;;  %v4120_v41 = vld [vmem:[%s15695_s10 + $0x78] sm:$0xff]  ;;  %v4140_v11 = vpop.permute.xlu1 %4139 }
 0xe47   :  { %v4042_v25 = vmul.f32 %v11972_v4, %v4030_v19  ;;  %v4044_v45 = vmul.f32 %v11972_v4, %v4032_v58  ;;  %v4046_v17 = vmul.f32 %v11972_v4, %v4034_v14  ;;  %v4048_v50 = vmul.f32 %v11972_v4, %v4036_v5 }
 0xe48   :  { %v4069_v9 = vmul.f32 %v14017_v48, %v4041_v47  ;;  %v4071_v26 = vmul.f32 %v14047_v43, %v4043_v34  ;;  %v4073_v8 = vmul.f32 %v4062_v63, %v4045_v20  ;;  %v4075_v61 = vmul.f32 %v4067_v12, %v4047_v55 }
 0xe49   :  { %v4070_v38 = vmul.f32 %v14017_v48, %v4042_v25  ;;  %v4072_v51 = vmul.f32 %v14047_v43, %v4044_v45  ;;  %v4074_v36 = vmul.f32 %v4062_v63, %v4046_v17  ;;  %v4076_v33 = vmul.f32 %v4067_v12, %v4048_v50  ;;  %v4105_v43 = vld [vmem:[%s15695_s10] sm:$0xff]  ;;  %v4114_v63 = vld [vmem:[%s15695_s10 + $0x48] sm:$0xff] }
 0xe4a   :  { %v4097_v31 = vadd.f32 %v4080_v30, %v4069_v9  ;;  %v4099_v40 = vadd.f32 %v4085_v39, %v4071_v26  ;;  %v4101_v44 = vadd.f32 %v4090_v49, %v4073_v8  ;;  %v4103_v60 = vadd.f32 %v4095_v10, %v4075_v61  ;;  %v4118_v12 = vld [vmem:[%s15695_s10 + $0x68] sm:$0xff]  ;;  %v4145_v5 = vpop.permute.xlu1 %4144 }
 0xe4b   :  { %v4098_v29 = vadd.f32 %v4080_v30, %v4070_v38  ;;  %v4100_v37 = vadd.f32 %v4085_v39, %v4072_v51  ;;  %v4102_v22 = vadd.f32 %v4090_v49, %v4074_v36  ;;  %v4104_v27 = vadd.f32 %v4095_v10, %v4076_v33  ;;  %v4106_v30 = vld [vmem:[%s15695_s10 + $0x8] sm:$0xff]  ;;  %v4107_v39 = vld [vmem:[%s15695_s10 + $0x10] sm:$0xff]  ;;  %v4155_v51 = vpop.permute.xlu0 %4154 }
 0xe4c   :  { %v11385_v28 = vpack.c.bf16 %v4099_v40, %v4097_v31  ;;  %v11389_v48 = vpack.c.bf16 %v4103_v60, %v4101_v44  ;;  %v4119_v49 = vld [vmem:[%s15695_s10 + $0x70] sm:$0xff] }
 0xe4d   :  { %v11383_v52 = vpack.c.bf16 %v4100_v37, %v4098_v29  ;;  %v11387_v3 = vpack.c.bf16 %v4104_v27, %v4102_v22 }
 0xe4e   :  { %v4150_v9 = vpop.permute.xlu1 %4149 }
 0xe4f   :  { %11384 = vmatprep.subr.bf16.mxu1 %v11383_v52 }
 0xe50   :  { %11386 = vmatpush1.bf16.msra.mxu1 %v11385_v28 }
 0xe51   :  { %11388 = vmatprep.subr.bf16.mxu1 %v11387_v3  ;;  %v4165_v3 = vpop.permute.xlu0 %4164 }
 0xe52   :  { %v4160_v28 = vpop.permute.xlu1 %4159 }
 0xe54   :  { %11390 = vmatpush1.bf16.msra.mxu1 %v11389_v48 }
 0xe57   :  { %9391 = vmatmul.mubr.msk.f32.vlgmr.msra.gmra.mrb[72].mxu1 %vm297_vm0, %v4105_v43 }
 0xe58   :  { %4335 = vmatprep.mubr.f32.mxu1 %v15752_v24 }
 0xe5b   :  { %9392 = vmatmul.mubr.msk.f32.gmra.mrb[74].mxu1 %vm297_vm0, %v4106_v30 }
 0xe5c   :  { %4341 = vmatprep.mubr.f32.mxu1 %v15752_v24 }
 0xe5f   :  { %9393 = vmatmul.mubr.msk.f32.gmra.mrb[76].mxu1 %vm297_vm0, %v4107_v39 }
 0xe60   :  { %4347 = vmatprep.mubr.f32.mxu1 %v15752_v24 }
 0xe63   :  { %9394 = vmatmul.mubr.msk.f32.gmra.mrb[78].mxu1 %vm297_vm0, %v4108_v35 }
 0xe64   :  { %4353 = vmatprep.mubr.f32.mxu1 %v15752_v24 }
 0xe67   :  { %9395 = vmatmul.mubr.msk.f32.gmra.mrb[80].mxu1 %vm297_vm0, %v4109_v56 }
 0xe68   :  { %4359 = vmatprep.mubr.f32.mxu1 %v15752_v24 }
 0xe6b   :  { %9396 = vmatmul.mubr.msk.f32.gmra.mrb[82].mxu1 %vm297_vm0, %v4110_v16 }
 0xe6c   :  { %4365 = vmatprep.mubr.f32.mxu1 %v15752_v24 }
 0xe6f   :  { %9397 = vmatmul.mubr.msk.f32.gmra.mrb[84].mxu1 %vm297_vm0, %v4111_v21 }
 0xe70   :  { %4371 = vmatprep.mubr.f32.mxu1 %v15752_v24 }
 0xe73   :  { %9398 = vmatmul.mubr.msk.f32.gmra.mrb[86].mxu1 %vm297_vm0, %v4112_v6 }
 0xe74   :  { %4377 = vmatprep.mubr.f32.mxu1 %v15752_v24 }
 0xe77   :  { %9399 = vmatmul.mubr.msk.f32.gmra.mrb[88].mxu1 %vm297_vm0, %v4113_v0 }
 0xe78   :  { %4383 = vmatprep.mubr.f32.mxu1 %v15752_v24 }
 0xe7b   :  { %9400 = vmatmul.mubr.msk.f32.gmra.mrb[90].mxu1 %vm297_vm0, %v4114_v63 }
 0xe7c   :  { %4389 = vmatprep.mubr.f32.mxu1 %v15752_v24 }
 0xe7f   :  { %9401 = vmatmul.mubr.msk.f32.gmra.mrb[92].mxu1 %vm297_vm0, %v4115_v59 }
 0xe80   :  { %4395 = vmatprep.mubr.f32.mxu1 %v15752_v24 }
 0xe83   :  { %9402 = vmatmul.mubr.msk.f32.gmra.mrb[94].mxu1 %vm297_vm0, %v4116_v53  ;;  %v4170_v53 = vpop.permute.xlu1 %4169 }
 0xe84   :  { %4401 = vmatprep.mubr.f32.mxu1 %v15752_v24 }
 0xe87   :  { %9403 = vmatmul.mubr.msk.f32.gmra.mrb[96].mxu1 %vm297_vm0, %v4117_v57 }
 0xe88   :  { %4407 = vmatprep.mubr.f32.mxu1 %v15752_v24 }
 0xe8b   :  { %9404 = vmatmul.mubr.msk.f32.gmra.mrb[98].mxu1 %vm297_vm0, %v4118_v12 }
 0xe8c   :  { %4413 = vmatprep.mubr.f32.mxu1 %v15752_v24 }
 0xe8f   :  { %9405 = vmatmul.mubr.msk.f32.gmra.mrb[100].mxu1 %vm297_vm0, %v4119_v49  ;;  %v4175_v49 = vpop.permute.xlu0 %4174 }
 0xe90   :  { %4419 = vmatprep.mubr.f32.mxu1 %v15752_v24 }
 0xe93   :  { %9406 = vmatmul.mubr.msk.f32.gmra.mrb[102].mxu1 %vm297_vm0, %v4120_v41 }
 0xe94   :  { %4562 = vmatprep.mubr.f32.mxu1 %v15752_v24 }
 0xf2a   :  { %v4331_v1 = vpop.f32.mrb[72].mxu1 }
 0xf2b   :  { %v4333_v15 = vpop.f32.mrb[73].mxu1  ;;  %v4332_v62 = vadd.f32 %v4331_v1, %v4140_v11 }
 0xf2c   :  { %v4334_v19 = vadd.f32 %v4333_v15, %v4140_v11 }
 0xf2d   :  { %v4426_v47 = vmax.f32 %v4332_v62, 0.0 }
 0xf2e   :  { %v4337_v58 = vpop.f32.mrb[74].mxu1  ;;  %v4427_v20 = vmax.f32 %v4334_v19, 0.0 }
 0xf2f   :  { %v4338_v14 = vadd.f32 %v4337_v58, %v4145_v5  ;;  %v4339_v4 = vpop.f32.mrb[75].mxu1 }
 0xf30   :  { %v4340_v55 = vadd.f32 %v4339_v4, %v4145_v5 }
 0xf31   :  { %v4428_v34 = vmax.f32 %v4338_v14, 0.0 }
 0xf32   :  { %v4429_v25 = vmax.f32 %v4340_v55, 0.0  ;;  %v4343_v45 = vpop.f32.mrb[76].mxu1 }
 0xf33   :  { %v11393_v17 = vpack.c.bf16 %v4428_v34, %v4426_v47  ;;  %v4345_v50 = vpop.f32.mrb[77].mxu1  ;;  %v4344_v38 = vadd.f32 %v4343_v45, %v4150_v9  ;;  %v4180_v34 = vpop.permute.xlu1 %4179 }
 0xf34   :  { %v11391_v26 = vpack.c.bf16 %v4429_v25, %v4427_v20  ;;  %v4346_v36 = vadd.f32 %v4345_v50, %v4150_v9  ;;  %v4185_v45 = vpop.permute.xlu0 %4184 }
 0xf35   :  { %v4430_v8 = vmax.f32 %v4344_v38, 0.0 }
 0xf36   :  { %v4349_v33 = vpop.f32.mrb[78].mxu1  ;;  %11392 = vmatprep.subr.bf16.mxu0 %v11391_v26  ;;  %11671 = vmatprep.subr.bf16.mxu1 %v11391_v26  ;;  %v4431_v29 = vmax.f32 %v4346_v36, 0.0 }
 0xf37   :  { %v4350_v10 = vadd.f32 %v4349_v33, %v4155_v51  ;;  %v4351_v31 = vpop.f32.mrb[79].mxu1  ;;  %11394 = vmatpush1.bf16.msra.mxu0 %v11393_v17  ;;  %11679 = vmatpush1.bf16.msra.mxu1 %v11393_v17 }
 0xf38   :  { %v4352_v40 = vadd.f32 %v4351_v31, %v4155_v51 }
 0xf39   :  { %v4432_v61 = vmax.f32 %v4350_v10, 0.0 }
 0xf3a   :  { %v4433_v37 = vmax.f32 %v4352_v40, 0.0  ;;  %v4355_v22 = vpop.f32.mrb[80].mxu1 }
 0xf3b   :  { %v11397_v27 = vpack.c.bf16 %v4432_v61, %v4430_v8  ;;  %v4357_v52 = vpop.f32.mrb[81].mxu1  ;;  %v4356_v60 = vadd.f32 %v4355_v22, %v4160_v28  ;;  %v4190_v61 = vpop.permute.xlu1 %4189 }
 0xf3c   :  { %v11395_v44 = vpack.c.bf16 %v4433_v37, %v4431_v29  ;;  %v4358_v48 = vadd.f32 %v4357_v52, %v4160_v28  ;;  %v4195_v22 = vpop.permute.xlu0 %4194 }
 0xf3d   :  { %v4434_v56 = vmax.f32 %v4356_v60, 0.0 }
 0xf3e   :  { %v4361_v43 = vpop.f32.mrb[82].mxu1  ;;  %11396 = vmatprep.subr.bf16.mxu0 %v11395_v44  ;;  %11672 = vmatprep.subr.bf16.mxu1 %v11395_v44  ;;  %v4435_v21 = vmax.f32 %v4358_v48, 0.0 }
 0xf3f   :  { %v4362_v30 = vadd.f32 %v4361_v43, %v4165_v3  ;;  %v4363_v39 = vpop.f32.mrb[83].mxu1  ;;  %11398 = vmatpush1.bf16.msra.mxu0 %v11397_v27  ;;  %11680 = vmatpush1.bf16.msra.mxu1 %v11397_v27 }
 0xf40   :  { %v4364_v35 = vadd.f32 %v4363_v39, %v4165_v3 }
 0xf41   :  { %v4436_v16 = vmax.f32 %v4362_v30, 0.0 }
 0xf42   :  { %v4437_v6 = vmax.f32 %v4364_v35, 0.0  ;;  %v4367_v0 = vpop.f32.mrb[84].mxu1 }
 0xf43   :  { %v11401_v63 = vpack.c.bf16 %v4436_v16, %v4434_v56  ;;  %v4369_v59 = vpop.f32.mrb[85].mxu1  ;;  %v4368_v12 = vadd.f32 %v4367_v0, %v4170_v53  ;;  %v4200_v16 = vpop.permute.xlu1 %4199 }
 0xf44   :  { %v11399_v57 = vpack.c.bf16 %v4437_v6, %v4435_v21  ;;  %v4370_v41 = vadd.f32 %v4369_v59, %v4170_v53  ;;  %v4205_v0 = vpop.permute.xlu0 %4204 }
 0xf45   :  { %v4438_v5 = vmax.f32 %v4368_v12, 0.0 }
 0xf46   :  { %v4373_v11 = vpop.f32.mrb[86].mxu1  ;;  %11400 = vmatprep.subr.bf16.mxu0 %v11399_v57  ;;  %11673 = vmatprep.subr.bf16.mxu1 %v11399_v57  ;;  %v4439_v58 = vmax.f32 %v4370_v41, 0.0 }
 0xf47   :  { %v4374_v1 = vadd.f32 %v4373_v11, %v4175_v49  ;;  %v4375_v15 = vpop.f32.mrb[87].mxu1  ;;  %11402 = vmatpush1.bf16.msra.mxu0 %v11401_v63  ;;  %11681 = vmatpush1.bf16.msra.mxu1 %v11401_v63 }
 0xf48   :  { %v4376_v62 = vadd.f32 %v4375_v15, %v4175_v49 }
 0xf49   :  { %v4440_v19 = vmax.f32 %v4374_v1, 0.0 }
 0xf4a   :  { %v4441_v14 = vmax.f32 %v4376_v62, 0.0  ;;  %v4379_v4 = vpop.f32.mrb[88].mxu1 }
 0xf4b   :  { %v11405_v55 = vpack.c.bf16 %v4440_v19, %v4438_v5  ;;  %v4381_v47 = vpop.f32.mrb[89].mxu1  ;;  %v4380_v25 = vadd.f32 %v4379_v4, %v4180_v34  ;;  %v4210_v19 = vpop.permute.xlu1 %4209 }
 0xf4c   :  { %v11403_v20 = vpack.c.bf16 %v4441_v14, %v4439_v58  ;;  %v4382_v17 = vadd.f32 %v4381_v47, %v4180_v34  ;;  %v4215_v4 = vpop.permute.xlu0 %4214 }
 0xf4d   :  { %v4442_v51 = vmax.f32 %v4380_v25, 0.0 }
 0xf4e   :  { %v4385_v50 = vpop.f32.mrb[90].mxu1  ;;  %11404 = vmatprep.subr.bf16.mxu0 %v11403_v20  ;;  %11674 = vmatprep.subr.bf16.mxu1 %v11403_v20  ;;  %v4443_v33 = vmax.f32 %v4382_v17, 0.0 }
 0xf4f   :  { %v4386_v9 = vadd.f32 %v4385_v50, %v4185_v45  ;;  %v4387_v26 = vpop.f32.mrb[91].mxu1  ;;  %11406 = vmatpush1.bf16.msra.mxu0 %v11405_v55  ;;  %11682 = vmatpush1.bf16.msra.mxu1 %v11405_v55 }
 0xf50   :  { %v4388_v38 = vadd.f32 %v4387_v26, %v4185_v45 }
 0xf51   :  { %v4444_v36 = vmax.f32 %v4386_v9, 0.0 }
 0xf52   :  { %v4445_v10 = vmax.f32 %v4388_v38, 0.0  ;;  %v4391_v31 = vpop.f32.mrb[92].mxu1 }
 0xf53   :  { %v11409_v40 = vpack.c.bf16 %v4444_v36, %v4442_v51  ;;  %v4393_v8 = vpop.f32.mrb[93].mxu1  ;;  %v4392_v37 = vadd.f32 %v4391_v31, %v4190_v61  ;;  %v4458_v51 = vld [vmem:[%s15696_s12] sm:$0xff]  ;;  %v4460_v36 = vld [vmem:[%s15696_s12 + $0x10] sm:$0xff]  ;;  %v4469_v31 = vpop.permute.xlu1 %4468 }
 0xf54   :  { %v11407_v29 = vpack.c.bf16 %v4445_v10, %v4443_v33  ;;  %v4394_v27 = vadd.f32 %v4393_v8, %v4190_v61  ;;  %v4459_v33 = vld [vmem:[%s15696_s12 + $0x8] sm:$0xff]  ;;  %v4461_v10 = vld [vmem:[%s15696_s12 + $0x18] sm:$0xff] }
 0xf55   :  { %v4446_v3 = vmax.f32 %v4392_v37, 0.0 }
 0xf56   :  { %v4397_v52 = vpop.f32.mrb[94].mxu1  ;;  %11408 = vmatprep.subr.bf16.mxu0 %v11407_v29  ;;  %11675 = vmatprep.subr.bf16.mxu1 %v11407_v29  ;;  %v4447_v43 = vmax.f32 %v4394_v27, 0.0 }
 0xf57   :  { %v4398_v28 = vadd.f32 %v4397_v52, %v4195_v22  ;;  %v4399_v44 = vpop.f32.mrb[95].mxu1  ;;  %11410 = vmatpush1.bf16.msra.mxu0 %v11409_v40  ;;  %11683 = vmatpush1.bf16.msra.mxu1 %v11409_v40  ;;  %v4474_v40 = vpop.permute.xlu0 %4473 }
 0xf58   :  { %v4400_v60 = vadd.f32 %v4399_v44, %v4195_v22  ;;  %v4479_v27 = vpop.permute.xlu1 %4478 }
 0xf59   :  { %v4448_v48 = vmax.f32 %v4398_v28, 0.0 }
 0xf5a   :  { %v4449_v30 = vmax.f32 %v4400_v60, 0.0  ;;  %v4403_v39 = vpop.f32.mrb[96].mxu1 }
 0xf5b   :  { %v11413_v35 = vpack.c.bf16 %v4448_v48, %v4446_v3  ;;  %v4405_v56 = vpop.f32.mrb[97].mxu1  ;;  %v4404_v6 = vadd.f32 %v4403_v39, %v4200_v16  ;;  %v4484_v28 = vpop.permute.xlu0 %4483 }
 0xf5c   :  { %v11411_v21 = vpack.c.bf16 %v4449_v30, %v4447_v43  ;;  %v4406_v63 = vadd.f32 %v4405_v56, %v4200_v16 }
 0xf5d   :  { %v4450_v49 = vmax.f32 %v4404_v6, 0.0 }
 0xf5e   :  { %v4409_v59 = vpop.f32.mrb[98].mxu1  ;;  %11412 = vmatprep.subr.bf16.mxu0 %v11411_v21  ;;  %11676 = vmatprep.subr.bf16.mxu1 %v11411_v21  ;;  %v4451_v11 = vmax.f32 %v4406_v63, 0.0 }
 0xf5f   :  { %v4410_v53 = vadd.f32 %v4409_v59, %v4205_v0  ;;  %v4411_v57 = vpop.f32.mrb[99].mxu1  ;;  %11414 = vmatpush1.bf16.msra.mxu0 %v11413_v35  ;;  %11684 = vmatpush1.bf16.msra.mxu1 %v11413_v35 }
 0xf60   :  { %v4412_v12 = vadd.f32 %v4411_v57, %v4205_v0 }
 0xf61   :  { %v4452_v41 = vmax.f32 %v4410_v53, 0.0 }
 0xf62   :  { %v4453_v1 = vmax.f32 %v4412_v12, 0.0  ;;  %v4415_v15 = vpop.f32.mrb[100].mxu1 }
 0xf63   :  { %v11417_v62 = vpack.c.bf16 %v4452_v41, %v4450_v49  ;;  %v4417_v5 = vpop.f32.mrb[101].mxu1  ;;  %v4416_v14 = vadd.f32 %v4415_v15, %v4210_v19 }
 0xf64   :  { %v11415_v58 = vpack.c.bf16 %v4453_v1, %v4451_v11  ;;  %v4418_v55 = vadd.f32 %v4417_v5, %v4210_v19 }
 0xf65   :  { %v4454_v45 = vmax.f32 %v4416_v14, 0.0 }
 0xf66   :  { %v4421_v47 = vpop.f32.mrb[102].mxu1  ;;  %11416 = vmatprep.subr.bf16.mxu0 %v11415_v58  ;;  %11677 = vmatprep.subr.bf16.mxu1 %v11415_v58  ;;  %v4455_v50 = vmax.f32 %v4418_v55, 0.0 }
 0xf67   :  { %v4422_v34 = vadd.f32 %v4421_v47, %v4215_v4  ;;  %v4423_v20 = vpop.f32.mrb[103].mxu1  ;;  %11418 = vmatpush1.bf16.msra.mxu0 %v11417_v62  ;;  %11685 = vmatpush1.bf16.msra.mxu1 %v11417_v62 }
 0xf68   :  { %v4424_v25 = vadd.f32 %v4423_v20, %v4215_v4 }
 0xf69   :  { %v4456_v17 = vmax.f32 %v4422_v34, 0.0 }
 0xf6a   :  { %v4457_v9 = vmax.f32 %v4424_v25, 0.0 }
 0xf6b   :  { %v11421_v26 = vpack.c.bf16 %v4456_v17, %v4454_v45 }
 0xf6c   :  { %v11419_v38 = vpack.c.bf16 %v4457_v9, %v4455_v50 }
 0xf6e   :  { %11420 = vmatprep.subr.bf16.mxu0 %v11419_v38  ;;  %11678 = vmatprep.subr.bf16.mxu1 %v11419_v38 }
 0xf6f   :  { %11422 = vmatpush1.bf16.msra.mxu0 %v11421_v26  ;;  %11686 = vmatpush1.bf16.msra.mxu1 %v11421_v26 }
 0xf72   :  { %4551 = vmatmul.mubr.f32.vlgmr.msra.gmra.mrb[104].mxu0 %v4458_v51  ;;  %4563 = vmatmul.mubr.f32.vlgmr.msra.gmra.mrb[104].mxu1 %v4460_v36 }
 0xf73   :  { %4556 = vmatprep.mubr.f32.mxu0 %v15752_v24  ;;  %4568 = vmatprep.mubr.f32.mxu1 %v15752_v24 }
 0xf76   :  { %4557 = vmatmul.mubr.f32.gmra.mrb[106].mxu0 %v4459_v33  ;;  %4569 = vmatmul.mubr.f32.gmra.mrb[106].mxu1 %v4461_v10 }
 0xf77   :  { %4907 = vmatprep.mubr.f32.mxu0 %v15752_v24 }
0x1045   :  { %v4552_v8 = vpop.f32.mrb[104].mxu0  ;;  %v4564_v61 = vpop.f32.mrb[104].mxu1 }
0x1046   :  { %v4553_v29 = vadd.f32 %v4552_v8, %v4469_v31  ;;  %v4554_v37 = vpop.f32.mrb[105].mxu0  ;;  %v4566_v22 = vpop.f32.mrb[105].mxu1  ;;  %v4565_v44 = vadd.f32 %v4564_v61, %v4479_v27 }
0x1047   :  { %v4555_v52 = vadd.f32 %v4554_v37, %v4469_v31  ;;  %v4567_v60 = vadd.f32 %v4566_v22, %v4479_v27 }
0x1048   :  { %v14160_v43 = vadd.f32 %v4553_v29, %v14007_v7  ;;  %v14166_v0 = vadd.f32 %v4565_v44, %v14015_v23 }
0x1049   :  { %v4558_v3 = vpop.f32.mrb[106].mxu0  ;;  %v4570_v48 = vpop.f32.mrb[106].mxu1  ;;  %v14163_v16 = vadd.f32 %v4555_v52, %v14010_v42  ;;  %v14172_v59 = vadd.f32 %v4567_v60, %v14022_v54 }
0x104a   :  { %15828 = vst [vmem:[#allocation23_spill] sm:$0xff] %v14160_v43  ;;  %v4559_v30 = vadd.f32 %v4558_v3, %v4474_v40  ;;  %v4571_v39 = vadd.f32 %v4570_v48, %v4484_v28  ;;  %v4560_v35 = vpop.f32.mrb[107].mxu0  ;;  %v4572_v56 = vpop.f32.mrb[107].mxu1  ;;  %15830 = vst [vmem:[#allocation25_spill] sm:$0xff] %v14166_v0  ;;  %v4613_v53 = vmul.f32 %v14160_v43, %v14160_v43 }
0x104b   :  { %15829 = vst [vmem:[#allocation24_spill] sm:$0xff] %v14163_v16  ;;  %v4561_v21 = vadd.f32 %v4560_v35, %v4474_v40  ;;  %v4573_v6 = vadd.f32 %v4572_v56, %v4484_v28  ;;  %15832 = vst [vmem:[#allocation27_spill] sm:$0xff] %v14172_v59  ;;  %v4617_v49 = vmul.f32 %v14166_v0, %v14166_v0  ;;  %v4668_v56 = vpop.permute.xlu1 %4667 }
0x104c   :  { %v14169_v63 = vadd.f32 %v4559_v30, %v14001_v2  ;;  %v14184_v23 = vadd.f32 %v4571_v39, %v14038_v13  ;;  %v4614_v2 = vmul.f32 %v14163_v16, %v14163_v16  ;;  %v4618_v13 = vmul.f32 %v14172_v59, %v14172_v59 }
0x104d   :  { %v14175_v7 = vadd.f32 %v4561_v21, %v14004_v18  ;;  %v14193_v12 = vadd.f32 %v4573_v6, %v14042_v32  ;;  %v4673_v21 = vpop.permute.xlu0 %4672 }
0x104e   :  { %15831 = vst [vmem:[#allocation26_spill] sm:$0xff] %v14169_v63  ;;  %v4593_v42 = vadd.f32 %v14169_v63, %v14160_v43  ;;  %v4615_v57 = vmul.f32 %v14169_v63, %v14169_v63  ;;  %15834 = vst [vmem:[#allocation29_spill] sm:$0xff] %v14184_v23  ;;  %v4619_v5 = vmul.f32 %v14184_v23, %v14184_v23 }
0x104f   :  { %15833 = vst [vmem:[#allocation28_spill] sm:$0xff] %v14175_v7  ;;  %v4602_v54 = vadd.f32 %v14175_v7, %v14163_v16  ;;  %v4616_v18 = vmul.f32 %v14175_v7, %v14175_v7  ;;  %15835 = vst [vmem:[#allocation30_spill] sm:$0xff] %v14193_v12  ;;  %v4620_v58 = vmul.f32 %v14193_v12, %v14193_v12 }
0x1050   :  { %v4621_v41 = vadd.f32 %v4615_v57, %v4613_v53  ;;  %v4594_v11 = vadd.f32 %v4593_v42, %v14166_v0  ;;  %v4696_v57 = vpop.permute.xlu1 %4695 }
0x1051   :  { %v4630_v1 = vadd.f32 %v4616_v18, %v4614_v2  ;;  %v4603_v15 = vadd.f32 %v4602_v54, %v14172_v59  ;;  %v4701_v2 = vpop.permute.xlu0 %4700 }
0x1052   :  { %v4595_v62 = vadd.f32 %v4594_v11, %v14184_v23  ;;  %v4622_v19 = vadd.f32 %v4621_v41, %v4617_v49 }
0x1053   :  { %v4604_v32 = vadd.f32 %v4603_v15, %v14193_v12  ;;  %v4631_v14 = vadd.f32 %v4630_v1, %v4618_v13 }
0x1054   :  { %v4596_v4 = vrot.slane %v4595_v62, 4  ;;  %v4623_v55 = vadd.f32 %v4622_v19, %v4619_v5  ;;  %v4678_v54 = vpop.permute.xlu1 %4677 }
0x1055   :  { %v4605_v47 = vrot.slane %v4604_v32, 4  ;;  %v4632_v34 = vadd.f32 %v4631_v14, %v4620_v58  ;;  %v4683_v18 = vpop.permute.xlu0 %4682 }
0x1056   :  { %v4597_v20 = vadd.f32 %v4596_v4, %v4595_v62  ;;  %v4624_v25 = vrot.slane %v4623_v55, 4 }
0x1057   :  { %v4606_v45 = vadd.f32 %v4605_v47, %v4604_v32  ;;  %v4633_v17 = vrot.slane %v4632_v34, 4 }
0x1058   :  { %v4598_v50 = vrot.slane %v4597_v20, 2  ;;  %v4625_v9 = vadd.f32 %v4624_v25, %v4623_v55 }
0x1059   :  { %v4607_v26 = vrot.slane %v4606_v45, 2  ;;  %v4634_v38 = vadd.f32 %v4633_v17, %v4632_v34 }
0x105a   :  { %v4599_v51 = vadd.f32 %v4598_v50, %v4597_v20  ;;  %v4626_v36 = vrot.slane %v4625_v9, 2 }
0x105b   :  { %v4608_v33 = vadd.f32 %v4607_v26, %v4606_v45  ;;  %v4635_v10 = vrot.slane %v4634_v38, 2 }
0x105c   :  { %v4600_v31 = vrot.slane %v4599_v51, 1  ;;  %v4627_v40 = vadd.f32 %v4626_v36, %v4625_v9  ;;  %v4711_v36 = vpop.permute.xlu0 %4710 }
0x105d   :  { %v4609_v8 = vrot.slane %v4608_v33, 1  ;;  %v4636_v61 = vadd.f32 %v4635_v10, %v4634_v38 }
0x105e   :  { %v4601_v29 = vadd.f32 %v4600_v31, %v4599_v51  ;;  %v4628_v37 = vrot.slane %v4627_v40, 1  ;;  %v4706_v51 = vpop.permute.xlu1 %4705 }
0x105f   :  { %v4610_v22 = vadd.f32 %v4609_v8, %v4608_v33  ;;  %v4637_v27 = vrot.slane %v4636_v61, 1 }
0x1060   :  { %v4611_v52 = vmul.f32 0.03125, %v4601_v29  ;;  %v4629_v28 = vadd.f32 %v4628_v37, %v4627_v40 }
0x1061   :  { %v4612_v44 = vmul.f32 0.03125, %v4610_v22  ;;  %v4638_v60 = vadd.f32 %v4637_v27, %v4636_v61 }
0x1062   :  { %v4639_v3 = vmul.f32 0.03125, %v4629_v28  ;;  %v4641_v48 = vmul.f32 %v4611_v52, %v4611_v52  ;;  %v4651_v49 = vsub.f32 %v14184_v23, %v4611_v52  ;;  %v4645_v41 = vsub.f32 %v14160_v43, %v4611_v52 }
0x1063   :  { %v4640_v30 = vmul.f32 0.03125, %v4638_v60  ;;  %v4642_v39 = vmul.f32 %v4612_v44, %v4612_v44  ;;  %v4647_v11 = vsub.f32 %v14169_v63, %v4611_v52  ;;  %v4649_v13 = vsub.f32 %v14166_v0, %v4611_v52 }
0x1064   :  { %v4643_v35 = vsub.f32 %v4639_v3, %v4641_v48  ;;  %v4652_v15 = vsub.f32 %v14193_v12, %v4612_v44  ;;  %v4646_v62 = vsub.f32 %v14163_v16, %v4612_v44  ;;  %v4648_v5 = vsub.f32 %v14175_v7, %v4612_v44  ;;  %v9415_v3 = vld [vmem:[%s15688_s4 + $0x60] sm:$0xff]  ;;  %v9416_v48 = vld [vmem:[%s15688_s4 + $0x68] sm:$0xff] }
0x1065   :  { %v4644_v6 = vsub.f32 %v4640_v30, %v4642_v39  ;;  %v4650_v19 = vsub.f32 %v14172_v59, %v4612_v44  ;;  %v9417_v30 = vld [vmem:[%s15688_s4 + $0x70] sm:$0xff]  ;;  %v9418_v39 = vld [vmem:[%s15688_s4 + $0x78] sm:$0xff] }
0x1066   :  { %v4653_v53 = vadd.f32 1e-05, %v4643_v35  ;;  %v9419_v35 = vld [vmem:[%s15688_s4 + $0x80] sm:$0xff] }
0x1067   :  { %v4654_v42 = vadd.f32 1e-05, %v4644_v6  ;;  %v9422_v6 = vld [vmem:[%s15688_s4 + $0x98] sm:$0xff] }
0x1068   :  { %11973 = vrsqrt.f32 %v4653_v53  ;;  %v9423_v53 = vld [vmem:[%s15688_s4 + $0xa0] sm:$0xff] }
0x1069   :  { %11975 = vrsqrt.f32 %v4654_v42  ;;  %v9424_v42 = vld [vmem:[%s15688_s4 + $0xa8] sm:$0xff] }
0x1072   :  { %v11974_v1 = vpop.eup %11973 }
0x1073   :  { %v11976_v32 = vpop.eup %11975  ;;  %v4663_v58 = vmul.f32 %v11974_v1, %v4651_v49  ;;  %v4657_v14 = vmul.f32 %v11974_v1, %v4645_v41  ;;  %v4659_v4 = vmul.f32 %v11974_v1, %v4647_v11  ;;  %v4661_v55 = vmul.f32 %v11974_v1, %v4649_v13 }
0x1074   :  { %v4658_v47 = vmul.f32 %v11976_v32, %v4646_v62  ;;  %v4660_v34 = vmul.f32 %v11976_v32, %v4648_v5  ;;  %v4662_v20 = vmul.f32 %v11976_v32, %v4650_v19  ;;  %v4664_v25 = vmul.f32 %v11976_v32, %v4652_v15  ;;  %v14289_v5 = vpop.permute.xlu1 %4769 }
0x1075   :  { %v4685_v45 = vmul.f32 %v4668_v56, %v4657_v14  ;;  %v4687_v17 = vmul.f32 %v4673_v21, %v4659_v4  ;;  %v4689_v31 = vmul.f32 %v4678_v54, %v4661_v55  ;;  %v4691_v40 = vmul.f32 %v4683_v18, %v4663_v58 }
0x1076   :  { %v4686_v50 = vmul.f32 %v4668_v56, %v4658_v47  ;;  %v4688_v9 = vmul.f32 %v4673_v21, %v4660_v34  ;;  %v4690_v26 = vmul.f32 %v4678_v54, %v4662_v20  ;;  %v4692_v38 = vmul.f32 %v4683_v18, %v4664_v25  ;;  %v9420_v56 = vld [vmem:[%s15688_s4 + $0x88] sm:$0xff]  ;;  %v9421_v21 = vld [vmem:[%s15688_s4 + $0x90] sm:$0xff] }
0x1077   :  { %v4713_v33 = vadd.f32 %v4696_v57, %v4685_v45  ;;  %v4715_v10 = vadd.f32 %v4701_v2, %v4687_v17  ;;  %v4717_v52 = vadd.f32 %v4706_v51, %v4689_v31  ;;  %v4719_v28 = vadd.f32 %v4711_v36, %v4691_v40  ;;  %v9437_v40 = vld [vmem:[%s15685_s5 + $0xb0] sm:$0xff] }
0x1078   :  { %v4714_v8 = vadd.f32 %v4696_v57, %v4686_v50  ;;  %v4716_v61 = vadd.f32 %v4701_v2, %v4688_v9  ;;  %v4718_v29 = vadd.f32 %v4706_v51, %v4690_v26  ;;  %v4720_v37 = vadd.f32 %v4711_v36, %v4692_v38  ;;  %v9425_v57 = vld [vmem:[%s15688_s4 + $0xb0] sm:$0xff]  ;;  %v14271_v2 = vpop.permute.xlu0 %4749  ;;  %v9426_v38 = vld [vmem:[%s15688_s4 + $0xb8] sm:$0xff] }
0x1079   :  { %v11425_v27 = vpack.c.bf16 %v4715_v10, %v4713_v33  ;;  %v11429_v60 = vpack.c.bf16 %v4719_v28, %v4717_v52  ;;  %15836 = vst [vmem:[#allocation31_spill] sm:$0xff] %v14271_v2  ;;  %v9433_v9 = vld [vmem:[%s15685_s5 + $0x90] sm:$0xff]  ;;  %v9436_v33 = vld [vmem:[%s15685_s5 + $0xa8] sm:$0xff]  ;;  %v9434_v10 = vld [vmem:[%s15685_s5 + $0x98] sm:$0xff] }
0x107a   :  { %v11423_v22 = vpack.c.bf16 %v4716_v61, %v4714_v8  ;;  %v11427_v44 = vpack.c.bf16 %v4720_v37, %v4718_v29  ;;  %v9429_v26 = vld [vmem:[%s15685_s5 + $0x70] sm:$0xff]  ;;  %v9430_v61 = vld [vmem:[%s15685_s5 + $0x78] sm:$0xff] }
0x107c   :  { %11424 = vmatprep.subr.bf16.mxu0 %v11423_v22  ;;  %v14294_v14 = vpop.permute.xlu0 %4774 }
0x107d   :  { %11426 = vmatpush1.bf16.msra.mxu0 %v11425_v27 }
0x107e   :  { %11428 = vmatprep.subr.bf16.mxu0 %v11427_v44 }
0x1080   :  { %v14343_v29 = vpop.permute.xlu0 %4789 }
0x1081   :  { %11430 = vmatpush1.bf16.msra.mxu0 %v11429_v60  ;;  %15845 = vst [vmem:[#allocation48_spill] sm:$0xff] %v14343_v29 }
0x1082   :  { %11431 = vmatprep.subr.bf16.mxu0 %v15770_v46 }
0x1084   :  { %9439 = vmatmul.mubr.msk.f32.vlgmr.msra.gmra.mrb[108].mxu0 %vm297_vm0, %v9415_v3  ;;  %v14346_v22 = vpop.permute.xlu0 %4754 }
0x1085   :  { %4913 = vmatprep.mubr.f32.mxu0 %v15752_v24 }
0x1088   :  { %9440 = vmatmul.mubr.msk.f32.gmra.mrb[110].mxu0 %vm297_vm0, %v9416_v48 }
0x1089   :  { %4919 = vmatprep.mubr.f32.mxu0 %v15752_v24 }
0x108c   :  { %9441 = vmatmul.mubr.msk.f32.gmra.mrb[112].mxu0 %vm297_vm0, %v9417_v30 }
0x108d   :  { %4925 = vmatprep.mubr.f32.mxu0 %v15752_v24 }
0x1090   :  { %9442 = vmatmul.mubr.msk.f32.gmra.mrb[114].mxu0 %vm297_vm0, %v9418_v39 }
0x1091   :  { %4931 = vmatprep.mubr.f32.mxu0 %v15752_v24 }
0x1094   :  { %9443 = vmatmul.mubr.msk.f32.gmra.mrb[116].mxu0 %vm297_vm0, %v9419_v35 }
0x1095   :  { %4937 = vmatprep.mubr.f32.mxu0 %v15752_v24 }
0x1098   :  { %9444 = vmatmul.mubr.msk.f32.gmra.mrb[118].mxu0 %vm297_vm0, %v9420_v56 }
0x1099   :  { %4943 = vmatprep.mubr.f32.mxu0 %v15752_v24 }
0x109c   :  { %9445 = vmatmul.mubr.msk.f32.gmra.mrb[120].mxu0 %vm297_vm0, %v9421_v21 }
0x109d   :  { %4949 = vmatprep.mubr.f32.mxu0 %v15752_v24 }
0x10a0   :  { %9446 = vmatmul.mubr.msk.f32.gmra.mrb[122].mxu0 %vm297_vm0, %v9422_v6 }
0x10a1   :  { %4955 = vmatprep.mubr.f32.mxu0 %v15752_v24 }
0x10a4   :  { %9447 = vmatmul.mubr.msk.f32.gmra.mrb[124].mxu0 %vm297_vm0, %v9423_v53 }
0x10a5   :  { %4961 = vmatprep.mubr.f32.mxu0 %v15752_v24 }
0x10a8   :  { %9448 = vmatmul.mubr.msk.f32.gmra.mrb[126].mxu0 %vm297_vm0, %v9424_v42 }
0x10a9   :  { %4967 = vmatprep.mubr.f32.mxu0 %v15752_v24 }
0x10ac   :  { %9449 = vmatmul.mubr.msk.f32.gmra.mrb[128].mxu0 %vm297_vm0, %v9425_v57 }
0x10ad   :  { %4973 = vmatprep.mubr.f32.mxu0 %v15752_v24 }
0x10b0   :  { %9450 = vmatmul.mubr.msk.f32.gmra.mrb[130].mxu0 %vm297_vm0, %v9426_v38 }
0x10b1   :  { %10745 = vmatprep.mubr.msk.f32.mxu0 %vm12260_vm2, %v15752_v24 }
0x1157   :  { %v4909_v54 = vpop.f32.mrb[108].mxu0 }
0x1158   :  { %v4910_v18 = vadd.f32 %v4909_v54, %v14271_v2  ;;  %v14274_v49 = vpop.f32.mrb[109].mxu0 }
0x1159   :  { %15837 = vst [vmem:[#allocation32_spill] sm:$0xff] %v14274_v49 }
0x115a   :  { %10687 = vmatprep.subr.mxu1 %v4910_v18 }
0x115b   :  { %v14276_v41 = vpop.f32.mrb[110].mxu0  ;;  %10688 = vmatpush3.msra.mxu1 %v4910_v18 }
0x115c   :  { %v14278_v11 = vpop.f32.mrb[111].mxu0  ;;  %11455 = vmatprep.subr.bf16.mxu1 %v15770_v46 }
0x115d   :  { %15838 = vst [vmem:[#allocation33_spill] sm:$0xff] %v14278_v11 }
0x115f   :  { %v14281_v13 = vpop.f32.mrb[112].mxu0 }
0x1160   :  { %v14283_v1 = vpop.f32.mrb[113].mxu0 }
0x1161   :  { %15839 = vst [vmem:[#allocation34_spill] sm:$0xff] %v14283_v1 }
0x1163   :  { %v14285_v15 = vpop.f32.mrb[114].mxu0 }
0x1164   :  { %15840 = vst [vmem:[#allocation35_spill] sm:$0xff] %v14285_v15  ;;  %v14287_v62 = vpop.f32.mrb[115].mxu0 }
0x1165   :  { %15841 = vst [vmem:[#allocation36_spill] sm:$0xff] %v14287_v62 }
0x1167   :  { %v4933_v19 = vpop.f32.mrb[116].mxu0 }
0x1168   :  { %v4934_v32 = vadd.f32 %v4933_v19, %v14289_v5  ;;  %v14292_v58 = vpop.f32.mrb[117].mxu0 }
0x116a   :  { %4980 = vxpose.xlu1.b32.start.end [1/1] (short) %v4934_v32, 128 }
0x116b   :  { %v4939_v4 = vpop.f32.mrb[118].mxu0 }
0x116c   :  { %v4940_v55 = vadd.f32 %v4939_v4, %v14294_v14  ;;  %v14297_v47 = vpop.f32.mrb[119].mxu0 }
0x116e   :  { %5399 = vxpose.xlu0.b32.start.end [1/1] (short) %v4940_v55, 128 }
0x116f   :  { %v14299_v34 = vpop.f32.mrb[120].mxu0 }
0x1170   :  { %v14301_v20 = vpop.f32.mrb[121].mxu0 }
0x1173   :  { %v14303_v25 = vpop.f32.mrb[122].mxu0 }
0x1174   :  { %v14305_v45 = vpop.f32.mrb[123].mxu0 }
0x1177   :  { %v14307_v17 = vpop.f32.mrb[124].mxu0 }
0x1178   :  { %v14309_v50 = vpop.f32.mrb[125].mxu0 }
0x1179   :  { %15842 = vst [vmem:[#allocation37_spill] sm:$0xff] %v14309_v50 }
0x117b   :  { %v14323_v51 = vpop.f32.mrb[126].mxu0 }
0x117c   :  { %v14325_v36 = vpop.f32.mrb[127].mxu0 }
0x117f   :  { %v14333_v31 = vpop.f32.mrb[128].mxu0 }
0x1180   :  { %15843 = vst [vmem:[#allocation11_spill] sm:$0xff] %v14333_v31  ;;  %v14338_v8 = vpop.f32.mrb[129].mxu0 }
0x1181   :  { %15844 = vst [vmem:[#allocation12_spill] sm:$0xff] %v14338_v8 }
0x11c4   :  { %4779 = vperm.xlu1 %11692, %v9433_v9  }
0x11c8   :  { %4759 = vperm.xlu1 %11692, %v9429_v26  }
0x11d3   :  { %4794 = vperm.xlu0 %11691, %v9436_v33  }
0x11d7   :  { %4784 = vperm.xlu0 %11691, %v9434_v10  }
0x11db   :  { %4799 = vperm.xlu0 %11691, %v9437_v40  }
0x11df   :  { %4764 = vperm.xlu0 %11691, %v9430_v61  }
0x11ea   :  { %v4996_v37 = vpop.trf.xlu1 }
0x11eb   :  { %10689 = vmatprep.mubr.msk.f32.mxu1 %vm503_vm1, %v4996_v37 }
0x11ee   :  { %v4997_v27 = vpop.trf.xlu1  ;;  %v14349_v28 = vpop.trf.xlu0 }
0x11ef   :  { %10690 = vmatmul.mubr.msk.f32.vlgmr.msra.gmra.mrb[108].mxu1 %vm503_vm1, %v4997_v27 }
0x11f2   :  { %v4998_v52 = vpop.trf.xlu1  ;;  %v14353_v60 = vpop.trf.xlu0 }
0x11f3   :  { %10692 = vmatprep.mubr.msk.f32.mxu1 %vm503_vm1, %v4998_v52 }
0x11f6   :  { %v4999_v44 = vpop.trf.xlu1  ;;  %v14356_v30 = vpop.trf.xlu0 }
0x11f7   :  { %10693 = vmatmul.mubr.msk.f32.gmra.mrb[110].mxu1 %vm503_vm1, %v4999_v44 }
0x11fa   :  { %v5000_v3 = vpop.trf.xlu1  ;;  %v14360_v35 = vpop.trf.xlu0 }
0x11fb   :  { %10695 = vmatprep.mubr.msk.f32.mxu1 %vm503_vm1, %v5000_v3 }
0x11fe   :  { %v5001_v48 = vpop.trf.xlu1  ;;  %v14363_v6 = vpop.trf.xlu0 }
0x11ff   :  { %10696 = vmatmul.mubr.msk.f32.gmra.mrb[112].mxu1 %vm503_vm1, %v5001_v48 }
0x1202   :  { %v5002_v39 = vpop.trf.xlu1  ;;  %v14367_v42 = vpop.trf.xlu0 }
0x1203   :  { %10698 = vmatprep.mubr.msk.f32.mxu1 %vm503_vm1, %v5002_v39 }
0x1206   :  { %v5003_v56 = vpop.trf.xlu1  ;;  %v14370_v18 = vpop.trf.xlu0 }
0x1207   :  { %10699 = vmatmul.mubr.msk.f32.gmra.mrb[114].mxu1 %vm503_vm1, %v5003_v56 }
0x120a   :  { %v5004_v21 = vpop.trf.xlu1  ;;  %v14374_v32 = vpop.trf.xlu0 }
0x120b   :  { %10701 = vmatprep.mubr.msk.f32.mxu1 %vm503_vm1, %v5004_v21 }
0x120e   :  { %v5005_v53 = vpop.trf.xlu1  ;;  %v14377_v9 = vpop.trf.xlu0 }
0x120f   :  { %10702 = vmatmul.mubr.msk.f32.gmra.mrb[116].mxu1 %vm503_vm1, %v5005_v53 }
0x1212   :  { %v5006_v57 = vpop.trf.xlu1  ;;  %v14381_v38 = vpop.trf.xlu0 }
0x1213   :  { %10704 = vmatprep.mubr.msk.f32.mxu1 %vm503_vm1, %v5006_v57 }
0x1216   :  { %v5007_v54 = vpop.trf.xlu1  ;;  %v14385_v33 = vpop.trf.xlu0 }
0x1217   :  { %10705 = vmatmul.mubr.msk.f32.gmra.mrb[118].mxu1 %vm503_vm1, %v5007_v54 }
0x121a   :  { %v5008_v19 = vpop.trf.xlu1  ;;  %v14387_v10 = vpop.trf.xlu0 }
0x121b   :  { %10707 = vmatprep.mubr.msk.f32.mxu1 %vm503_vm1, %v5008_v19 }
0x121e   :  { %v5009_v4 = vpop.trf.xlu1  ;;  %v14389_v40 = vpop.trf.xlu0 }
0x121f   :  { %10708 = vmatmul.mubr.msk.f32.gmra.mrb[120].mxu1 %vm503_vm1, %v5009_v4 }
0x1222   :  { %v5010_v55 = vpop.trf.xlu1  ;;  %v14391_v61 = vpop.trf.xlu0 }
0x1223   :  { %10710 = vmatprep.mubr.msk.f32.mxu1 %vm503_vm1, %v5010_v55 }
0x1226   :  { %v5011_v26 = vpop.trf.xlu1  ;;  %v14395_v44 = vpop.trf.xlu0 }
0x1227   :  { %10711 = vmatmul.mubr.msk.f32.gmra.mrb[122].mxu1 %vm503_vm1, %v5011_v26  ;;  %v4942_v26 = vadd.f32 %v14297_v47, %v14294_v14 }
0x1228   :  { %10806 = vmatprep.mubr.msk.f32.mxu1 %vm12260_vm2, %v15752_v24 }
0x122a   :  { %v14397_v3 = vpop.trf.xlu0 }
0x1243   :  { %v4780_v37 = vpop.permute.xlu1 %4779 }
0x1244   :  { %v4946_v27 = vadd.f32 %v14299_v34, %v4780_v37  ;;  %v4948_v52 = vadd.f32 %v14301_v20, %v4780_v37  ;;  %v4936_v34 = vadd.f32 %v14292_v58, %v14289_v5  ;;  %v9438_v20 = vld [vmem:[%s15685_s5 + $0xb8] sm:$0xff] }
0x1246   :  { %5818 = vxpose.xlu1.b32.start.end [1/1] (short) %v4946_v27, 128 }
0x1247   :  { %v14418_v54 = vpop.permute.xlu1 %4759 }
0x1252   :  { %v4795_v48 = vpop.permute.xlu0 %4794 }
0x1253   :  { %v14400_v39 = vadd.f32 %v14323_v51, %v4795_v48  ;;  %v14403_v56 = vadd.f32 %v14325_v36, %v4795_v48  ;;  %v14414_v51 = vpop.f32.mrb[130].mxu0 }
0x1254   :  { %15847 = vst [vmem:[#allocation38_spill] sm:$0xff] %v14414_v51  ;;  %v14416_v36 = vpop.f32.mrb[131].mxu0 }
0x1255   :  { %15846 = vst [vmem:[#allocation21_spill] sm:$0xff] %v14403_v56 }
0x1256   :  { %v4785_v21 = vpop.permute.xlu0 %4784 }
0x1257   :  { %v4952_v53 = vadd.f32 %v14303_v25, %v4785_v21  ;;  %v14407_v57 = vadd.f32 %v14305_v45, %v4785_v21 }
0x1259   :  { %6237 = vxpose.xlu0.b32.start.end [1/1] (short) %v4952_v53, 128 }
0x125a   :  { %v14430_v48 = vpop.permute.xlu0 %4799 }
0x125b   :  { %15848 = vst [vmem:[#allocation39_spill] sm:$0xff] %v14430_v48 }
0x1296   :  { %6656 = vxpose.xlu0.b32.start.end [1/1] (short) %v4936_v34, 128 }
0x12a0   :  { %4804 = vperm.xlu1 %11692, %v9438_v20  }
0x12c2   :  { %v10691_v25 = vpop.f32.mrb[108].mxu1 }
0x12c3   :  { %v5126_v19 = vpop.f32.mrb[109].mxu1  ;;  %v14432_v21 = vmul.f32 0.35355338, %v10691_v25 }
0x12c4   :  { %v14436_v34 = vmul.f32 0.35355338, %v5126_v19 }
0x12c6   :  { %v14420_v45 = vpop.trf.xlu1 }
0x12c9   :  { %7494 = vxpose.xlu1.b32.start.end [1/1] (short) %v4948_v52, 128 }
0x12ca   :  { %v10694_v4 = vpop.f32.mrb[110].mxu1  ;;  %v14422_v55 = vpop.trf.xlu1 }
0x12cb   :  { %v5136_v5 = vpop.f32.mrb[111].mxu1  ;;  %v14446_v59 = vmul.f32 0.35355338, %v10694_v4 }
0x12ce   :  { %v14424_v58 = vpop.trf.xlu1 }
0x12d2   :  { %v10697_v37 = vpop.f32.mrb[112].mxu1  ;;  %v14428_v27 = vpop.trf.xlu1 }
0x12d3   :  { %v14434_v53 = vmul.f32 0.35355338, %v10697_v37  ;;  %7075 = vxpose.xlu0.b32.start.end [1/1] (short) %v4942_v26, 128  ;;  %v5146_v52 = vpop.f32.mrb[113].mxu1  ;;  %v14450_v26 = vmul.f32 0.35355338, %v5136_v5 }
0x12d4   :  { %v14438_v20 = vmul.f32 0.35355338, %v5146_v52 }
0x12d5   :  { %v5222_v12 = vmax.f32 %v14432_v21, %v14434_v53 }
0x12d6   :  { %v5221_v14 = vmax.f32 %v14436_v34, %v14438_v20  ;;  %v14444_v47 = vpop.trf.xlu1 }
0x12da   :  { %v10700_v23 = vpop.f32.mrb[114].mxu1  ;;  %v14456_v0 = vpop.trf.xlu1 }
0x12db   :  { %v14448_v25 = vmul.f32 0.35355338, %v10700_v23  ;;  %v5156_v37 = vpop.f32.mrb[115].mxu1  ;;  %15849 = vst [vmem:[#allocation40_spill] sm:$0xff] %v14456_v0 }
0x12dc   :  { %v14452_v19 = vmul.f32 0.35355338, %v5156_v37 }
0x12dd   :  { %v5224_v52 = vmax.f32 %v14446_v59, %v14448_v25 }
0x12de   :  { %v5223_v16 = vmax.f32 %v14450_v26, %v14452_v19  ;;  %v14462_v63 = vpop.trf.xlu1 }
0x12df   :  { %15850 = vst [vmem:[#allocation41_spill] sm:$0xff] %v14462_v63 }
0x12e2   :  { %v10703_v43 = vpop.f32.mrb[116].mxu1  ;;  %v14468_v8 = vpop.trf.xlu1 }
0x12e3   :  { %v14460_v7 = vmul.f32 0.35355338, %v10703_v43  ;;  %v5166_v4 = vpop.f32.mrb[117].mxu1  ;;  %15851 = vst [vmem:[#allocation42_spill] sm:$0xff] %v14468_v8 }
0x12e4   :  { %v14464_v23 = vmul.f32 0.35355338, %v5166_v4 }
0x12e5   :  { %v5226_v5 = vmax.f32 %v5222_v12, %v14460_v7 }
0x12e6   :  { %v5225_v37 = vmax.f32 %v5221_v14, %v14464_v23  ;;  %v14476_v51 = vpop.trf.xlu1 }
0x12e7   :  { %15852 = vst [vmem:[#allocation43_spill] sm:$0xff] %v14476_v51 }
0x12ea   :  { %v10706_v62 = vpop.f32.mrb[118].mxu1  ;;  %v14483_v31 = vpop.trf.xlu1 }
0x12eb   :  { %v14470_v56 = vmul.f32 0.35355338, %v10706_v62  ;;  %v5176_v1 = vpop.f32.mrb[119].mxu1  ;;  %15853 = vst [vmem:[#allocation44_spill] sm:$0xff] %v14483_v31 }
0x12ec   :  { %v14472_v50 = vmul.f32 0.35355338, %v5176_v1 }
0x12ed   :  { %v5228_v43 = vmax.f32 %v5224_v52, %v14470_v56 }
0x12ee   :  { %v5227_v11 = vmax.f32 %v5223_v16, %v14472_v50  ;;  %v14488_v16 = vpop.trf.xlu1 }
0x12ef   :  { %15854 = vst [vmem:[#allocation45_spill] sm:$0xff] %v14488_v16 }
0x12f2   :  { %v10709_v4 = vpop.f32.mrb[120].mxu1  ;;  %v14494_v63 = vpop.trf.xlu1 }
0x12f3   :  { %v14478_v49 = vmul.f32 0.35355338, %v10709_v4  ;;  %v5186_v12 = vpop.f32.mrb[121].mxu1 }
0x12f4   :  { %v14480_v2 = vmul.f32 0.35355338, %v5186_v12 }
0x12f5   :  { %v5230_v14 = vmax.f32 %v5226_v5, %v14478_v49 }
0x12f6   :  { %v5229_v62 = vmax.f32 %v5225_v37, %v14480_v2  ;;  %v14497_v37 = vpop.trf.xlu1 }
0x12f8   :  { %v5233_v1 = vmax.f32 %v5229_v62, %v5230_v14 }
0x12fa   :  { %v10712_v48 = vpop.f32.mrb[122].mxu1 }
0x12fb   :  { %v14486_v15 = vmul.f32 0.35355338, %v10712_v48  ;;  %v5196_v52 = vpop.f32.mrb[123].mxu1  ;;  %v14499_v48 = vpop.permute.xlu0 %4764 }
0x12fc   :  { %v14490_v51 = vmul.f32 0.35355338, %v5196_v52  ;;  %15855 = vst [vmem:[#allocation46_spill] sm:$0xff] %v14499_v48 }
0x12fd   :  { %v5232_v4 = vmax.f32 %v5228_v43, %v14486_v15  ;;  %v14503_v43 = vpop.trf.xlu1 }
0x12fe   :  { %v5231_v12 = vmax.f32 %v5227_v11, %v14490_v51 }
0x12ff   :  { %v14501_v52 = vpop.trf.xlu0 }
0x1300   :  { %v5234_v8 = vmax.f32 %v5231_v12, %v5232_v4  ;;  %15856 = vst [vmem:[#allocation47_spill] sm:$0xff] %v14501_v52 }
0x1302   :  { %v5235_v5 = vmax.f32 %v5233_v1, %v5234_v8 }
0x1303   :  { %v14523_v12 = vpop.trf.xlu0 }
0x1304   :  { %v5236_v31 = vrot.slane %v5235_v5, 4  ;;  %15857 = vst [vmem:[#allocation19_spill] sm:$0xff] %v14523_v12 }
0x1306   :  { %v5237_v0 = vmax.f32 %v5235_v5, %v5236_v31  ;;  %7913 = vxpose.xlu1.b32.start.end [1/1] (short) %v14407_v57, 128  ;;  %v14541_v5 = vpop.trf.xlu1 }
0x1307   :  { %15858 = vst [vmem:[#allocation13_spill] sm:$0xff] %v14541_v5 }
0x1308   :  { %v5238_v14 = vrot.slane %v5237_v0, 2 }
0x130a   :  { %v5239_v62 = vmax.f32 %v5237_v0, %v5238_v14  ;;  %v14545_v12 = vpop.trf.xlu1 }
0x130b   :  { %15860 = vst [vmem:[#allocation16_spill] sm:$0xff] %v14545_v12 }
0x130c   :  { %v5240_v16 = vrot.slane %v5239_v62, 1 }
0x130e   :  { %v14505_v11 = vmax.f32 %v5239_v62, %v5240_v16  ;;  %v14543_v62 = vpop.trf.xlu0 }
0x130f   :  { %15859 = vst [vmem:[#allocation18_spill] sm:$0xff] %v14543_v62 }
0x1310   :  { %v5242_v8 = vsub.f32 %v14436_v34, %v14505_v11  ;;  %v5243_v31 = vsub.f32 %v14432_v21, %v14505_v11  ;;  %v5244_v57 = vsub.f32 %v14450_v26, %v14505_v11  ;;  %v5245_v1 = vsub.f32 %v14446_v59, %v14505_v11 }
0x1311   :  { %v5246_v0 = vsub.f32 %v14438_v20, %v14505_v11  ;;  %v5247_v4 = vsub.f32 %v14434_v53, %v14505_v11  ;;  %v5248_v16 = vsub.f32 %v14452_v19, %v14505_v11  ;;  %v5249_v34 = vsub.f32 %v14448_v25, %v14505_v11 }
0x1312   :  { %v5250_v21 = vsub.f32 %v14464_v23, %v14505_v11  ;;  %v5251_v59 = vsub.f32 %v14460_v7, %v14505_v11  ;;  %v5252_v20 = vsub.f32 %v14472_v50, %v14505_v11  ;;  %v5253_v53 = vsub.f32 %v14470_v56, %v14505_v11  ;;  %v14547_v52 = vpop.trf.xlu0 }
0x1313   :  { %v5254_v26 = vsub.f32 %v14480_v2, %v14505_v11  ;;  %v5255_v25 = vsub.f32 %v14478_v49, %v14505_v11  ;;  %v5256_v19 = vsub.f32 %v14490_v51, %v14505_v11  ;;  %v5257_v23 = vsub.f32 %v14486_v15, %v14505_v11  ;;  %15861 = vst [vmem:[#allocation14_spill] sm:$0xff] %v14547_v52 }
0x1314   :  { %v5258_v7 = vmul.f32 1.442695, %v5242_v8  ;;  %v5260_v14 = vmul.f32 1.442695, %v5243_v31  ;;  %v5262_v50 = vmul.f32 1.442695, %v5244_v57 }
0x1315   :  { %v5264_v56 = vmul.f32 1.442695, %v5245_v1  ;;  %v5266_v2 = vmul.f32 1.442695, %v5246_v0  ;;  %v5268_v49 = vmul.f32 1.442695, %v5247_v4 }
0x1316   :  { %11977 = vpow2.f32 %v5258_v7  ;;  %v5270_v51 = vmul.f32 1.442695, %v5248_v16  ;;  %v5272_v15 = vmul.f32 1.442695, %v5249_v34  ;;  %v5274_v1 = vmul.f32 1.442695, %v5250_v21  ;;  %v14564_v7 = vpop.trf.xlu0 }
0x1317   :  { %11979 = vpow2.f32 %v5260_v14  ;;  %v5276_v16 = vmul.f32 1.442695, %v5251_v59  ;;  %15864 = vst [vmem:[#allocation49_spill] sm:$0xff] %v14564_v7  ;;  %v5280_v21 = vmul.f32 1.442695, %v5253_v53 }
0x1318   :  { %11981 = vpow2.f32 %v5262_v50  ;;  %v5282_v59 = vmul.f32 1.442695, %v5254_v26  ;;  %v5286_v53 = vmul.f32 1.442695, %v5256_v19  ;;  %v5288_v26 = vmul.f32 1.442695, %v5257_v23 }
0x1319   :  { %11983 = vpow2.f32 %v5264_v56  ;;  %v9583_v19 = vld [vmem:[%s15689_s7 + $0x20] sm:$0xff] }
0x131a   :  { %11985 = vpow2.f32 %v5266_v2 }
0x131b   :  { %11987 = vpow2.f32 %v5268_v49 }
0x131c   :  { %11989 = vpow2.f32 %v5270_v51 }
0x131d   :  { %11991 = vpow2.f32 %v5272_v15  ;;  %v14575_v15 = vpop.trf.xlu0 }
0x131e   :  { %11993 = vpow2.f32 %v5274_v1  ;;  %15865 = vst [vmem:[#allocation17_spill] sm:$0xff] %v14575_v15 }
0x131f   :  { %v14549_v11 = vpop.permute.xlu1 %4804  ;;  %11995 = vpow2.f32 %v5276_v16 }
0x1320   :  { %15862 = vst [vmem:[#allocation15_spill] sm:$0xff] %v14549_v11  ;;  %v14551_v8 = vpop.eup %11977  ;;  %v14555_v31 = vadd.f32 %v14416_v36, %v14549_v11  ;;  %v5278_v36 = vmul.f32 1.442695, %v5252_v20  ;;  %v5284_v20 = vmul.f32 1.442695, %v5255_v25 }
0x1321   :  { %v14557_v57 = vpop.eup %11979 }
0x1322   :  { %15863 = vst [vmem:[#allocation20_spill] sm:$0xff] %v14555_v31  ;;  %v5290_v0 = vadd.f32 %v14557_v57, %v14551_v8  ;;  %v14561_v4 = vpop.eup %11981  ;;  %11997 = vpow2.f32 %v5278_v36 }
0x1323   :  { %v14566_v14 = vpop.eup %11983  ;;  %11999 = vpow2.f32 %v5280_v21 }
0x1324   :  { %v5291_v34 = vadd.f32 %v14561_v4, %v5290_v0  ;;  %v14569_v56 = vpop.eup %11985  ;;  %12001 = vpow2.f32 %v5282_v59 }
0x1325   :  { %v14572_v49 = vpop.eup %11987  ;;  %12003 = vpow2.f32 %v5284_v20 }
0x1326   :  { %v5292_v50 = vadd.f32 %v14566_v14, %v5291_v34  ;;  %v14577_v0 = vpop.eup %11989  ;;  %12005 = vpow2.f32 %v5286_v53  ;;  %v9585_v53 = vld [vmem:[%s15689_s7 + $0x30] sm:$0xff] }
0x1327   :  { %v14580_v34 = vpop.eup %11991  ;;  %12007 = vpow2.f32 %v5288_v26 }
0x1328   :  { %v5293_v2 = vadd.f32 %v14569_v56, %v5292_v50  ;;  %v14583_v50 = vpop.eup %11993 }
0x1329   :  { %v11996_v31 = vpop.eup %11995 }
0x132a   :  { %v5294_v51 = vadd.f32 %v14572_v49, %v5293_v2  ;;  %v14586_v2 = vpop.trf.xlu0 }
0x132b   :  { %15866 = vst [vmem:[#allocation22_spill] sm:$0xff] %v14586_v2 }
0x132c   :  { %v5295_v1 = vadd.f32 %v14577_v0, %v5294_v51  ;;  %v11998_v25 = vpop.eup %11997 }
0x132d   :  { %v12000_v11 = vpop.eup %11999 }
0x132e   :  { %v5296_v16 = vadd.f32 %v14580_v34, %v5295_v1  ;;  %v14591_v1 = vpop.trf.xlu0  ;;  %v12002_v20 = vpop.eup %12001 }
0x132f   :  { %15867 = vst [vmem:[#allocation4_spill] sm:$0xff] %v14591_v1 }
0x1330   :  { %v5297_v36 = vadd.f32 %v14583_v50, %v5296_v16  ;;  %v12004_v16 = vpop.eup %12003 }
0x1331   :  { %v12006_v2 = vpop.eup %12005 }
0x1332   :  { %v5298_v21 = vadd.f32 %v11996_v31, %v5297_v36  ;;  %v12008_v15 = vpop.eup %12007 }
0x1334   :  { %v5299_v51 = vadd.f32 %v11998_v25, %v5298_v21  ;;  %v14596_v21 = vpop.trf.xlu0 }
0x1335   :  { %15868 = vst [vmem:[#allocation6_spill] sm:$0xff] %v14596_v21 }
0x1336   :  { %v5300_v59 = vadd.f32 %v12000_v11, %v5299_v51  ;;  %v9586_v51 = vld [vmem:[%s15689_s7 + $0x38] sm:$0xff] }
0x1338   :  { %v5301_v23 = vadd.f32 %v12002_v20, %v5300_v59  ;;  %8352 = vperm.xlu0 %11691, %v9583_v19   ;;  %v9591_v19 = vld [vmem:[%s15690_s8 + $0x20] sm:$0xff]  ;;  %v14604_v52 = vpop.trf.xlu0 }
0x1339   :  { %15869 = vst [vmem:[#allocation3_spill] sm:$0xff] %v14604_v52 }
0x133a   :  { %v5302_v36 = vadd.f32 %v12004_v16, %v5301_v23 }
0x133c   :  { %v5303_v26 = vadd.f32 %v12006_v2, %v5302_v36  ;;  %8362 = vperm.xlu0 %11691, %v9585_v53   ;;  %v9592_v53 = vld [vmem:[%s15690_s8 + $0x28] sm:$0xff]  ;;  %v14609_v62 = vpop.trf.xlu0 }
0x133d   :  { %15870 = vst [vmem:[#allocation5_spill] sm:$0xff] %v14609_v62 }
0x133e   :  { %v5304_v1 = vadd.f32 %v12008_v15, %v5303_v26  ;;  %v9595_v26 = vld [vmem:[%s15691_s9 + $0x20] sm:$0xff] }
0x1340   :  { %v5305_v7 = vrot.slane %v5304_v1, 4  ;;  %8367 = vperm.xlu0 %11691, %v9586_v51  }
0x1342   :  { %v5306_v59 = vadd.f32 %v5305_v7, %v5304_v1  ;;  %v9596_v7 = vld [vmem:[%s15691_s9 + $0x28] sm:$0xff]  ;;  %v14617_v1 = vpop.trf.xlu0 }
0x1343   :  { %15871 = vst [vmem:[#allocation7_spill] sm:$0xff] %v14617_v1 }
0x1344   :  { %v5307_v23 = vrot.slane %v5306_v59, 2  ;;  %8563 = vperm.xlu0 %11691, %v9591_v19   ;;  %v9593_v19 = vld [vmem:[%s15690_s8 + $0x30] sm:$0xff] }
0x1346   :  { %v5308_v36 = vadd.f32 %v5307_v23, %v5306_v59  ;;  %v14622_v59 = vpop.trf.xlu0 }
0x1347   :  { %15872 = vst [vmem:[#allocation8_spill] sm:$0xff] %v14622_v59 }
0x1348   :  { %v5309_v21 = vrot.slane %v5308_v36, 1  ;;  %8568 = vperm.xlu0 %11691, %v9592_v53  }
0x134a   :  { %v5310_v51 = vadd.f32 %v5309_v21, %v5308_v36  ;;  %v9594_v21 = vld [vmem:[%s15690_s8 + $0x38] sm:$0xff]  ;;  %v14639_v48 = vpop.trf.xlu0 }
0x134c   :  { %12009 = vrcp.f32 %v5310_v51  ;;  %8591 = vperm.xlu0 %11691, %v9595_v26  }
0x1350   :  { %8596 = vperm.xlu0 %11691, %v9596_v7  }
0x1354   :  { %8573 = vperm.xlu0 %11691, %v9593_v19  }
0x1356   :  { %v12010_v23 = vpop.eup %12009 }
0x1357   :  { %v5312_v53 = vmul.f32 %v12010_v23, %v14551_v8  ;;  %v5313_v36 = vmul.f32 %v12010_v23, %v14557_v57  ;;  %v5314_v26 = vmul.f32 %v12010_v23, %v14561_v4  ;;  %v5315_v51 = vmul.f32 %v12010_v23, %v14566_v14  ;;  %v9597_v8 = vld [vmem:[%s15691_s9 + $0x30] sm:$0xff] }
0x1358   :  { %8578 = vperm.xlu0 %11691, %v9594_v21   ;;  %v5316_v7 = vmul.f32 %v12010_v23, %v14569_v56  ;;  %v5317_v1 = vmul.f32 %v12010_v23, %v14572_v49  ;;  %v5318_v19 = vmul.f32 %v12010_v23, %v14577_v0  ;;  %v5319_v59 = vmul.f32 %v12010_v23, %v14580_v34 }
0x1359   :  { %v11432_v62 = vpack.c.bf16 %v5313_v36, %v5312_v53  ;;  %v11435_v52 = vpack.c.bf16 %v5315_v51, %v5314_v26  ;;  %v5320_v57 = vmul.f32 %v12010_v23, %v14583_v50  ;;  %v5321_v4 = vmul.f32 %v12010_v23, %v11996_v31  ;;  %v9598_v31 = vld [vmem:[%s15691_s9 + $0x38] sm:$0xff]  ;;  %v9621_v26 = vld [vmem:[%s15692_s11 + $0xb0] sm:$0xff] }
0x135a   :  { %v11438_v14 = vpack.c.bf16 %v5317_v1, %v5316_v7  ;;  %v11441_v21 = vpack.c.bf16 %v5319_v59, %v5318_v19  ;;  %v5322_v56 = vmul.f32 %v12010_v23, %v11998_v25  ;;  %v5323_v12 = vmul.f32 %v12010_v23, %v12000_v11  ;;  %v9584_v25 = vld [vmem:[%s15689_s7 + $0x28] sm:$0xff]  ;;  %v9619_v59 = vld [vmem:[%s15692_s11 + $0xa0] sm:$0xff]  ;;  %v9626_v7 = vld [vmem:[%s15692_s11 + $0xd8] sm:$0xff] }
0x135b   :  { %11433 = vmatpush3.bf16.msra.mxu0 %v11432_v62  ;;  %v11444_v49 = vpack.c.bf16 %v5321_v4, %v5320_v57  ;;  %v5324_v0 = vmul.f32 %v12010_v23, %v12002_v20  ;;  %v5325_v5 = vmul.f32 %v12010_v23, %v12004_v16  ;;  %v5326_v34 = vmul.f32 %v12010_v23, %v12006_v2  ;;  %v14648_v62 = vpop.trf.xlu0  ;;  %v9620_v2 = vld [vmem:[%s15692_s11 + $0xa8] sm:$0xff]  ;;  %v9617_v20 = vld [vmem:[%s15692_s11 + $0x90] sm:$0xff]  ;;  %v9622_v16 = vld [vmem:[%s15692_s11 + $0xb8] sm:$0xff] }
0x135c   :  { %11434 = vmatprep.subr.bf16.mxu0 %v15770_v46  ;;  %8601 = vperm.xlu0 %11691, %v9597_v8   ;;  %v11447_v53 = vpack.c.bf16 %v5323_v12, %v5322_v56  ;;  %v5327_v36 = vmul.f32 %v12010_v23, %v12008_v15  ;;  %v9615_v12 = vld [vmem:[%s15692_s11 + $0x80] sm:$0xff]  ;;  %v9624_v23 = vld [vmem:[%s15692_s11 + $0xc8] sm:$0xff]  ;;  %v4916_v8 = vadd.f32 %v14276_v41, %v14346_v22  ;;  %v9630_v41 = vld [vmem:[%s15692_s11 + $0xf8] sm:$0xff] }
0x135d   :  { %v11450_v50 = vpack.c.bf16 %v5325_v5, %v5324_v0  ;;  %v9618_v5 = vld [vmem:[%s15692_s11 + $0x98] sm:$0xff]  ;;  %v9623_v19 = vld [vmem:[%s15692_s11 + $0xc0] sm:$0xff]  ;;  %v9628_v57 = vld [vmem:[%s15692_s11 + $0xe8] sm:$0xff]  ;;  %v4958_v4 = vadd.f32 %v14307_v17, %v14343_v29 }
0x135e   :  { %v11453_v11 = vpack.c.bf16 %v5327_v36, %v5326_v34  ;;  %v9627_v17 = vld [vmem:[%s15692_s11 + $0xe0] sm:$0xff] }
0x135f   :  { %11436 = vmatpush3.bf16.msra.mxu0 %v11435_v52  ;;  %v9616_v52 = vld [vmem:[%s15692_s11 + $0x88] sm:$0xff]  ;;  %v14661_v15 = vpop.trf.xlu0 }
0x1360   :  { %11437 = vmatprep.subr.bf16.mxu0 %v15770_v46  ;;  %8606 = vperm.xlu0 %11691, %v9598_v31  }
0x1361   :  { %8357 = vperm.xlu1 %11692, %v9584_v25  }
0x1363   :  { %11439 = vmatpush3.bf16.msra.mxu0 %v11438_v14  ;;  %v14673_v1 = vpop.trf.xlu0 }
0x1364   :  { %11440 = vmatprep.subr.bf16.mxu0 %v15770_v46  ;;  %8653 = vperm.xlu0 %11691, %v9615_v12  }
0x1365   :  { %8668 = vperm.xlu1 %11692, %v9618_v5  }
0x1367   :  { %11442 = vmatpush3.bf16.msra.mxu0 %v11441_v21  ;;  %v14686_v51 = vpop.trf.xlu0  ;;  %v9625_v21 = vld [vmem:[%s15692_s11 + $0xd0] sm:$0xff] }
0x1368   :  { %11443 = vmatprep.subr.bf16.mxu0 %v15770_v46  ;;  %8658 = vperm.xlu0 %11691, %v9616_v52  }
0x1369   :  { %8678 = vperm.xlu1 %11692, %v9620_v2  }
0x136b   :  { %11445 = vmatpush3.bf16.msra.mxu0 %v11444_v49  ;;  %v14702_v14 = vpop.trf.xlu0  ;;  %v9652_v49 = vld [vmem:[%s15693_s13 + $0x28] sm:$0xff] }
0x136c   :  { %11446 = vmatprep.subr.bf16.mxu0 %v15770_v46  ;;  %8663 = vperm.xlu0 %11691, %v9617_v20  }
0x136d   :  { %8688 = vperm.xlu1 %11692, %v9622_v16  }
0x136f   :  { %11448 = vmatpush3.bf16.msra.mxu0 %v11447_v53  ;;  %v14716_v56 = vpop.trf.xlu0 }
0x1370   :  { %11449 = vmatprep.subr.bf16.mxu0 %v15770_v46  ;;  %8673 = vperm.xlu0 %11691, %v9619_v59  }
0x1371   :  { %8698 = vperm.xlu1 %11692, %v9624_v23  }
0x1373   :  { %11451 = vmatpush3.bf16.msra.mxu0 %v11450_v50  ;;  %v14735_v0 = vpop.trf.xlu0 }
0x1374   :  { %11452 = vmatprep.subr.bf16.mxu0 %v15770_v46  ;;  %8683 = vperm.xlu0 %11691, %v9621_v26  }
0x1375   :  { %8708 = vperm.xlu1 %11692, %v9626_v7  }
0x1377   :  { %11454 = vmatpush3.bf16.msra.mxu0 %v11453_v11  ;;  %v14750_v34 = vpop.trf.xlu0 }
0x1378   :  { %10748 = vmatprep.subr.mxu0 %v4916_v8  ;;  %8693 = vperm.xlu0 %11691, %v9623_v19  }
0x1379   :  { %8718 = vperm.xlu1 %11692, %v9628_v57  }
0x137a   :  { %10746 = vmatmul.mubr.f32.vlgmr.msra.gmra.mrb[132].mxu0 %v4958_v4 }
0x137b   :  { %10749 = vmatpush3.msra.mxu0 %v4916_v8  ;;  %10750 = vmatprep.mubr.msk.f32.mxu0 %vm503_vm1, %v14349_v28  ;;  %v9629_v28 = vld [vmem:[%s15692_s11 + $0xf0] sm:$0xff]  ;;  %v14769_v53 = vpop.trf.xlu0 }
0x137c   :  { %8703 = vperm.xlu0 %11691, %v9625_v21   ;;  %11479 = vmatprep.subr.bf16.mxu0 %v15770_v46 }
0x137d   :  { %8728 = vperm.xlu1 %11692, %v9630_v41  }
0x137e   :  { %10751 = vmatmul.mubr.msk.f32.vlgmr.msra.gmra.mrb[134].mxu0 %vm503_vm1, %v14353_v60  ;;  %v9654_v60 = vld [vmem:[%s15693_s13 + $0x38] sm:$0xff] }
0x137f   :  { %10753 = vmatprep.mubr.msk.f32.mxu0 %vm503_vm1, %v14356_v30  ;;  %v9651_v30 = vld [vmem:[%s15693_s13 + $0x20] sm:$0xff]  ;;  %v14784_v36 = vpop.trf.xlu0 }
0x1380   :  { %8713 = vperm.xlu0 %11691, %v9627_v17  }
0x1381   :  { %8989 = vperm.xlu1 %11692, %v9652_v49  }
0x1382   :  { %10754 = vmatmul.mubr.msk.f32.gmra.mrb[136].mxu0 %vm503_vm1, %v14360_v35  ;;  %v9100_v35 = vld [vmem:[%s15697_s14 + $0x8] sm:$0xff] }
0x1383   :  { %10756 = vmatprep.mubr.msk.f32.mxu0 %vm503_vm1, %v14363_v6  ;;  %v9653_v6 = vld [vmem:[%s15693_s13 + $0x30] sm:$0xff] }
0x1384   :  { %8723 = vperm.xlu0 %11691, %v9629_v28  }
0x1385   :  { %8999 = vperm.xlu1 %11692, %v9654_v60  }
0x1386   :  { %10757 = vmatmul.mubr.msk.f32.gmra.mrb[138].mxu0 %vm503_vm1, %v14367_v42  ;;  %v9102_v42 = vld [vmem:[%s15697_s14 + $0x18] sm:$0xff] }
0x1387   :  { %10759 = vmatprep.mubr.msk.f32.mxu0 %vm503_vm1, %v14370_v18  ;;  %v9099_v18 = vld [vmem:[%s15697_s14] sm:$0xff] }
0x1388   :  { %8984 = vperm.xlu0 %11691, %v9651_v30  }
0x1389   :  { %9186 = vperm.xlu1 %11692, %v9100_v35  }
0x138a   :  { %10760 = vmatmul.mubr.msk.f32.gmra.mrb[140].mxu0 %vm503_vm1, %v14374_v32  ;;  %v9104_v32 = vld [vmem:[%s15698_s15 + $0x8] sm:$0xff] }
0x138b   :  { %10762 = vmatprep.mubr.msk.f32.mxu0 %vm503_vm1, %v14377_v9  ;;  %v9101_v9 = vld [vmem:[%s15697_s14 + $0x10] sm:$0xff] }
0x138c   :  { %8994 = vperm.xlu0 %11691, %v9653_v6  }
0x138d   :  { %9196 = vperm.xlu1 %11692, %v9102_v42  }
0x138e   :  { %10763 = vmatmul.mubr.msk.f32.gmra.mrb[142].mxu0 %vm503_vm1, %v14381_v38  ;;  %v9106_v38 = vld [vmem:[%s15698_s15 + $0x18] sm:$0xff] }
0x138f   :  { %10765 = vmatprep.mubr.msk.f32.mxu0 %vm503_vm1, %v14385_v33  ;;  %v9103_v33 = vld [vmem:[%s15698_s15] sm:$0xff] }
0x1390   :  { %9181 = vperm.xlu0 %11691, %v9099_v18  }
0x1391   :  { %9214 = vperm.xlu1 %11692, %v9104_v32  }
0x1392   :  { %10766 = vmatmul.mubr.msk.f32.gmra.mrb[144].mxu0 %vm503_vm1, %v14387_v10  ;;  %v9105_v10 = vld [vmem:[%s15698_s15 + $0x10] sm:$0xff] }
0x1393   :  { %10768 = vmatprep.mubr.msk.f32.mxu0 %vm503_vm1, %v14389_v40  ;;  %v14797_v40 = vpop.trf.xlu0 }
0x1394   :  { %9191 = vperm.xlu0 %11691, %v9101_v9  }
0x1395   :  { %9224 = vperm.xlu1 %11692, %v9106_v38  }
0x1396   :  { %10769 = vmatmul.mubr.msk.f32.gmra.mrb[146].mxu0 %vm503_vm1, %v14391_v61 }
0x1397   :  { %10771 = vmatprep.mubr.msk.f32.mxu0 %vm503_vm1, %v14395_v44 }
0x1398   :  { %9209 = vperm.xlu0 %11691, %v9103_v33  }
0x139a   :  { %10772 = vmatmul.mubr.msk.f32.gmra.mrb[148].mxu0 %vm503_vm1, %v14397_v3 }
0x139b   :  { %10867 = vmatprep.mubr.msk.f32.mxu0 %vm12260_vm2, %v15752_v24 }
0x139c   :  { %9219 = vperm.xlu0 %11691, %v9105_v10  }
0x144d   :  { %v14799_v31 = vpop.f32.mrb[132].mxu0 }
0x144e   :  { %v10747_v61 = vpop.f32.mrb[133].mxu0 }
0x1451   :  { %v10752_v50 = vpop.f32.mrb[134].mxu0 }
0x1452   :  { %v5545_v25 = vpop.f32.mrb[135].mxu0  ;;  %v14801_v5 = vmul.f32 0.35355338, %v10752_v50 }
0x1453   :  { %v5624_v3 = vmul.f32 0.35355338, %v5545_v25 }
0x1455   :  { %v10755_v44 = vpop.f32.mrb[136].mxu0 }
0x1456   :  { %v5555_v11 = vpop.f32.mrb[137].mxu0  ;;  %v5627_v26 = vmul.f32 0.35355338, %v10755_v44 }
0x1457   :  { %v5626_v8 = vmul.f32 0.35355338, %v5555_v11 }
0x1459   :  { %v10758_v12 = vpop.f32.mrb[138].mxu0 }
0x145a   :  { %v14803_v52 = vmul.f32 0.35355338, %v10758_v12  ;;  %v5565_v2 = vpop.f32.mrb[139].mxu0 }
0x145b   :  { %v14805_v20 = vmul.f32 0.35355338, %v5565_v2 }
0x145c   :  { %v5641_v16 = vmax.f32 %v14801_v5, %v14803_v52 }
0x145d   :  { %v5640_v59 = vmax.f32 %v5624_v3, %v14805_v20  ;;  %v10761_v23 = vpop.f32.mrb[140].mxu0 }
0x145e   :  { %v14810_v7 = vmul.f32 0.35355338, %v10761_v23  ;;  %v5575_v19 = vpop.f32.mrb[141].mxu0 }
0x145f   :  { %v14812_v57 = vmul.f32 0.35355338, %v5575_v19 }
0x1460   :  { %v5643_v4 = vmax.f32 %v5627_v26, %v14810_v7 }
0x1461   :  { %v5642_v21 = vmax.f32 %v5626_v8, %v14812_v57  ;;  %v10764_v41 = vpop.f32.mrb[142].mxu0 }
0x1462   :  { %v14816_v17 = vmul.f32 0.35355338, %v10764_v41  ;;  %v5585_v49 = vpop.f32.mrb[143].mxu0 }
0x1463   :  { %v14818_v28 = vmul.f32 0.35355338, %v5585_v49 }
0x1464   :  { %v5645_v60 = vmax.f32 %v5641_v16, %v14816_v17 }
0x1465   :  { %v5644_v30 = vmax.f32 %v5640_v59, %v14818_v28  ;;  %v10767_v35 = vpop.f32.mrb[144].mxu0 }
0x1466   :  { %v14822_v6 = vmul.f32 0.35355338, %v10767_v35  ;;  %v5595_v42 = vpop.f32.mrb[145].mxu0 }
0x1467   :  { %v14824_v18 = vmul.f32 0.35355338, %v5595_v42 }
0x1468   :  { %v5647_v32 = vmax.f32 %v5643_v4, %v14822_v6 }
0x1469   :  { %v5646_v9 = vmax.f32 %v5642_v21, %v14824_v18  ;;  %v10770_v38 = vpop.f32.mrb[146].mxu0 }
0x146a   :  { %v14828_v33 = vmul.f32 0.35355338, %v10770_v38  ;;  %v5605_v10 = vpop.f32.mrb[147].mxu0 }
0x146b   :  { %v14830_v61 = vmul.f32 0.35355338, %v5605_v10 }
0x146c   :  { %v5649_v50 = vmax.f32 %v5645_v60, %v14828_v33 }
0x146d   :  { %v5648_v25 = vmax.f32 %v5644_v30, %v14830_v61  ;;  %v10773_v44 = vpop.f32.mrb[148].mxu0 }
0x146e   :  { %v14834_v11 = vmul.f32 0.35355338, %v10773_v44  ;;  %v5615_v12 = vpop.f32.mrb[149].mxu0 }
0x146f   :  { %v5652_v2 = vmax.f32 %v5648_v25, %v5649_v50  ;;  %v14836_v16 = vmul.f32 0.35355338, %v5615_v12 }
0x1470   :  { %v5651_v59 = vmax.f32 %v5647_v32, %v14834_v11 }
0x1471   :  { %v5650_v23 = vmax.f32 %v5646_v9, %v14836_v16 }
0x1473   :  { %v5653_v19 = vmax.f32 %v5650_v23, %v5651_v59 }
0x1475   :  { %v5654_v4 = vmax.f32 %v5652_v2, %v5653_v19 }
0x1477   :  { %v5655_v21 = vrot.slane %v5654_v4, 4 }
0x1479   :  { %v5656_v41 = vmax.f32 %v5654_v4, %v5655_v21 }
0x147b   :  { %v5657_v49 = vrot.slane %v5656_v41, 2 }
0x147d   :  { %v5658_v35 = vmax.f32 %v5656_v41, %v5657_v49 }
0x147f   :  { %v5659_v60 = vrot.slane %v5658_v35, 1 }
0x1481   :  { %v5660_v42 = vmax.f32 %v5658_v35, %v5659_v60 }
0x1483   :  { %v5661_v30 = vsub.f32 %v5624_v3, %v5660_v42  ;;  %v5662_v38 = vsub.f32 %v14801_v5, %v5660_v42  ;;  %v5663_v10 = vsub.f32 %v5626_v8, %v5660_v42  ;;  %v5664_v44 = vsub.f32 %v5627_v26, %v5660_v42 }
0x1484   :  { %v5665_v50 = vsub.f32 %v14805_v20, %v5660_v42  ;;  %v5666_v25 = vsub.f32 %v14803_v52, %v5660_v42  ;;  %v5667_v32 = vsub.f32 %v14812_v57, %v5660_v42  ;;  %v5668_v9 = vsub.f32 %v14810_v7, %v5660_v42 }
0x1485   :  { %v5669_v12 = vsub.f32 %v14818_v28, %v5660_v42  ;;  %v5670_v2 = vsub.f32 %v14816_v17, %v5660_v42  ;;  %v5671_v59 = vsub.f32 %v14824_v18, %v5660_v42  ;;  %v5672_v3 = vsub.f32 %v14822_v6, %v5660_v42 }
0x1486   :  { %v5673_v5 = vsub.f32 %v14830_v61, %v5660_v42  ;;  %v5674_v26 = vsub.f32 %v14828_v33, %v5660_v42  ;;  %v5675_v20 = vsub.f32 %v14836_v16, %v5660_v42  ;;  %v5676_v52 = vsub.f32 %v14834_v11, %v5660_v42 }
0x1487   :  { %v5677_v8 = vmul.f32 1.442695, %v5661_v30  ;;  %v5679_v57 = vmul.f32 1.442695, %v5662_v38  ;;  %v5681_v23 = vmul.f32 1.442695, %v5663_v10 }
0x1488   :  { %v5683_v7 = vmul.f32 1.442695, %v5664_v44  ;;  %v5685_v17 = vmul.f32 1.442695, %v5665_v50  ;;  %v5687_v28 = vmul.f32 1.442695, %v5666_v25 }
0x1489   :  { %12011 = vpow2.f32 %v5677_v8  ;;  %v5689_v6 = vmul.f32 1.442695, %v5667_v32  ;;  %v5691_v18 = vmul.f32 1.442695, %v5668_v9  ;;  %v5693_v16 = vmul.f32 1.442695, %v5669_v12 }
0x148a   :  { %12013 = vpow2.f32 %v5679_v57  ;;  %v5695_v4 = vmul.f32 1.442695, %v5670_v2  ;;  %v5697_v49 = vmul.f32 1.442695, %v5671_v59  ;;  %v5699_v42 = vmul.f32 1.442695, %v5672_v3 }
0x148b   :  { %12015 = vpow2.f32 %v5681_v23  ;;  %v5701_v10 = vmul.f32 1.442695, %v5673_v5  ;;  %v5703_v25 = vmul.f32 1.442695, %v5674_v26  ;;  %v5705_v12 = vmul.f32 1.442695, %v5675_v20 }
0x148c   :  { %12017 = vpow2.f32 %v5683_v7  ;;  %v5707_v59 = vmul.f32 1.442695, %v5676_v52 }
0x148d   :  { %12019 = vpow2.f32 %v5685_v17 }
0x148e   :  { %12021 = vpow2.f32 %v5687_v28 }
0x148f   :  { %12023 = vpow2.f32 %v5689_v6 }
0x1490   :  { %12025 = vpow2.f32 %v5691_v18 }
0x1491   :  { %12027 = vpow2.f32 %v5693_v16 }
0x1492   :  { %12029 = vpow2.f32 %v5695_v4 }
0x1493   :  { %v12012_v61 = vpop.eup %12011  ;;  %12031 = vpow2.f32 %v5697_v49 }
0x1494   :  { %v12014_v33 = vpop.eup %12013  ;;  %12033 = vpow2.f32 %v5699_v42 }
0x1495   :  { %v5709_v19 = vadd.f32 %v12014_v33, %v12012_v61  ;;  %v12016_v11 = vpop.eup %12015  ;;  %12035 = vpow2.f32 %v5701_v10 }
0x1496   :  { %v12018_v41 = vpop.eup %12017  ;;  %12037 = vpow2.f32 %v5703_v25 }
0x1497   :  { %v5710_v21 = vadd.f32 %v12016_v11, %v5709_v19  ;;  %v12020_v60 = vpop.eup %12019  ;;  %12039 = vpow2.f32 %v5705_v12 }
0x1498   :  { %v12022_v38 = vpop.eup %12021  ;;  %12041 = vpow2.f32 %v5707_v59 }
0x1499   :  { %v5711_v35 = vadd.f32 %v12018_v41, %v5710_v21  ;;  %v12024_v50 = vpop.eup %12023 }
0x149a   :  { %v12026_v9 = vpop.eup %12025 }
0x149b   :  { %v5712_v30 = vadd.f32 %v12020_v60, %v5711_v35  ;;  %v12028_v8 = vpop.eup %12027 }
0x149c   :  { %v12030_v23 = vpop.eup %12029 }
0x149d   :  { %v5713_v44 = vadd.f32 %v12022_v38, %v5712_v30  ;;  %v12032_v7 = vpop.eup %12031 }
0x149e   :  { %v12034_v5 = vpop.eup %12033 }
0x149f   :  { %v5714_v32 = vadd.f32 %v12024_v50, %v5713_v44  ;;  %v12036_v6 = vpop.eup %12035 }
0x14a0   :  { %v12038_v26 = vpop.eup %12037 }
0x14a1   :  { %v5715_v2 = vadd.f32 %v12026_v9, %v5714_v32  ;;  %v12040_v19 = vpop.eup %12039 }
0x14a2   :  { %v12042_v20 = vpop.eup %12041 }
0x14a3   :  { %v5716_v57 = vadd.f32 %v12028_v8, %v5715_v2 }
0x14a5   :  { %v5717_v3 = vadd.f32 %v12030_v23, %v5716_v57 }
0x14a7   :  { %v5718_v17 = vadd.f32 %v12032_v7, %v5717_v3 }
0x14a9   :  { %v5719_v28 = vadd.f32 %v12034_v5, %v5718_v17 }
0x14ab   :  { %v5720_v18 = vadd.f32 %v12036_v6, %v5719_v28 }
0x14ad   :  { %v5721_v16 = vadd.f32 %v12038_v26, %v5720_v18 }
0x14af   :  { %v5722_v4 = vadd.f32 %v12040_v19, %v5721_v16 }
0x14b1   :  { %v5723_v21 = vadd.f32 %v12042_v20, %v5722_v4 }
0x14b3   :  { %v5724_v49 = vrot.slane %v5723_v21, 4 }
0x14b5   :  { %v5725_v35 = vadd.f32 %v5724_v49, %v5723_v21 }
0x14b7   :  { %v5726_v52 = vrot.slane %v5725_v35, 2 }
0x14b9   :  { %v5727_v42 = vadd.f32 %v5726_v52, %v5725_v35 }
0x14bb   :  { %v5728_v30 = vrot.slane %v5727_v42, 1 }
0x14bd   :  { %v5729_v10 = vadd.f32 %v5728_v30, %v5727_v42 }
0x14bf   :  { %12043 = vrcp.f32 %v5729_v10 }
0x14c9   :  { %v12044_v44 = vpop.eup %12043 }
0x14ca   :  { %v5731_v25 = vmul.f32 %v12044_v44, %v12012_v61  ;;  %v5732_v32 = vmul.f32 %v12044_v44, %v12014_v33  ;;  %v5733_v12 = vmul.f32 %v12044_v44, %v12016_v11  ;;  %v5734_v2 = vmul.f32 %v12044_v44, %v12018_v41 }
0x14cb   :  { %v5735_v59 = vmul.f32 %v12044_v44, %v12020_v60  ;;  %v5736_v57 = vmul.f32 %v12044_v44, %v12022_v38  ;;  %v5737_v3 = vmul.f32 %v12044_v44, %v12024_v50  ;;  %v5738_v17 = vmul.f32 %v12044_v44, %v12026_v9 }
0x14cc   :  { %v11456_v28 = vpack.c.bf16 %v5732_v32, %v5731_v25  ;;  %v11459_v18 = vpack.c.bf16 %v5734_v2, %v5733_v12  ;;  %v5739_v16 = vmul.f32 %v12044_v44, %v12028_v8  ;;  %v5740_v4 = vmul.f32 %v12044_v44, %v12030_v23 }
0x14cd   :  { %v11462_v29 = vpack.c.bf16 %v5736_v57, %v5735_v59  ;;  %v11465_v21 = vpack.c.bf16 %v5738_v17, %v5737_v3  ;;  %v5741_v49 = vmul.f32 %v12044_v44, %v12032_v7  ;;  %v5742_v35 = vmul.f32 %v12044_v44, %v12034_v5 }
0x14ce   :  { %11457 = vmatpush3.bf16.msra.mxu1 %v11456_v28  ;;  %v11468_v52 = vpack.c.bf16 %v5740_v4, %v5739_v16  ;;  %v5743_v42 = vmul.f32 %v12044_v44, %v12036_v6  ;;  %v5744_v30 = vmul.f32 %v12044_v44, %v12038_v26  ;;  %v5745_v61 = vmul.f32 %v12044_v44, %v12040_v19 }
0x14cf   :  { %11458 = vmatprep.subr.bf16.mxu1 %v15770_v46  ;;  %v11471_v33 = vpack.c.bf16 %v5742_v35, %v5741_v49  ;;  %v5746_v11 = vmul.f32 %v12044_v44, %v12042_v20  ;;  %v4922_v38 = vadd.f32 %v14281_v13, %v14418_v54  ;;  %v15873_v13 = vld [vmem:[#allocation40_spill] sm:$0xff] }
0x14d0   :  { %v11474_v41 = vpack.c.bf16 %v5744_v30, %v5743_v42 }
0x14d1   :  { %v11477_v60 = vpack.c.bf16 %v5746_v11, %v5745_v61 }
0x14d2   :  { %11460 = vmatpush3.bf16.msra.mxu1 %v11459_v18 }
0x14d3   :  { %11461 = vmatprep.subr.bf16.mxu1 %v15770_v46 }
0x14d6   :  { %11463 = vmatpush3.bf16.msra.mxu1 %v11462_v29  ;;  %v15874_v29 = vld [vmem:[#allocation41_spill] sm:$0xff] }
0x14d7   :  { %11464 = vmatprep.subr.bf16.mxu1 %v15770_v46 }
0x14da   :  { %11466 = vmatpush3.bf16.msra.mxu1 %v11465_v21 }
0x14db   :  { %11467 = vmatprep.subr.bf16.mxu1 %v15770_v46 }
0x14de   :  { %11469 = vmatpush3.bf16.msra.mxu1 %v11468_v52 }
0x14df   :  { %11470 = vmatprep.subr.bf16.mxu1 %v15770_v46 }
0x14e2   :  { %11472 = vmatpush3.bf16.msra.mxu1 %v11471_v33 }
0x14e3   :  { %11473 = vmatprep.subr.bf16.mxu1 %v15770_v46 }
0x14e6   :  { %11475 = vmatpush3.bf16.msra.mxu1 %v11474_v41 }
0x14e7   :  { %11476 = vmatprep.subr.bf16.mxu1 %v15770_v46 }
0x14ea   :  { %11478 = vmatpush3.bf16.msra.mxu1 %v11477_v60 }
0x14eb   :  { %10809 = vmatprep.subr.mxu1 %v4922_v38 }
0x14ed   :  { %10807 = vmatmul.mubr.f32.vlgmr.msra.gmra.mrb[124].mxu1 %v14400_v39  ;;  %v15875_v39 = vld [vmem:[#allocation42_spill] sm:$0xff] }
0x14ee   :  { %10810 = vmatpush3.msra.mxu1 %v4922_v38  ;;  %10811 = vmatprep.mubr.msk.f32.mxu1 %vm503_vm1, %v14420_v45  ;;  %v15876_v45 = vld [vmem:[#allocation43_spill] sm:$0xff] }
0x14ef   :  { %11503 = vmatprep.subr.bf16.mxu1 %v15770_v46 }
0x14f1   :  { %10812 = vmatmul.mubr.msk.f32.vlgmr.msra.gmra.mrb[126].mxu1 %vm503_vm1, %v14422_v55  ;;  %v15877_v55 = vld [vmem:[#allocation44_spill] sm:$0xff] }
0x14f2   :  { %10814 = vmatprep.mubr.msk.f32.mxu1 %vm503_vm1, %v14424_v58  ;;  %v15878_v58 = vld [vmem:[#allocation45_spill] sm:$0xff] }
0x14f5   :  { %10815 = vmatmul.mubr.msk.f32.gmra.mrb[128].mxu1 %vm503_vm1, %v14428_v27  ;;  %v15879_v27 = vld [vmem:[#allocation13_spill] sm:$0xff] }
0x14f6   :  { %10817 = vmatprep.mubr.msk.f32.mxu1 %vm503_vm1, %v14444_v47  ;;  %v15880_v47 = vld [vmem:[#allocation16_spill] sm:$0xff] }
0x14f9   :  { %10818 = vmatmul.mubr.msk.f32.gmra.mrb[130].mxu1 %vm503_vm1, %v15873_v13 }
0x14fa   :  { %10820 = vmatprep.mubr.msk.f32.mxu1 %vm503_vm1, %v15874_v29 }
0x14fd   :  { %10821 = vmatmul.mubr.msk.f32.gmra.mrb[132].mxu1 %vm503_vm1, %v15875_v39 }
0x14fe   :  { %10823 = vmatprep.mubr.msk.f32.mxu1 %vm503_vm1, %v15876_v45 }
0x1501   :  { %10824 = vmatmul.mubr.msk.f32.gmra.mrb[134].mxu1 %vm503_vm1, %v15877_v55 }
0x1502   :  { %10826 = vmatprep.mubr.msk.f32.mxu1 %vm503_vm1, %v15878_v58 }
0x1505   :  { %10827 = vmatmul.mubr.msk.f32.gmra.mrb[136].mxu1 %vm503_vm1, %v14494_v63 }
0x1506   :  { %10829 = vmatprep.mubr.msk.f32.mxu1 %vm503_vm1, %v14497_v37 }
0x1509   :  { %10830 = vmatmul.mubr.msk.f32.gmra.mrb[138].mxu1 %vm503_vm1, %v14503_v43 }
0x150a   :  { %10832 = vmatprep.mubr.msk.f32.mxu1 %vm503_vm1, %v15879_v27 }
0x150d   :  { %10833 = vmatmul.mubr.msk.f32.gmra.mrb[140].mxu1 %vm503_vm1, %v15880_v47 }
0x150e   :  { %10928 = vmatprep.mubr.msk.f32.mxu1 %vm12260_vm2, %v15752_v24 }
0x15c0   :  { %v14898_v50 = vpop.f32.mrb[124].mxu1 }
0x15c1   :  { %v11625_v63 = vpack.c.bf16 %v14898_v50, %v14799_v31  ;;  %v10808_v9 = vpop.f32.mrb[125].mxu1  ;;  %v9580_v31 = vld [vmem:[%s15694_s6 + $0x28] sm:$0xff]  ;;  %v9581_v50 = vld [vmem:[%s15694_s6 + $0x30] sm:$0xff] }
0x15c4   :  { %v10813_v8 = vpop.f32.mrb[126].mxu1 }
0x15c5   :  { %v5964_v37 = vpop.f32.mrb[127].mxu1  ;;  %v14902_v5 = vmul.f32 0.35355338, %v10813_v8 }
0x15c6   :  { %v6043_v19 = vmul.f32 0.35355338, %v5964_v37 }
0x15c8   :  { %v10816_v23 = vpop.f32.mrb[128].mxu1 }
0x15c9   :  { %v5974_v7 = vpop.f32.mrb[129].mxu1  ;;  %v6046_v32 = vmul.f32 0.35355338, %v10816_v23 }
0x15ca   :  { %v6045_v59 = vmul.f32 0.35355338, %v5974_v7 }
0x15cc   :  { %v10819_v43 = vpop.f32.mrb[130].mxu1 }
0x15cd   :  { %v14904_v6 = vmul.f32 0.35355338, %v10819_v43  ;;  %v5984_v26 = vpop.f32.mrb[131].mxu1 }
0x15ce   :  { %v14906_v20 = vmul.f32 0.35355338, %v5984_v26 }
0x15cf   :  { %v6060_v10 = vmax.f32 %v14902_v5, %v14904_v6 }
0x15d0   :  { %v6059_v44 = vmax.f32 %v6043_v19, %v14906_v20  ;;  %v10822_v25 = vpop.f32.mrb[132].mxu1 }
0x15d1   :  { %v14911_v12 = vmul.f32 0.35355338, %v10822_v25  ;;  %v5994_v2 = vpop.f32.mrb[133].mxu1 }
0x15d2   :  { %v14913_v57 = vmul.f32 0.35355338, %v5994_v2 }
0x15d3   :  { %v6062_v3 = vmax.f32 %v6046_v32, %v14911_v12 }
0x15d4   :  { %v6061_v17 = vmax.f32 %v6045_v59, %v14913_v57  ;;  %v10825_v28 = vpop.f32.mrb[134].mxu1 }
0x15d5   :  { %v14917_v18 = vmul.f32 0.35355338, %v10825_v28  ;;  %v6004_v16 = vpop.f32.mrb[135].mxu1 }
0x15d6   :  { %v14919_v4 = vmul.f32 0.35355338, %v6004_v16 }
0x15d7   :  { %v6064_v21 = vmax.f32 %v6060_v10, %v14917_v18 }
0x15d8   :  { %v6063_v49 = vmax.f32 %v6059_v44, %v14919_v4  ;;  %v10828_v35 = vpop.f32.mrb[136].mxu1 }
0x15d9   :  { %v14923_v52 = vmul.f32 0.35355338, %v10828_v35  ;;  %v6014_v42 = vpop.f32.mrb[137].mxu1 }
0x15da   :  { %v14925_v30 = vmul.f32 0.35355338, %v6014_v42 }
0x15db   :  { %v6066_v61 = vmax.f32 %v6062_v3, %v14923_v52 }
0x15dc   :  { %v6065_v33 = vmax.f32 %v6061_v17, %v14925_v30  ;;  %v10831_v11 = vpop.f32.mrb[138].mxu1 }
0x15dd   :  { %v14929_v41 = vmul.f32 0.35355338, %v10831_v11  ;;  %v6024_v60 = vpop.f32.mrb[139].mxu1 }
0x15de   :  { %v14931_v38 = vmul.f32 0.35355338, %v6024_v60 }
0x15df   :  { %v6068_v13 = vmax.f32 %v6064_v21, %v14929_v41 }
0x15e0   :  { %v6067_v29 = vmax.f32 %v6063_v49, %v14931_v38  ;;  %v10834_v39 = vpop.f32.mrb[140].mxu1 }
0x15e1   :  { %v14935_v45 = vmul.f32 0.35355338, %v10834_v39  ;;  %v6034_v55 = vpop.f32.mrb[141].mxu1 }
0x15e2   :  { %v6071_v58 = vmax.f32 %v6067_v29, %v6068_v13  ;;  %v14937_v27 = vmul.f32 0.35355338, %v6034_v55 }
0x15e3   :  { %v6070_v47 = vmax.f32 %v6066_v61, %v14935_v45 }
0x15e4   :  { %v6069_v9 = vmax.f32 %v6065_v33, %v14937_v27 }
0x15e6   :  { %v6072_v8 = vmax.f32 %v6069_v9, %v6070_v47 }
0x15e8   :  { %v6073_v37 = vmax.f32 %v6071_v58, %v6072_v8 }
0x15ea   :  { %v6074_v23 = vrot.slane %v6073_v37, 4 }
0x15ec   :  { %v6075_v7 = vmax.f32 %v6073_v37, %v6074_v23 }
0x15ee   :  { %v6076_v43 = vrot.slane %v6075_v7, 2 }
0x15f0   :  { %v6077_v26 = vmax.f32 %v6075_v7, %v6076_v43 }
0x15f2   :  { %v6078_v10 = vrot.slane %v6077_v26, 1 }
0x15f4   :  { %v6079_v44 = vmax.f32 %v6077_v26, %v6078_v10 }
0x15f6   :  { %v6080_v25 = vsub.f32 %v6043_v19, %v6079_v44  ;;  %v6081_v2 = vsub.f32 %v14902_v5, %v6079_v44  ;;  %v6082_v3 = vsub.f32 %v6045_v59, %v6079_v44  ;;  %v6083_v17 = vsub.f32 %v6046_v32, %v6079_v44 }
0x15f7   :  { %v6084_v28 = vsub.f32 %v14906_v20, %v6079_v44  ;;  %v6085_v16 = vsub.f32 %v14904_v6, %v6079_v44  ;;  %v6086_v21 = vsub.f32 %v14913_v57, %v6079_v44  ;;  %v6087_v49 = vsub.f32 %v14911_v12, %v6079_v44 }
0x15f8   :  { %v6088_v35 = vsub.f32 %v14919_v4, %v6079_v44  ;;  %v6089_v42 = vsub.f32 %v14917_v18, %v6079_v44  ;;  %v6090_v61 = vsub.f32 %v14925_v30, %v6079_v44  ;;  %v6091_v19 = vsub.f32 %v14923_v52, %v6079_v44 }
0x15f9   :  { %v6092_v5 = vsub.f32 %v14931_v38, %v6079_v44  ;;  %v6093_v32 = vsub.f32 %v14929_v41, %v6079_v44  ;;  %v6094_v20 = vsub.f32 %v14937_v27, %v6079_v44  ;;  %v6095_v6 = vsub.f32 %v14935_v45, %v6079_v44 }
0x15fa   :  { %v6096_v59 = vmul.f32 1.442695, %v6080_v25  ;;  %v6098_v57 = vmul.f32 1.442695, %v6081_v2  ;;  %v6100_v33 = vmul.f32 1.442695, %v6082_v3 }
0x15fb   :  { %v6102_v12 = vmul.f32 1.442695, %v6083_v17  ;;  %v6104_v18 = vmul.f32 1.442695, %v6084_v28  ;;  %v6106_v4 = vmul.f32 1.442695, %v6085_v16 }
0x15fc   :  { %12045 = vpow2.f32 %v6096_v59  ;;  %v6108_v52 = vmul.f32 1.442695, %v6086_v21  ;;  %v6110_v30 = vmul.f32 1.442695, %v6087_v49  ;;  %v6112_v60 = vmul.f32 1.442695, %v6088_v35 }
0x15fd   :  { %12047 = vpow2.f32 %v6098_v57  ;;  %v6114_v29 = vmul.f32 1.442695, %v6089_v42  ;;  %v6116_v55 = vmul.f32 1.442695, %v6090_v61  ;;  %v6118_v47 = vmul.f32 1.442695, %v6091_v19 }
0x15fe   :  { %12049 = vpow2.f32 %v6100_v33  ;;  %v6120_v37 = vmul.f32 1.442695, %v6092_v5  ;;  %v6122_v43 = vmul.f32 1.442695, %v6093_v32  ;;  %v6124_v44 = vmul.f32 1.442695, %v6094_v20 }
0x15ff   :  { %12051 = vpow2.f32 %v6102_v12  ;;  %v6126_v3 = vmul.f32 1.442695, %v6095_v6 }
0x1600   :  { %12053 = vpow2.f32 %v6104_v18 }
0x1601   :  { %12055 = vpow2.f32 %v6106_v4 }
0x1602   :  { %12057 = vpow2.f32 %v6108_v52 }
0x1603   :  { %12059 = vpow2.f32 %v6110_v30 }
0x1604   :  { %12061 = vpow2.f32 %v6112_v60 }
0x1605   :  { %12063 = vpow2.f32 %v6114_v29 }
0x1606   :  { %v12046_v11 = vpop.eup %12045  ;;  %12065 = vpow2.f32 %v6116_v55 }
0x1607   :  { %v12048_v41 = vpop.eup %12047  ;;  %12067 = vpow2.f32 %v6118_v47 }
0x1608   :  { %v6128_v38 = vadd.f32 %v12048_v41, %v12046_v11  ;;  %v12050_v13 = vpop.eup %12049  ;;  %12069 = vpow2.f32 %v6120_v37 }
0x1609   :  { %v12052_v45 = vpop.eup %12051  ;;  %12071 = vpow2.f32 %v6122_v43 }
0x160a   :  { %v6129_v39 = vadd.f32 %v12050_v13, %v6128_v38  ;;  %v12054_v27 = vpop.eup %12053  ;;  %12073 = vpow2.f32 %v6124_v44 }
0x160b   :  { %v12056_v8 = vpop.eup %12055  ;;  %12075 = vpow2.f32 %v6126_v3 }
0x160c   :  { %v6130_v58 = vadd.f32 %v12052_v45, %v6129_v39  ;;  %v12058_v7 = vpop.eup %12057 }
0x160d   :  { %v12060_v10 = vpop.eup %12059 }
0x160e   :  { %v6131_v9 = vadd.f32 %v12054_v27, %v6130_v58  ;;  %v12062_v2 = vpop.eup %12061 }
0x160f   :  { %v12064_v28 = vpop.eup %12063 }
0x1610   :  { %v6132_v23 = vadd.f32 %v12056_v8, %v6131_v9  ;;  %v12066_v21 = vpop.eup %12065 }
0x1611   :  { %v12068_v35 = vpop.eup %12067 }
0x1612   :  { %v6133_v26 = vadd.f32 %v12058_v7, %v6132_v23  ;;  %v12070_v61 = vpop.eup %12069 }
0x1613   :  { %v12072_v5 = vpop.eup %12071 }
0x1614   :  { %v6134_v25 = vadd.f32 %v12060_v10, %v6133_v26  ;;  %v12074_v59 = vpop.eup %12073 }
0x1615   :  { %v12076_v20 = vpop.eup %12075 }
0x1616   :  { %v6135_v17 = vadd.f32 %v12062_v2, %v6134_v25 }
0x1618   :  { %v6136_v16 = vadd.f32 %v12064_v28, %v6135_v17 }
0x161a   :  { %v6137_v49 = vadd.f32 %v12066_v21, %v6136_v16 }
0x161c   :  { %v6138_v42 = vadd.f32 %v12068_v35, %v6137_v49 }
0x161e   :  { %v6139_v19 = vadd.f32 %v12070_v61, %v6138_v42 }
0x1620   :  { %v6140_v32 = vadd.f32 %v12072_v5, %v6139_v19 }
0x1622   :  { %v6141_v57 = vadd.f32 %v12074_v59, %v6140_v32  ;;  %v15888_v32 = vld [vmem:[#allocation14_spill] sm:$0xff] }
0x1624   :  { %v6142_v33 = vadd.f32 %v12076_v20, %v6141_v57  ;;  %v15890_v57 = vld [vmem:[#allocation17_spill] sm:$0xff] }
0x1626   :  { %v6143_v12 = vrot.slane %v6142_v33, 4 }
0x1628   :  { %v6144_v18 = vadd.f32 %v6143_v12, %v6142_v33  ;;  %v15892_v33 = vld [vmem:[#allocation4_spill] sm:$0xff]  ;;  %v15893_v12 = vld [vmem:[#allocation6_spill] sm:$0xff] }
0x162a   :  { %v6145_v6 = vrot.slane %v6144_v18, 2 }
0x162c   :  { %v6146_v4 = vadd.f32 %v6145_v6, %v6144_v18  ;;  %v15894_v18 = vld [vmem:[#allocation3_spill] sm:$0xff]  ;;  %v15895_v6 = vld [vmem:[#allocation5_spill] sm:$0xff] }
0x162e   :  { %v6147_v52 = vrot.slane %v6146_v4, 1 }
0x1630   :  { %v6148_v30 = vadd.f32 %v6147_v52, %v6146_v4  ;;  %v15896_v4 = vld [vmem:[#allocation7_spill] sm:$0xff]  ;;  %v15897_v52 = vld [vmem:[#allocation8_spill] sm:$0xff] }
0x1632   :  { %12077 = vrcp.f32 %v6148_v30 }
0x163c   :  { %v12078_v60 = vpop.eup %12077 }
0x163d   :  { %v6150_v38 = vmul.f32 %v12078_v60, %v12046_v11  ;;  %v6151_v29 = vmul.f32 %v12078_v60, %v12048_v41  ;;  %v6152_v39 = vmul.f32 %v12078_v60, %v12050_v13  ;;  %v6153_v55 = vmul.f32 %v12078_v60, %v12052_v45 }
0x163e   :  { %v6154_v58 = vmul.f32 %v12078_v60, %v12054_v27  ;;  %v6155_v47 = vmul.f32 %v12078_v60, %v12056_v8  ;;  %v6156_v9 = vmul.f32 %v12078_v60, %v12058_v7  ;;  %v6157_v37 = vmul.f32 %v12078_v60, %v12060_v10  ;;  %v15881_v8 = vld [vmem:[#allocation46_spill] sm:$0xff]  ;;  %v15882_v7 = vld [vmem:[#allocation35_spill] sm:$0xff] }
0x163f   :  { %v11480_v23 = vpack.c.bf16 %v6151_v29, %v6150_v38  ;;  %v11483_v43 = vpack.c.bf16 %v6153_v55, %v6152_v39  ;;  %v6158_v26 = vmul.f32 %v12078_v60, %v12062_v2  ;;  %v6159_v44 = vmul.f32 %v12078_v60, %v12064_v28  ;;  %v15883_v2 = vld [vmem:[#allocation39_spill] sm:$0xff] }
0x1640   :  { %v11486_v25 = vpack.c.bf16 %v6155_v47, %v6154_v58  ;;  %v11489_v3 = vpack.c.bf16 %v6157_v37, %v6156_v9  ;;  %v6160_v17 = vmul.f32 %v12078_v60, %v12066_v21  ;;  %v6161_v16 = vmul.f32 %v12078_v60, %v12068_v35  ;;  %v15884_v28 = vld [vmem:[#allocation11_spill] sm:$0xff] }
0x1641   :  { %11481 = vmatpush3.bf16.msra.mxu0 %v11480_v23  ;;  %v11492_v49 = vpack.c.bf16 %v6159_v44, %v6158_v26  ;;  %v6162_v42 = vmul.f32 %v12078_v60, %v12070_v61  ;;  %v6163_v19 = vmul.f32 %v12078_v60, %v12072_v5  ;;  %v6164_v11 = vmul.f32 %v12078_v60, %v12074_v59  ;;  %v15885_v35 = vld [vmem:[#allocation47_spill] sm:$0xff]  ;;  %v15887_v5 = vld [vmem:[#allocation18_spill] sm:$0xff]  ;;  %v15889_v59 = vld [vmem:[#allocation49_spill] sm:$0xff] }
0x1642   :  { %11482 = vmatprep.subr.bf16.mxu0 %v15770_v46  ;;  %v11495_v41 = vpack.c.bf16 %v6161_v16, %v6160_v17  ;;  %v6165_v13 = vmul.f32 %v12078_v60, %v12076_v20  ;;  %v4928_v10 = vadd.f32 %v15882_v7, %v15881_v8  ;;  %v4970_v21 = vadd.f32 %v15884_v28, %v15883_v2  ;;  %v15886_v61 = vld [vmem:[#allocation19_spill] sm:$0xff]  ;;  %v15891_v20 = vld [vmem:[#allocation22_spill] sm:$0xff] }
0x1643   :  { %v11498_v45 = vpack.c.bf16 %v6163_v19, %v6162_v42 }
0x1644   :  { %v11501_v27 = vpack.c.bf16 %v6165_v13, %v6164_v11 }
0x1645   :  { %11484 = vmatpush3.bf16.msra.mxu0 %v11483_v43 }
0x1646   :  { %11485 = vmatprep.subr.bf16.mxu0 %v15770_v46 }
0x1649   :  { %11487 = vmatpush3.bf16.msra.mxu0 %v11486_v25 }
0x164a   :  { %11488 = vmatprep.subr.bf16.mxu0 %v15770_v46 }
0x164d   :  { %11490 = vmatpush3.bf16.msra.mxu0 %v11489_v3 }
0x164e   :  { %11491 = vmatprep.subr.bf16.mxu0 %v15770_v46 }
0x1651   :  { %11493 = vmatpush3.bf16.msra.mxu0 %v11492_v49 }
0x1652   :  { %11494 = vmatprep.subr.bf16.mxu0 %v15770_v46 }
0x1655   :  { %11496 = vmatpush3.bf16.msra.mxu0 %v11495_v41 }
0x1656   :  { %11497 = vmatprep.subr.bf16.mxu0 %v15770_v46 }
0x1659   :  { %11499 = vmatpush3.bf16.msra.mxu0 %v11498_v45 }
0x165a   :  { %11500 = vmatprep.subr.bf16.mxu0 %v15770_v46 }
0x165d   :  { %11502 = vmatpush3.bf16.msra.mxu0 %v11501_v27 }
0x165e   :  { %10870 = vmatprep.subr.mxu0 %v4928_v10 }
0x1660   :  { %10868 = vmatmul.mubr.f32.vlgmr.msra.gmra.mrb[150].mxu0 %v4970_v21 }
0x1661   :  { %10871 = vmatpush3.msra.mxu0 %v4928_v10  ;;  %10872 = vmatprep.mubr.msk.f32.mxu0 %vm503_vm1, %v15885_v35 }
0x1662   :  { %11527 = vmatprep.subr.bf16.mxu0 %v15770_v46 }
0x1664   :  { %10873 = vmatmul.mubr.msk.f32.vlgmr.msra.gmra.mrb[152].mxu0 %vm503_vm1, %v15886_v61 }
0x1665   :  { %10875 = vmatprep.mubr.msk.f32.mxu0 %vm503_vm1, %v15887_v5 }
0x1668   :  { %10876 = vmatmul.mubr.msk.f32.gmra.mrb[154].mxu0 %vm503_vm1, %v15888_v32 }
0x1669   :  { %10878 = vmatprep.mubr.msk.f32.mxu0 %vm503_vm1, %v15889_v59 }
0x166c   :  { %10879 = vmatmul.mubr.msk.f32.gmra.mrb[156].mxu0 %vm503_vm1, %v15890_v57 }
0x166d   :  { %10881 = vmatprep.mubr.msk.f32.mxu0 %vm503_vm1, %v15891_v20 }
0x1670   :  { %10882 = vmatmul.mubr.msk.f32.gmra.mrb[158].mxu0 %vm503_vm1, %v15892_v33 }
0x1671   :  { %10884 = vmatprep.mubr.msk.f32.mxu0 %vm503_vm1, %v15893_v12 }
0x1674   :  { %10885 = vmatmul.mubr.msk.f32.gmra.mrb[160].mxu0 %vm503_vm1, %v15894_v18 }
0x1675   :  { %10887 = vmatprep.mubr.msk.f32.mxu0 %vm503_vm1, %v15895_v6 }
0x1678   :  { %10888 = vmatmul.mubr.msk.f32.gmra.mrb[162].mxu0 %vm503_vm1, %v15896_v4 }
0x1679   :  { %10890 = vmatprep.mubr.msk.f32.mxu0 %vm503_vm1, %v15897_v52 }
0x167c   :  { %10891 = vmatmul.mubr.msk.f32.gmra.mrb[164].mxu0 %vm503_vm1, %v14639_v48 }
0x167d   :  { %10893 = vmatprep.mubr.msk.f32.mxu0 %vm503_vm1, %v14648_v62 }
0x1680   :  { %10894 = vmatmul.mubr.msk.f32.gmra.mrb[166].mxu0 %vm503_vm1, %v14661_v15 }
0x1681   :  { %10989 = vmatprep.mubr.msk.f32.mxu0 %vm12260_vm2, %v15752_v24 }
0x1733   :  { %v15000_v30 = vpop.f32.mrb[150].mxu0 }
0x1734   :  { %v10869_v60 = vpop.f32.mrb[151].mxu0 }
0x1737   :  { %v10874_v38 = vpop.f32.mrb[152].mxu0 }
0x1738   :  { %v6383_v29 = vpop.f32.mrb[153].mxu0  ;;  %v15002_v47 = vmul.f32 0.35355338, %v10874_v38 }
0x1739   :  { %v6462_v62 = vmul.f32 0.35355338, %v6383_v29 }
0x173b   :  { %v10877_v39 = vpop.f32.mrb[154].mxu0 }
0x173c   :  { %v6393_v55 = vpop.f32.mrb[155].mxu0  ;;  %v6465_v26 = vmul.f32 0.35355338, %v10877_v39 }
0x173d   :  { %v6464_v3 = vmul.f32 0.35355338, %v6393_v55 }
0x173f   :  { %v10880_v58 = vpop.f32.mrb[156].mxu0 }
0x1740   :  { %v15004_v48 = vmul.f32 0.35355338, %v10880_v58  ;;  %v6403_v9 = vpop.f32.mrb[157].mxu0 }
0x1741   :  { %v15006_v37 = vmul.f32 0.35355338, %v6403_v9 }
0x1742   :  { %v6479_v15 = vmax.f32 %v15002_v47, %v15004_v48 }
0x1743   :  { %v6478_v23 = vmax.f32 %v6462_v62, %v15006_v37  ;;  %v10883_v43 = vpop.f32.mrb[158].mxu0 }
0x1744   :  { %v15011_v44 = vmul.f32 0.35355338, %v10883_v43  ;;  %v6413_v25 = vpop.f32.mrb[159].mxu0 }
0x1745   :  { %v15013_v17 = vmul.f32 0.35355338, %v6413_v25 }
0x1746   :  { %v6481_v16 = vmax.f32 %v6465_v26, %v15011_v44 }
0x1747   :  { %v6480_v49 = vmax.f32 %v6464_v3, %v15013_v17  ;;  %v10886_v42 = vpop.f32.mrb[160].mxu0 }
0x1748   :  { %v15017_v19 = vmul.f32 0.35355338, %v10886_v42  ;;  %v6423_v11 = vpop.f32.mrb[161].mxu0 }
0x1749   :  { %v15019_v41 = vmul.f32 0.35355338, %v6423_v11 }
0x174a   :  { %v6483_v13 = vmax.f32 %v6479_v15, %v15017_v19 }
0x174b   :  { %v6482_v45 = vmax.f32 %v6478_v23, %v15019_v41  ;;  %v10889_v27 = vpop.f32.mrb[162].mxu0 }
0x174c   :  { %v15023_v7 = vmul.f32 0.35355338, %v10889_v27  ;;  %v6433_v10 = vpop.f32.mrb[163].mxu0 }
0x174d   :  { %v15025_v28 = vmul.f32 0.35355338, %v6433_v10 }
0x174e   :  { %v6485_v21 = vmax.f32 %v6481_v16, %v15023_v7 }
0x174f   :  { %v6484_v35 = vmax.f32 %v6480_v49, %v15025_v28  ;;  %v10892_v61 = vpop.f32.mrb[164].mxu0 }
0x1750   :  { %v15029_v5 = vmul.f32 0.35355338, %v10892_v61  ;;  %v6443_v32 = vpop.f32.mrb[165].mxu0 }
0x1751   :  { %v15031_v59 = vmul.f32 0.35355338, %v6443_v32 }
0x1752   :  { %v6487_v57 = vmax.f32 %v6483_v13, %v15029_v5 }
0x1753   :  { %v6486_v20 = vmax.f32 %v6482_v45, %v15031_v59  ;;  %v10895_v33 = vpop.f32.mrb[166].mxu0 }
0x1754   :  { %v15035_v12 = vmul.f32 0.35355338, %v10895_v33  ;;  %v6453_v18 = vpop.f32.mrb[167].mxu0 }
0x1755   :  { %v6490_v6 = vmax.f32 %v6486_v20, %v6487_v57  ;;  %v15037_v4 = vmul.f32 0.35355338, %v6453_v18 }
0x1756   :  { %v6489_v52 = vmax.f32 %v6485_v21, %v15035_v12 }
0x1757   :  { %v6488_v60 = vmax.f32 %v6484_v35, %v15037_v4 }
0x1759   :  { %v6491_v38 = vmax.f32 %v6488_v60, %v6489_v52 }
0x175b   :  { %v6492_v29 = vmax.f32 %v6490_v6, %v6491_v38 }
0x175d   :  { %v6493_v39 = vrot.slane %v6492_v29, 4 }
0x175f   :  { %v6494_v55 = vmax.f32 %v6492_v29, %v6493_v39 }
0x1761   :  { %v6495_v58 = vrot.slane %v6494_v55, 2 }
0x1763   :  { %v6496_v9 = vmax.f32 %v6494_v55, %v6495_v58 }
0x1765   :  { %v6497_v15 = vrot.slane %v6496_v9, 1 }
0x1767   :  { %v6498_v23 = vmax.f32 %v6496_v9, %v6497_v15 }
0x1769   :  { %v6499_v43 = vsub.f32 %v6462_v62, %v6498_v23  ;;  %v6500_v25 = vsub.f32 %v15002_v47, %v6498_v23  ;;  %v6501_v16 = vsub.f32 %v6464_v3, %v6498_v23  ;;  %v6502_v49 = vsub.f32 %v6465_v26, %v6498_v23 }
0x176a   :  { %v6503_v42 = vsub.f32 %v15006_v37, %v6498_v23  ;;  %v6504_v11 = vsub.f32 %v15004_v48, %v6498_v23  ;;  %v6505_v13 = vsub.f32 %v15013_v17, %v6498_v23  ;;  %v6506_v45 = vsub.f32 %v15011_v44, %v6498_v23 }
0x176b   :  { %v6507_v27 = vsub.f32 %v15019_v41, %v6498_v23  ;;  %v6508_v10 = vsub.f32 %v15017_v19, %v6498_v23  ;;  %v6509_v21 = vsub.f32 %v15025_v28, %v6498_v23  ;;  %v6510_v62 = vsub.f32 %v15023_v7, %v6498_v23 }
0x176c   :  { %v6511_v47 = vsub.f32 %v15031_v59, %v6498_v23  ;;  %v6512_v26 = vsub.f32 %v15029_v5, %v6498_v23  ;;  %v6513_v37 = vsub.f32 %v15037_v4, %v6498_v23  ;;  %v6514_v48 = vsub.f32 %v15035_v12, %v6498_v23 }
0x176d   :  { %v6515_v3 = vmul.f32 1.442695, %v6499_v43  ;;  %v6517_v17 = vmul.f32 1.442695, %v6500_v25  ;;  %v6519_v35 = vmul.f32 1.442695, %v6501_v16 }
0x176e   :  { %v6521_v44 = vmul.f32 1.442695, %v6502_v49  ;;  %v6523_v19 = vmul.f32 1.442695, %v6503_v42  ;;  %v6525_v41 = vmul.f32 1.442695, %v6504_v11 }
0x176f   :  { %12079 = vpow2.f32 %v6515_v3  ;;  %v6527_v7 = vmul.f32 1.442695, %v6505_v13  ;;  %v6529_v28 = vmul.f32 1.442695, %v6506_v45  ;;  %v6531_v32 = vmul.f32 1.442695, %v6507_v27 }
0x1770   :  { %12081 = vpow2.f32 %v6517_v17  ;;  %v6533_v20 = vmul.f32 1.442695, %v6508_v10  ;;  %v6535_v18 = vmul.f32 1.442695, %v6509_v21  ;;  %v6537_v52 = vmul.f32 1.442695, %v6510_v62 }
0x1771   :  { %12083 = vpow2.f32 %v6519_v35  ;;  %v6539_v29 = vmul.f32 1.442695, %v6511_v47  ;;  %v6541_v58 = vmul.f32 1.442695, %v6512_v26  ;;  %v6543_v23 = vmul.f32 1.442695, %v6513_v37 }
0x1772   :  { %12085 = vpow2.f32 %v6521_v44  ;;  %v6545_v16 = vmul.f32 1.442695, %v6514_v48 }
0x1773   :  { %12087 = vpow2.f32 %v6523_v19 }
0x1774   :  { %12089 = vpow2.f32 %v6525_v41 }
0x1775   :  { %12091 = vpow2.f32 %v6527_v7 }
0x1776   :  { %12093 = vpow2.f32 %v6529_v28 }
0x1777   :  { %12095 = vpow2.f32 %v6531_v32 }
0x1778   :  { %12097 = vpow2.f32 %v6533_v20 }
0x1779   :  { %v12080_v61 = vpop.eup %12079  ;;  %12099 = vpow2.f32 %v6535_v18 }
0x177a   :  { %v12082_v5 = vpop.eup %12081  ;;  %12101 = vpow2.f32 %v6537_v52 }
0x177b   :  { %v6547_v59 = vadd.f32 %v12082_v5, %v12080_v61  ;;  %v12084_v57 = vpop.eup %12083  ;;  %12103 = vpow2.f32 %v6539_v29 }
0x177c   :  { %v12086_v12 = vpop.eup %12085  ;;  %12105 = vpow2.f32 %v6541_v58 }
0x177d   :  { %v6548_v33 = vadd.f32 %v12084_v57, %v6547_v59  ;;  %v12088_v4 = vpop.eup %12087  ;;  %12107 = vpow2.f32 %v6543_v23 }
0x177e   :  { %v12090_v38 = vpop.eup %12089  ;;  %12109 = vpow2.f32 %v6545_v16 }
0x177f   :  { %v6549_v6 = vadd.f32 %v12086_v12, %v6548_v33  ;;  %v12092_v55 = vpop.eup %12091 }
0x1780   :  { %v12094_v15 = vpop.eup %12093 }
0x1781   :  { %v6550_v60 = vadd.f32 %v12088_v4, %v6549_v6  ;;  %v12096_v25 = vpop.eup %12095 }
0x1782   :  { %v12098_v42 = vpop.eup %12097 }
0x1783   :  { %v6551_v39 = vadd.f32 %v12090_v38, %v6550_v60  ;;  %v12100_v13 = vpop.eup %12099 }
0x1784   :  { %v12102_v27 = vpop.eup %12101 }
0x1785   :  { %v6552_v9 = vadd.f32 %v12092_v55, %v6551_v39  ;;  %v12104_v21 = vpop.eup %12103 }
0x1786   :  { %v12106_v47 = vpop.eup %12105 }
0x1787   :  { %v6553_v43 = vadd.f32 %v12094_v15, %v6552_v9  ;;  %v12108_v3 = vpop.eup %12107 }
0x1788   :  { %v12110_v37 = vpop.eup %12109 }
0x1789   :  { %v6554_v49 = vadd.f32 %v12096_v25, %v6553_v43 }
0x178b   :  { %v6555_v11 = vadd.f32 %v12098_v42, %v6554_v49 }
0x178d   :  { %v6556_v45 = vadd.f32 %v12100_v13, %v6555_v11 }
0x178f   :  { %v6557_v10 = vadd.f32 %v12102_v27, %v6556_v45 }
0x1791   :  { %v6558_v62 = vadd.f32 %v12104_v21, %v6557_v10 }
0x1793   :  { %v6559_v26 = vadd.f32 %v12106_v47, %v6558_v62 }
0x1795   :  { %v6560_v17 = vadd.f32 %v12108_v3, %v6559_v26 }
0x1797   :  { %v6561_v35 = vadd.f32 %v12110_v37, %v6560_v17 }
0x1799   :  { %v6562_v44 = vrot.slane %v6561_v35, 4 }
0x179b   :  { %v6563_v19 = vadd.f32 %v6562_v44, %v6561_v35 }
0x179d   :  { %v6564_v48 = vrot.slane %v6563_v19, 2 }
0x179f   :  { %v6565_v41 = vadd.f32 %v6564_v48, %v6563_v19 }
0x17a1   :  { %v6566_v7 = vrot.slane %v6565_v41, 1 }
0x17a3   :  { %v6567_v28 = vadd.f32 %v6566_v7, %v6565_v41 }
0x17a5   :  { %12111 = vrcp.f32 %v6567_v28 }
0x17af   :  { %v12112_v32 = vpop.eup %12111 }
0x17b0   :  { %v6569_v59 = vmul.f32 %v12112_v32, %v12080_v61  ;;  %v6570_v20 = vmul.f32 %v12112_v32, %v12082_v5  ;;  %v6571_v33 = vmul.f32 %v12112_v32, %v12084_v57  ;;  %v6572_v18 = vmul.f32 %v12112_v32, %v12086_v12 }
0x17b1   :  { %v6573_v6 = vmul.f32 %v12112_v32, %v12088_v4  ;;  %v6574_v52 = vmul.f32 %v12112_v32, %v12090_v38  ;;  %v6575_v60 = vmul.f32 %v12112_v32, %v12092_v55  ;;  %v6576_v29 = vmul.f32 %v12112_v32, %v12094_v15  ;;  %v6681_v38 = vpop.trf.xlu0  ;;  %v15898_v55 = vld [vmem:[#allocation31_spill] sm:$0xff]  ;;  %v15899_v15 = vld [vmem:[#allocation32_spill] sm:$0xff] }
0x17b2   :  { %v11504_v39 = vpack.c.bf16 %v6570_v20, %v6569_v59  ;;  %v11507_v58 = vpack.c.bf16 %v6572_v18, %v6571_v33  ;;  %v6577_v9 = vmul.f32 %v12112_v32, %v12096_v25  ;;  %v6578_v23 = vmul.f32 %v12112_v32, %v12098_v42  ;;  %v15900_v42 = vld [vmem:[#allocation15_spill] sm:$0xff] }
0x17b3   :  { %v11510_v43 = vpack.c.bf16 %v6574_v52, %v6573_v6  ;;  %v11513_v16 = vpack.c.bf16 %v6576_v29, %v6575_v60  ;;  %v6579_v49 = vmul.f32 %v12112_v32, %v12100_v13  ;;  %v6580_v11 = vmul.f32 %v12112_v32, %v12102_v27  ;;  %v15901_v13 = vld [vmem:[#allocation38_spill] sm:$0xff] }
0x17b4   :  { %11505 = vmatpush3.bf16.msra.mxu1 %v11504_v39  ;;  %v11516_v45 = vpack.c.bf16 %v6578_v23, %v6577_v9  ;;  %v6581_v10 = vmul.f32 %v12112_v32, %v12104_v21  ;;  %v6582_v62 = vmul.f32 %v12112_v32, %v12106_v47  ;;  %v6583_v61 = vmul.f32 %v12112_v32, %v12108_v3 }
0x17b5   :  { %11506 = vmatprep.subr.bf16.mxu1 %v15770_v46  ;;  %v11519_v5 = vpack.c.bf16 %v6580_v11, %v6579_v49  ;;  %v6584_v57 = vmul.f32 %v12112_v32, %v12110_v37  ;;  %v4912_v25 = vadd.f32 %v15899_v15, %v15898_v55  ;;  %v4976_v27 = vadd.f32 %v15901_v13, %v15900_v42  ;;  %v6682_v21 = vpop.trf.xlu0 }
0x17b6   :  { %v11522_v12 = vpack.c.bf16 %v6582_v62, %v6581_v10 }
0x17b7   :  { %v11525_v4 = vpack.c.bf16 %v6584_v57, %v6583_v61 }
0x17b8   :  { %11508 = vmatpush3.bf16.msra.mxu1 %v11507_v58 }
0x17b9   :  { %11509 = vmatprep.subr.bf16.mxu1 %v15770_v46  ;;  %v6683_v47 = vpop.trf.xlu0 }
0x17bc   :  { %11511 = vmatpush3.bf16.msra.mxu1 %v11510_v43 }
0x17bd   :  { %11512 = vmatprep.subr.bf16.mxu1 %v15770_v46  ;;  %v6684_v26 = vpop.trf.xlu0 }
0x17c0   :  { %11514 = vmatpush3.bf16.msra.mxu1 %v11513_v16 }
0x17c1   :  { %11515 = vmatprep.subr.bf16.mxu1 %v15770_v46 }
0x17c4   :  { %11517 = vmatpush3.bf16.msra.mxu1 %v11516_v45 }
0x17c5   :  { %11518 = vmatprep.subr.bf16.mxu1 %v15770_v46 }
0x17c8   :  { %11520 = vmatpush3.bf16.msra.mxu1 %v11519_v5 }
0x17c9   :  { %11521 = vmatprep.subr.bf16.mxu1 %v15770_v46 }
0x17cc   :  { %11523 = vmatpush3.bf16.msra.mxu1 %v11522_v12 }
0x17cd   :  { %11524 = vmatprep.subr.bf16.mxu1 %v15770_v46 }
0x17d0   :  { %11526 = vmatpush3.bf16.msra.mxu1 %v11525_v4 }
0x17d1   :  { %10931 = vmatprep.subr.mxu1 %v4912_v25 }
0x17d3   :  { %10929 = vmatmul.mubr.f32.vlgmr.msra.gmra.mrb[142].mxu1 %v4976_v27 }
0x17d4   :  { %10932 = vmatpush3.msra.mxu1 %v4912_v25  ;;  %10933 = vmatprep.mubr.msk.f32.mxu1 %vm503_vm1, %v14673_v1  ;;  %v6685_v1 = vpop.trf.xlu0 }
0x17d5   :  { %11551 = vmatprep.subr.bf16.mxu1 %v15770_v46 }
0x17d7   :  { %10934 = vmatmul.mubr.msk.f32.vlgmr.msra.gmra.mrb[144].mxu1 %vm503_vm1, %v14686_v51 }
0x17d8   :  { %10936 = vmatprep.mubr.msk.f32.mxu1 %vm503_vm1, %v14702_v14  ;;  %v6686_v51 = vpop.trf.xlu0 }
0x17db   :  { %10937 = vmatmul.mubr.msk.f32.gmra.mrb[146].mxu1 %vm503_vm1, %v14716_v56 }
0x17dc   :  { %10939 = vmatprep.mubr.msk.f32.mxu1 %vm503_vm1, %v14735_v0  ;;  %v6687_v14 = vpop.trf.xlu0 }
0x17df   :  { %10940 = vmatmul.mubr.msk.f32.gmra.mrb[148].mxu1 %vm503_vm1, %v14750_v34 }
0x17e0   :  { %10942 = vmatprep.mubr.msk.f32.mxu1 %vm503_vm1, %v14769_v53 }
0x17e3   :  { %10943 = vmatmul.mubr.msk.f32.gmra.mrb[150].mxu1 %vm503_vm1, %v14784_v36 }
0x17e4   :  { %10945 = vmatprep.mubr.msk.f32.mxu1 %vm503_vm1, %v14797_v40 }
0x17e7   :  { %10946 = vmatmul.mubr.msk.f32.gmra.mrb[152].mxu1 %vm503_vm1, %v6681_v38 }
0x17e8   :  { %10948 = vmatprep.mubr.msk.f32.mxu1 %vm503_vm1, %v6682_v21 }
0x17eb   :  { %10949 = vmatmul.mubr.msk.f32.gmra.mrb[154].mxu1 %vm503_vm1, %v6683_v47 }
0x17ec   :  { %10951 = vmatprep.mubr.msk.f32.mxu1 %vm503_vm1, %v6684_v26 }
0x17ef   :  { %10952 = vmatmul.mubr.msk.f32.gmra.mrb[156].mxu1 %vm503_vm1, %v6685_v1 }
0x17f0   :  { %10954 = vmatprep.mubr.msk.f32.mxu1 %vm503_vm1, %v6686_v51 }
0x17f3   :  { %10955 = vmatmul.mubr.msk.f32.gmra.mrb[158].mxu1 %vm503_vm1, %v6687_v14 }
0x17f4   :  { %11050 = vmatprep.mubr.msk.f32.mxu1 %vm12260_vm2, %v15752_v24 }
0x18a6   :  { %v15093_v56 = vpop.f32.mrb[142].mxu1 }
0x18a7   :  { %v11629_v0 = vpack.c.bf16 %v15093_v56, %v15000_v30  ;;  %v10930_v34 = vpop.f32.mrb[143].mxu1 }
0x18aa   :  { %v10935_v53 = vpop.f32.mrb[144].mxu1 }
0x18ab   :  { %v6802_v36 = vpop.f32.mrb[145].mxu1  ;;  %v15097_v37 = vmul.f32 0.35355338, %v10935_v53 }
0x18ac   :  { %v6881_v19 = vmul.f32 0.35355338, %v6802_v36 }
0x18ae   :  { %v10938_v40 = vpop.f32.mrb[146].mxu1 }
0x18af   :  { %v6812_v3 = vpop.f32.mrb[147].mxu1  ;;  %v6884_v32 = vmul.f32 0.35355338, %v10938_v40 }
0x18b0   :  { %v6883_v33 = vmul.f32 0.35355338, %v6812_v3 }
0x18b2   :  { %v10941_v17 = vpop.f32.mrb[148].mxu1 }
0x18b3   :  { %v15099_v35 = vmul.f32 0.35355338, %v10941_v17  ;;  %v6822_v44 = vpop.f32.mrb[149].mxu1 }
0x18b4   :  { %v15101_v48 = vmul.f32 0.35355338, %v6822_v44 }
0x18b5   :  { %v6898_v41 = vmax.f32 %v15097_v37, %v15099_v35 }
0x18b6   :  { %v6897_v7 = vmax.f32 %v6881_v19, %v15101_v48  ;;  %v10944_v28 = vpop.f32.mrb[150].mxu1 }
0x18b7   :  { %v15106_v59 = vmul.f32 0.35355338, %v10944_v28  ;;  %v6832_v20 = vpop.f32.mrb[151].mxu1 }
0x18b8   :  { %v15108_v18 = vmul.f32 0.35355338, %v6832_v20 }
0x18b9   :  { %v6900_v6 = vmax.f32 %v6884_v32, %v15106_v59 }
0x18ba   :  { %v6899_v52 = vmax.f32 %v6883_v33, %v15108_v18  ;;  %v10947_v60 = vpop.f32.mrb[152].mxu1 }
0x18bb   :  { %v15112_v29 = vmul.f32 0.35355338, %v10947_v60  ;;  %v6842_v39 = vpop.f32.mrb[153].mxu1 }
0x18bc   :  { %v15114_v58 = vmul.f32 0.35355338, %v6842_v39 }
0x18bd   :  { %v6902_v9 = vmax.f32 %v6898_v41, %v15112_v29 }
0x18be   :  { %v6901_v23 = vmax.f32 %v6897_v7, %v15114_v58  ;;  %v10950_v43 = vpop.f32.mrb[154].mxu1 }
0x18bf   :  { %v15118_v16 = vmul.f32 0.35355338, %v10950_v43  ;;  %v6852_v49 = vpop.f32.mrb[155].mxu1 }
0x18c0   :  { %v15120_v11 = vmul.f32 0.35355338, %v6852_v49 }
0x18c1   :  { %v6904_v45 = vmax.f32 %v6900_v6, %v15118_v16 }
0x18c2   :  { %v6903_v10 = vmax.f32 %v6899_v52, %v15120_v11  ;;  %v10953_v62 = vpop.f32.mrb[156].mxu1 }
0x18c3   :  { %v15124_v61 = vmul.f32 0.35355338, %v10953_v62  ;;  %v6862_v5 = vpop.f32.mrb[157].mxu1 }
0x18c4   :  { %v15126_v57 = vmul.f32 0.35355338, %v6862_v5 }
0x18c5   :  { %v6906_v12 = vmax.f32 %v6902_v9, %v15124_v61 }
0x18c6   :  { %v6905_v4 = vmax.f32 %v6901_v23, %v15126_v57  ;;  %v10956_v38 = vpop.f32.mrb[158].mxu1 }
0x18c7   :  { %v15130_v55 = vmul.f32 0.35355338, %v10956_v38  ;;  %v6872_v15 = vpop.f32.mrb[159].mxu1 }
0x18c8   :  { %v6909_v25 = vmax.f32 %v6905_v4, %v6906_v12  ;;  %v15132_v42 = vmul.f32 0.35355338, %v6872_v15 }
0x18c9   :  { %v6908_v13 = vmax.f32 %v6904_v45, %v15130_v55 }
0x18ca   :  { %v6907_v27 = vmax.f32 %v6903_v10, %v15132_v42 }
0x18cc   :  { %v6910_v21 = vmax.f32 %v6907_v27, %v6908_v13 }
0x18ce   :  { %v6911_v47 = vmax.f32 %v6909_v25, %v6910_v21 }
0x18d0   :  { %v6912_v26 = vrot.slane %v6911_v47, 4 }
0x18d2   :  { %v6913_v1 = vmax.f32 %v6911_v47, %v6912_v26 }
0x18d4   :  { %v6914_v51 = vrot.slane %v6913_v1, 2 }
0x18d6   :  { %v6915_v14 = vmax.f32 %v6913_v1, %v6914_v51 }
0x18d8   :  { %v6916_v34 = vrot.slane %v6915_v14, 1 }
0x18da   :  { %v6917_v53 = vmax.f32 %v6915_v14, %v6916_v34 }
0x18dc   :  { %v6918_v36 = vsub.f32 %v6881_v19, %v6917_v53  ;;  %v6919_v40 = vsub.f32 %v15097_v37, %v6917_v53  ;;  %v6920_v3 = vsub.f32 %v6883_v33, %v6917_v53  ;;  %v6921_v17 = vsub.f32 %v6884_v32, %v6917_v53 }
0x18dd   :  { %v6922_v44 = vsub.f32 %v15101_v48, %v6917_v53  ;;  %v6923_v41 = vsub.f32 %v15099_v35, %v6917_v53  ;;  %v6924_v7 = vsub.f32 %v15108_v18, %v6917_v53  ;;  %v6925_v28 = vsub.f32 %v15106_v59, %v6917_v53 }
0x18de   :  { %v6926_v20 = vsub.f32 %v15114_v58, %v6917_v53  ;;  %v6927_v6 = vsub.f32 %v15112_v29, %v6917_v53  ;;  %v6928_v52 = vsub.f32 %v15120_v11, %v6917_v53  ;;  %v6929_v19 = vsub.f32 %v15118_v16, %v6917_v53 }
0x18df   :  { %v6930_v37 = vsub.f32 %v15126_v57, %v6917_v53  ;;  %v6931_v32 = vsub.f32 %v15124_v61, %v6917_v53  ;;  %v6932_v48 = vsub.f32 %v15132_v42, %v6917_v53  ;;  %v6933_v35 = vsub.f32 %v15130_v55, %v6917_v53 }
0x18e0   :  { %v6934_v33 = vmul.f32 1.442695, %v6918_v36  ;;  %v6936_v18 = vmul.f32 1.442695, %v6919_v40  ;;  %v6938_v60 = vmul.f32 1.442695, %v6920_v3 }
0x18e1   :  { %v6940_v59 = vmul.f32 1.442695, %v6921_v17  ;;  %v6942_v29 = vmul.f32 1.442695, %v6922_v44  ;;  %v6944_v39 = vmul.f32 1.442695, %v6923_v41 }
0x18e2   :  { %12113 = vpow2.f32 %v6934_v33  ;;  %v6946_v58 = vmul.f32 1.442695, %v6924_v7  ;;  %v6948_v9 = vmul.f32 1.442695, %v6925_v28  ;;  %v6950_v16 = vmul.f32 1.442695, %v6926_v20 }
0x18e3   :  { %12115 = vpow2.f32 %v6936_v18  ;;  %v6952_v45 = vmul.f32 1.442695, %v6927_v6  ;;  %v6954_v61 = vmul.f32 1.442695, %v6928_v52  ;;  %v6956_v12 = vmul.f32 1.442695, %v6929_v19  ;;  %v15149_v19 = vpop.trf.xlu0 }
0x18e4   :  { %12117 = vpow2.f32 %v6938_v60  ;;  %v6958_v55 = vmul.f32 1.442695, %v6930_v37  ;;  %v6960_v42 = vmul.f32 1.442695, %v6931_v32  ;;  %v6962_v21 = vmul.f32 1.442695, %v6932_v48 }
0x18e5   :  { %12119 = vpow2.f32 %v6940_v59  ;;  %v6964_v1 = vmul.f32 1.442695, %v6933_v35 }
0x18e6   :  { %12121 = vpow2.f32 %v6942_v29 }
0x18e7   :  { %12123 = vpow2.f32 %v6944_v39  ;;  %v7092_v35 = vpop.trf.xlu0 }
0x18e8   :  { %12125 = vpow2.f32 %v6946_v58 }
0x18e9   :  { %12127 = vpow2.f32 %v6948_v9 }
0x18ea   :  { %12129 = vpow2.f32 %v6950_v16 }
0x18eb   :  { %12131 = vpow2.f32 %v6952_v45  ;;  %v7093_v59 = vpop.trf.xlu0 }
0x18ec   :  { %v12114_v23 = vpop.eup %12113  ;;  %12133 = vpow2.f32 %v6954_v61 }
0x18ed   :  { %v12116_v43 = vpop.eup %12115  ;;  %12135 = vpow2.f32 %v6956_v12 }
0x18ee   :  { %v6966_v49 = vadd.f32 %v12116_v43, %v12114_v23  ;;  %v12118_v11 = vpop.eup %12117  ;;  %12137 = vpow2.f32 %v6958_v55 }
0x18ef   :  { %v12120_v62 = vpop.eup %12119  ;;  %12139 = vpow2.f32 %v6960_v42  ;;  %v7094_v29 = vpop.trf.xlu0 }
0x18f0   :  { %v6967_v10 = vadd.f32 %v12118_v11, %v6966_v49  ;;  %v12122_v57 = vpop.eup %12121  ;;  %12141 = vpow2.f32 %v6962_v21 }
0x18f1   :  { %v12124_v38 = vpop.eup %12123  ;;  %12143 = vpow2.f32 %v6964_v1 }
0x18f2   :  { %v6968_v5 = vadd.f32 %v12120_v62, %v6967_v10  ;;  %v12126_v25 = vpop.eup %12125 }
0x18f3   :  { %v12128_v27 = vpop.eup %12127  ;;  %v7095_v58 = vpop.trf.xlu0 }
0x18f4   :  { %v6969_v4 = vadd.f32 %v12122_v57, %v6968_v5  ;;  %v12130_v26 = vpop.eup %12129 }
0x18f5   :  { %v12132_v14 = vpop.eup %12131 }
0x18f6   :  { %v6970_v15 = vadd.f32 %v12124_v38, %v6969_v4  ;;  %v12134_v53 = vpop.eup %12133 }
0x18f7   :  { %v12136_v40 = vpop.eup %12135 }
0x18f8   :  { %v6971_v13 = vadd.f32 %v12126_v25, %v6970_v15  ;;  %v12138_v17 = vpop.eup %12137 }
0x18f9   :  { %v12140_v41 = vpop.eup %12139 }
0x18fa   :  { %v6972_v47 = vadd.f32 %v12128_v27, %v6971_v13  ;;  %v12142_v28 = vpop.eup %12141 }
0x18fb   :  { %v12144_v6 = vpop.eup %12143 }
0x18fc   :  { %v6973_v51 = vadd.f32 %v12130_v26, %v6972_v47 }
0x18fe   :  { %v6974_v34 = vadd.f32 %v12132_v14, %v6973_v51 }
0x1900   :  { %v6975_v36 = vadd.f32 %v12134_v53, %v6974_v34 }
0x1902   :  { %v6976_v3 = vadd.f32 %v12136_v40, %v6975_v36 }
0x1904   :  { %v6977_v44 = vadd.f32 %v12138_v17, %v6976_v3  ;;  %v15903_v3 = vld [vmem:[#allocation48_spill] sm:$0xff] }
0x1906   :  { %v6978_v7 = vadd.f32 %v12140_v41, %v6977_v44 }
0x1908   :  { %v6979_v20 = vadd.f32 %v12142_v28, %v6978_v7 }
0x190a   :  { %v6980_v52 = vadd.f32 %v12144_v6, %v6979_v20 }
0x190c   :  { %v6981_v37 = vrot.slane %v6980_v52, 4 }
0x190e   :  { %v6982_v32 = vadd.f32 %v6981_v37, %v6980_v52 }
0x1910   :  { %v6983_v48 = vrot.slane %v6982_v32, 2 }
0x1912   :  { %v6984_v33 = vadd.f32 %v6983_v48, %v6982_v32 }
0x1914   :  { %v6985_v18 = vrot.slane %v6984_v33, 1 }
0x1916   :  { %v6986_v60 = vadd.f32 %v6985_v18, %v6984_v33 }
0x1918   :  { %12145 = vrcp.f32 %v6986_v60 }
0x1922   :  { %v12146_v39 = vpop.eup %12145 }
0x1923   :  { %v6988_v9 = vmul.f32 %v12146_v39, %v12114_v23  ;;  %v6989_v16 = vmul.f32 %v12146_v39, %v12116_v43  ;;  %v6990_v49 = vmul.f32 %v12146_v39, %v12118_v11  ;;  %v6991_v45 = vmul.f32 %v12146_v39, %v12120_v62  ;;  %v7096_v62 = vpop.trf.xlu0 }
0x1924   :  { %v6992_v10 = vmul.f32 %v12146_v39, %v12122_v57  ;;  %v6993_v61 = vmul.f32 %v12146_v39, %v12124_v38  ;;  %v6994_v5 = vmul.f32 %v12146_v39, %v12126_v25  ;;  %v6995_v12 = vmul.f32 %v12146_v39, %v12128_v27 }
0x1925   :  { %v11528_v4 = vpack.c.bf16 %v6989_v16, %v6988_v9  ;;  %v11531_v55 = vpack.c.bf16 %v6991_v45, %v6990_v49  ;;  %v6996_v15 = vmul.f32 %v12146_v39, %v12130_v26  ;;  %v6997_v42 = vmul.f32 %v12146_v39, %v12132_v14 }
0x1926   :  { %v11534_v13 = vpack.c.bf16 %v6993_v61, %v6992_v10  ;;  %v11537_v21 = vpack.c.bf16 %v6995_v12, %v6994_v5  ;;  %v6998_v47 = vmul.f32 %v12146_v39, %v12134_v53  ;;  %v6999_v1 = vmul.f32 %v12146_v39, %v12136_v40  ;;  %v15902_v53 = vld [vmem:[#allocation33_spill] sm:$0xff] }
0x1927   :  { %11529 = vmatpush3.bf16.msra.mxu0 %v11528_v4  ;;  %v11540_v51 = vpack.c.bf16 %v6997_v42, %v6996_v15  ;;  %v7000_v34 = vmul.f32 %v12146_v39, %v12138_v17  ;;  %v7001_v36 = vmul.f32 %v12146_v39, %v12140_v41  ;;  %v7002_v23 = vmul.f32 %v12146_v39, %v12142_v28  ;;  %v7097_v25 = vpop.trf.xlu0  ;;  %v15904_v17 = vld [vmem:[#allocation37_spill] sm:$0xff] }
0x1928   :  { %11530 = vmatprep.subr.bf16.mxu0 %v15770_v46  ;;  %v11543_v43 = vpack.c.bf16 %v6999_v1, %v6998_v47  ;;  %v7003_v11 = vmul.f32 %v12146_v39, %v12144_v6  ;;  %v4918_v40 = vadd.f32 %v15902_v53, %v14346_v22  ;;  %v4960_v44 = vadd.f32 %v15904_v17, %v15903_v3 }
0x1929   :  { %v11546_v57 = vpack.c.bf16 %v7001_v36, %v7000_v34 }
0x192a   :  { %v11549_v38 = vpack.c.bf16 %v7003_v11, %v7002_v23 }
0x192b   :  { %11532 = vmatpush3.bf16.msra.mxu0 %v11531_v55  ;;  %v7098_v27 = vpop.trf.xlu0 }
0x192c   :  { %11533 = vmatprep.subr.bf16.mxu0 %v15770_v46 }
0x192f   :  { %11535 = vmatpush3.bf16.msra.mxu0 %v11534_v13  ;;  %v7099_v26 = vpop.trf.xlu0 }
0x1930   :  { %11536 = vmatprep.subr.bf16.mxu0 %v15770_v46 }
0x1933   :  { %11538 = vmatpush3.bf16.msra.mxu0 %v11537_v21  ;;  %v7100_v14 = vpop.trf.xlu0 }
0x1934   :  { %11539 = vmatprep.subr.bf16.mxu0 %v15770_v46 }
0x1937   :  { %11541 = vmatpush3.bf16.msra.mxu0 %v11540_v51  ;;  %v7101_v41 = vpop.trf.xlu0 }
0x1938   :  { %11542 = vmatprep.subr.bf16.mxu0 %v15770_v46 }
0x193b   :  { %11544 = vmatpush3.bf16.msra.mxu0 %v11543_v43  ;;  %v7102_v7 = vpop.trf.xlu0 }
0x193c   :  { %11545 = vmatprep.subr.bf16.mxu0 %v15770_v46 }
0x193f   :  { %11547 = vmatpush3.bf16.msra.mxu0 %v11546_v57  ;;  %v7103_v22 = vpop.trf.xlu0 }
0x1940   :  { %11548 = vmatprep.subr.bf16.mxu0 %v15770_v46 }
0x1943   :  { %11550 = vmatpush3.bf16.msra.mxu0 %v11549_v38  ;;  %v7104_v28 = vpop.trf.xlu0 }
0x1944   :  { %10992 = vmatprep.subr.mxu0 %v4918_v40 }
0x1946   :  { %10990 = vmatmul.mubr.f32.vlgmr.msra.gmra.mrb[168].mxu0 %v4960_v44 }
0x1947   :  { %10993 = vmatpush3.msra.mxu0 %v4918_v40  ;;  %10994 = vmatprep.mubr.msk.f32.mxu0 %vm503_vm1, %v15149_v19  ;;  %v7105_v20 = vpop.trf.xlu0 }
0x1948   :  { %11575 = vmatprep.subr.bf16.mxu0 %v15770_v46 }
0x194a   :  { %10995 = vmatmul.mubr.msk.f32.vlgmr.msra.gmra.mrb[170].mxu0 %vm503_vm1, %v7092_v35 }
0x194b   :  { %10997 = vmatprep.mubr.msk.f32.mxu0 %vm503_vm1, %v7093_v59  ;;  %v7106_v6 = vpop.trf.xlu0 }
0x194e   :  { %10998 = vmatmul.mubr.msk.f32.gmra.mrb[172].mxu0 %vm503_vm1, %v7094_v29 }
0x194f   :  { %11000 = vmatprep.mubr.msk.f32.mxu0 %vm503_vm1, %v7095_v58  ;;  %v8353_v30 = vpop.permute.xlu0 %8352 }
0x1952   :  { %11001 = vmatmul.mubr.msk.f32.gmra.mrb[174].mxu0 %vm503_vm1, %v7096_v62 }
0x1953   :  { %11003 = vmatprep.mubr.msk.f32.mxu0 %vm503_vm1, %v7097_v25  ;;  %v8363_v56 = vpop.permute.xlu0 %8362 }
0x1956   :  { %11004 = vmatmul.mubr.msk.f32.gmra.mrb[176].mxu0 %vm503_vm1, %v7098_v27 }
0x1957   :  { %11006 = vmatprep.mubr.msk.f32.mxu0 %vm503_vm1, %v7099_v26 }
0x195a   :  { %11007 = vmatmul.mubr.msk.f32.gmra.mrb[178].mxu0 %vm503_vm1, %v7100_v14 }
0x195b   :  { %11009 = vmatprep.mubr.msk.f32.mxu0 %vm503_vm1, %v7101_v41 }
0x195e   :  { %11010 = vmatmul.mubr.msk.f32.gmra.mrb[180].mxu0 %vm503_vm1, %v7102_v7 }
0x195f   :  { %11012 = vmatprep.mubr.msk.f32.mxu0 %vm503_vm1, %v7103_v22 }
0x1962   :  { %11013 = vmatmul.mubr.msk.f32.gmra.mrb[182].mxu0 %vm503_vm1, %v7104_v28 }
0x1963   :  { %11015 = vmatprep.mubr.msk.f32.mxu0 %vm503_vm1, %v7105_v20 }
0x1966   :  { %11016 = vmatmul.mubr.msk.f32.gmra.mrb[184].mxu0 %vm503_vm1, %v7106_v6 }
0x1967   :  { %11111 = vmatprep.mubr.msk.f32.mxu0 %vm12260_vm2, %v15752_v24 }
0x1a19   :  { %v15182_v52 = vpop.f32.mrb[168].mxu0 }
0x1a1a   :  { %v10991_v19 = vpop.f32.mrb[169].mxu0 }
0x1a1d   :  { %v10996_v37 = vpop.f32.mrb[170].mxu0 }
0x1a1e   :  { %v7221_v32 = vpop.f32.mrb[171].mxu0  ;;  %v15184_v18 = vmul.f32 0.35355338, %v10996_v37 }
0x1a1f   :  { %v7300_v29 = vmul.f32 0.35355338, %v7221_v32 }
0x1a21   :  { %v10999_v48 = vpop.f32.mrb[172].mxu0 }
0x1a22   :  { %v7231_v35 = vpop.f32.mrb[173].mxu0  ;;  %v7303_v49 = vmul.f32 0.35355338, %v10999_v48 }
0x1a23   :  { %v7302_v61 = vmul.f32 0.35355338, %v7231_v35 }
0x1a25   :  { %v11002_v33 = vpop.f32.mrb[174].mxu0 }
0x1a26   :  { %v15186_v60 = vmul.f32 0.35355338, %v11002_v33  ;;  %v7241_v59 = vpop.f32.mrb[175].mxu0 }
0x1a27   :  { %v15188_v39 = vmul.f32 0.35355338, %v7241_v59 }
0x1a28   :  { %v7317_v58 = vmax.f32 %v15184_v18, %v15186_v60 }
0x1a29   :  { %v7316_v9 = vmax.f32 %v7300_v29, %v15188_v39  ;;  %v11005_v16 = vpop.f32.mrb[176].mxu0 }
0x1a2a   :  { %v15193_v45 = vmul.f32 0.35355338, %v11005_v16  ;;  %v7251_v10 = vpop.f32.mrb[177].mxu0 }
0x1a2b   :  { %v15195_v5 = vmul.f32 0.35355338, %v7251_v10 }
0x1a2c   :  { %v7319_v12 = vmax.f32 %v7303_v49, %v15193_v45 }
0x1a2d   :  { %v7318_v4 = vmax.f32 %v7302_v61, %v15195_v5  ;;  %v11008_v55 = vpop.f32.mrb[178].mxu0 }
0x1a2e   :  { %v15199_v15 = vmul.f32 0.35355338, %v11008_v55  ;;  %v7261_v42 = vpop.f32.mrb[179].mxu0 }
0x1a2f   :  { %v15201_v13 = vmul.f32 0.35355338, %v7261_v42 }
0x1a30   :  { %v7321_v21 = vmax.f32 %v7317_v58, %v15199_v15 }
0x1a31   :  { %v7320_v47 = vmax.f32 %v7316_v9, %v15201_v13  ;;  %v11011_v1 = vpop.f32.mrb[180].mxu0 }
0x1a32   :  { %v15205_v51 = vmul.f32 0.35355338, %v11011_v1  ;;  %v7271_v34 = vpop.f32.mrb[181].mxu0 }
0x1a33   :  { %v15207_v36 = vmul.f32 0.35355338, %v7271_v34 }
0x1a34   :  { %v7323_v23 = vmax.f32 %v7319_v12, %v15205_v51 }
0x1a35   :  { %v7322_v43 = vmax.f32 %v7318_v4, %v15207_v36  ;;  %v11014_v11 = vpop.f32.mrb[182].mxu0 }
0x1a36   :  { %v15211_v62 = vmul.f32 0.35355338, %v11014_v11  ;;  %v7281_v57 = vpop.f32.mrb[183].mxu0 }
0x1a37   :  { %v15213_v38 = vmul.f32 0.35355338, %v7281_v57 }
0x1a38   :  { %v7325_v25 = vmax.f32 %v7321_v21, %v15211_v62 }
0x1a39   :  { %v7324_v27 = vmax.f32 %v7320_v47, %v15213_v38  ;;  %v11017_v26 = vpop.f32.mrb[184].mxu0 }
0x1a3a   :  { %v15217_v14 = vmul.f32 0.35355338, %v11017_v26  ;;  %v7291_v53 = vpop.f32.mrb[185].mxu0 }
0x1a3b   :  { %v7328_v40 = vmax.f32 %v7324_v27, %v7325_v25  ;;  %v15219_v3 = vmul.f32 0.35355338, %v7291_v53 }
0x1a3c   :  { %v7327_v17 = vmax.f32 %v7323_v23, %v15217_v14 }
0x1a3d   :  { %v7326_v44 = vmax.f32 %v7322_v43, %v15219_v3 }
0x1a3f   :  { %v7329_v41 = vmax.f32 %v7326_v44, %v7327_v17 }
0x1a41   :  { %v7330_v7 = vmax.f32 %v7328_v40, %v7329_v41 }
0x1a43   :  { %v7331_v22 = vrot.slane %v7330_v7, 4 }
0x1a45   :  { %v7332_v28 = vmax.f32 %v7330_v7, %v7331_v22 }
0x1a47   :  { %v7333_v20 = vrot.slane %v7332_v28, 2 }
0x1a49   :  { %v7334_v6 = vmax.f32 %v7332_v28, %v7333_v20 }
0x1a4b   :  { %v7335_v19 = vrot.slane %v7334_v6, 1 }
0x1a4d   :  { %v7336_v37 = vmax.f32 %v7334_v6, %v7335_v19 }
0x1a4f   :  { %v7337_v32 = vsub.f32 %v7300_v29, %v7336_v37  ;;  %v7338_v48 = vsub.f32 %v15184_v18, %v7336_v37  ;;  %v7339_v35 = vsub.f32 %v7302_v61, %v7336_v37  ;;  %v7340_v33 = vsub.f32 %v7303_v49, %v7336_v37 }
0x1a50   :  { %v7341_v59 = vsub.f32 %v15188_v39, %v7336_v37  ;;  %v7342_v58 = vsub.f32 %v15186_v60, %v7336_v37  ;;  %v7343_v9 = vsub.f32 %v15195_v5, %v7336_v37  ;;  %v7344_v16 = vsub.f32 %v15193_v45, %v7336_v37 }
0x1a51   :  { %v7345_v10 = vsub.f32 %v15201_v13, %v7336_v37  ;;  %v7346_v12 = vsub.f32 %v15199_v15, %v7336_v37  ;;  %v7347_v4 = vsub.f32 %v15207_v36, %v7336_v37  ;;  %v7348_v29 = vsub.f32 %v15205_v51, %v7336_v37 }
0x1a52   :  { %v7349_v18 = vsub.f32 %v15213_v38, %v7336_v37  ;;  %v7350_v49 = vsub.f32 %v15211_v62, %v7336_v37  ;;  %v7351_v39 = vsub.f32 %v15219_v3, %v7336_v37  ;;  %v7352_v60 = vsub.f32 %v15217_v14, %v7336_v37 }
0x1a53   :  { %v7353_v61 = vmul.f32 1.442695, %v7337_v32  ;;  %v7355_v5 = vmul.f32 1.442695, %v7338_v48  ;;  %v7357_v55 = vmul.f32 1.442695, %v7339_v35 }
0x1a54   :  { %v7359_v45 = vmul.f32 1.442695, %v7340_v33  ;;  %v7361_v15 = vmul.f32 1.442695, %v7341_v59  ;;  %v7363_v42 = vmul.f32 1.442695, %v7342_v58 }
0x1a55   :  { %12147 = vpow2.f32 %v7353_v61  ;;  %v7365_v13 = vmul.f32 1.442695, %v7343_v9  ;;  %v7367_v21 = vmul.f32 1.442695, %v7344_v16  ;;  %v7369_v51 = vmul.f32 1.442695, %v7345_v10 }
0x1a56   :  { %12149 = vpow2.f32 %v7355_v5  ;;  %v7371_v23 = vmul.f32 1.442695, %v7346_v12  ;;  %v7373_v62 = vmul.f32 1.442695, %v7347_v4  ;;  %v7375_v25 = vmul.f32 1.442695, %v7348_v29  ;;  %v7510_v29 = vpop.trf.xlu1 }
0x1a57   :  { %12151 = vpow2.f32 %v7357_v55  ;;  %v7377_v14 = vmul.f32 1.442695, %v7349_v18  ;;  %v7379_v3 = vmul.f32 1.442695, %v7350_v49  ;;  %v7381_v41 = vmul.f32 1.442695, %v7351_v39 }
0x1a58   :  { %12153 = vpow2.f32 %v7359_v45  ;;  %v7383_v28 = vmul.f32 1.442695, %v7352_v60 }
0x1a59   :  { %12155 = vpow2.f32 %v7361_v15 }
0x1a5a   :  { %12157 = vpow2.f32 %v7363_v42  ;;  %v7511_v60 = vpop.trf.xlu1 }
0x1a5b   :  { %12159 = vpow2.f32 %v7365_v13 }
0x1a5c   :  { %12161 = vpow2.f32 %v7367_v21 }
0x1a5d   :  { %12163 = vpow2.f32 %v7369_v51 }
0x1a5e   :  { %12165 = vpow2.f32 %v7371_v23  ;;  %v7512_v45 = vpop.trf.xlu1 }
0x1a5f   :  { %v12148_v47 = vpop.eup %12147  ;;  %12167 = vpow2.f32 %v7373_v62 }
0x1a60   :  { %v12150_v1 = vpop.eup %12149  ;;  %12169 = vpow2.f32 %v7375_v25 }
0x1a61   :  { %v7385_v34 = vadd.f32 %v12150_v1, %v12148_v47  ;;  %v12152_v36 = vpop.eup %12151  ;;  %12171 = vpow2.f32 %v7377_v14 }
0x1a62   :  { %v12154_v11 = vpop.eup %12153  ;;  %12173 = vpow2.f32 %v7379_v3  ;;  %v7513_v15 = vpop.trf.xlu1 }
0x1a63   :  { %v7386_v43 = vadd.f32 %v12152_v36, %v7385_v34  ;;  %v12156_v38 = vpop.eup %12155  ;;  %12175 = vpow2.f32 %v7381_v41 }
0x1a64   :  { %v12158_v26 = vpop.eup %12157  ;;  %12177 = vpow2.f32 %v7383_v28 }
0x1a65   :  { %v7387_v57 = vadd.f32 %v12154_v11, %v7386_v43  ;;  %v12160_v40 = vpop.eup %12159 }
0x1a66   :  { %v12162_v44 = vpop.eup %12161  ;;  %v7514_v13 = vpop.trf.xlu1 }
0x1a67   :  { %v7388_v27 = vadd.f32 %v12156_v38, %v7387_v57  ;;  %v12164_v22 = vpop.eup %12163 }
0x1a68   :  { %v12166_v6 = vpop.eup %12165 }
0x1a69   :  { %v7389_v53 = vadd.f32 %v12158_v26, %v7388_v27  ;;  %v12168_v37 = vpop.eup %12167 }
0x1a6a   :  { %v12170_v48 = vpop.eup %12169 }
0x1a6b   :  { %v7390_v17 = vadd.f32 %v12160_v40, %v7389_v53  ;;  %v12172_v33 = vpop.eup %12171 }
0x1a6c   :  { %v12174_v58 = vpop.eup %12173 }
0x1a6d   :  { %v7391_v7 = vadd.f32 %v12162_v44, %v7390_v17  ;;  %v12176_v16 = vpop.eup %12175 }
0x1a6e   :  { %v12178_v12 = vpop.eup %12177 }
0x1a6f   :  { %v7392_v20 = vadd.f32 %v12164_v22, %v7391_v7 }
0x1a71   :  { %v7393_v19 = vadd.f32 %v12166_v6, %v7392_v20 }
0x1a73   :  { %v7394_v32 = vadd.f32 %v12168_v37, %v7393_v19 }
0x1a75   :  { %v7395_v35 = vadd.f32 %v12170_v48, %v7394_v32 }
0x1a77   :  { %v7396_v59 = vadd.f32 %v12172_v33, %v7395_v35  ;;  %v15906_v35 = vld [vmem:[#allocation21_spill] sm:$0xff] }
0x1a79   :  { %v7397_v9 = vadd.f32 %v12174_v58, %v7396_v59 }
0x1a7b   :  { %v7398_v10 = vadd.f32 %v12176_v16, %v7397_v9 }
0x1a7d   :  { %v7399_v4 = vadd.f32 %v12178_v12, %v7398_v10 }
0x1a7f   :  { %v7400_v18 = vrot.slane %v7399_v4, 4 }
0x1a81   :  { %v7401_v49 = vadd.f32 %v7400_v18, %v7399_v4 }
0x1a83   :  { %v7402_v39 = vrot.slane %v7401_v49, 2 }
0x1a85   :  { %v7403_v61 = vadd.f32 %v7402_v39, %v7401_v49 }
0x1a87   :  { %v7404_v5 = vrot.slane %v7403_v61, 1 }
0x1a89   :  { %v7405_v55 = vadd.f32 %v7404_v5, %v7403_v61 }
0x1a8b   :  { %12179 = vrcp.f32 %v7405_v55 }
0x1a95   :  { %v12180_v42 = vpop.eup %12179 }
0x1a96   :  { %v7407_v21 = vmul.f32 %v12180_v42, %v12148_v47  ;;  %v7408_v51 = vmul.f32 %v12180_v42, %v12150_v1  ;;  %v7409_v34 = vmul.f32 %v12180_v42, %v12152_v36  ;;  %v7410_v23 = vmul.f32 %v12180_v42, %v12154_v11  ;;  %v7515_v11 = vpop.trf.xlu1 }
0x1a97   :  { %v7411_v43 = vmul.f32 %v12180_v42, %v12156_v38  ;;  %v7412_v62 = vmul.f32 %v12180_v42, %v12158_v26  ;;  %v7413_v57 = vmul.f32 %v12180_v42, %v12160_v40  ;;  %v7414_v25 = vmul.f32 %v12180_v42, %v12162_v44 }
0x1a98   :  { %v11552_v27 = vpack.c.bf16 %v7408_v51, %v7407_v21  ;;  %v11555_v14 = vpack.c.bf16 %v7410_v23, %v7409_v34  ;;  %v7415_v53 = vmul.f32 %v12180_v42, %v12164_v22  ;;  %v7416_v3 = vmul.f32 %v12180_v42, %v12166_v6 }
0x1a99   :  { %v11558_v17 = vpack.c.bf16 %v7412_v62, %v7411_v43  ;;  %v11561_v41 = vpack.c.bf16 %v7414_v25, %v7413_v57  ;;  %v7417_v7 = vmul.f32 %v12180_v42, %v12168_v37  ;;  %v7418_v28 = vmul.f32 %v12180_v42, %v12170_v48  ;;  %v15905_v37 = vld [vmem:[#allocation34_spill] sm:$0xff] }
0x1a9a   :  { %11553 = vmatpush3.bf16.msra.mxu1 %v11552_v27  ;;  %v11564_v20 = vpack.c.bf16 %v7416_v3, %v7415_v53  ;;  %v7419_v19 = vmul.f32 %v12180_v42, %v12172_v33  ;;  %v7420_v32 = vmul.f32 %v12180_v42, %v12174_v58  ;;  %v7421_v47 = vmul.f32 %v12180_v42, %v12176_v16  ;;  %v7516_v40 = vpop.trf.xlu1 }
0x1a9b   :  { %11554 = vmatprep.subr.bf16.mxu1 %v15770_v46  ;;  %v11567_v1 = vpack.c.bf16 %v7418_v28, %v7417_v7  ;;  %v7422_v36 = vmul.f32 %v12180_v42, %v12178_v12  ;;  %v4924_v48 = vadd.f32 %v15905_v37, %v14418_v54 }
0x1a9c   :  { %v11570_v38 = vpack.c.bf16 %v7420_v32, %v7419_v19 }
0x1a9d   :  { %v11573_v26 = vpack.c.bf16 %v7422_v36, %v7421_v47 }
0x1a9e   :  { %11556 = vmatpush3.bf16.msra.mxu1 %v11555_v14  ;;  %v7517_v44 = vpop.trf.xlu1 }
0x1a9f   :  { %11557 = vmatprep.subr.bf16.mxu1 %v15770_v46 }
0x1aa2   :  { %11559 = vmatpush3.bf16.msra.mxu1 %v11558_v17  ;;  %v7518_v22 = vpop.trf.xlu1 }
0x1aa3   :  { %11560 = vmatprep.subr.bf16.mxu1 %v15770_v46 }
0x1aa6   :  { %11562 = vmatpush3.bf16.msra.mxu1 %v11561_v41  ;;  %v7519_v6 = vpop.trf.xlu1 }
0x1aa7   :  { %11563 = vmatprep.subr.bf16.mxu1 %v15770_v46 }
0x1aaa   :  { %11565 = vmatpush3.bf16.msra.mxu1 %v11564_v20  ;;  %v7520_v33 = vpop.trf.xlu1 }
0x1aab   :  { %11566 = vmatprep.subr.bf16.mxu1 %v15770_v46 }
0x1aae   :  { %11568 = vmatpush3.bf16.msra.mxu1 %v11567_v1  ;;  %v7521_v59 = vpop.trf.xlu1 }
0x1aaf   :  { %11569 = vmatprep.subr.bf16.mxu1 %v15770_v46 }
0x1ab2   :  { %11571 = vmatpush3.bf16.msra.mxu1 %v11570_v38  ;;  %v7522_v54 = vpop.trf.xlu1 }
0x1ab3   :  { %11572 = vmatprep.subr.bf16.mxu1 %v15770_v46 }
0x1ab6   :  { %11574 = vmatpush3.bf16.msra.mxu1 %v11573_v26  ;;  %v7523_v58 = vpop.trf.xlu1 }
0x1ab7   :  { %11053 = vmatprep.subr.mxu1 %v4924_v48 }
0x1ab9   :  { %11051 = vmatmul.mubr.f32.vlgmr.msra.gmra.mrb[160].mxu1 %v15906_v35 }
0x1aba   :  { %11054 = vmatpush3.msra.mxu1 %v4924_v48  ;;  %11055 = vmatprep.mubr.msk.f32.mxu1 %vm503_vm1, %v7510_v29  ;;  %v7524_v9 = vpop.trf.xlu1 }
0x1abb   :  { %11599 = vmatprep.subr.bf16.mxu1 %v15770_v46 }
0x1abd   :  { %11056 = vmatmul.mubr.msk.f32.vlgmr.msra.gmra.mrb[162].mxu1 %vm503_vm1, %v7511_v60 }
0x1abe   :  { %11058 = vmatprep.mubr.msk.f32.mxu1 %vm503_vm1, %v7512_v45  ;;  %v7525_v16 = vpop.trf.xlu1 }
0x1ac1   :  { %11059 = vmatmul.mubr.msk.f32.gmra.mrb[164].mxu1 %vm503_vm1, %v7513_v15 }
0x1ac2   :  { %11061 = vmatprep.mubr.msk.f32.mxu1 %vm503_vm1, %v7514_v13 }
0x1ac5   :  { %11062 = vmatmul.mubr.msk.f32.gmra.mrb[166].mxu1 %vm503_vm1, %v7515_v11 }
0x1ac6   :  { %11064 = vmatprep.mubr.msk.f32.mxu1 %vm503_vm1, %v7516_v40 }
0x1ac9   :  { %11065 = vmatmul.mubr.msk.f32.gmra.mrb[168].mxu1 %vm503_vm1, %v7517_v44 }
0x1aca   :  { %11067 = vmatprep.mubr.msk.f32.mxu1 %vm503_vm1, %v7518_v22 }
0x1acd   :  { %11068 = vmatmul.mubr.msk.f32.gmra.mrb[170].mxu1 %vm503_vm1, %v7519_v6 }
0x1ace   :  { %11070 = vmatprep.mubr.msk.f32.mxu1 %vm503_vm1, %v7520_v33 }
0x1ad1   :  { %11071 = vmatmul.mubr.msk.f32.gmra.mrb[172].mxu1 %vm503_vm1, %v7521_v59 }
0x1ad2   :  { %11073 = vmatprep.mubr.msk.f32.mxu1 %vm503_vm1, %v7522_v54 }
0x1ad5   :  { %11074 = vmatmul.mubr.msk.f32.gmra.mrb[174].mxu1 %vm503_vm1, %v7523_v58 }
0x1ad6   :  { %11076 = vmatprep.mubr.msk.f32.mxu1 %vm503_vm1, %v7524_v9 }
0x1ad9   :  { %11077 = vmatmul.mubr.msk.f32.gmra.mrb[176].mxu1 %vm503_vm1, %v7525_v16 }
0x1ada   :  { %11172 = vmatprep.mubr.msk.f32.mxu1 %vm12260_vm2, %v15752_v24 }
0x1b8c   :  { %v15265_v10 = vpop.f32.mrb[160].mxu1 }
0x1b8d   :  { %v11623_v12 = vpack.c.bf16 %v15265_v10, %v15182_v52  ;;  %v11052_v4 = vpop.f32.mrb[161].mxu1 }
0x1b90   :  { %v11057_v29 = vpop.f32.mrb[162].mxu1 }
0x1b91   :  { %v7640_v18 = vpop.f32.mrb[163].mxu1  ;;  %v15269_v61 = vmul.f32 0.35355338, %v11057_v29 }
0x1b92   :  { %v7719_v45 = vmul.f32 0.35355338, %v7640_v18 }
0x1b94   :  { %v11060_v49 = vpop.f32.mrb[164].mxu1 }
0x1b95   :  { %v7650_v39 = vpop.f32.mrb[165].mxu1  ;;  %v7722_v51 = vmul.f32 0.35355338, %v11060_v49 }
0x1b96   :  { %v7721_v43 = vmul.f32 0.35355338, %v7650_v39 }
0x1b98   :  { %v11063_v60 = vpop.f32.mrb[166].mxu1 }
0x1b99   :  { %v15271_v5 = vmul.f32 0.35355338, %v11063_v60  ;;  %v7660_v55 = vpop.f32.mrb[167].mxu1 }
0x1b9a   :  { %v15273_v15 = vmul.f32 0.35355338, %v7660_v55 }
0x1b9b   :  { %v7736_v42 = vmax.f32 %v15269_v61, %v15271_v5 }
0x1b9c   :  { %v7735_v13 = vmax.f32 %v7719_v45, %v15273_v15  ;;  %v11066_v21 = vpop.f32.mrb[168].mxu1 }
0x1b9d   :  { %v15278_v34 = vmul.f32 0.35355338, %v11066_v21  ;;  %v7670_v23 = vpop.f32.mrb[169].mxu1 }
0x1b9e   :  { %v15280_v62 = vmul.f32 0.35355338, %v7670_v23 }
0x1b9f   :  { %v7738_v57 = vmax.f32 %v7722_v51, %v15278_v34 }
0x1ba0   :  { %v7737_v25 = vmax.f32 %v7721_v43, %v15280_v62  ;;  %v11069_v27 = vpop.f32.mrb[170].mxu1 }
0x1ba1   :  { %v15284_v14 = vmul.f32 0.35355338, %v11069_v27  ;;  %v7680_v53 = vpop.f32.mrb[171].mxu1 }
0x1ba2   :  { %v15286_v3 = vmul.f32 0.35355338, %v7680_v53 }
0x1ba3   :  { %v7740_v17 = vmax.f32 %v7736_v42, %v15284_v14 }
0x1ba4   :  { %v7739_v41 = vmax.f32 %v7735_v13, %v15286_v3  ;;  %v11072_v7 = vpop.f32.mrb[172].mxu1 }
0x1ba5   :  { %v15290_v28 = vmul.f32 0.35355338, %v11072_v7  ;;  %v7690_v20 = vpop.f32.mrb[173].mxu1 }
0x1ba6   :  { %v15292_v19 = vmul.f32 0.35355338, %v7690_v20 }
0x1ba7   :  { %v7742_v32 = vmax.f32 %v7738_v57, %v15290_v28 }
0x1ba8   :  { %v7741_v47 = vmax.f32 %v7737_v25, %v15292_v19  ;;  %v11075_v1 = vpop.f32.mrb[174].mxu1 }
0x1ba9   :  { %v15296_v36 = vmul.f32 0.35355338, %v11075_v1  ;;  %v7700_v11 = vpop.f32.mrb[175].mxu1 }
0x1baa   :  { %v15298_v38 = vmul.f32 0.35355338, %v7700_v11 }
0x1bab   :  { %v7744_v26 = vmax.f32 %v7740_v17, %v15296_v36 }
0x1bac   :  { %v7743_v40 = vmax.f32 %v7739_v41, %v15298_v38  ;;  %v11078_v44 = vpop.f32.mrb[176].mxu1 }
0x1bad   :  { %v15302_v22 = vmul.f32 0.35355338, %v11078_v44  ;;  %v7710_v6 = vpop.f32.mrb[177].mxu1 }
0x1bae   :  { %v7747_v37 = vmax.f32 %v7743_v40, %v7744_v26  ;;  %v15304_v48 = vmul.f32 0.35355338, %v7710_v6 }
0x1baf   :  { %v7746_v35 = vmax.f32 %v7742_v32, %v15302_v22 }
0x1bb0   :  { %v7745_v33 = vmax.f32 %v7741_v47, %v15304_v48 }
0x1bb2   :  { %v7748_v59 = vmax.f32 %v7745_v33, %v7746_v35 }
0x1bb4   :  { %v7749_v54 = vmax.f32 %v7747_v37, %v7748_v59 }
0x1bb6   :  { %v7750_v58 = vrot.slane %v7749_v54, 4 }
0x1bb8   :  { %v7751_v9 = vmax.f32 %v7749_v54, %v7750_v58 }
0x1bba   :  { %v7752_v16 = vrot.slane %v7751_v9, 2 }
0x1bbc   :  { %v7753_v4 = vmax.f32 %v7751_v9, %v7752_v16 }
0x1bbe   :  { %v7754_v29 = vrot.slane %v7753_v4, 1 }
0x1bc0   :  { %v7755_v18 = vmax.f32 %v7753_v4, %v7754_v29 }
0x1bc2   :  { %v7756_v49 = vsub.f32 %v7719_v45, %v7755_v18  ;;  %v7757_v39 = vsub.f32 %v15269_v61, %v7755_v18  ;;  %v7758_v60 = vsub.f32 %v7721_v43, %v7755_v18  ;;  %v7759_v55 = vsub.f32 %v7722_v51, %v7755_v18 }
0x1bc3   :  { %v7760_v42 = vsub.f32 %v15273_v15, %v7755_v18  ;;  %v7761_v13 = vsub.f32 %v15271_v5, %v7755_v18  ;;  %v7762_v21 = vsub.f32 %v15280_v62, %v7755_v18  ;;  %v7763_v23 = vsub.f32 %v15278_v34, %v7755_v18 }
0x1bc4   :  { %v7764_v57 = vsub.f32 %v15286_v3, %v7755_v18  ;;  %v7765_v25 = vsub.f32 %v15284_v14, %v7755_v18  ;;  %v7766_v27 = vsub.f32 %v15292_v19, %v7755_v18  ;;  %v7767_v45 = vsub.f32 %v15290_v28, %v7755_v18 }
0x1bc5   :  { %v7768_v61 = vsub.f32 %v15298_v38, %v7755_v18  ;;  %v7769_v51 = vsub.f32 %v15296_v36, %v7755_v18  ;;  %v7770_v15 = vsub.f32 %v15304_v48, %v7755_v18  ;;  %v7771_v5 = vsub.f32 %v15302_v22, %v7755_v18 }
0x1bc6   :  { %v7772_v43 = vmul.f32 1.442695, %v7756_v49  ;;  %v7774_v62 = vmul.f32 1.442695, %v7757_v39  ;;  %v7776_v53 = vmul.f32 1.442695, %v7758_v60 }
0x1bc7   :  { %v7778_v34 = vmul.f32 1.442695, %v7759_v55  ;;  %v7780_v14 = vmul.f32 1.442695, %v7760_v42  ;;  %v7782_v3 = vmul.f32 1.442695, %v7761_v13 }
0x1bc8   :  { %12181 = vpow2.f32 %v7772_v43  ;;  %v7784_v17 = vmul.f32 1.442695, %v7762_v21  ;;  %v7786_v41 = vmul.f32 1.442695, %v7763_v23  ;;  %v7788_v20 = vmul.f32 1.442695, %v7764_v57 }
0x1bc9   :  { %12183 = vpow2.f32 %v7774_v62  ;;  %v7790_v47 = vmul.f32 1.442695, %v7765_v25  ;;  %v7792_v11 = vmul.f32 1.442695, %v7766_v27  ;;  %v7794_v40 = vmul.f32 1.442695, %v7767_v45 }
0x1bca   :  { %12185 = vpow2.f32 %v7776_v53  ;;  %v7796_v6 = vmul.f32 1.442695, %v7768_v61  ;;  %v7798_v35 = vmul.f32 1.442695, %v7769_v51  ;;  %v7800_v54 = vmul.f32 1.442695, %v7770_v15  ;;  %v15321_v61 = vpop.trf.xlu1 }
0x1bcb   :  { %12187 = vpow2.f32 %v7778_v34  ;;  %v7802_v16 = vmul.f32 1.442695, %v7771_v5 }
0x1bcc   :  { %12189 = vpow2.f32 %v7780_v14 }
0x1bcd   :  { %12191 = vpow2.f32 %v7782_v3 }
0x1bce   :  { %12193 = vpow2.f32 %v7784_v17  ;;  %v7930_v43 = vpop.trf.xlu1 }
0x1bcf   :  { %12195 = vpow2.f32 %v7786_v41 }
0x1bd0   :  { %12197 = vpow2.f32 %v7788_v20 }
0x1bd1   :  { %12199 = vpow2.f32 %v7790_v47 }
0x1bd2   :  { %v12182_v7 = vpop.eup %12181  ;;  %12201 = vpow2.f32 %v7792_v11  ;;  %v7931_v14 = vpop.trf.xlu1 }
0x1bd3   :  { %v12184_v28 = vpop.eup %12183  ;;  %12203 = vpow2.f32 %v7794_v40 }
0x1bd4   :  { %v7804_v19 = vadd.f32 %v12184_v28, %v12182_v7  ;;  %v12186_v32 = vpop.eup %12185  ;;  %12205 = vpow2.f32 %v7796_v6 }
0x1bd5   :  { %v12188_v36 = vpop.eup %12187  ;;  %12207 = vpow2.f32 %v7798_v35 }
0x1bd6   :  { %v7805_v1 = vadd.f32 %v12186_v32, %v7804_v19  ;;  %v12190_v26 = vpop.eup %12189  ;;  %12209 = vpow2.f32 %v7800_v54  ;;  %v7932_v3 = vpop.trf.xlu1 }
0x1bd7   :  { %v12192_v22 = vpop.eup %12191  ;;  %12211 = vpow2.f32 %v7802_v16 }
0x1bd8   :  { %v7806_v38 = vadd.f32 %v12188_v36, %v7805_v1  ;;  %v12194_v48 = vpop.eup %12193 }
0x1bd9   :  { %v12196_v59 = vpop.eup %12195 }
0x1bda   :  { %v7807_v44 = vadd.f32 %v12190_v26, %v7806_v38  ;;  %v12198_v9 = vpop.eup %12197  ;;  %v7933_v41 = vpop.trf.xlu1 }
0x1bdb   :  { %v12200_v29 = vpop.eup %12199 }
0x1bdc   :  { %v7808_v37 = vadd.f32 %v12192_v22, %v7807_v44  ;;  %v12202_v49 = vpop.eup %12201 }
0x1bdd   :  { %v12204_v60 = vpop.eup %12203 }
0x1bde   :  { %v7809_v33 = vadd.f32 %v12194_v48, %v7808_v37  ;;  %v12206_v42 = vpop.eup %12205 }
0x1bdf   :  { %v12208_v21 = vpop.eup %12207 }
0x1be0   :  { %v7810_v58 = vadd.f32 %v12196_v59, %v7809_v33  ;;  %v12210_v57 = vpop.eup %12209 }
0x1be1   :  { %v12212_v27 = vpop.eup %12211 }
0x1be2   :  { %v7811_v4 = vadd.f32 %v12198_v9, %v7810_v58 }
0x1be4   :  { %v7812_v18 = vadd.f32 %v12200_v29, %v7811_v4 }
0x1be6   :  { %v7813_v39 = vadd.f32 %v12202_v49, %v7812_v18 }
0x1be8   :  { %v7814_v55 = vadd.f32 %v12204_v60, %v7813_v39 }
0x1bea   :  { %v7815_v13 = vadd.f32 %v12206_v42, %v7814_v55 }
0x1bec   :  { %v7816_v23 = vadd.f32 %v12208_v21, %v7815_v13 }
0x1bee   :  { %v7817_v25 = vadd.f32 %v12210_v57, %v7816_v23 }
0x1bf0   :  { %v7818_v45 = vadd.f32 %v12212_v27, %v7817_v25 }
0x1bf2   :  { %v7819_v51 = vrot.slane %v7818_v45, 4 }
0x1bf4   :  { %v7820_v15 = vadd.f32 %v7819_v51, %v7818_v45 }
0x1bf6   :  { %v7821_v5 = vrot.slane %v7820_v15, 2 }
0x1bf8   :  { %v7822_v62 = vadd.f32 %v7821_v5, %v7820_v15 }
0x1bfa   :  { %v7823_v53 = vrot.slane %v7822_v62, 1 }
0x1bfc   :  { %v7824_v34 = vadd.f32 %v7823_v53, %v7822_v62 }
0x1bfe   :  { %12213 = vrcp.f32 %v7824_v34 }
0x1c08   :  { %v12214_v17 = vpop.eup %12213 }
0x1c09   :  { %v7826_v20 = vmul.f32 %v12214_v17, %v12182_v7  ;;  %v7827_v19 = vmul.f32 %v12214_v17, %v12184_v28  ;;  %v7828_v47 = vmul.f32 %v12214_v17, %v12186_v32  ;;  %v7829_v1 = vmul.f32 %v12214_v17, %v12188_v36  ;;  %v7934_v36 = vpop.trf.xlu1 }
0x1c0a   :  { %v7830_v11 = vmul.f32 %v12214_v17, %v12190_v26  ;;  %v7831_v38 = vmul.f32 %v12214_v17, %v12192_v22  ;;  %v7832_v40 = vmul.f32 %v12214_v17, %v12194_v48  ;;  %v7833_v44 = vmul.f32 %v12214_v17, %v12196_v59 }
0x1c0b   :  { %v11576_v6 = vpack.c.bf16 %v7827_v19, %v7826_v20  ;;  %v11579_v37 = vpack.c.bf16 %v7829_v1, %v7828_v47  ;;  %v7834_v35 = vmul.f32 %v12214_v17, %v12198_v9  ;;  %v7835_v33 = vmul.f32 %v12214_v17, %v12200_v29 }
0x1c0c   :  { %v11582_v54 = vpack.c.bf16 %v7831_v38, %v7830_v11  ;;  %v11585_v58 = vpack.c.bf16 %v7833_v44, %v7832_v40  ;;  %v7836_v16 = vmul.f32 %v12214_v17, %v12202_v49  ;;  %v7837_v4 = vmul.f32 %v12214_v17, %v12204_v60  ;;  %v15907_v49 = vld [vmem:[#allocation36_spill] sm:$0xff] }
0x1c0d   :  { %11577 = vmatpush3.bf16.msra.mxu0 %v11576_v6  ;;  %v11588_v18 = vpack.c.bf16 %v7835_v33, %v7834_v35  ;;  %v7838_v39 = vmul.f32 %v12214_v17, %v12206_v42  ;;  %v7839_v55 = vmul.f32 %v12214_v17, %v12208_v21  ;;  %v7840_v7 = vmul.f32 %v12214_v17, %v12210_v57  ;;  %v7935_v48 = vpop.trf.xlu1  ;;  %v15908_v42 = vld [vmem:[#allocation12_spill] sm:$0xff] }
0x1c0e   :  { %11578 = vmatprep.subr.bf16.mxu0 %v15770_v46  ;;  %v11591_v28 = vpack.c.bf16 %v7837_v4, %v7836_v16  ;;  %v7841_v32 = vmul.f32 %v12214_v17, %v12212_v27  ;;  %v4930_v60 = vadd.f32 %v15907_v49, %v15881_v8  ;;  %v4972_v13 = vadd.f32 %v15908_v42, %v15883_v2 }
0x1c0f   :  { %v11594_v26 = vpack.c.bf16 %v7839_v55, %v7838_v39 }
0x1c10   :  { %v11597_v22 = vpack.c.bf16 %v7841_v32, %v7840_v7 }
0x1c11   :  { %11580 = vmatpush3.bf16.msra.mxu0 %v11579_v37  ;;  %v7936_v59 = vpop.trf.xlu1 }
0x1c12   :  { %11581 = vmatprep.subr.bf16.mxu0 %v15770_v46 }
0x1c15   :  { %11583 = vmatpush3.bf16.msra.mxu0 %v11582_v54  ;;  %v7937_v9 = vpop.trf.xlu1 }
0x1c16   :  { %11584 = vmatprep.subr.bf16.mxu0 %v15770_v46 }
0x1c19   :  { %11586 = vmatpush3.bf16.msra.mxu0 %v11585_v58  ;;  %v7938_v29 = vpop.trf.xlu1 }
0x1c1a   :  { %11587 = vmatprep.subr.bf16.mxu0 %v15770_v46 }
0x1c1d   :  { %11589 = vmatpush3.bf16.msra.mxu0 %v11588_v18  ;;  %v7939_v21 = vpop.trf.xlu1 }
0x1c1e   :  { %11590 = vmatprep.subr.bf16.mxu0 %v15770_v46 }
0x1c21   :  { %11592 = vmatpush3.bf16.msra.mxu0 %v11591_v28  ;;  %v7940_v23 = vpop.trf.xlu1 }
0x1c22   :  { %11593 = vmatprep.subr.bf16.mxu0 %v15770_v46 }
0x1c25   :  { %11595 = vmatpush3.bf16.msra.mxu0 %v11594_v26  ;;  %v7941_v8 = vpop.trf.xlu1 }
0x1c26   :  { %11596 = vmatprep.subr.bf16.mxu0 %v15770_v46 }
0x1c29   :  { %11598 = vmatpush3.bf16.msra.mxu0 %v11597_v22  ;;  %v7942_v2 = vpop.trf.xlu1 }
0x1c2a   :  { %11114 = vmatprep.subr.mxu0 %v4930_v60 }
0x1c2c   :  { %11112 = vmatmul.mubr.f32.vlgmr.msra.gmra.mrb[186].mxu0 %v4972_v13 }
0x1c2d   :  { %11115 = vmatpush3.msra.mxu0 %v4930_v60  ;;  %11116 = vmatprep.mubr.msk.f32.mxu0 %vm503_vm1, %v15321_v61  ;;  %v7943_v57 = vpop.trf.xlu1 }
0x1c30   :  { %11117 = vmatmul.mubr.msk.f32.vlgmr.msra.gmra.mrb[188].mxu0 %vm503_vm1, %v7930_v43 }
0x1c31   :  { %11119 = vmatprep.mubr.msk.f32.mxu0 %vm503_vm1, %v7931_v14  ;;  %v7944_v25 = vpop.trf.xlu1 }
0x1c34   :  { %11120 = vmatmul.mubr.msk.f32.gmra.mrb[190].mxu0 %vm503_vm1, %v7932_v3 }
0x1c35   :  { %11122 = vmatprep.mubr.msk.f32.mxu0 %vm503_vm1, %v7933_v41  ;;  %v8358_v10 = vpop.permute.xlu1 %8357 }
0x1c38   :  { %11123 = vmatmul.mubr.msk.f32.gmra.mrb[192].mxu0 %vm503_vm1, %v7934_v36 }
0x1c39   :  { %11125 = vmatprep.mubr.msk.f32.mxu0 %vm503_vm1, %v7935_v48 }
0x1c3c   :  { %11126 = vmatmul.mubr.msk.f32.gmra.mrb[194].mxu0 %vm503_vm1, %v7936_v59 }
0x1c3d   :  { %11128 = vmatprep.mubr.msk.f32.mxu0 %vm503_vm1, %v7937_v9 }
0x1c40   :  { %11129 = vmatmul.mubr.msk.f32.gmra.mrb[196].mxu0 %vm503_vm1, %v7938_v29 }
0x1c41   :  { %11131 = vmatprep.mubr.msk.f32.mxu0 %vm503_vm1, %v7939_v21 }
0x1c44   :  { %11132 = vmatmul.mubr.msk.f32.gmra.mrb[198].mxu0 %vm503_vm1, %v7940_v23 }
0x1c45   :  { %11134 = vmatprep.mubr.msk.f32.mxu0 %vm503_vm1, %v7941_v8 }
0x1c48   :  { %11135 = vmatmul.mubr.msk.f32.gmra.mrb[200].mxu0 %vm503_vm1, %v7942_v2 }
0x1c49   :  { %11137 = vmatprep.mubr.msk.f32.mxu0 %vm503_vm1, %v7943_v57 }
0x1c4c   :  { %11138 = vmatmul.mubr.msk.f32.gmra.mrb[202].mxu0 %vm503_vm1, %v7944_v25 }
0x1c4d   :  { %9066 = vmatprep.mubr.f32.mxu0 %v15752_v24 }
0x1cff   :  { %v15352_v27 = vpop.f32.mrb[186].mxu0 }
0x1d00   :  { %v11113_v45 = vpop.f32.mrb[187].mxu0 }
0x1d03   :  { %v11118_v61 = vpop.f32.mrb[188].mxu0 }
0x1d04   :  { %v8059_v51 = vpop.f32.mrb[189].mxu0  ;;  %v15354_v62 = vmul.f32 0.35355338, %v11118_v61 }
0x1d05   :  { %v8138_v14 = vmul.f32 0.35355338, %v8059_v51 }
0x1d07   :  { %v11121_v15 = vpop.f32.mrb[190].mxu0 }
0x1d08   :  { %v8069_v5 = vpop.f32.mrb[191].mxu0  ;;  %v8141_v19 = vmul.f32 0.35355338, %v11121_v15 }
0x1d09   :  { %v8140_v11 = vmul.f32 0.35355338, %v8069_v5 }
0x1d0b   :  { %v11124_v43 = vpop.f32.mrb[192].mxu0 }
0x1d0c   :  { %v15356_v53 = vmul.f32 0.35355338, %v11124_v43  ;;  %v8079_v34 = vpop.f32.mrb[193].mxu0 }
0x1d0d   :  { %v15358_v3 = vmul.f32 0.35355338, %v8079_v34 }
0x1d0e   :  { %v8155_v17 = vmax.f32 %v15354_v62, %v15356_v53 }
0x1d0f   :  { %v8154_v41 = vmax.f32 %v8138_v14, %v15358_v3  ;;  %v11127_v20 = vpop.f32.mrb[194].mxu0 }
0x1d10   :  { %v15363_v47 = vmul.f32 0.35355338, %v11127_v20  ;;  %v8089_v1 = vpop.f32.mrb[195].mxu0 }
0x1d11   :  { %v15365_v38 = vmul.f32 0.35355338, %v8089_v1 }
0x1d12   :  { %v8157_v40 = vmax.f32 %v8141_v19, %v15363_v47 }
0x1d13   :  { %v8156_v44 = vmax.f32 %v8140_v11, %v15365_v38  ;;  %v11130_v6 = vpop.f32.mrb[196].mxu0 }
0x1d14   :  { %v15369_v37 = vmul.f32 0.35355338, %v11130_v6  ;;  %v8099_v35 = vpop.f32.mrb[197].mxu0 }
0x1d15   :  { %v15371_v33 = vmul.f32 0.35355338, %v8099_v35 }
0x1d16   :  { %v8159_v54 = vmax.f32 %v8155_v17, %v15369_v37 }
0x1d17   :  { %v8158_v58 = vmax.f32 %v8154_v41, %v15371_v33  ;;  %v11133_v16 = vpop.f32.mrb[198].mxu0 }
0x1d18   :  { %v15375_v4 = vmul.f32 0.35355338, %v11133_v16  ;;  %v8109_v18 = vpop.f32.mrb[199].mxu0 }
0x1d19   :  { %v15377_v39 = vmul.f32 0.35355338, %v8109_v18 }
0x1d1a   :  { %v8161_v55 = vmax.f32 %v8157_v40, %v15375_v4 }
0x1d1b   :  { %v8160_v7 = vmax.f32 %v8156_v44, %v15377_v39  ;;  %v11136_v28 = vpop.f32.mrb[200].mxu0 }
0x1d1c   :  { %v15381_v32 = vmul.f32 0.35355338, %v11136_v28  ;;  %v8119_v36 = vpop.f32.mrb[201].mxu0 }
0x1d1d   :  { %v15383_v26 = vmul.f32 0.35355338, %v8119_v36 }
0x1d1e   :  { %v8163_v22 = vmax.f32 %v8159_v54, %v15381_v32 }
0x1d1f   :  { %v8162_v48 = vmax.f32 %v8158_v58, %v15383_v26  ;;  %v11139_v59 = vpop.f32.mrb[202].mxu0 }
0x1d20   :  { %v15387_v9 = vmul.f32 0.35355338, %v11139_v59  ;;  %v8129_v29 = vpop.f32.mrb[203].mxu0 }
0x1d21   :  { %v8166_v49 = vmax.f32 %v8162_v48, %v8163_v22  ;;  %v15389_v60 = vmul.f32 0.35355338, %v8129_v29 }
0x1d22   :  { %v8165_v42 = vmax.f32 %v8161_v55, %v15387_v9 }
0x1d23   :  { %v8164_v13 = vmax.f32 %v8160_v7, %v15389_v60 }
0x1d25   :  { %v8167_v21 = vmax.f32 %v8164_v13, %v8165_v42 }
0x1d27   :  { %v8168_v23 = vmax.f32 %v8166_v49, %v8167_v21 }
0x1d29   :  { %v8169_v8 = vrot.slane %v8168_v23, 4 }
0x1d2b   :  { %v8170_v2 = vmax.f32 %v8168_v23, %v8169_v8 }
0x1d2d   :  { %v8171_v57 = vrot.slane %v8170_v2, 2 }
0x1d2f   :  { %v8172_v25 = vmax.f32 %v8170_v2, %v8171_v57 }
0x1d31   :  { %v8173_v45 = vrot.slane %v8172_v25, 1 }
0x1d33   :  { %v8174_v61 = vmax.f32 %v8172_v25, %v8173_v45 }
0x1d35   :  { %v8175_v51 = vsub.f32 %v8138_v14, %v8174_v61  ;;  %v8176_v15 = vsub.f32 %v15354_v62, %v8174_v61  ;;  %v8177_v5 = vsub.f32 %v8140_v11, %v8174_v61  ;;  %v8178_v43 = vsub.f32 %v8141_v19, %v8174_v61 }
0x1d36   :  { %v8179_v34 = vsub.f32 %v15358_v3, %v8174_v61  ;;  %v8180_v17 = vsub.f32 %v15356_v53, %v8174_v61  ;;  %v8181_v41 = vsub.f32 %v15365_v38, %v8174_v61  ;;  %v8182_v20 = vsub.f32 %v15363_v47, %v8174_v61 }
0x1d37   :  { %v8183_v1 = vsub.f32 %v15371_v33, %v8174_v61  ;;  %v8184_v40 = vsub.f32 %v15369_v37, %v8174_v61  ;;  %v8185_v44 = vsub.f32 %v15377_v39, %v8174_v61  ;;  %v8186_v14 = vsub.f32 %v15375_v4, %v8174_v61 }
0x1d38   :  { %v8187_v62 = vsub.f32 %v15383_v26, %v8174_v61  ;;  %v8188_v19 = vsub.f32 %v15381_v32, %v8174_v61  ;;  %v8189_v3 = vsub.f32 %v15389_v60, %v8174_v61  ;;  %v8190_v53 = vsub.f32 %v15387_v9, %v8174_v61 }
0x1d39   :  { %v8191_v11 = vmul.f32 1.442695, %v8175_v51  ;;  %v8193_v38 = vmul.f32 1.442695, %v8176_v15  ;;  %v8195_v6 = vmul.f32 1.442695, %v8177_v5 }
0x1d3a   :  { %v8197_v47 = vmul.f32 1.442695, %v8178_v43  ;;  %v8199_v37 = vmul.f32 1.442695, %v8179_v34  ;;  %v8201_v35 = vmul.f32 1.442695, %v8180_v17 }
0x1d3b   :  { %12215 = vpow2.f32 %v8191_v11  ;;  %v8203_v33 = vmul.f32 1.442695, %v8181_v41  ;;  %v8205_v54 = vmul.f32 1.442695, %v8182_v20  ;;  %v8207_v4 = vmul.f32 1.442695, %v8183_v1 }
0x1d3c   :  { %12217 = vpow2.f32 %v8193_v38  ;;  %v8209_v55 = vmul.f32 1.442695, %v8184_v40  ;;  %v8211_v32 = vmul.f32 1.442695, %v8185_v44  ;;  %v8213_v22 = vmul.f32 1.442695, %v8186_v14 }
0x1d3d   :  { %12219 = vpow2.f32 %v8195_v6  ;;  %v8215_v9 = vmul.f32 1.442695, %v8187_v62  ;;  %v8217_v60 = vmul.f32 1.442695, %v8188_v19  ;;  %v8219_v21 = vmul.f32 1.442695, %v8189_v3 }
0x1d3e   :  { %12221 = vpow2.f32 %v8197_v47  ;;  %v8221_v2 = vmul.f32 1.442695, %v8190_v53 }
0x1d3f   :  { %12223 = vpow2.f32 %v8199_v37 }
0x1d40   :  { %12225 = vpow2.f32 %v8201_v35 }
0x1d41   :  { %12227 = vpow2.f32 %v8203_v33 }
0x1d42   :  { %12229 = vpow2.f32 %v8205_v54 }
0x1d43   :  { %12231 = vpow2.f32 %v8207_v4 }
0x1d44   :  { %12233 = vpow2.f32 %v8209_v55 }
0x1d45   :  { %v12216_v58 = vpop.eup %12215  ;;  %12235 = vpow2.f32 %v8211_v32 }
0x1d46   :  { %v12218_v16 = vpop.eup %12217  ;;  %12237 = vpow2.f32 %v8213_v22 }
0x1d47   :  { %v8223_v18 = vadd.f32 %v12218_v16, %v12216_v58  ;;  %v12220_v39 = vpop.eup %12219  ;;  %12239 = vpow2.f32 %v8215_v9 }
0x1d48   :  { %v12222_v28 = vpop.eup %12221  ;;  %12241 = vpow2.f32 %v8217_v60 }
0x1d49   :  { %v8224_v7 = vadd.f32 %v12220_v39, %v8223_v18  ;;  %v12224_v26 = vpop.eup %12223  ;;  %12243 = vpow2.f32 %v8219_v21 }
0x1d4a   :  { %v12226_v59 = vpop.eup %12225  ;;  %12245 = vpow2.f32 %v8221_v2 }
0x1d4b   :  { %v8225_v36 = vadd.f32 %v12222_v28, %v8224_v7  ;;  %v12228_v49 = vpop.eup %12227 }
0x1d4c   :  { %v12230_v13 = vpop.eup %12229 }
0x1d4d   :  { %v8226_v48 = vadd.f32 %v12224_v26, %v8225_v36  ;;  %v12232_v8 = vpop.eup %12231 }
0x1d4e   :  { %v12234_v25 = vpop.eup %12233 }
0x1d4f   :  { %v8227_v29 = vadd.f32 %v12226_v59, %v8226_v48  ;;  %v12236_v61 = vpop.eup %12235 }
0x1d50   :  { %v12238_v15 = vpop.eup %12237 }
0x1d51   :  { %v8228_v42 = vadd.f32 %v12228_v49, %v8227_v29  ;;  %v12240_v43 = vpop.eup %12239 }
0x1d52   :  { %v12242_v17 = vpop.eup %12241 }
0x1d53   :  { %v8229_v23 = vadd.f32 %v12230_v13, %v8228_v42  ;;  %v12244_v20 = vpop.eup %12243 }
0x1d54   :  { %v12246_v40 = vpop.eup %12245 }
0x1d55   :  { %v8230_v57 = vadd.f32 %v12232_v8, %v8229_v23 }
0x1d57   :  { %v8231_v45 = vadd.f32 %v12234_v25, %v8230_v57  ;;  %v8368_v57 = vpop.permute.xlu0 %8367 }
0x1d59   :  { %v8232_v51 = vadd.f32 %v12236_v61, %v8231_v45 }
0x1d5b   :  { %v8233_v5 = vadd.f32 %v12238_v15, %v8232_v51 }
0x1d5d   :  { %v8234_v34 = vadd.f32 %v12240_v43, %v8233_v5 }
0x1d5f   :  { %v8235_v41 = vadd.f32 %v12242_v17, %v8234_v34  ;;  %v15912_v34 = vld [vmem:[#allocation23_spill] sm:$0xff] }
0x1d61   :  { %v8236_v1 = vadd.f32 %v12244_v20, %v8235_v41 }
0x1d63   :  { %v8237_v44 = vadd.f32 %v12246_v40, %v8236_v1  ;;  %v15913_v1 = vld [vmem:[#allocation24_spill] sm:$0xff] }
0x1d65   :  { %v8238_v14 = vrot.slane %v8237_v44, 4 }
0x1d67   :  { %v8239_v62 = vadd.f32 %v8238_v14, %v8237_v44 }
0x1d69   :  { %v8240_v19 = vrot.slane %v8239_v62, 2 }
0x1d6b   :  { %v8241_v3 = vadd.f32 %v8240_v19, %v8239_v62  ;;  %v15914_v62 = vld [vmem:[#allocation25_spill] sm:$0xff] }
0x1d6d   :  { %v8242_v53 = vrot.slane %v8241_v3, 1 }
0x1d6f   :  { %v8243_v11 = vadd.f32 %v8242_v53, %v8241_v3  ;;  %v15462_v3 = vpop.permute.xlu0 %8563 }
0x1d71   :  { %12247 = vrcp.f32 %v8243_v11  ;;  %v15915_v11 = vld [vmem:[#allocation27_spill] sm:$0xff] }
0x1d7b   :  { %v12248_v38 = vpop.eup %12247 }
0x1d7c   :  { %v8245_v6 = vmul.f32 %v12248_v38, %v12216_v58  ;;  %v8246_v47 = vmul.f32 %v12248_v38, %v12218_v16  ;;  %v8247_v37 = vmul.f32 %v12248_v38, %v12220_v39  ;;  %v8248_v35 = vmul.f32 %v12248_v38, %v12222_v28 }
0x1d7d   :  { %v8249_v33 = vmul.f32 %v12248_v38, %v12224_v26  ;;  %v8250_v54 = vmul.f32 %v12248_v38, %v12226_v59  ;;  %v8251_v4 = vmul.f32 %v12248_v38, %v12228_v49  ;;  %v8252_v18 = vmul.f32 %v12248_v38, %v12230_v13  ;;  %v15909_v59 = vld [vmem:[#allocation20_spill] sm:$0xff] }
0x1d7e   :  { %v11600_v55 = vpack.c.bf16 %v8246_v47, %v8245_v6  ;;  %v11603_v7 = vpack.c.bf16 %v8248_v35, %v8247_v37  ;;  %v8253_v32 = vmul.f32 %v12248_v38, %v12232_v8  ;;  %v8254_v36 = vmul.f32 %v12248_v38, %v12234_v25 }
0x1d7f   :  { %v11606_v22 = vpack.c.bf16 %v8250_v54, %v8249_v33  ;;  %v11609_v48 = vpack.c.bf16 %v8252_v18, %v8251_v4  ;;  %v8255_v9 = vmul.f32 %v12248_v38, %v12236_v61  ;;  %v8256_v29 = vmul.f32 %v12248_v38, %v12238_v15  ;;  %v15910_v61 = vld [vmem:[#allocation26_spill] sm:$0xff]  ;;  %v15911_v15 = vld [vmem:[#allocation28_spill] sm:$0xff] }
0x1d80   :  { %11601 = vmatpush3.bf16.msra.mxu1 %v11600_v55  ;;  %v11612_v60 = vpack.c.bf16 %v8254_v36, %v8253_v32  ;;  %v8257_v42 = vmul.f32 %v12248_v38, %v12240_v43  ;;  %v8258_v21 = vmul.f32 %v12248_v38, %v12242_v17  ;;  %v8259_v58 = vmul.f32 %v12248_v38, %v12244_v20 }
0x1d81   :  { %11602 = vmatprep.subr.bf16.mxu1 %v15770_v46  ;;  %v11615_v16 = vpack.c.bf16 %v8256_v29, %v8255_v9  ;;  %v8260_v39 = vmul.f32 %v12248_v38, %v12246_v40 }
0x1d82   :  { %v11618_v28 = vpack.c.bf16 %v8258_v21, %v8257_v42 }
0x1d83   :  { %v11621_v26 = vpack.c.bf16 %v8260_v39, %v8259_v58  ;;  %v15492_v39 = vpop.permute.xlu0 %8568 }
0x1d84   :  { %11604 = vmatpush3.bf16.msra.mxu1 %v11603_v7 }
0x1d85   :  { %11605 = vmatprep.subr.bf16.mxu1 %v15770_v46 }
0x1d88   :  { %11607 = vmatpush3.bf16.msra.mxu1 %v11606_v22  ;;  %v15916_v22 = vld [vmem:[#allocation29_spill] sm:$0xff] }
0x1d89   :  { %11608 = vmatprep.subr.bf16.mxu1 %v15770_v46 }
0x1d8c   :  { %11610 = vmatpush3.bf16.msra.mxu1 %v11609_v48 }
0x1d8d   :  { %11611 = vmatprep.subr.bf16.mxu1 %v15770_v46 }
0x1d90   :  { %11613 = vmatpush3.bf16.msra.mxu1 %v11612_v60  ;;  %v15917_v60 = vld [vmem:[#allocation30_spill] sm:$0xff] }
0x1d91   :  { %11614 = vmatprep.subr.bf16.mxu1 %v15770_v46 }
0x1d94   :  { %11616 = vmatpush3.bf16.msra.mxu1 %v11615_v16 }
0x1d95   :  { %11617 = vmatprep.subr.bf16.mxu1 %v15770_v46 }
0x1d98   :  { %11619 = vmatpush3.bf16.msra.mxu1 %v11618_v28 }
0x1d99   :  { %11620 = vmatprep.subr.bf16.mxu1 %v15770_v46  ;;  %v9579_v46 = vld [vmem:[%s15694_s6 + $0x20] sm:$0xff] }
0x1d9c   :  { %11622 = vmatpush3.bf16.msra.mxu1 %v11621_v26 }
0x1d9d   :  { %11624 = vmatprep.subr.bf16.mxu1 %v11623_v12 }
0x1d9f   :  { %11173 = vmatmul.mubr.f32.vlgmr.msra.gmra.mrb[178].mxu1 %v15909_v59 }
0x1da0   :  { %11626 = vmatpush1.bf16.msra.mxu1 %v11625_v63  ;;  %8446 = vmatprep.mubr.f32.mxu1 %v15752_v24  ;;  %v9582_v63 = vld [vmem:[%s15694_s6 + $0x38] sm:$0xff] }
0x1e72   :  { %v8327_v49 = vpop.f32.mrb[178].mxu1 }
0x1e73   :  { %v11627_v13 = vpack.c.bf16 %v8327_v49, %v15352_v27  ;;  %v11174_v23 = vpop.f32.mrb[179].mxu1 }
0x1e75   :  { %11628 = vmatprep.subr.bf16.mxu1 %v11627_v13 }
0x1e76   :  { %11630 = vmatpush1.bf16.msra.mxu1 %v11629_v0 }
0x1e79   :  { %9587 = vmatmul.mubr.msk.f32.vlgmr.msra.gmra.mrb[180].mxu1 %vm297_vm0, %v9579_v46 }
0x1e7a   :  { %8452 = vmatprep.mubr.f32.mxu1 %v15752_v24 }
0x1e7d   :  { %9588 = vmatmul.mubr.msk.f32.gmra.mrb[182].mxu1 %vm297_vm0, %v9580_v31 }
0x1e7e   :  { %8458 = vmatprep.mubr.f32.mxu1 %v15752_v24 }
0x1e81   :  { %9589 = vmatmul.mubr.msk.f32.gmra.mrb[184].mxu1 %vm297_vm0, %v9581_v50 }
0x1e82   :  { %8464 = vmatprep.mubr.f32.mxu1 %v15752_v24 }
0x1e85   :  { %9590 = vmatmul.mubr.msk.f32.gmra.mrb[186].mxu1 %vm297_vm0, %v9582_v63 }
0x1e86   :  { %8843 = vmatprep.mubr.f32.mxu1 %v15752_v24 }
0x1f4c   :  { %v8448_v0 = vpop.f32.mrb[180].mxu1 }
0x1f4d   :  { %v8450_v52 = vpop.f32.mrb[181].mxu1  ;;  %v8449_v27 = vadd.f32 %v8448_v0, %v8353_v30 }
0x1f4e   :  { %v8451_v25 = vadd.f32 %v8450_v52, %v8353_v30  ;;  %v8592_v52 = vpop.permute.xlu0 %8591 }
0x1f4f   :  { %v15452_v17 = vadd.f32 %v8449_v27, %v15912_v34 }
0x1f50   :  { %v8454_v12 = vpop.f32.mrb[182].mxu1  ;;  %v15455_v40 = vadd.f32 %v8451_v25, %v15913_v1 }
0x1f51   :  { %v8455_v8 = vadd.f32 %v8454_v12, %v8358_v10  ;;  %v8456_v2 = vpop.f32.mrb[183].mxu1  ;;  %v8509_v47 = vmul.f32 %v15452_v17, %v15452_v17 }
0x1f52   :  { %v8457_v45 = vadd.f32 %v8456_v2, %v8358_v10  ;;  %v8510_v4 = vmul.f32 %v15455_v40, %v15455_v40 }
0x1f53   :  { %v15446_v51 = vadd.f32 %v8455_v8, %v15910_v61 }
0x1f54   :  { %v15449_v5 = vadd.f32 %v8457_v45, %v15911_v15  ;;  %v8460_v43 = vpop.f32.mrb[184].mxu1 }
0x1f55   :  { %v8461_v41 = vadd.f32 %v8460_v43, %v8363_v56  ;;  %v8462_v20 = vpop.f32.mrb[185].mxu1  ;;  %v8511_v14 = vmul.f32 %v15446_v51, %v15446_v51  ;;  %v8489_v37 = vadd.f32 %v15446_v51, %v15452_v17 }
0x1f56   :  { %v8463_v44 = vadd.f32 %v8462_v20, %v8363_v56  ;;  %v8512_v53 = vmul.f32 %v15449_v5, %v15449_v5  ;;  %v8498_v18 = vadd.f32 %v15449_v5, %v15455_v40 }
0x1f57   :  { %v15460_v19 = vadd.f32 %v8461_v41, %v15914_v62  ;;  %v8517_v32 = vadd.f32 %v8511_v14, %v8509_v47  ;;  %v8597_v41 = vpop.permute.xlu0 %8596 }
0x1f58   :  { %v15467_v38 = vadd.f32 %v8463_v44, %v15915_v11  ;;  %v8466_v6 = vpop.f32.mrb[186].mxu1  ;;  %v8526_v9 = vadd.f32 %v8512_v53, %v8510_v4 }
0x1f59   :  { %v8513_v35 = vmul.f32 %v15460_v19, %v15460_v19  ;;  %v8467_v33 = vadd.f32 %v8466_v6, %v8368_v57  ;;  %v8468_v54 = vpop.f32.mrb[187].mxu1  ;;  %v8490_v36 = vadd.f32 %v8489_v37, %v15460_v19 }
0x1f5a   :  { %v8514_v55 = vmul.f32 %v15467_v38, %v15467_v38  ;;  %v8469_v7 = vadd.f32 %v8468_v54, %v8368_v57  ;;  %v8499_v29 = vadd.f32 %v8498_v18, %v15467_v38 }
0x1f5b   :  { %v15483_v48 = vadd.f32 %v8467_v33, %v15916_v22  ;;  %v8518_v21 = vadd.f32 %v8517_v32, %v8513_v35  ;;  %v8574_v33 = vpop.permute.xlu0 %8573 }
0x1f5c   :  { %v15487_v42 = vadd.f32 %v8469_v7, %v15917_v60  ;;  %v8527_v28 = vadd.f32 %v8526_v9, %v8514_v55 }
0x1f5d   :  { %v8491_v58 = vadd.f32 %v8490_v36, %v15483_v48  ;;  %v8515_v16 = vmul.f32 %v15483_v48, %v15483_v48 }
0x1f5e   :  { %v8500_v26 = vadd.f32 %v8499_v29, %v15487_v42  ;;  %v8516_v59 = vmul.f32 %v15487_v42, %v15487_v42 }
0x1f5f   :  { %v8492_v49 = vrot.slane %v8491_v58, 4  ;;  %v8519_v13 = vadd.f32 %v8518_v21, %v8515_v16  ;;  %v8579_v55 = vpop.permute.xlu0 %8578 }
0x1f60   :  { %v8501_v23 = vrot.slane %v8500_v26, 4  ;;  %v8528_v46 = vadd.f32 %v8527_v28, %v8516_v59 }
0x1f61   :  { %v8493_v31 = vadd.f32 %v8492_v49, %v8491_v58  ;;  %v8520_v50 = vrot.slane %v8519_v13, 4 }
0x1f62   :  { %v8502_v63 = vadd.f32 %v8501_v23, %v8500_v26  ;;  %v8529_v30 = vrot.slane %v8528_v46, 4 }
0x1f63   :  { %v8494_v56 = vrot.slane %v8493_v31, 2  ;;  %v8521_v0 = vadd.f32 %v8520_v50, %v8519_v13  ;;  %v8602_v7 = vpop.permute.xlu0 %8601 }
0x1f64   :  { %v8503_v10 = vrot.slane %v8502_v63, 2  ;;  %v8530_v12 = vadd.f32 %v8529_v30, %v8528_v46 }
0x1f65   :  { %v8495_v27 = vadd.f32 %v8494_v56, %v8493_v31  ;;  %v8522_v8 = vrot.slane %v8521_v0, 2 }
0x1f66   :  { %v8504_v2 = vadd.f32 %v8503_v10, %v8502_v63  ;;  %v8531_v57 = vrot.slane %v8530_v12, 2 }
0x1f67   :  { %v8496_v25 = vrot.slane %v8495_v27, 1  ;;  %v8523_v45 = vadd.f32 %v8522_v8, %v8521_v0 }
0x1f68   :  { %v8505_v61 = vrot.slane %v8504_v2, 1  ;;  %v8532_v15 = vadd.f32 %v8531_v57, %v8530_v12 }
0x1f69   :  { %v8497_v43 = vadd.f32 %v8496_v25, %v8495_v27  ;;  %v8524_v34 = vrot.slane %v8523_v45, 1  ;;  %v8607_v27 = vpop.permute.xlu0 %8606 }
0x1f6a   :  { %v8506_v20 = vadd.f32 %v8505_v61, %v8504_v2  ;;  %v8533_v1 = vrot.slane %v8532_v15, 1 }
0x1f6b   :  { %v8507_v44 = vmul.f32 0.03125, %v8497_v43  ;;  %v8525_v14 = vadd.f32 %v8524_v34, %v8523_v45 }
0x1f6c   :  { %v8508_v62 = vmul.f32 0.03125, %v8506_v20  ;;  %v8534_v53 = vadd.f32 %v8533_v1, %v8532_v15 }
0x1f6d   :  { %v8535_v11 = vmul.f32 0.03125, %v8525_v14  ;;  %v8537_v6 = vmul.f32 %v8507_v44, %v8507_v44  ;;  %v8547_v32 = vsub.f32 %v15483_v48, %v8507_v44  ;;  %v8541_v36 = vsub.f32 %v15452_v17, %v8507_v44 }
0x1f6e   :  { %v8536_v47 = vmul.f32 0.03125, %v8534_v53  ;;  %v8538_v37 = vmul.f32 %v8508_v62, %v8508_v62  ;;  %v8543_v22 = vsub.f32 %v15446_v51, %v8507_v44  ;;  %v8545_v9 = vsub.f32 %v15460_v19, %v8507_v44  ;;  %v9603_v53 = vld [vmem:[%s15695_s10 + $0xa0] sm:$0xff] }
0x1f6f   :  { %v8539_v35 = vsub.f32 %v8535_v11, %v8537_v6  ;;  %v8548_v60 = vsub.f32 %v15487_v42, %v8508_v62  ;;  %v8542_v21 = vsub.f32 %v15455_v40, %v8508_v62  ;;  %v8544_v58 = vsub.f32 %v15449_v5, %v8508_v62  ;;  %v9604_v11 = vld [vmem:[%s15695_s10 + $0xa8] sm:$0xff]  ;;  %v9605_v6 = vld [vmem:[%s15695_s10 + $0xb0] sm:$0xff] }
0x1f70   :  { %v8540_v54 = vsub.f32 %v8536_v47, %v8538_v37  ;;  %v8546_v16 = vsub.f32 %v15467_v38, %v8508_v62  ;;  %v9602_v62 = vld [vmem:[%s15695_s10 + $0x98] sm:$0xff]  ;;  %v9607_v37 = vld [vmem:[%s15695_s10 + $0xc0] sm:$0xff] }
0x1f71   :  { %v8549_v4 = vadd.f32 1e-05, %v8539_v35  ;;  %v9606_v47 = vld [vmem:[%s15695_s10 + $0xb8] sm:$0xff]  ;;  %v9608_v35 = vld [vmem:[%s15695_s10 + $0xc8] sm:$0xff] }
0x1f72   :  { %v8550_v18 = vadd.f32 1e-05, %v8540_v54  ;;  %v9610_v54 = vld [vmem:[%s15695_s10 + $0xd8] sm:$0xff] }
0x1f73   :  { %12249 = vrsqrt.f32 %v8549_v4  ;;  %v9611_v4 = vld [vmem:[%s15695_s10 + $0xe0] sm:$0xff] }
0x1f74   :  { %12251 = vrsqrt.f32 %v8550_v18  ;;  %v9612_v18 = vld [vmem:[%s15695_s10 + $0xe8] sm:$0xff] }
0x1f7d   :  { %v12250_v29 = vpop.eup %12249 }
0x1f7e   :  { %v12252_v28 = vpop.eup %12251  ;;  %v8559_v26 = vmul.f32 %v12250_v29, %v8547_v32  ;;  %v8553_v59 = vmul.f32 %v12250_v29, %v8541_v36  ;;  %v8555_v49 = vmul.f32 %v12250_v29, %v8543_v22  ;;  %v8557_v13 = vmul.f32 %v12250_v29, %v8545_v9  ;;  %v8654_v32 = vpop.permute.xlu0 %8653 }
0x1f7f   :  { %v8554_v23 = vmul.f32 %v12252_v28, %v8542_v21  ;;  %v8556_v46 = vmul.f32 %v12252_v28, %v8544_v58  ;;  %v8558_v31 = vmul.f32 %v12252_v28, %v8546_v16  ;;  %v8560_v50 = vmul.f32 %v12252_v28, %v8548_v60 }
0x1f80   :  { %v8581_v63 = vmul.f32 %v15462_v3, %v8553_v59  ;;  %v8583_v30 = vmul.f32 %v15492_v39, %v8555_v49  ;;  %v8585_v57 = vmul.f32 %v8574_v33, %v8557_v13  ;;  %v8587_v25 = vmul.f32 %v8579_v55, %v8559_v26 }
0x1f81   :  { %v8582_v56 = vmul.f32 %v15462_v3, %v8554_v23  ;;  %v8584_v0 = vmul.f32 %v15492_v39, %v8556_v46  ;;  %v8586_v10 = vmul.f32 %v8574_v33, %v8558_v31  ;;  %v8588_v12 = vmul.f32 %v8579_v55, %v8560_v50  ;;  %v9599_v39 = vld [vmem:[%s15695_s10 + $0x80] sm:$0xff]  ;;  %v9609_v33 = vld [vmem:[%s15695_s10 + $0xd0] sm:$0xff] }
0x1f82   :  { %v8609_v8 = vadd.f32 %v8592_v52, %v8581_v63  ;;  %v8611_v2 = vadd.f32 %v8597_v41, %v8583_v30  ;;  %v8613_v1 = vadd.f32 %v8602_v7, %v8585_v57  ;;  %v8615_v44 = vadd.f32 %v8607_v27, %v8587_v25  ;;  %v9613_v55 = vld [vmem:[%s15695_s10 + $0xf0] sm:$0xff]  ;;  %v8659_v29 = vpop.permute.xlu0 %8658 }
0x1f83   :  { %v8610_v45 = vadd.f32 %v8592_v52, %v8582_v56  ;;  %v8612_v61 = vadd.f32 %v8597_v41, %v8584_v0  ;;  %v8614_v15 = vadd.f32 %v8602_v7, %v8586_v10  ;;  %v8616_v43 = vadd.f32 %v8607_v27, %v8588_v12  ;;  %v9600_v52 = vld [vmem:[%s15695_s10 + $0x88] sm:$0xff]  ;;  %v9601_v41 = vld [vmem:[%s15695_s10 + $0x90] sm:$0xff]  ;;  %v9614_v7 = vld [vmem:[%s15695_s10 + $0xf8] sm:$0xff]  ;;  %v8669_v56 = vpop.permute.xlu1 %8668 }
0x1f84   :  { %v11633_v20 = vpack.c.bf16 %v8611_v2, %v8609_v8  ;;  %v11637_v3 = vpack.c.bf16 %v8615_v44, %v8613_v1 }
0x1f85   :  { %v11631_v34 = vpack.c.bf16 %v8612_v61, %v8610_v45  ;;  %v11635_v14 = vpack.c.bf16 %v8616_v43, %v8614_v15 }
0x1f86   :  { %v8664_v50 = vpop.permute.xlu0 %8663 }
0x1f87   :  { %11632 = vmatprep.subr.bf16.mxu1 %v11631_v34  ;;  %v8679_v44 = vpop.permute.xlu1 %8678 }
0x1f88   :  { %11634 = vmatpush1.bf16.msra.mxu1 %v11633_v20 }
0x1f89   :  { %11636 = vmatprep.subr.bf16.mxu1 %v11635_v14 }
0x1f8a   :  { %v8674_v34 = vpop.permute.xlu0 %8673 }
0x1f8c   :  { %11638 = vmatpush1.bf16.msra.mxu1 %v11637_v3 }
0x1f8f   :  { %9631 = vmatmul.mubr.msk.f32.vlgmr.msra.gmra.mrb[188].mxu1 %vm297_vm0, %v9599_v39 }
0x1f90   :  { %8849 = vmatprep.mubr.f32.mxu1 %v15752_v24 }
0x1f93   :  { %9632 = vmatmul.mubr.msk.f32.gmra.mrb[190].mxu1 %vm297_vm0, %v9600_v52 }
0x1f94   :  { %8855 = vmatprep.mubr.f32.mxu1 %v15752_v24 }
0x1f97   :  { %9633 = vmatmul.mubr.msk.f32.gmra.mrb[192].mxu1 %vm297_vm0, %v9601_v41 }
0x1f98   :  { %8861 = vmatprep.mubr.f32.mxu1 %v15752_v24 }
0x1f9b   :  { %9634 = vmatmul.mubr.msk.f32.gmra.mrb[194].mxu1 %vm297_vm0, %v9602_v62 }
0x1f9c   :  { %8867 = vmatprep.mubr.f32.mxu1 %v15752_v24 }
0x1f9f   :  { %9635 = vmatmul.mubr.msk.f32.gmra.mrb[196].mxu1 %vm297_vm0, %v9603_v53 }
0x1fa0   :  { %8873 = vmatprep.mubr.f32.mxu1 %v15752_v24 }
0x1fa3   :  { %9636 = vmatmul.mubr.msk.f32.gmra.mrb[198].mxu1 %vm297_vm0, %v9604_v11 }
0x1fa4   :  { %8879 = vmatprep.mubr.f32.mxu1 %v15752_v24 }
0x1fa7   :  { %9637 = vmatmul.mubr.msk.f32.gmra.mrb[200].mxu1 %vm297_vm0, %v9605_v6 }
0x1fa8   :  { %8885 = vmatprep.mubr.f32.mxu1 %v15752_v24 }
0x1fab   :  { %9638 = vmatmul.mubr.msk.f32.gmra.mrb[202].mxu1 %vm297_vm0, %v9606_v47 }
0x1fac   :  { %8891 = vmatprep.mubr.f32.mxu1 %v15752_v24 }
0x1faf   :  { %9639 = vmatmul.mubr.msk.f32.gmra.mrb[204].mxu1 %vm297_vm0, %v9607_v37 }
0x1fb0   :  { %8897 = vmatprep.mubr.f32.mxu1 %v15752_v24 }
0x1fb3   :  { %9640 = vmatmul.mubr.msk.f32.gmra.mrb[206].mxu1 %vm297_vm0, %v9608_v35 }
0x1fb4   :  { %8903 = vmatprep.mubr.f32.mxu1 %v15752_v24 }
0x1fb7   :  { %9641 = vmatmul.mubr.msk.f32.gmra.mrb[208].mxu1 %vm297_vm0, %v9609_v33  ;;  %v8684_v33 = vpop.permute.xlu0 %8683 }
0x1fb8   :  { %8909 = vmatprep.mubr.f32.mxu1 %v15752_v24 }
0x1fbb   :  { %9642 = vmatmul.mubr.msk.f32.gmra.mrb[210].mxu1 %vm297_vm0, %v9610_v54 }
0x1fbc   :  { %8915 = vmatprep.mubr.f32.mxu1 %v15752_v24 }
0x1fbf   :  { %9643 = vmatmul.mubr.msk.f32.gmra.mrb[212].mxu1 %vm297_vm0, %v9611_v4 }
0x1fc0   :  { %8921 = vmatprep.mubr.f32.mxu1 %v15752_v24 }
0x1fc3   :  { %9644 = vmatmul.mubr.msk.f32.gmra.mrb[214].mxu1 %vm297_vm0, %v9612_v18  ;;  %v8689_v18 = vpop.permute.xlu1 %8688 }
0x1fc4   :  { %8927 = vmatprep.mubr.f32.mxu1 %v15752_v24 }
0x1fc7   :  { %9645 = vmatmul.mubr.msk.f32.gmra.mrb[216].mxu1 %vm297_vm0, %v9613_v55 }
0x1fc8   :  { %8933 = vmatprep.mubr.f32.mxu1 %v15752_v24 }
0x1fcb   :  { %9646 = vmatmul.mubr.msk.f32.gmra.mrb[218].mxu1 %vm297_vm0, %v9614_v7 }
0x2062   :  { %v8845_v36 = vpop.f32.mrb[188].mxu1 }
0x2063   :  { %v8847_v22 = vpop.f32.mrb[189].mxu1  ;;  %v8846_v9 = vadd.f32 %v8845_v36, %v8654_v32 }
0x2064   :  { %v8848_v60 = vadd.f32 %v8847_v22, %v8654_v32 }
0x2065   :  { %v8940_v26 = vmax.f32 %v8846_v9, 0.0 }
0x2066   :  { %v8851_v21 = vpop.f32.mrb[190].mxu1  ;;  %v8941_v49 = vmax.f32 %v8848_v60, 0.0 }
0x2067   :  { %v8852_v58 = vadd.f32 %v8851_v21, %v8659_v29  ;;  %v8853_v16 = vpop.f32.mrb[191].mxu1 }
0x2068   :  { %v8854_v28 = vadd.f32 %v8853_v16, %v8659_v29 }
0x2069   :  { %v8942_v59 = vmax.f32 %v8852_v58, 0.0 }
0x206a   :  { %v8943_v13 = vmax.f32 %v8854_v28, 0.0  ;;  %v8857_v23 = vpop.f32.mrb[192].mxu1 }
0x206b   :  { %v11641_v46 = vpack.c.bf16 %v8942_v59, %v8940_v26  ;;  %v8859_v31 = vpop.f32.mrb[193].mxu1  ;;  %v8858_v30 = vadd.f32 %v8857_v23, %v8664_v50  ;;  %v8694_v26 = vpop.permute.xlu0 %8693 }
0x206c   :  { %v11639_v63 = vpack.c.bf16 %v8943_v13, %v8941_v49  ;;  %v8860_v0 = vadd.f32 %v8859_v31, %v8664_v50  ;;  %v8699_v13 = vpop.permute.xlu1 %8698 }
0x206d   :  { %v8944_v2 = vmax.f32 %v8858_v30, 0.0 }
0x206e   :  { %v8863_v10 = vpop.f32.mrb[194].mxu1  ;;  %11640 = vmatprep.subr.bf16.mxu0 %v11639_v63  ;;  %v8945_v25 = vmax.f32 %v8860_v0, 0.0 }
0x206f   :  { %v8864_v12 = vadd.f32 %v8863_v10, %v8669_v56  ;;  %v8865_v27 = vpop.f32.mrb[195].mxu1  ;;  %11642 = vmatpush1.bf16.msra.mxu0 %v11641_v46 }
0x2070   :  { %v8866_v8 = vadd.f32 %v8865_v27, %v8669_v56 }
0x2071   :  { %v8946_v57 = vmax.f32 %v8864_v12, 0.0 }
0x2072   :  { %v8947_v45 = vmax.f32 %v8866_v8, 0.0  ;;  %v8869_v61 = vpop.f32.mrb[196].mxu1 }
0x2073   :  { %v11645_v15 = vpack.c.bf16 %v8946_v57, %v8944_v2  ;;  %v8871_v43 = vpop.f32.mrb[197].mxu1  ;;  %v8870_v1 = vadd.f32 %v8869_v61, %v8674_v34  ;;  %v8704_v2 = vpop.permute.xlu0 %8703 }
0x2074   :  { %v11643_v20 = vpack.c.bf16 %v8947_v45, %v8945_v25  ;;  %v8872_v14 = vadd.f32 %v8871_v43, %v8674_v34  ;;  %v8709_v45 = vpop.permute.xlu1 %8708 }
0x2075   :  { %v8948_v62 = vmax.f32 %v8870_v1, 0.0 }
0x2076   :  { %v8875_v3 = vpop.f32.mrb[198].mxu1  ;;  %11644 = vmatprep.subr.bf16.mxu0 %v11643_v20  ;;  %v8949_v11 = vmax.f32 %v8872_v14, 0.0 }
0x2077   :  { %v8876_v39 = vadd.f32 %v8875_v3, %v8679_v44  ;;  %v8877_v52 = vpop.f32.mrb[199].mxu1  ;;  %11646 = vmatpush1.bf16.msra.mxu0 %v11645_v15 }
0x2078   :  { %v8878_v41 = vadd.f32 %v8877_v52, %v8679_v44 }
0x2079   :  { %v8950_v53 = vmax.f32 %v8876_v39, 0.0 }
0x207a   :  { %v8951_v6 = vmax.f32 %v8878_v41, 0.0  ;;  %v8881_v47 = vpop.f32.mrb[200].mxu1 }
0x207b   :  { %v11649_v37 = vpack.c.bf16 %v8950_v53, %v8948_v62  ;;  %v8883_v35 = vpop.f32.mrb[201].mxu1  ;;  %v8882_v4 = vadd.f32 %v8881_v47, %v8684_v33  ;;  %v8714_v62 = vpop.permute.xlu0 %8713 }
0x207c   :  { %v11647_v54 = vpack.c.bf16 %v8951_v6, %v8949_v11  ;;  %v8884_v55 = vadd.f32 %v8883_v35, %v8684_v33  ;;  %v8719_v6 = vpop.permute.xlu1 %8718 }
0x207d   :  { %v8952_v9 = vmax.f32 %v8882_v4, 0.0 }
0x207e   :  { %v8887_v7 = vpop.f32.mrb[202].mxu1  ;;  %11648 = vmatprep.subr.bf16.mxu0 %v11647_v54  ;;  %v8953_v60 = vmax.f32 %v8884_v55, 0.0 }
0x207f   :  { %v8888_v32 = vadd.f32 %v8887_v7, %v8689_v18  ;;  %v8889_v36 = vpop.f32.mrb[203].mxu1  ;;  %11650 = vmatpush1.bf16.msra.mxu0 %v11649_v37 }
0x2080   :  { %v8890_v22 = vadd.f32 %v8889_v36, %v8689_v18 }
0x2081   :  { %v8954_v29 = vmax.f32 %v8888_v32, 0.0 }
0x2082   :  { %v8955_v21 = vmax.f32 %v8890_v22, 0.0  ;;  %v8893_v58 = vpop.f32.mrb[204].mxu1 }
0x2083   :  { %v11653_v16 = vpack.c.bf16 %v8954_v29, %v8952_v9  ;;  %v8895_v28 = vpop.f32.mrb[205].mxu1  ;;  %v8894_v49 = vadd.f32 %v8893_v58, %v8694_v26  ;;  %v8724_v9 = vpop.permute.xlu0 %8723 }
0x2084   :  { %v11651_v59 = vpack.c.bf16 %v8955_v21, %v8953_v60  ;;  %v8896_v23 = vadd.f32 %v8895_v28, %v8694_v26  ;;  %v8729_v21 = vpop.permute.xlu1 %8728 }
0x2085   :  { %v8956_v30 = vmax.f32 %v8894_v49, 0.0 }
0x2086   :  { %v8899_v46 = vpop.f32.mrb[206].mxu1  ;;  %11652 = vmatprep.subr.bf16.mxu0 %v11651_v59  ;;  %v8957_v0 = vmax.f32 %v8896_v23, 0.0 }
0x2087   :  { %v8900_v31 = vadd.f32 %v8899_v46, %v8699_v13  ;;  %v8901_v50 = vpop.f32.mrb[207].mxu1  ;;  %11654 = vmatpush1.bf16.msra.mxu0 %v11653_v16 }
0x2088   :  { %v8902_v63 = vadd.f32 %v8901_v50, %v8699_v13 }
0x2089   :  { %v8958_v56 = vmax.f32 %v8900_v31, 0.0 }
0x208a   :  { %v8959_v10 = vmax.f32 %v8902_v63, 0.0  ;;  %v8905_v12 = vpop.f32.mrb[208].mxu1  ;;  %v9647_v63 = vld [vmem:[%s15696_s12 + $0x20] sm:$0xff] }
0x208b   :  { %v11657_v27 = vpack.c.bf16 %v8958_v56, %v8956_v30  ;;  %v8907_v8 = vpop.f32.mrb[209].mxu1  ;;  %v8906_v25 = vadd.f32 %v8905_v12, %v8704_v2  ;;  %v9648_v30 = vld [vmem:[%s15696_s12 + $0x28] sm:$0xff]  ;;  %v9649_v56 = vld [vmem:[%s15696_s12 + $0x30] sm:$0xff] }
0x208c   :  { %v11655_v57 = vpack.c.bf16 %v8959_v10, %v8957_v0  ;;  %v8908_v61 = vadd.f32 %v8907_v8, %v8704_v2  ;;  %v9650_v0 = vld [vmem:[%s15696_s12 + $0x38] sm:$0xff]  ;;  %v8985_v10 = vpop.permute.xlu0 %8984 }
0x208d   :  { %v8960_v1 = vmax.f32 %v8906_v25, 0.0 }
0x208e   :  { %v8911_v15 = vpop.f32.mrb[210].mxu1  ;;  %11656 = vmatprep.subr.bf16.mxu0 %v11655_v57  ;;  %v8961_v14 = vmax.f32 %v8908_v61, 0.0  ;;  %v8990_v57 = vpop.permute.xlu1 %8989 }
0x208f   :  { %v8912_v43 = vadd.f32 %v8911_v15, %v8709_v45  ;;  %v8913_v34 = vpop.f32.mrb[211].mxu1  ;;  %11658 = vmatpush1.bf16.msra.mxu0 %v11657_v27 }
0x2090   :  { %v8914_v20 = vadd.f32 %v8913_v34, %v8709_v45 }
0x2091   :  { %v8962_v44 = vmax.f32 %v8912_v43, 0.0 }
0x2092   :  { %v8963_v3 = vmax.f32 %v8914_v20, 0.0  ;;  %v8917_v39 = vpop.f32.mrb[212].mxu1  ;;  %v8995_v20 = vpop.permute.xlu0 %8994 }
0x2093   :  { %v11661_v52 = vpack.c.bf16 %v8962_v44, %v8960_v1  ;;  %v8919_v41 = vpop.f32.mrb[213].mxu1  ;;  %v8918_v11 = vadd.f32 %v8917_v39, %v8714_v62 }
0x2094   :  { %v11659_v53 = vpack.c.bf16 %v8963_v3, %v8961_v14  ;;  %v8920_v47 = vadd.f32 %v8919_v41, %v8714_v62 }
0x2095   :  { %v8964_v4 = vmax.f32 %v8918_v11, 0.0  ;;  %v9000_v11 = vpop.permute.xlu1 %8999 }
0x2096   :  { %v8923_v37 = vpop.f32.mrb[214].mxu1  ;;  %11660 = vmatprep.subr.bf16.mxu0 %v11659_v53  ;;  %v8965_v55 = vmax.f32 %v8920_v47, 0.0 }
0x2097   :  { %v8924_v35 = vadd.f32 %v8923_v37, %v8719_v6  ;;  %v8925_v33 = vpop.f32.mrb[215].mxu1  ;;  %11662 = vmatpush1.bf16.msra.mxu0 %v11661_v52 }
0x2098   :  { %v8926_v54 = vadd.f32 %v8925_v33, %v8719_v6 }
0x2099   :  { %v8966_v18 = vmax.f32 %v8924_v35, 0.0 }
0x209a   :  { %v8967_v7 = vmax.f32 %v8926_v54, 0.0  ;;  %v8929_v32 = vpop.f32.mrb[216].mxu1 }
0x209b   :  { %v11665_v36 = vpack.c.bf16 %v8966_v18, %v8964_v4  ;;  %v8931_v22 = vpop.f32.mrb[217].mxu1  ;;  %v8930_v60 = vadd.f32 %v8929_v32, %v8724_v9 }
0x209c   :  { %v11663_v29 = vpack.c.bf16 %v8967_v7, %v8965_v55  ;;  %v8932_v58 = vadd.f32 %v8931_v22, %v8724_v9 }
0x209d   :  { %v8968_v49 = vmax.f32 %v8930_v60, 0.0 }
0x209e   :  { %v8935_v16 = vpop.f32.mrb[218].mxu1  ;;  %11664 = vmatprep.subr.bf16.mxu0 %v11663_v29  ;;  %v8969_v23 = vmax.f32 %v8932_v58, 0.0 }
0x209f   :  { %v8936_v28 = vadd.f32 %v8935_v16, %v8729_v21  ;;  %v8937_v26 = vpop.f32.mrb[219].mxu1  ;;  %11666 = vmatpush1.bf16.msra.mxu0 %v11665_v36 }
0x20a0   :  { %v8938_v59 = vadd.f32 %v8937_v26, %v8729_v21 }
0x20a1   :  { %v8970_v13 = vmax.f32 %v8936_v28, 0.0 }
0x20a2   :  { %v8971_v46 = vmax.f32 %v8938_v59, 0.0 }
0x20a3   :  { %v11669_v31 = vpack.c.bf16 %v8970_v13, %v8968_v49 }
0x20a4   :  { %v11667_v50 = vpack.c.bf16 %v8971_v46, %v8969_v23 }
0x20a6   :  { %11668 = vmatprep.subr.bf16.mxu0 %v11667_v50 }
0x20a7   :  { %11670 = vmatpush1.bf16.msra.mxu0 %v11669_v31 }
0x20aa   :  { %9067 = vmatmul.mubr.f32.vlgmr.msra.gmra.mrb[204].mxu0 %v9647_v63 }
0x20ab   :  { %9072 = vmatprep.mubr.f32.mxu0 %v15752_v24 }
0x20ae   :  { %9073 = vmatmul.mubr.f32.gmra.mrb[206].mxu0 %v9648_v30 }
0x20af   :  { %9078 = vmatprep.mubr.f32.mxu0 %v15752_v24 }
0x20b2   :  { %9079 = vmatmul.mubr.f32.gmra.mrb[208].mxu0 %v9649_v56 }
0x20b3   :  { %9084 = vmatprep.mubr.f32.mxu0 %v15752_v24 }
0x20b6   :  { %9085 = vmatmul.mubr.f32.gmra.mrb[210].mxu0 %v9650_v0 }
0x217d   :  { %v9068_v12 = vpop.f32.mrb[204].mxu0 }
0x217e   :  { %v9069_v27 = vadd.f32 %v9068_v12, %v8985_v10  ;;  %v9070_v8 = vpop.f32.mrb[205].mxu0 }
0x217f   :  { %v9071_v2 = vadd.f32 %v9070_v8, %v8985_v10 }
0x2180   :  { %v15604_v45 = vadd.f32 %v9069_v27, %v15452_v17 }
0x2181   :  { %v9074_v25 = vpop.f32.mrb[206].mxu0  ;;  %v15607_v43 = vadd.f32 %v9071_v2, %v15455_v40 }
0x2182   :  { %v9075_v61 = vadd.f32 %v9074_v25, %v8990_v57  ;;  %v9076_v15 = vpop.f32.mrb[207].mxu0  ;;  %v9127_v14 = vmul.f32 %v15604_v45, %v15604_v45 }
0x2183   :  { %v9077_v24 = vadd.f32 %v9076_v15, %v8990_v57 }
0x2184   :  { %v15610_v34 = vadd.f32 %v9075_v61, %v15446_v51  ;;  %v9128_v51 = vmul.f32 %v15607_v43, %v15607_v43 }
0x2185   :  { %v15613_v1 = vadd.f32 %v9077_v24, %v15449_v5  ;;  %v9080_v44 = vpop.f32.mrb[208].mxu0 }
0x2186   :  { %v9107_v17 = vadd.f32 %v15610_v34, %v15604_v45  ;;  %v9129_v3 = vmul.f32 %v15610_v34, %v15610_v34  ;;  %v9081_v40 = vadd.f32 %v9080_v44, %v8995_v20  ;;  %v9082_v39 = vpop.f32.mrb[209].mxu0 }
0x2187   :  { %v9116_v52 = vadd.f32 %v15613_v1, %v15607_v43  ;;  %v9130_v5 = vmul.f32 %v15613_v1, %v15613_v1  ;;  %v9083_v41 = vadd.f32 %v9082_v39, %v8995_v20 }
0x2188   :  { %v9135_v62 = vadd.f32 %v9129_v3, %v9127_v14  ;;  %v15628_v53 = vadd.f32 %v9081_v40, %v15460_v19 }
0x2189   :  { %v9144_v6 = vadd.f32 %v9130_v5, %v9128_v51  ;;  %v15631_v47 = vadd.f32 %v9083_v41, %v15467_v38  ;;  %v9086_v37 = vpop.f32.mrb[210].mxu0  ;;  %v9182_v5 = vpop.permute.xlu0 %9181 }
0x218a   :  { %v9108_v35 = vadd.f32 %v9107_v17, %v15628_v53  ;;  %v9131_v33 = vmul.f32 %v15628_v53, %v15628_v53  ;;  %v9087_v54 = vadd.f32 %v9086_v37, %v9000_v11  ;;  %v9088_v4 = vpop.f32.mrb[211].mxu0 }
0x218b   :  { %v9117_v18 = vadd.f32 %v9116_v52, %v15631_v47  ;;  %v9132_v55 = vmul.f32 %v15631_v47, %v15631_v47  ;;  %v9089_v19 = vadd.f32 %v9088_v4, %v9000_v11  ;;  %v9187_v52 = vpop.permute.xlu1 %9186 }
0x218c   :  { %v9136_v7 = vadd.f32 %v9135_v62, %v9131_v33  ;;  %v15640_v32 = vadd.f32 %v9087_v54, %v15483_v48 }
0x218d   :  { %v9145_v38 = vadd.f32 %v9144_v6, %v9132_v55  ;;  %v15643_v36 = vadd.f32 %v9089_v19, %v15487_v42  ;;  %v9192_v33 = vpop.permute.xlu0 %9191 }
0x218e   :  { %v9109_v22 = vadd.f32 %v9108_v35, %v15640_v32  ;;  %v9133_v9 = vmul.f32 %v15640_v32, %v15640_v32 }
0x218f   :  { %v9118_v29 = vadd.f32 %v9117_v18, %v15643_v36  ;;  %v9134_v60 = vmul.f32 %v15643_v36, %v15643_v36 }
0x2190   :  { %v9110_v21 = vrot.slane %v9109_v22, 4  ;;  %v9137_v58 = vadd.f32 %v9136_v7, %v9133_v9 }
0x2191   :  { %v9119_v16 = vrot.slane %v9118_v29, 4  ;;  %v9146_v28 = vadd.f32 %v9145_v38, %v9134_v60  ;;  %v9210_v4 = vpop.permute.xlu0 %9209 }
0x2192   :  { %v9111_v48 = vadd.f32 %v9110_v21, %v9109_v22  ;;  %v9138_v26 = vrot.slane %v9137_v58, 4 }
0x2193   :  { %v9120_v59 = vadd.f32 %v9119_v16, %v9118_v29  ;;  %v9147_v49 = vrot.slane %v9146_v28, 4 }
0x2194   :  { %v9112_v42 = vrot.slane %v9111_v48, 2  ;;  %v9139_v13 = vadd.f32 %v9138_v26, %v9137_v58 }
0x2195   :  { %v9121_v23 = vrot.slane %v9120_v59, 2  ;;  %v9148_v46 = vadd.f32 %v9147_v49, %v9146_v28  ;;  %v9220_v58 = vpop.permute.xlu0 %9219 }
0x2196   :  { %v9113_v31 = vadd.f32 %v9112_v42, %v9111_v48  ;;  %v9140_v50 = vrot.slane %v9139_v13, 2 }
0x2197   :  { %v9122_v63 = vadd.f32 %v9121_v23, %v9120_v59  ;;  %v9149_v30 = vrot.slane %v9148_v46, 2 }
0x2198   :  { %v9114_v56 = vrot.slane %v9113_v31, 1  ;;  %v9141_v0 = vadd.f32 %v9140_v50, %v9139_v13 }
0x2199   :  { %v9123_v10 = vrot.slane %v9122_v63, 1  ;;  %v9150_v12 = vadd.f32 %v9149_v30, %v9148_v46 }
0x219a   :  { %v9115_v27 = vadd.f32 %v9114_v56, %v9113_v31  ;;  %v9142_v8 = vrot.slane %v9141_v0, 1 }
0x219b   :  { %v9124_v2 = vadd.f32 %v9123_v10, %v9122_v63  ;;  %v9151_v57 = vrot.slane %v9150_v12, 1 }
0x219c   :  { %v9125_v25 = vmul.f32 0.03125, %v9115_v27  ;;  %v9143_v61 = vadd.f32 %v9142_v8, %v9141_v0 }
0x219d   :  { %v9126_v15 = vmul.f32 0.03125, %v9124_v2  ;;  %v9152_v24 = vadd.f32 %v9151_v57, %v9150_v12 }
0x219e   :  { %v9153_v20 = vmul.f32 0.03125, %v9143_v61  ;;  %v9155_v44 = vmul.f32 %v9125_v25, %v9125_v25  ;;  %v9159_v14 = vsub.f32 %v15604_v45, %v9125_v25  ;;  %v9161_v17 = vsub.f32 %v15610_v34, %v9125_v25 }
0x219f   :  { %v9163_v3 = vsub.f32 %v15628_v53, %v9125_v25  ;;  %v9165_v40 = vsub.f32 %v15640_v32, %v9125_v25  ;;  %v9154_v39 = vmul.f32 0.03125, %v9152_v24  ;;  %v9156_v51 = vmul.f32 %v9126_v15, %v9126_v15  ;;  %v9197_v53 = vpop.permute.xlu1 %9196 }
0x21a0   :  { %v9157_v41 = vsub.f32 %v9153_v20, %v9155_v44  ;;  %v9160_v62 = vsub.f32 %v15607_v43, %v9126_v15  ;;  %v9162_v11 = vsub.f32 %v15613_v1, %v9126_v15  ;;  %v9164_v6 = vsub.f32 %v15631_v47, %v9126_v15 }
0x21a1   :  { %v9158_v37 = vsub.f32 %v9154_v39, %v9156_v51  ;;  %v9166_v45 = vsub.f32 %v15643_v36, %v9126_v15 }
0x21a2   :  { %v9167_v35 = vadd.f32 1e-05, %v9157_v41 }
0x21a3   :  { %v9168_v34 = vadd.f32 1e-05, %v9158_v37  ;;  %v9215_v54 = vpop.permute.xlu1 %9214 }
0x21a4   :  { %12253 = vrsqrt.f32 %v9167_v35 }
0x21a5   :  { %12255 = vrsqrt.f32 %v9168_v34 }
0x21a7   :  { %v9225_v21 = vpop.permute.xlu1 %9224 }
0x21ae   :  { %v12254_v18 = vpop.eup %12253 }
0x21af   :  { %v12256_v55 = vpop.eup %12255  ;;  %v9171_v19 = vmul.f32 %v12254_v18, %v9159_v14  ;;  %v9173_v7 = vmul.f32 %v12254_v18, %v9161_v17  ;;  %v9175_v43 = vmul.f32 %v12254_v18, %v9163_v3  ;;  %v9177_v32 = vmul.f32 %v12254_v18, %v9165_v40 }
0x21b0   :  { %v9172_v1 = vmul.f32 %v12256_v55, %v9160_v62  ;;  %v9174_v38 = vmul.f32 %v12256_v55, %v9162_v11  ;;  %v9176_v47 = vmul.f32 %v12256_v55, %v9164_v6  ;;  %v9178_v22 = vmul.f32 %v12256_v55, %v9166_v45 }
0x21b1   :  { %v9199_v9 = vmul.f32 %v9182_v5, %v9171_v19  ;;  %v9201_v36 = vmul.f32 %v9187_v52, %v9173_v7  ;;  %v9203_v29 = vmul.f32 %v9192_v33, %v9175_v43  ;;  %v9205_v60 = vmul.f32 %v9197_v53, %v9177_v32 }
0x21b2   :  { %v9200_v16 = vmul.f32 %v9182_v5, %v9172_v1  ;;  %v9202_v28 = vmul.f32 %v9187_v52, %v9174_v38  ;;  %v9204_v48 = vmul.f32 %v9192_v33, %v9176_v47  ;;  %v9206_v26 = vmul.f32 %v9197_v53, %v9178_v22 }
0x21b3   :  { %v9227_v59 = vadd.f32 %v9210_v4, %v9199_v9  ;;  %v9229_v49 = vadd.f32 %v9215_v54, %v9201_v36  ;;  %v9231_v42 = vadd.f32 %v9220_v58, %v9203_v29  ;;  %v9233_v13 = vadd.f32 %v9225_v21, %v9205_v60 }
0x21b4   :  { %v9228_v23 = vadd.f32 %v9210_v4, %v9200_v16  ;;  %v9230_v46 = vadd.f32 %v9215_v54, %v9202_v28  ;;  %v9232_v31 = vadd.f32 %v9220_v58, %v9204_v48  ;;  %v9234_v50 = vadd.f32 %v9225_v21, %v9206_v26 }
0x21b5   :  { %9235 = vst [vmem:[%s15699_s16] sm:$0xff] %v9227_v59  ;;  %9237 = vst [vmem:[%s15699_s16 + $0x10] sm:$0xff] %v9229_v49 }
0x21b6   :  { %9239 = vst [vmem:[%s15699_s16 + $0x20] sm:$0xff] %v9231_v42  ;;  %9241 = vst [vmem:[%s15699_s16 + $0x30] sm:$0xff] %v9233_v13 }
0x21b7   :  { %9236 = vst [vmem:[%s15699_s16 + $0x8] sm:$0xff] %v9228_v23  ;;  %9238 = vst [vmem:[%s15699_s16 + $0x18] sm:$0xff] %v9230_v46 }
0x21b8   :  { %9240 = vst [vmem:[%s15699_s16 + $0x28] sm:$0xff] %v9232_v31  ;;  %9242 = vst [vmem:[%s15699_s16 + $0x38] sm:$0xff] %v9234_v50 }

</bundles_post_ra>
